<compile_context>
chip_gen: v6e
topology: v6e:2x2x1
jax: 0.10.0
libtpu: 0.0.40
codegen_flags: <defaults>
</compile_context>

<pallas_src>
import math
import functools

import jax
import jax.numpy as jnp
from jax.experimental import pallas as pl
from jax.experimental.pallas import tpu as pltpu


# ----------------------------- Pallas kernels -----------------------------

def _attn_block_kernel(x_ref, g1_ref, b1_ref, qkvw_ref, qkvb_ref,
                       projw_ref, projb_ref, cos_ref, sin_ref,
                       o_ref, att_ref, *, num_heads, eps):
    """Per batch element:  out = x + proj(SDPA(RoPE(qkv(LN1(x)))))."""
    x = x_ref[0]                                    # (S, C) f32
    S, C = x.shape
    D = C // num_heads

    # LayerNorm1 (params come in as (1, C), broadcast over S in-register).
    mu = jnp.mean(x, axis=-1, keepdims=True)
    xc = x - mu
    var = jnp.mean(xc * xc, axis=-1, keepdims=True)
    h = (xc * jax.lax.rsqrt(var + eps)) * g1_ref[...] + b1_ref[...]

    # Fused QKV projection: bf16 MXU inputs, f32 accumulate, f32 bias.
    # qkv_w/qkv_b were column-permuted in the wrapper so each head's q/k features are ordered
    # [even pairs | odd pairs]; RoPE then takes the cheap rotate-half form below.
    qkv = jnp.dot(h.astype(jnp.bfloat16), qkvw_ref[...],
                  preferred_element_type=jnp.float32) + qkvb_ref[...]

    cos = cos_ref[...]                              # (S, D) f32
    sin = sin_ref[...]                              # (S, D) f32, first half pre-negated

    scale = 1.0 / math.sqrt(D)
    # TODO(synk): lax.fori_loop / head grid axis once num_heads grows.
    for hh in range(num_heads):
        lo = hh * D
        qh = qkv[:, lo:lo + D]
        kh = qkv[:, C + lo:C + lo + D]
        vh = qkv[:, 2 * C + lo:2 * C + lo + D].astype(jnp.bfloat16)

        # RoPE (rotate-half form): rolling by exactly D/2 swaps the two halves (XLU lane
        # rotation, direction-independent); the sign of the rotated part is folded into sin.
        qh = qh * cos + pltpu.roll(qh, D // 2, 1) * sin
        kh = kh * cos + pltpu.roll(kh, D // 2, 1) * sin

        s = jax.lax.dot_general(qh.astype(jnp.bfloat16), kh.astype(jnp.bfloat16),
                                (((1,), (1,)), ((), ())),
                                preferred_element_type=jnp.float32) * scale
        m = jnp.max(s, axis=-1, keepdims=True)
        p = jnp.exp(s - m)                          # f32 VPU/EUP
        l = jnp.sum(p, axis=-1, keepdims=True)
        o = jnp.dot(p.astype(jnp.bfloat16), vh, preferred_element_type=jnp.float32)
        # Normalize the (S, D) output (not the (S, S) probs) and park it in the scratch slab.
        att_ref[:, lo:lo + D] = (o * pl.reciprocal(l, approx=True)).astype(att_ref.dtype)

    # Output projection over the lane-dense bf16 (S, C) slab + fused residual add.
    y = jnp.dot(att_ref[...], projw_ref[...],
                preferred_element_type=jnp.float32) + projb_ref[...]
    o_ref[0] = x + y


def _mlp_block_kernel(x_ref, g2_ref, b2_ref, w1_ref, fb1_ref, w2_ref, fb2_ref,
                      o_ref, *, eps):
    """Row tile:  out = x + fc2(gelu_tanh(fc1(LN2(x))))."""
    x = x_ref[...]                                  # (bm, C) f32
    mu = jnp.mean(x, axis=-1, keepdims=True)
    xc = x - mu
    var = jnp.mean(xc * xc, axis=-1, keepdims=True)
    h = (xc * jax.lax.rsqrt(var + eps)) * g2_ref[...] + b2_ref[...]

    h = jnp.dot(h.astype(jnp.bfloat16), w1_ref[...],
                preferred_element_type=jnp.float32) + fb1_ref[...]
    c = math.sqrt(2.0 / math.pi)
    h = 0.5 * h * (1.0 + jnp.tanh(c * (h + 0.044715 * h * h * h)))   # GELU tanh, f32

    h = jnp.dot(h.astype(jnp.bfloat16), w2_ref[...],
                preferred_element_type=jnp.float32) + fb2_ref[...]
    o_ref[...] = x + h                              # fused residual


# ----------------------------- wrappers -----------------------------

def _row_tile(mp):
    """Largest row tile <= 256 dividing mp, preferring >= 4 grid steps (>= 2 if possible)."""
    for min_steps in (4, 2, 1):
        for bm in (256, 128, 64, 32, 16, 8):
            if mp % bm == 0 and mp // bm >= min_steps:
                return bm
    return 8


def _vmem_limit(est_bytes):
    # >= v5e's 16 MiB scoped default with headroom; stay below v7x's 64 MiB physical VMEM.
    return int(min(max(int(est_bytes * 1.5), 32 * 2 ** 20), 60 * 2 ** 20))


def _fold_rope_perm_into_qkv(qkv_w, qkv_b, num_heads):
    """Permute the q/k output columns of the QKV projection, per head, to [evens | odds].

    Applying the same permutation to q and k leaves the attention scores unchanged, so
    interleaved RoPE on the original layout == rotate-half RoPE on the permuted layout."""
    C = qkv_w.shape[0]
    D = C // num_heads
    base = jnp.concatenate([jnp.arange(0, D, 2), jnp.arange(1, D, 2)])
    head_perm = (jnp.arange(num_heads)[:, None] * D + base[None, :]).reshape(-1)
    perm = jnp.concatenate([head_perm, head_perm + C, jnp.arange(2 * C, 3 * C)])
    return qkv_w[:, perm], qkv_b[perm]


def attn_residual(x, p, cos, sin, num_heads, eps):
    B, S, C = x.shape
    D = C // num_heads
    qkv_w, qkv_b = _fold_rope_perm_into_qkv(p["qkv_w"], p["qkv_b"], num_heads)
    kern = functools.partial(_attn_block_kernel, num_heads=num_heads, eps=eps)
    const = lambda *shape: pl.BlockSpec(shape, lambda b, _s=shape: (0,) * len(_s))
    est = (2 * 2 * S * C * 4                                    # x / out blocks (dbl-buffered)
           + 2 * ((C * 3 * C + C * C) * 2 + 8 * C * 4)          # bf16 weights + f32 biases/LN
           + 2 * 2 * S * D * 4                                  # cos / sin
           + S * C * 2                                          # bf16 attention slab scratch
           + S * 3 * C * 4 + 2 * S * S * 4 + 2 * S * C * 4)     # f32 intermediates
    # TODO(synk): when B == 1, add a query-row-tile grid axis so both v7x TensorCores get work.
    return pl.pallas_call(
        kern,
        out_shape=jax.ShapeDtypeStruct((B, S, C), jnp.float32),
        grid=(B,),
        in_specs=[
            pl.BlockSpec((1, S, C), lambda b: (b, 0, 0)),   # x
            const(1, C), const(1, C),                       # norm1 gamma, beta
            const(C, 3 * C), const(1, 3 * C),               # qkv w (bf16, RoPE-permuted), b
            const(C, C), const(1, C),                       # proj w (bf16), b
            const(S, D), const(S, D),                       # rope cos, signed sin (per head)
        ],
        out_specs=pl.BlockSpec((1, S, C), lambda b: (b, 0, 0)),
        scratch_shapes=[pltpu.VMEM((S, C), jnp.bfloat16)],  # per-head output slab
        compiler_params=pltpu.CompilerParams(
            dimension_semantics=("parallel",),
            vmem_limit_bytes=_vmem_limit(est)),
    )(
        x.astype(jnp.float32),
        p["norm1_g"].reshape(1, C).astype(jnp.float32),
        p["norm1_b"].reshape(1, C).astype(jnp.float32),
        qkv_w.astype(jnp.bfloat16),
        qkv_b.reshape(1, 3 * C).astype(jnp.float32),
        p["proj_w"].astype(jnp.bfloat16),
        p["proj_b"].reshape(1, C).astype(jnp.float32),
        cos.astype(jnp.float32),
        sin.astype(jnp.float32),
    )


def mlp_residual(x2d, p, eps):
    M, C = x2d.shape
    Ch = p["fc1_w"].shape[1]
    Mp = ((M + 7) // 8) * 8
    # Padded rows go through LN with var=0 (h = beta) and are sliced off below -- benign,
    # but do not reduce over the padded output.
    x_pad = x2d if Mp == M else jnp.pad(x2d, ((0, Mp - M), (0, 0)))
    bm = _row_tile(Mp)
    est = (2 * 2 * bm * C * 4
           + 2 * ((C * Ch + Ch * C) * 2 + (Ch + 3 * C) * 4)
           + 3 * bm * Ch * 4)
    kern = functools.partial(_mlp_block_kernel, eps=eps)
    out = pl.pallas_call(
        kern,
        out_shape=jax.ShapeDtypeStruct((Mp, C), jnp.float32),
        grid=(Mp // bm,),
        in_specs=[
            pl.BlockSpec((bm, C), lambda i: (i, 0)),        # x row tile
            pl.BlockSpec((1, C), lambda i: (0, 0)),         # norm2 gamma
            pl.BlockSpec((1, C), lambda i: (0, 0)),         # norm2 beta
            pl.BlockSpec((C, Ch), lambda i: (0, 0)),        # fc1 w (bf16)
            pl.BlockSpec((1, Ch), lambda i: (0, 0)),        # fc1 b
            pl.BlockSpec((Ch, C), lambda i: (0, 0)),        # fc2 w (bf16)
            pl.BlockSpec((1, C), lambda i: (0, 0)),         # fc2 b
        ],
        out_specs=pl.BlockSpec((bm, C), lambda i: (i, 0)),
        compiler_params=pltpu.CompilerParams(
            dimension_semantics=("parallel",),
            vmem_limit_bytes=_vmem_limit(est)),
    )(
        x_pad.astype(jnp.float32),
        p["norm2_g"].reshape(1, C).astype(jnp.float32),
        p["norm2_b"].reshape(1, C).astype(jnp.float32),
        p["fc1_w"].astype(jnp.bfloat16),
        p["fc1_b"].reshape(1, Ch).astype(jnp.float32),
        p["fc2_w"].astype(jnp.bfloat16),
        p["fc2_b"].reshape(1, C).astype(jnp.float32),
    )
    return out[:M]


def transformer_block(p, x, cos, sin, num_heads, eps=1e-6):
    """x: (B, S, C)  ->  (B, S, C); matches the PyTorch TransformerBlock forward."""
    B, S, C = x.shape
    x = attn_residual(x, p, cos, sin, num_heads, eps)      # x + attn(LN1(x))
    y = mlp_residual(x.reshape(B * S, C), p, eps)          # x + mlp(LN2(x))
    return y.reshape(B, S, C)


# ----------------------------- RoPE tables (host-side, tiny) -----------------------------

def rope_cos_sin(h, w, dims_per_axis, theta=10000.0):
    rows = jnp.arange(h, dtype=jnp.float32)
    cols = jnp.arange(w, dtype=jnp.float32)
    pos = [jnp.repeat(rows, w), jnp.tile(cols, h)]   # row-major (H W) flatten
    angs = []
    for ax, d in enumerate(dims_per_axis):
        freqs = 1.0 / (theta ** (jnp.arange(0, d, 2, dtype=jnp.float32) / d))
        angs.append(pos[ax][:, None] * freqs[None, :])
    ang = jnp.concatenate(angs, axis=-1)             # (S, head_dim // 2)
    return jnp.cos(ang), jnp.sin(ang)


def rope_tables(h, w, head_dim, theta=10000.0):
    """(S, D) cos / signed-sin tables for the in-kernel rotate-half RoPE."""
    cos, sin = rope_cos_sin(h, w, [head_dim // 2, head_dim // 2], theta)
    cos_full = jnp.concatenate([cos, cos], axis=-1)          # (S, D)
    sin_signed = jnp.concatenate([-sin, sin], axis=-1)       # (S, D): sign folded in
    return cos_full, sin_signed


# ----------------------------- pure-JAX reference (interleaved RoPE) -----------------------------

def reference_block(p, x, *, hg, wg, num_heads, eps=1e-6):
    B, S, C = x.shape
    D = C // num_heads
    cos, sin = rope_cos_sin(hg, wg, [D // 2, D // 2])
    cos_i = jnp.repeat(cos, 2, axis=-1)              # (S, D) interleaved
    sin_i = jnp.repeat(sin, 2, axis=-1)

    def ln(v, g, b):
        mu = v.mean(-1, keepdims=True)
        var = ((v - mu) ** 2).mean(-1, keepdims=True)
        return (v - mu) * jax.lax.rsqrt(var + eps) * g + b

    def rope_interleaved(t):                         # t: (B, H, S, D)
        t2 = t.reshape(*t.shape[:-1], D // 2, 2)
        tr = jnp.stack([-t2[..., 1], t2[..., 0]], axis=-1).reshape(t.shape)
        return t * cos_i + tr * sin_i

    h = ln(x, p["norm1_g"], p["norm1_b"])
    qkv = h @ p["qkv_w"] + p["qkv_b"]
    q, k, v = (t.reshape(B, S, num_heads, D).transpose(0, 2, 1, 3)
               for t in (qkv[..., :C], qkv[..., C:2 * C], qkv[..., 2 * C:]))
    q, k = rope_interleaved(q), rope_interleaved(k)
    s = jnp.einsum("bhqd,bhkd->bhqk", q, k) / math.sqrt(D)
    a = jax.nn.softmax(s, axis=-1)
    o = jnp.einsum("bhqk,bhkd->bhqd", a, v).transpose(0, 2, 1, 3).reshape(B, S, C)
    x = x + (o @ p["proj_w"] + p["proj_b"])
    h = ln(x, p["norm2_g"], p["norm2_b"])
    h = h @ p["fc1_w"] + p["fc1_b"]
    c = math.sqrt(2.0 / math.pi)
    h = 0.5 * h * (1.0 + jnp.tanh(c * (h + 0.044715 * h ** 3)))
    return x + (h @ p["fc2_w"] + p["fc2_b"])


# ----------------------------- parameter init -----------------------------

def init_params(key, C, num_heads, mlp_ratio):
    Ch = int(C * mlp_ratio)
    ks = iter(jax.random.split(key, 16))
    nrm = lambda shape: jax.random.normal(next(ks), shape, jnp.float32) * 0.02
    z = lambda n: jnp.zeros((n,), jnp.float32)
    return {
        "norm1_g": jnp.ones((C,), jnp.float32), "norm1_b": z(C),
        "qkv_w": nrm((C, 3 * C)), "qkv_b": z(3 * C),
        "proj_w": nrm((C, C)), "proj_b": z(C),
        "norm2_g": jnp.ones((C,), jnp.float32), "norm2_b": z(C),
        "fc1_w": nrm((C, Ch)), "fc1_b": z(Ch),
        "fc2_w": nrm((Ch, C)), "fc2_b": z(C),
    }


# ----------------------------- demo -----------------------------

if __name__ == "__main__":
    # Lane-dense config: C and per-head D are multiples of 128.
    B, Hg, Wg = 2, 16, 16          # token grid for the 2-axis RoPE
    S = Hg * Wg                    # 256
    C, num_heads, mlp_ratio = 256, 2, 2.0   # head dim D = 128

    key = jax.random.PRNGKey(0)
    pkey, xkey = jax.random.split(key)
    params = init_params(pkey, C, num_heads, mlp_ratio)
    x = jax.random.normal(xkey, (B, S, C), jnp.float32)
    cos, sin = rope_tables(Hg, Wg, C // num_heads)

    fwd = jax.jit(functools.partial(transformer_block, num_heads=num_heads))
    out = jax.block_until_ready(fwd(params, x, cos, sin))

    assert out.shape == (B, S, C), out.shape
    assert bool(jnp.all(jnp.isfinite(out)))

    # Parity vs pure-JAX reference of the PyTorch forward (bf16 MXU operands + approx
    # softmax reciprocal give ~1e-3-level deviations).
    ref = reference_block(params, x, hg=Hg, wg=Wg, num_heads=num_heads)
    err = float(jnp.max(jnp.abs(out - ref)))
    assert err < 3e-2, f"max |out - ref| = {err}"
    print("KERNEL_OK")
</pallas_src>

<mosaic_0001>
module attributes {stable_mosaic.version = 11 : i64} {
  func.func @_attn_block_kernel(%arg0: i32, %arg1: memref<1x256x256xf32, #tpu.memory_space<vmem>>, %arg2: memref<1x256xf32, #tpu.memory_space<vmem>>, %arg3: memref<1x256xf32, #tpu.memory_space<vmem>>, %arg4: memref<256x768xbf16, #tpu.memory_space<vmem>>, %arg5: memref<1x768xf32, #tpu.memory_space<vmem>>, %arg6: memref<256x256xbf16, #tpu.memory_space<vmem>>, %arg7: memref<1x256xf32, #tpu.memory_space<vmem>>, %arg8: memref<256x128xf32, #tpu.memory_space<vmem>>, %arg9: memref<256x128xf32, #tpu.memory_space<vmem>>, %arg10: memref<1x256x256xf32, #tpu.memory_space<vmem>>, %arg11: memref<256x256xbf16, #tpu.memory_space<vmem>>) attributes {dimension_semantics = [#tpu.dimension_semantics<parallel>], iteration_bounds = array<i64: 2>, scalar_prefetch = 0 : i64, scratch_operands = 1 : i64, tpu.core_type = #tpu.core_type<tc>, window_params = [{transform_indices = @transform_0, window_bounds = array<i64: 1, 256, 256>}, {pipeline_mode = #tpu.pipeline_mode<synchronous>, transform_indices = @transform_1, window_bounds = array<i64: 1, 256>}, {pipeline_mode = #tpu.pipeline_mode<synchronous>, transform_indices = @transform_2, window_bounds = array<i64: 1, 256>}, {pipeline_mode = #tpu.pipeline_mode<synchronous>, transform_indices = @transform_3, window_bounds = array<i64: 256, 768>}, {pipeline_mode = #tpu.pipeline_mode<synchronous>, transform_indices = @transform_4, window_bounds = array<i64: 1, 768>}, {pipeline_mode = #tpu.pipeline_mode<synchronous>, transform_indices = @transform_5, window_bounds = array<i64: 256, 256>}, {pipeline_mode = #tpu.pipeline_mode<synchronous>, transform_indices = @transform_6, window_bounds = array<i64: 1, 256>}, {pipeline_mode = #tpu.pipeline_mode<synchronous>, transform_indices = @transform_7, window_bounds = array<i64: 256, 128>}, {pipeline_mode = #tpu.pipeline_mode<synchronous>, transform_indices = @transform_8, window_bounds = array<i64: 256, 128>}, {transform_indices = @transform_9, window_bounds = array<i64: 1, 256, 256>}]} {
    %c0 = arith.constant 0 : index
    %c0_0 = arith.constant 0 : index
    %c0_1 = arith.constant 0 : index
    %0 = vector.load %arg1[%c0, %c0_0, %c0_1] : memref<1x256x256xf32, #tpu.memory_space<vmem>>, vector<1x256x256xf32>
    %1 = vector.shape_cast %0 : vector<1x256x256xf32> to vector<256x256xf32>
    %cst = arith.constant dense<0.000000e+00> : vector<256xf32>
    %2 = vector.multi_reduction <add>, %1, %cst [1] : vector<256x256xf32> to vector<256xf32>
    %3 = vector.shape_cast %2 : vector<256xf32> to vector<256x1xf32>
    %cst_2 = arith.constant 2.560000e+02 : f32
    %4 = vector.broadcast %cst_2 : f32 to vector<256x1xf32>
    %5 = arith.divf %3, %4 : vector<256x1xf32>
    %6 = vector.broadcast %5 : vector<256x1xf32> to vector<256x256xf32>
    %7 = arith.subf %1, %6 : vector<256x256xf32>
    %8 = arith.mulf %7, %7 : vector<256x256xf32>
    %cst_3 = arith.constant dense<0.000000e+00> : vector<256xf32>
    %9 = vector.multi_reduction <add>, %8, %cst_3 [1] : vector<256x256xf32> to vector<256xf32>
    %10 = vector.shape_cast %9 : vector<256xf32> to vector<256x1xf32>
    %cst_4 = arith.constant 2.560000e+02 : f32
    %11 = vector.broadcast %cst_4 : f32 to vector<256x1xf32>
    %12 = arith.divf %10, %11 : vector<256x1xf32>
    %cst_5 = arith.constant 9.99999997E-7 : f32
    %13 = vector.broadcast %cst_5 : f32 to vector<256x1xf32>
    %14 = arith.addf %12, %13 : vector<256x1xf32>
    %15 = math.rsqrt %14 : vector<256x1xf32>
    %16 = vector.broadcast %15 : vector<256x1xf32> to vector<256x256xf32>
    %17 = arith.mulf %7, %16 : vector<256x256xf32>
    %c0_6 = arith.constant 0 : index
    %c0_7 = arith.constant 0 : index
    %18 = vector.load %arg2[%c0_6, %c0_7] : memref<1x256xf32, #tpu.memory_space<vmem>>, vector<1x256xf32>
    %19 = vector.broadcast %18 : vector<1x256xf32> to vector<256x256xf32>
    %20 = arith.mulf %17, %19 : vector<256x256xf32>
    %c0_8 = arith.constant 0 : index
    %c0_9 = arith.constant 0 : index
    %21 = vector.load %arg3[%c0_8, %c0_9] : memref<1x256xf32, #tpu.memory_space<vmem>>, vector<1x256xf32>
    %22 = vector.broadcast %21 : vector<1x256xf32> to vector<256x256xf32>
    %23 = arith.addf %20, %22 : vector<256x256xf32>
    %24 = arith.truncf %23 : vector<256x256xf32> to vector<256x256xbf16>
    %c0_10 = arith.constant 0 : index
    %c0_11 = arith.constant 0 : index
    %25 = vector.load %arg4[%c0_10, %c0_11] : memref<256x768xbf16, #tpu.memory_space<vmem>>, vector<256x768xbf16>
    %cst_12 = arith.constant dense<0.000000e+00> : vector<256x768xf32>
    %26 = tpu.matmul %24, %25, %cst_12 {dimension_numbers = #tpu.dot_dimension_numbers<[1], [0], [0], [1], [0, 0, 1, 1], [], []>} : vector<256x256xbf16>, vector<256x768xbf16>, vector<256x768xf32> -> vector<256x768xf32>
    %c0_13 = arith.constant 0 : index
    %c0_14 = arith.constant 0 : index
    %27 = vector.load %arg5[%c0_13, %c0_14] : memref<1x768xf32, #tpu.memory_space<vmem>>, vector<1x768xf32>
    %28 = vector.broadcast %27 : vector<1x768xf32> to vector<256x768xf32>
    %29 = arith.addf %26, %28 : vector<256x768xf32>
    %c0_15 = arith.constant 0 : index
    %c0_16 = arith.constant 0 : index
    %30 = vector.load %arg8[%c0_15, %c0_16] : memref<256x128xf32, #tpu.memory_space<vmem>>, vector<256x128xf32>
    %c0_17 = arith.constant 0 : index
    %c0_18 = arith.constant 0 : index
    %31 = vector.load %arg9[%c0_17, %c0_18] : memref<256x128xf32, #tpu.memory_space<vmem>>, vector<256x128xf32>
    %32 = vector.extract_strided_slice %29 {offsets = [0, 0], sizes = [256, 128], strides = [1, 1]} : vector<256x768xf32> to vector<256x128xf32>
    %33 = vector.extract_strided_slice %29 {offsets = [0, 256], sizes = [256, 128], strides = [1, 1]} : vector<256x768xf32> to vector<256x128xf32>
    %34 = vector.extract_strided_slice %29 {offsets = [0, 512], sizes = [256, 128], strides = [1, 1]} : vector<256x768xf32> to vector<256x128xf32>
    %35 = arith.truncf %34 : vector<256x128xf32> to vector<256x128xbf16>
    %36 = arith.mulf %32, %30 : vector<256x128xf32>
    %c64_i32 = arith.constant 64 : i32
    %37 = tpu.dynamic_rotate %32 by %c64_i32 dim 1 : vector<256x128xf32>, i32 -> vector<256x128xf32>
    %38 = arith.mulf %37, %31 : vector<256x128xf32>
    %39 = arith.addf %36, %38 : vector<256x128xf32>
    %40 = arith.mulf %33, %30 : vector<256x128xf32>
    %c64_i32_19 = arith.constant 64 : i32
    %41 = tpu.dynamic_rotate %33 by %c64_i32_19 dim 1 : vector<256x128xf32>, i32 -> vector<256x128xf32>
    %42 = arith.mulf %41, %31 : vector<256x128xf32>
    %43 = arith.addf %40, %42 : vector<256x128xf32>
    %44 = arith.truncf %39 : vector<256x128xf32> to vector<256x128xbf16>
    %45 = arith.truncf %43 : vector<256x128xf32> to vector<256x128xbf16>
    %cst_20 = arith.constant dense<0.000000e+00> : vector<256x256xf32>
    %46 = tpu.matmul %44, %45, %cst_20 {dimension_numbers = #tpu.dot_dimension_numbers<[1], [1], [0], [0], [0, 0, 1, 0], [], []>} : vector<256x128xbf16>, vector<256x128xbf16>, vector<256x256xf32> -> vector<256x256xf32>
    %cst_21 = arith.constant 0.0883883461 : f32
    %47 = vector.broadcast %cst_21 : f32 to vector<256x256xf32>
    %48 = arith.mulf %46, %47 : vector<256x256xf32>
    %cst_22 = arith.constant dense<0xFF800000> : vector<256xf32>
    %49 = vector.multi_reduction <maximumf>, %48, %cst_22 [1] : vector<256x256xf32> to vector<256xf32>
    %50 = vector.shape_cast %49 : vector<256xf32> to vector<256x1xf32>
    %51 = vector.broadcast %50 : vector<256x1xf32> to vector<256x256xf32>
    %52 = arith.subf %48, %51 : vector<256x256xf32>
    %53 = math.exp %52 : vector<256x256xf32>
    %cst_23 = arith.constant dense<0.000000e+00> : vector<256xf32>
    %54 = vector.multi_reduction <add>, %53, %cst_23 [1] : vector<256x256xf32> to vector<256xf32>
    %55 = vector.shape_cast %54 : vector<256xf32> to vector<256x1xf32>
    %56 = arith.truncf %53 : vector<256x256xf32> to vector<256x256xbf16>
    %cst_24 = arith.constant dense<0.000000e+00> : vector<256x128xf32>
    %57 = tpu.matmul %56, %35, %cst_24 {dimension_numbers = #tpu.dot_dimension_numbers<[1], [0], [0], [1], [0, 0, 1, 1], [], []>} : vector<256x256xbf16>, vector<256x128xbf16>, vector<256x128xf32> -> vector<256x128xf32>
    %58 = tpu.reciprocal %55 {approx = true} : vector<256x1xf32> -> vector<256x1xf32>
    %59 = vector.broadcast %58 : vector<256x1xf32> to vector<256x128xf32>
    %60 = arith.mulf %57, %59 : vector<256x128xf32>
    %61 = arith.truncf %60 : vector<256x128xf32> to vector<256x128xbf16>
    %c0_25 = arith.constant 0 : index
    %c0_26 = arith.constant 0 : index
    %62 = vector.load %arg11[%c0_25, %c0_26] : memref<256x256xbf16, #tpu.memory_space<vmem>>, vector<256x128xbf16>
    tpu.vector_store %arg11[%c0_25, %c0_26], %61 {strides = array<i32>} : memref<256x256xbf16, #tpu.memory_space<vmem>>, vector<256x128xbf16>,
    %63 = vector.extract_strided_slice %29 {offsets = [0, 128], sizes = [256, 128], strides = [1, 1]} : vector<256x768xf32> to vector<256x128xf32>
    %64 = vector.extract_strided_slice %29 {offsets = [0, 384], sizes = [256, 128], strides = [1, 1]} : vector<256x768xf32> to vector<256x128xf32>
    %65 = vector.extract_strided_slice %29 {offsets = [0, 640], sizes = [256, 128], strides = [1, 1]} : vector<256x768xf32> to vector<256x128xf32>
    %66 = arith.truncf %65 : vector<256x128xf32> to vector<256x128xbf16>
    %67 = arith.mulf %63, %30 : vector<256x128xf32>
    %c64_i32_27 = arith.constant 64 : i32
    %68 = tpu.dynamic_rotate %63 by %c64_i32_27 dim 1 : vector<256x128xf32>, i32 -> vector<256x128xf32>
    %69 = arith.mulf %68, %31 : vector<256x128xf32>
    %70 = arith.addf %67, %69 : vector<256x128xf32>
    %71 = arith.mulf %64, %30 : vector<256x128xf32>
    %c64_i32_28 = arith.constant 64 : i32
    %72 = tpu.dynamic_rotate %64 by %c64_i32_28 dim 1 : vector<256x128xf32>, i32 -> vector<256x128xf32>
    %73 = arith.mulf %72, %31 : vector<256x128xf32>
    %74 = arith.addf %71, %73 : vector<256x128xf32>
    %75 = arith.truncf %70 : vector<256x128xf32> to vector<256x128xbf16>
    %76 = arith.truncf %74 : vector<256x128xf32> to vector<256x128xbf16>
    %cst_29 = arith.constant dense<0.000000e+00> : vector<256x256xf32>
    %77 = tpu.matmul %75, %76, %cst_29 {dimension_numbers = #tpu.dot_dimension_numbers<[1], [1], [0], [0], [0, 0, 1, 0], [], []>} : vector<256x128xbf16>, vector<256x128xbf16>, vector<256x256xf32> -> vector<256x256xf32>
    %cst_30 = arith.constant 0.0883883461 : f32
    %78 = vector.broadcast %cst_30 : f32 to vector<256x256xf32>
    %79 = arith.mulf %77, %78 : vector<256x256xf32>
    %cst_31 = arith.constant dense<0xFF800000> : vector<256xf32>
    %80 = vector.multi_reduction <maximumf>, %79, %cst_31 [1] : vector<256x256xf32> to vector<256xf32>
    %81 = vector.shape_cast %80 : vector<256xf32> to vector<256x1xf32>
    %82 = vector.broadcast %81 : vector<256x1xf32> to vector<256x256xf32>
    %83 = arith.subf %79, %82 : vector<256x256xf32>
    %84 = math.exp %83 : vector<256x256xf32>
    %cst_32 = arith.constant dense<0.000000e+00> : vector<256xf32>
    %85 = vector.multi_reduction <add>, %84, %cst_32 [1] : vector<256x256xf32> to vector<256xf32>
    %86 = vector.shape_cast %85 : vector<256xf32> to vector<256x1xf32>
    %87 = arith.truncf %84 : vector<256x256xf32> to vector<256x256xbf16>
    %cst_33 = arith.constant dense<0.000000e+00> : vector<256x128xf32>
    %88 = tpu.matmul %87, %66, %cst_33 {dimension_numbers = #tpu.dot_dimension_numbers<[1], [0], [0], [1], [0, 0, 1, 1], [], []>} : vector<256x256xbf16>, vector<256x128xbf16>, vector<256x128xf32> -> vector<256x128xf32>
    %89 = tpu.reciprocal %86 {approx = true} : vector<256x1xf32> -> vector<256x1xf32>
    %90 = vector.broadcast %89 : vector<256x1xf32> to vector<256x128xf32>
    %91 = arith.mulf %88, %90 : vector<256x128xf32>
    %92 = arith.truncf %91 : vector<256x128xf32> to vector<256x128xbf16>
    %c0_34 = arith.constant 0 : index
    %c128 = arith.constant 128 : index
    %93 = vector.load %arg11[%c0_34, %c128] : memref<256x256xbf16, #tpu.memory_space<vmem>>, vector<256x128xbf16>
    tpu.vector_store %arg11[%c0_34, %c128], %92 {strides = array<i32>} : memref<256x256xbf16, #tpu.memory_space<vmem>>, vector<256x128xbf16>,
    %c0_35 = arith.constant 0 : index
    %c0_36 = arith.constant 0 : index
    %94 = vector.load %arg11[%c0_35, %c0_36] : memref<256x256xbf16, #tpu.memory_space<vmem>>, vector<256x256xbf16>
    %c0_37 = arith.constant 0 : index
    %c0_38 = arith.constant 0 : index
    %95 = vector.load %arg6[%c0_37, %c0_38] : memref<256x256xbf16, #tpu.memory_space<vmem>>, vector<256x256xbf16>
    %cst_39 = arith.constant dense<0.000000e+00> : vector<256x256xf32>
    %96 = tpu.matmul %94, %95, %cst_39 {dimension_numbers = #tpu.dot_dimension_numbers<[1], [0], [0], [1], [0, 0, 1, 1], [], []>} : vector<256x256xbf16>, vector<256x256xbf16>, vector<256x256xf32> -> vector<256x256xf32>
    %c0_40 = arith.constant 0 : index
    %c0_41 = arith.constant 0 : index
    %97 = vector.load %arg7[%c0_40, %c0_41] : memref<1x256xf32, #tpu.memory_space<vmem>>, vector<1x256xf32>
    %98 = vector.broadcast %97 : vector<1x256xf32> to vector<256x256xf32>
    %99 = arith.addf %96, %98 : vector<256x256xf32>
    %100 = arith.addf %1, %99 : vector<256x256xf32>
    %c0_42 = arith.constant 0 : index
    %c0_43 = arith.constant 0 : index
    %c0_44 = arith.constant 0 : index
    %101 = vector.load %arg10[%c0_42, %c0_43, %c0_44] : memref<1x256x256xf32, #tpu.memory_space<vmem>>, vector<1x256x256xf32>
    %102 = vector.shape_cast %101 : vector<1x256x256xf32> to vector<256x256xf32>
    %103 = vector.shape_cast %100 : vector<256x256xf32> to vector<1x256x256xf32>
    tpu.vector_store %arg10[%c0_42, %c0_43, %c0_44], %103 {strides = array<i32>} : memref<1x256x256xf32, #tpu.memory_space<vmem>>, vector<1x256x256xf32>,
    return
  }
  func.func @transform_0(%arg0: i32) -> (i32, i32, i32) {
    %c0_i32 = arith.constant 0 : i32
    %c0_i32_0 = arith.constant 0 : i32
    %c0_i32_1 = arith.constant 0 : i32
    return %arg0, %c0_i32, %c0_i32_0 : i32, i32, i32
  }
  func.func @transform_1(%arg0: i32) -> (i32, i32) {
    %c0_i32 = arith.constant 0 : i32
    %c0_i32_0 = arith.constant 0 : i32
    %c0_i32_1 = arith.constant 0 : i32
    return %c0_i32, %c0_i32_0 : i32, i32
  }
  func.func @transform_2(%arg0: i32) -> (i32, i32) {
    %c0_i32 = arith.constant 0 : i32
    %c0_i32_0 = arith.constant 0 : i32
    %c0_i32_1 = arith.constant 0 : i32
    return %c0_i32, %c0_i32_0 : i32, i32
  }
  func.func @transform_3(%arg0: i32) -> (i32, i32) {
    %c0_i32 = arith.constant 0 : i32
    %c0_i32_0 = arith.constant 0 : i32
    %c0_i32_1 = arith.constant 0 : i32
    return %c0_i32, %c0_i32_0 : i32, i32
  }
  func.func @transform_4(%arg0: i32) -> (i32, i32) {
    %c0_i32 = arith.constant 0 : i32
    %c0_i32_0 = arith.constant 0 : i32
    %c0_i32_1 = arith.constant 0 : i32
    return %c0_i32, %c0_i32_0 : i32, i32
  }
  func.func @transform_5(%arg0: i32) -> (i32, i32) {
    %c0_i32 = arith.constant 0 : i32
    %c0_i32_0 = arith.constant 0 : i32
    %c0_i32_1 = arith.constant 0 : i32
    return %c0_i32, %c0_i32_0 : i32, i32
  }
  func.func @transform_6(%arg0: i32) -> (i32, i32) {
    %c0_i32 = arith.constant 0 : i32
    %c0_i32_0 = arith.constant 0 : i32
    %c0_i32_1 = arith.constant 0 : i32
    return %c0_i32, %c0_i32_0 : i32, i32
  }
  func.func @transform_7(%arg0: i32) -> (i32, i32) {
    %c0_i32 = arith.constant 0 : i32
    %c0_i32_0 = arith.constant 0 : i32
    %c0_i32_1 = arith.constant 0 : i32
    return %c0_i32, %c0_i32_0 : i32, i32
  }
  func.func @transform_8(%arg0: i32) -> (i32, i32) {
    %c0_i32 = arith.constant 0 : i32
    %c0_i32_0 = arith.constant 0 : i32
    %c0_i32_1 = arith.constant 0 : i32
    return %c0_i32, %c0_i32_0 : i32, i32
  }
  func.func @transform_9(%arg0: i32) -> (i32, i32, i32) {
    %c0_i32 = arith.constant 0 : i32
    %c0_i32_0 = arith.constant 0 : i32
    %c0_i32_1 = arith.constant 0 : i32
    return %arg0, %c0_i32, %c0_i32_0 : i32, i32, i32
  }
}

module attributes {stable_mosaic.version = 11 : i64} {
  func.func @_mlp_block_kernel(%arg0: i32, %arg1: memref<128x256xf32, #tpu.memory_space<vmem>>, %arg2: memref<1x256xf32, #tpu.memory_space<vmem>>, %arg3: memref<1x256xf32, #tpu.memory_space<vmem>>, %arg4: memref<256x512xbf16, #tpu.memory_space<vmem>>, %arg5: memref<1x512xf32, #tpu.memory_space<vmem>>, %arg6: memref<512x256xbf16, #tpu.memory_space<vmem>>, %arg7: memref<1x256xf32, #tpu.memory_space<vmem>>, %arg8: memref<128x256xf32, #tpu.memory_space<vmem>>) attributes {dimension_semantics = [#tpu.dimension_semantics<parallel>], iteration_bounds = array<i64: 4>, scalar_prefetch = 0 : i64, scratch_operands = 0 : i64, tpu.core_type = #tpu.core_type<tc>, window_params = [{transform_indices = @transform_0, window_bounds = array<i64: 128, 256>}, {pipeline_mode = #tpu.pipeline_mode<synchronous>, transform_indices = @transform_1, window_bounds = array<i64: 1, 256>}, {pipeline_mode = #tpu.pipeline_mode<synchronous>, transform_indices = @transform_2, window_bounds = array<i64: 1, 256>}, {pipeline_mode = #tpu.pipeline_mode<synchronous>, transform_indices = @transform_3, window_bounds = array<i64: 256, 512>}, {pipeline_mode = #tpu.pipeline_mode<synchronous>, transform_indices = @transform_4, window_bounds = array<i64: 1, 512>}, {pipeline_mode = #tpu.pipeline_mode<synchronous>, transform_indices = @transform_5, window_bounds = array<i64: 512, 256>}, {pipeline_mode = #tpu.pipeline_mode<synchronous>, transform_indices = @transform_6, window_bounds = array<i64: 1, 256>}, {transform_indices = @transform_7, window_bounds = array<i64: 128, 256>}]} {
    %c0 = arith.constant 0 : index
    %c0_0 = arith.constant 0 : index
    %0 = vector.load %arg1[%c0, %c0_0] : memref<128x256xf32, #tpu.memory_space<vmem>>, vector<128x256xf32>
    %cst = arith.constant dense<0.000000e+00> : vector<128xf32>
    %1 = vector.multi_reduction <add>, %0, %cst [1] : vector<128x256xf32> to vector<128xf32>
    %2 = vector.shape_cast %1 : vector<128xf32> to vector<128x1xf32>
    %cst_1 = arith.constant 2.560000e+02 : f32
    %3 = vector.broadcast %cst_1 : f32 to vector<128x1xf32>
    %4 = arith.divf %2, %3 : vector<128x1xf32>
    %5 = vector.broadcast %4 : vector<128x1xf32> to vector<128x256xf32>
    %6 = arith.subf %0, %5 : vector<128x256xf32>
    %7 = arith.mulf %6, %6 : vector<128x256xf32>
    %cst_2 = arith.constant dense<0.000000e+00> : vector<128xf32>
    %8 = vector.multi_reduction <add>, %7, %cst_2 [1] : vector<128x256xf32> to vector<128xf32>
    %9 = vector.shape_cast %8 : vector<128xf32> to vector<128x1xf32>
    %cst_3 = arith.constant 2.560000e+02 : f32
    %10 = vector.broadcast %cst_3 : f32 to vector<128x1xf32>
    %11 = arith.divf %9, %10 : vector<128x1xf32>
    %cst_4 = arith.constant 9.99999997E-7 : f32
    %12 = vector.broadcast %cst_4 : f32 to vector<128x1xf32>
    %13 = arith.addf %11, %12 : vector<128x1xf32>
    %14 = math.rsqrt %13 : vector<128x1xf32>
    %15 = vector.broadcast %14 : vector<128x1xf32> to vector<128x256xf32>
    %16 = arith.mulf %6, %15 : vector<128x256xf32>
    %c0_5 = arith.constant 0 : index
    %c0_6 = arith.constant 0 : index
    %17 = vector.load %arg2[%c0_5, %c0_6] : memref<1x256xf32, #tpu.memory_space<vmem>>, vector<1x256xf32>
    %18 = vector.broadcast %17 : vector<1x256xf32> to vector<128x256xf32>
    %19 = arith.mulf %16, %18 : vector<128x256xf32>
    %c0_7 = arith.constant 0 : index
    %c0_8 = arith.constant 0 : index
    %20 = vector.load %arg3[%c0_7, %c0_8] : memref<1x256xf32, #tpu.memory_space<vmem>>, vector<1x256xf32>
    %21 = vector.broadcast %20 : vector<1x256xf32> to vector<128x256xf32>
    %22 = arith.addf %19, %21 : vector<128x256xf32>
    %23 = arith.truncf %22 : vector<128x256xf32> to vector<128x256xbf16>
    %c0_9 = arith.constant 0 : index
    %c0_10 = arith.constant 0 : index
    %24 = vector.load %arg4[%c0_9, %c0_10] : memref<256x512xbf16, #tpu.memory_space<vmem>>, vector<256x512xbf16>
    %cst_11 = arith.constant dense<0.000000e+00> : vector<128x512xf32>
    %25 = tpu.matmul %23, %24, %cst_11 {dimension_numbers = #tpu.dot_dimension_numbers<[1], [0], [0], [1], [0, 0, 1, 1], [], []>} : vector<128x256xbf16>, vector<256x512xbf16>, vector<128x512xf32> -> vector<128x512xf32>
    %c0_12 = arith.constant 0 : index
    %c0_13 = arith.constant 0 : index
    %26 = vector.load %arg5[%c0_12, %c0_13] : memref<1x512xf32, #tpu.memory_space<vmem>>, vector<1x512xf32>
    %27 = vector.broadcast %26 : vector<1x512xf32> to vector<128x512xf32>
    %28 = arith.addf %25, %27 : vector<128x512xf32>
    %cst_14 = arith.constant 5.000000e-01 : f32
    %29 = vector.broadcast %cst_14 : f32 to vector<128x512xf32>
    %30 = arith.mulf %29, %28 : vector<128x512xf32>
    %cst_15 = arith.constant 4.471500e-02 : f32
    %31 = vector.broadcast %cst_15 : f32 to vector<128x512xf32>
    %32 = arith.mulf %31, %28 : vector<128x512xf32>
    %33 = arith.mulf %32, %28 : vector<128x512xf32>
    %34 = arith.mulf %33, %28 : vector<128x512xf32>
    %35 = arith.addf %28, %34 : vector<128x512xf32>
    %cst_16 = arith.constant 0.797884583 : f32
    %36 = vector.broadcast %cst_16 : f32 to vector<128x512xf32>
    %37 = arith.mulf %36, %35 : vector<128x512xf32>
    %38 = math.tanh %37 : vector<128x512xf32>
    %cst_17 = arith.constant 1.000000e+00 : f32
    %39 = vector.broadcast %cst_17 : f32 to vector<128x512xf32>
    %40 = arith.addf %39, %38 : vector<128x512xf32>
    %41 = arith.mulf %30, %40 : vector<128x512xf32>
    %42 = arith.truncf %41 : vector<128x512xf32> to vector<128x512xbf16>
    %c0_18 = arith.constant 0 : index
    %c0_19 = arith.constant 0 : index
    %43 = vector.load %arg6[%c0_18, %c0_19] : memref<512x256xbf16, #tpu.memory_space<vmem>>, vector<512x256xbf16>
    %cst_20 = arith.constant dense<0.000000e+00> : vector<128x256xf32>
    %44 = tpu.matmul %42, %43, %cst_20 {dimension_numbers = #tpu.dot_dimension_numbers<[1], [0], [0], [1], [0, 0, 1, 1], [], []>} : vector<128x512xbf16>, vector<512x256xbf16>, vector<128x256xf32> -> vector<128x256xf32>
    %c0_21 = arith.constant 0 : index
    %c0_22 = arith.constant 0 : index
    %45 = vector.load %arg7[%c0_21, %c0_22] : memref<1x256xf32, #tpu.memory_space<vmem>>, vector<1x256xf32>
    %46 = vector.broadcast %45 : vector<1x256xf32> to vector<128x256xf32>
    %47 = arith.addf %44, %46 : vector<128x256xf32>
    %48 = arith.addf %0, %47 : vector<128x256xf32>
    %c0_23 = arith.constant 0 : index
    %c0_24 = arith.constant 0 : index
    %49 = vector.load %arg8[%c0_23, %c0_24] : memref<128x256xf32, #tpu.memory_space<vmem>>, vector<128x256xf32>
    tpu.vector_store %arg8[%c0_23, %c0_24], %48 {strides = array<i32>} : memref<128x256xf32, #tpu.memory_space<vmem>>, vector<128x256xf32>,
    return
  }
  func.func @transform_0(%arg0: i32) -> (i32, i32) {
    %c0_i32 = arith.constant 0 : i32
    %c0_i32_0 = arith.constant 0 : i32
    return %arg0, %c0_i32 : i32, i32
  }
  func.func @transform_1(%arg0: i32) -> (i32, i32) {
    %c0_i32 = arith.constant 0 : i32
    %c0_i32_0 = arith.constant 0 : i32
    %c0_i32_1 = arith.constant 0 : i32
    return %c0_i32, %c0_i32_0 : i32, i32
  }
  func.func @transform_2(%arg0: i32) -> (i32, i32) {
    %c0_i32 = arith.constant 0 : i32
    %c0_i32_0 = arith.constant 0 : i32
    %c0_i32_1 = arith.constant 0 : i32
    return %c0_i32, %c0_i32_0 : i32, i32
  }
  func.func @transform_3(%arg0: i32) -> (i32, i32) {
    %c0_i32 = arith.constant 0 : i32
    %c0_i32_0 = arith.constant 0 : i32
    %c0_i32_1 = arith.constant 0 : i32
    return %c0_i32, %c0_i32_0 : i32, i32
  }
  func.func @transform_4(%arg0: i32) -> (i32, i32) {
    %c0_i32 = arith.constant 0 : i32
    %c0_i32_0 = arith.constant 0 : i32
    %c0_i32_1 = arith.constant 0 : i32
    return %c0_i32, %c0_i32_0 : i32, i32
  }
  func.func @transform_5(%arg0: i32) -> (i32, i32) {
    %c0_i32 = arith.constant 0 : i32
    %c0_i32_0 = arith.constant 0 : i32
    %c0_i32_1 = arith.constant 0 : i32
    return %c0_i32, %c0_i32_0 : i32, i32
  }
  func.func @transform_6(%arg0: i32) -> (i32, i32) {
    %c0_i32 = arith.constant 0 : i32
    %c0_i32_0 = arith.constant 0 : i32
    %c0_i32_1 = arith.constant 0 : i32
    return %c0_i32, %c0_i32_0 : i32, i32
  }
  func.func @transform_7(%arg0: i32) -> (i32, i32) {
    %c0_i32 = arith.constant 0 : i32
    %c0_i32_0 = arith.constant 0 : i32
    return %arg0, %c0_i32 : i32, i32
  }
}

</mosaic_0001>

<bundles_post_ra>
// kernel: transformer_block.3
= control target key start
LH: loop header
LB: loop body
LE: loop exit
PB: predicated region body
PF: predicated region fallthrough
CT: control target
= control target key end

     0   :  { %12 = vsyncpa [#allocation3], 0  ;;  %s5127_s0 = inlined_call_operand.vmem [shape: f32[512,256], index: 0, kind: input, shape index: {}]   ;;  %s5128_s1 = inlined_call_operand.vmem [shape: f32[1,256], index: 1, kind: input, shape index: {}]   ;;  %s5129_s2 = inlined_call_operand.vmem [shape: f32[1,256], index: 2, kind: input, shape index: {}]   ;;  %s5130_s3 = inlined_call_operand.vmem [shape: bf16[256,512], index: 3, kind: input, shape index: {}]   ;;  %s5131_s4 = inlined_call_operand.vmem [shape: f32[1,512], index: 4, kind: input, shape index: {}]   ;;  %s5132_s5 = inlined_call_operand.vmem [shape: bf16[512,256], index: 5, kind: input, shape index: {}]   ;;  %s5133_s6 = inlined_call_operand.vmem [shape: f32[1,256], index: 6, kind: input, shape index: {}]   ;;  %s5134_s7 = inlined_call_operand.hbm [shape: f32[512,256], index: 7, kind: output, shape index: {}]  }
   0x1   :  { %14 = vsyncpa [#allocation3 + $0x1], 0  ;;  %s3354_s24 = smov 0   ;;  %s3356_s25 = smov 0  }
   0x2   :  { %s3358_s26 = smov 0   ;;  %s3360_s27 = smov 0  }
   0x3 LB: > { %s3375_s28 = sadd.s32 4294967295, %s3309_s27   ;;  %s2679_s29 = sadd.s32 4294967294, %s3309_s27   ;;  %s3309_s27 = sphi %s3360_s27, %s5329_s27   ;;  %s3305_s26 = sphi %s3358_s26, %s5328_s26   ;;  %s3301_s25 = sphi %s3356_s25, %s5327_s25   ;;  %s3297_s24 = sphi %s3354_s24, %s5326_s24  }
   0x4   : > { %s3379_s30 = sadd.s32 1, %s3309_s27   ;;  %s179_s8 = sadd.s32 1, %s3305_s26 }
   0x5   : > { %s176_s9 = ssub.s32 %s3309_s27, %s3379_s30  ;;  %p189_p0 = scmp.ne.s32.totalorder %s3305_s26, %s3301_s25 }
   0x6   : > { %p177_p1 = scmp.eq.s32.totalorder %s176_s9, 0  ;;  %p190_p2 = scmp.eq.s32.totalorder %s3375_s28, 3 }
   0x7   : > { %p195_p3 = scmp.ne.s32.totalorder %s3301_s25, %s3297_s24  ;;  %p196_p4 = scmp.eq.s32.totalorder %s2679_s29, 3 }
   0x8   : > { %s3390_s10 = scalar_select %p177_p1, %s3305_s26, %s179_s8  }
   0x9   : > { %p3392_p5 = por %p190_p2, %p189_p0  ;;  %p3396_p6 = por %p196_p4, %p195_p3 }
   0xa   : > { %p2682_p7 = scmp.ge.s32.totalorder %s3309_s27, 1  ;;  %p242_p8 = scmp.lt.s32.totalorder %s3309_s27, 5 }
   0xc   : > { %p243_p9 = pnand %p2682_p7, %p242_p8 }
   0xe   : > { %246 = sbr.rel (%p243_p9) target bundleno = 933 (0x3a5), region = 48 }
  0x13   : > { %s2684_s13 = sshll.u32 %s3375_s28, 4  ;;  %v2865_v48 = vld [vmem:[%s5130_s3 + $0xe4] ss:$16 sps:$4 sm:$0xff]   ;;  %v2867_v49 = vld [vmem:[%s5130_s3 + $0xec] ss:$16 sps:$4 sm:$0xff]   ;;  %s272_s22 = sand.u32 1, %s3301_s25  }
  0x14   : > { %p276_p10 = scmp.lt.s32.totalorder %s2684_s13, 63  ;;  %v2869_v50 = vld [vmem:[%s5130_s3 + $0xe0] ss:$16 sps:$4 sm:$0xff]   ;;  %v2870_v51 = vld [vmem:[%s5130_s3 + $0xe8] ss:$16 sps:$4 sm:$0xff]   ;;  %1082 = vmatprep.subr.bf16.mxu0 %v2865_v48  ;;  %1195 = vmatprep.subr.bf16.mxu1 %v2867_v49  ;;  %s2683_s23 = sshll.u32 %s272_s22, 8 }
  0x15   : > { %v2871_v52 = vld [vmem:[%s5130_s3 + $0xc4] ss:$16 sps:$4 sm:$0xff]   ;;  %v2873_v53 = vld [vmem:[%s5130_s3 + $0xcc] ss:$16 sps:$4 sm:$0xff]   ;;  %1083 = vmatpush1.bf16.msra.mxu0 %v2869_v50  ;;  %1196 = vmatpush1.bf16.msra.mxu1 %v2870_v51  ;;  %v2875_v54 = vld [vmem:[%s5130_s3 + $0xc0] ss:$16 sps:$4 sm:$0xff]  }
  0x16   : > { %s5331_s13 = smov (!%p276_p10, %s2684_s13), 63  ;;  %v2876_v55 = vld [vmem:[%s5130_s3 + $0xc8] ss:$16 sps:$4 sm:$0xff]   ;;  %1084 = vmatprep.subr.bf16.mxu0 %v2871_v52  ;;  %1197 = vmatprep.subr.bf16.mxu1 %v2873_v53  ;;  %v2877_v56 = vld [vmem:[%s5130_s3 + $0xa4] ss:$16 sps:$4 sm:$0xff]   ;;  %s4983_s29 = scalar_lea.vmem [#allocation2], %s2683_s23 }
  0x17   : > { %s2821_s14 = sshll.u32 %s5331_s13, 4  ;;  %v2879_v57 = vld [vmem:[%s5130_s3 + $0xac] ss:$16 sps:$4 sm:$0xff]   ;;  %v2881_v58 = vld [vmem:[%s5130_s3 + $0xa0] ss:$16 sps:$4 sm:$0xff]   ;;  %s2823_s8 = sshll.u32 %s3375_s28, 12 }
  0x18   : > { %s3406_s17 = scalar_lea.vmem %s5127_s0, %s2821_s14  ;;  %v2882_v59 = vld [vmem:[%s5130_s3 + $0xa8] ss:$16 sps:$4 sm:$0xff]   ;;  %v2883_v60 = vld [vmem:[%s5130_s3 + $0x84] ss:$16 sps:$4 sm:$0xff]   ;;  %v2885_v61 = vld [vmem:[%s5130_s3 + $0x8c] ss:$16 sps:$4 sm:$0xff]   ;;  %s5078_s15 = scalar_lea.hbm %s5134_s7, %s2823_s8 }
  0x19   : > { %v3409_v0 = vld [vmem:[%s3406_s17] sm:$0xff]  ;;  %v3412_v1 = vld [vmem:[%s3406_s17 + $0x8] sm:$0xff]  ;;  %v3423_v5 = vld [vmem:[%s3406_s17 + $0x10] sm:$0xff]  ;;  %1085 = vmatpush1.bf16.msra.mxu0 %v2875_v54  ;;  %1198 = vmatpush1.bf16.msra.mxu1 %v2876_v55  ;;  %s2617_s9 = sshll.u32 %s4983_s29, 4  ;;  %s5087_s28 = scalar_lea.sflag [#allocation3], %s272_s22  ;;  %s5080_s9 = int_to_ptr.vmem [resolvable:$true] %s2617_s9 }
  0x1a   : > { %v3415_v2 = vld [vmem:[%s3406_s17 + $0x20] sm:$0xff]  ;;  %v315_v3 = vadd.f32 %v3412_v1, %v3409_v0  ;;  %v3420_v4 = vld [vmem:[%s3406_s17 + $0x28] sm:$0xff]  ;;  %v3426_v6 = vld [vmem:[%s3406_s17 + $0x18] sm:$0xff]  ;;  %1086 = vmatprep.subr.bf16.mxu0 %v2877_v56  ;;  %1199 = vmatprep.subr.bf16.mxu1 %v2879_v57  ;;  %s3249_s16 = scalar_lea.vmem %s5080_s9, 4096  ;;  %s3311_s18 = smov [#allocation2]  }
  0x1b   : > { %v321_v7 = vadd.f32 %v3420_v4, %v3415_v2  ;;  %v3431_v8 = vld [vmem:[%s3406_s17 + $0x30] sm:$0xff]  ;;  %v3434_v9 = vld [vmem:[%s3406_s17 + $0x38] sm:$0xff]  ;;  %v318_v10 = vadd.f32 %v3426_v6, %v3423_v5  ;;  %v3441_v12 = vld [vmem:[%s3406_s17 + $0x40] sm:$0xff]  ;;  %p3250_p11 = scmp.ne.s32.totalorder %s5080_s9, %s3249_s16  ;;  %s3253_s19 = sshll.u32 %s3311_s18, 4  ;;  %s3254_s19 = int_to_ptr.vmem [resolvable:$false] %s3253_s19 }
  0x1c   : > { %316 = vadd.xlane.f32.xlu0 %v315_v3  ;;  %v324_v11 = vadd.f32 %v3434_v9, %v3431_v8  ;;  %v3444_v13 = vld [vmem:[%s3406_s17 + $0x48] sm:$0xff]  ;;  %v3447_v14 = vld [vmem:[%s3406_s17 + $0x50] sm:$0xff]  ;;  %v3450_v15 = vld [vmem:[%s3406_s17 + $0x58] sm:$0xff]  ;;  %s3255_s20 = scalar_lea.vmem %s3254_s19, 8192  ;;  %p3256_p0 = scmp.lt.s32.totalorder %s5080_s9, %s3254_s19 }
  0x1d   : > { %322 = vadd.xlane.f32.xlu1 %v321_v7  ;;  %v327_v16 = vadd.f32 %v3444_v13, %v3441_v12  ;;  %v330_v17 = vadd.f32 %v3450_v15, %v3447_v14  ;;  %v3457_v18 = vld [vmem:[%s3406_s17 + $0x60] sm:$0xff]  ;;  %v3460_v19 = vld [vmem:[%s3406_s17 + $0x68] sm:$0xff]  ;;  %v3463_v20 = vld [vmem:[%s3406_s17 + $0x70] sm:$0xff]  ;;  %1087 = vmatpush1.bf16.msra.mxu0 %v2881_v58  ;;  %p3251_p12 = pnand %p3250_p11, %p3392_p5  ;;  %p3257_p1 = scmp.lt.s32.totalorder %s3255_s20, %s3249_s16 }
  0x1e   : > { %v3466_v21 = vld [vmem:[%s3406_s17 + $0x78] sm:$0xff]  ;;  %v3469_v22 = vld [vmem:[%s3406_s17 + $0x80] sm:$0xff]  ;;  %v3472_v23 = vld [vmem:[%s3406_s17 + $0x88] sm:$0xff]  ;;  %v333_v24 = vadd.f32 %v3460_v19, %v3457_v18  ;;  %1200 = vmatpush1.bf16.msra.mxu1 %v2882_v59  ;;  %1088 = vmatprep.subr.bf16.mxu0 %v2883_v60 }
  0x1f   : > { %v3477_v25 = vld [vmem:[%s3406_s17 + $0x90] sm:$0xff]  ;;  %v3480_v26 = vld [vmem:[%s3406_s17 + $0x98] sm:$0xff]  ;;  %v336_v27 = vadd.f32 %v3466_v21, %v3463_v20  ;;  %v3485_v28 = vld [vmem:[%s3406_s17 + $0xa0] sm:$0xff]  ;;  %v339_v30 = vadd.f32 %v3472_v23, %v3469_v22  ;;  %1201 = vmatprep.subr.bf16.mxu1 %v2885_v61  ;;  %p3252_p13 = pneg %p3251_p12  ;;  %p3258_p2 = por %p3257_p1, %p3256_p0 }
  0x20   : > { %319 = vadd.xlane.f32.xlu0 %v318_v10  ;;  %v3488_v29 = vld [vmem:[%s3406_s17 + $0xa8] sm:$0xff]  ;;  %v3493_v31 = vld [vmem:[%s3406_s17 + $0xb0] sm:$0xff]  ;;  %v3496_v32 = vld [vmem:[%s3406_s17 + $0xb8] sm:$0xff]  ;;  %v342_v33 = vadd.f32 %v3480_v26, %v3477_v25 }
  0x21   : > { %325 = vadd.xlane.f32.xlu1 %v324_v11  ;;  %v3501_v34 = vld [vmem:[%s3406_s17 + $0xc0] sm:$0xff]  ;;  %v3504_v35 = vld [vmem:[%s3406_s17 + $0xc8] sm:$0xff]  ;;  %v345_v36 = vadd.f32 %v3488_v29, %v3485_v28  ;;  %v3509_v37 = vld [vmem:[%s3406_s17 + $0xd0] sm:$0xff]  ;;  %v348_v39 = vadd.f32 %v3496_v32, %v3493_v31  ;;  %p3259_p3 = pnand %p3258_p2, %p3252_p13 }
  0x22   : > { %v3512_v38 = vld [vmem:[%s3406_s17 + $0xd8] sm:$0xff]  ;;  %v3517_v40 = vld [vmem:[%s3406_s17 + $0xe0] sm:$0xff]  ;;  %v3520_v41 = vld [vmem:[%s3406_s17 + $0xe8] sm:$0xff]  ;;  %v351_v42 = vadd.f32 %v3504_v35, %v3501_v34 }
  0x23   : > { %v3525_v43 = vld [vmem:[%s3406_s17 + $0xf0] sm:$0xff]  ;;  %v3528_v44 = vld [vmem:[%s3406_s17 + $0xf8] sm:$0xff]  ;;  %v354_v45 = vadd.f32 %v3512_v38, %v3509_v37  ;;  %v357_v46 = vadd.f32 %v3520_v41, %v3517_v40 }
  0x24   : > { %328 = vadd.xlane.f32.xlu0 %v327_v16  ;;  %v360_v47 = vadd.f32 %v3528_v44, %v3525_v43  ;;  %v2887_v62 = vld [vmem:[%s5130_s3 + $0x80] ss:$16 sps:$4 sm:$0xff]   ;;  %v2888_v63 = vld [vmem:[%s5130_s3 + $0x88] ss:$16 sps:$4 sm:$0xff]   ;;  %v2889_v3 = vld [vmem:[%s5130_s3 + $0x64] ss:$16 sps:$4 sm:$0xff]  }
  0x25   : > { %331 = vadd.xlane.f32.xlu1 %v330_v17  ;;  %v2891_v7 = vld [vmem:[%s5130_s3 + $0x6c] ss:$16 sps:$4 sm:$0xff]   ;;  %1089 = vmatpush1.bf16.msra.mxu0 %v2887_v62  ;;  %v2893_v10 = vld [vmem:[%s5130_s3 + $0x60] ss:$16 sps:$4 sm:$0xff]   ;;  %v2894_v11 = vld [vmem:[%s5130_s3 + $0x68] ss:$16 sps:$4 sm:$0xff]  }
  0x26   : > { %1202 = vmatpush1.bf16.msra.mxu1 %v2888_v63  ;;  %1090 = vmatprep.subr.bf16.mxu0 %v2889_v3  ;;  %v2895_v16 = vld [vmem:[%s5130_s3 + $0x44] ss:$16 sps:$4 sm:$0xff]   ;;  %v2897_v17 = vld [vmem:[%s5130_s3 + $0x4c] ss:$16 sps:$4 sm:$0xff]  }
  0x27   : > { %1203 = vmatprep.subr.bf16.mxu1 %v2891_v7  ;;  %v2913_v48 = vld [vmem:[%s5130_s3 + $0x1e4] ss:$16 sps:$4 sm:$0xff]   ;;  %v2915_v49 = vld [vmem:[%s5130_s3 + $0x1ec] ss:$16 sps:$4 sm:$0xff]  }
  0x28   : > { %334 = vadd.xlane.f32.xlu0 %v333_v24  ;;  %v2899_v24 = vld [vmem:[%s5130_s3 + $0x40] ss:$16 sps:$4 sm:$0xff]  }
  0x29   : > { %337 = vadd.xlane.f32.xlu1 %v336_v27  ;;  %1091 = vmatpush1.bf16.msra.mxu0 %v2893_v10  ;;  %v2900_v27 = vld [vmem:[%s5130_s3 + $0x48] ss:$16 sps:$4 sm:$0xff]  }
  0x2a   : > { %1204 = vmatpush1.bf16.msra.mxu1 %v2894_v11  ;;  %1092 = vmatprep.subr.bf16.mxu0 %v2895_v16 }
  0x2b   : > { %1205 = vmatprep.subr.bf16.mxu1 %v2897_v17 }
  0x2c   : > { %340 = vadd.xlane.f32.xlu0 %v339_v30  ;;  %v2901_v30 = vld [vmem:[%s5130_s3 + $0x24] ss:$16 sps:$4 sm:$0xff]  }
  0x2d   : > { %343 = vadd.xlane.f32.xlu1 %v342_v33  ;;  %v2903_v33 = vld [vmem:[%s5130_s3 + $0x2c] ss:$16 sps:$4 sm:$0xff]   ;;  %1093 = vmatpush1.bf16.msra.mxu0 %v2899_v24 }
  0x2e   : > { %1206 = vmatpush1.bf16.msra.mxu1 %v2900_v27  ;;  %1094 = vmatprep.subr.bf16.mxu0 %v2901_v30 }
  0x2f   : > { %1207 = vmatprep.subr.bf16.mxu1 %v2903_v33 }
  0x30   : > { %346 = vadd.xlane.f32.xlu0 %v345_v36  ;;  %v2905_v36 = vld [vmem:[%s5130_s3 + $0x20] ss:$16 sps:$4 sm:$0xff]  }
  0x31   : > { %349 = vadd.xlane.f32.xlu1 %v348_v39  ;;  %v2906_v39 = vld [vmem:[%s5130_s3 + $0x28] ss:$16 sps:$4 sm:$0xff]   ;;  %1095 = vmatpush1.bf16.msra.mxu0 %v2905_v36 }
  0x32   : > { %1208 = vmatpush1.bf16.msra.mxu1 %v2906_v39 }
  0x34   : > { %352 = vadd.xlane.f32.xlu0 %v351_v42  ;;  %v2907_v42 = vld [vmem:[%s5130_s3 + $0x4] ss:$16 sps:$4 sm:$0xff]  }
  0x35   : > { %355 = vadd.xlane.f32.xlu1 %v354_v45  ;;  %v2909_v45 = vld [vmem:[%s5130_s3 + $0xc] ss:$16 sps:$4 sm:$0xff]   ;;  %1096 = vmatprep.subr.bf16.mxu0 %v2907_v42 }
  0x36   : > { %1209 = vmatprep.subr.bf16.mxu1 %v2909_v45 }
  0x38   : > { %358 = vadd.xlane.f32.xlu0 %v357_v46  ;;  %v2911_v46 = vld [vmem:[%s5130_s3] ss:$16 sps:$4 sm:$0xff]  }
  0x39   : > { %361 = vadd.xlane.f32.xlu1 %v360_v47  ;;  %v2912_v47 = vld [vmem:[%s5130_s3 + $0x8] ss:$16 sps:$4 sm:$0xff]   ;;  %1097 = vmatpush1.bf16.msra.mxu0 %v2911_v46 }
  0x3a   : > { %1210 = vmatpush1.bf16.msra.mxu1 %v2912_v47  ;;  %1098 = vmatprep.subr.bf16.mxu0 %v2913_v48 }
  0x3b   : > { %1211 = vmatprep.subr.bf16.mxu1 %v2915_v49 }
  0xa5   : > { %v317_v50 = vpop.xlane.xlu0 %316 }
  0xa6   : > { %v364_v51 = vmul.f32 0.00390625, %v317_v50  ;;  %v323_v52 = vpop.xlane.xlu1 %322 }
  0xa7   : > { %v366_v53 = vmul.f32 0.00390625, %v323_v52 }
  0xa8   : > { %v3639_v54 = vsub.f32 %v3409_v0, %v364_v51  ;;  %v3642_v55 = vsub.f32 %v3412_v1, %v364_v51 }
  0xa9   : > { %v3645_v56 = vsub.f32 %v3415_v2, %v366_v53  ;;  %v3648_v57 = vsub.f32 %v3420_v4, %v366_v53  ;;  %v320_v58 = vpop.xlane.xlu0 %319 }
  0xaa   : > { %v365_v59 = vmul.f32 0.00390625, %v320_v58  ;;  %v326_v60 = vpop.xlane.xlu1 %325  ;;  %v412_v61 = vmul.f32 %v3639_v54, %v3639_v54  ;;  %v413_v62 = vmul.f32 %v3642_v55, %v3642_v55 }
  0xab   : > { %v367_v0 = vmul.f32 0.00390625, %v326_v60  ;;  %v416_v1 = vmul.f32 %v3645_v56, %v3645_v56  ;;  %v417_v2 = vmul.f32 %v3648_v57, %v3648_v57 }
  0xac   : > { %v3659_v63 = vsub.f32 %v3423_v5, %v365_v59  ;;  %v3662_v4 = vsub.f32 %v3426_v6, %v365_v59  ;;  %v444_v3 = vadd.f32 %v413_v62, %v412_v61 }
  0xad   : > { %v3665_v7 = vsub.f32 %v3431_v8, %v367_v0  ;;  %v3668_v10 = vsub.f32 %v3434_v9, %v367_v0  ;;  %v329_v11 = vpop.xlane.xlu0 %328  ;;  %v450_v24 = vadd.f32 %v417_v2, %v416_v1 }
  0xae   : > { %v368_v16 = vmul.f32 0.00390625, %v329_v11  ;;  %445 = vadd.xlane.f32.xlu0 %v444_v3  ;;  %v332_v17 = vpop.xlane.xlu1 %331  ;;  %v414_v27 = vmul.f32 %v3659_v63, %v3659_v63  ;;  %v415_v5 = vmul.f32 %v3662_v4, %v3662_v4 }
  0xaf   : > { %v369_v6 = vmul.f32 0.00390625, %v332_v17  ;;  %v418_v30 = vmul.f32 %v3665_v7, %v3665_v7  ;;  %v419_v8 = vmul.f32 %v3668_v10, %v3668_v10 }
  0xb0   : > { %v3679_v9 = vsub.f32 %v3441_v12, %v368_v16  ;;  %v3682_v33 = vsub.f32 %v3444_v13, %v368_v16  ;;  %v447_v36 = vadd.f32 %v415_v5, %v414_v27  ;;  %v2919_v5 = vld [vmem:[%s5130_s3 + $0x1c4] ss:$16 sps:$4 sm:$0xff]  }
  0xb1   : > { %v3685_v39 = vsub.f32 %v3447_v14, %v369_v6  ;;  %v3688_v42 = vsub.f32 %v3450_v15, %v369_v6  ;;  %v335_v45 = vpop.xlane.xlu0 %334  ;;  %v453_v48 = vadd.f32 %v419_v8, %v418_v30 }
  0xb2   : > { %v370_v46 = vmul.f32 0.00390625, %v335_v45  ;;  %451 = vadd.xlane.f32.xlu0 %v450_v24  ;;  %448 = vadd.xlane.f32.xlu1 %v447_v36  ;;  %v338_v47 = vpop.xlane.xlu1 %337  ;;  %v420_v12 = vmul.f32 %v3679_v9, %v3679_v9  ;;  %v421_v13 = vmul.f32 %v3682_v33, %v3682_v33 }
  0xb3   : > { %v371_v49 = vmul.f32 0.00390625, %v338_v47  ;;  %v422_v14 = vmul.f32 %v3685_v39, %v3685_v39  ;;  %v423_v15 = vmul.f32 %v3688_v42, %v3688_v42  ;;  %v2924_v47 = vld [vmem:[%s5130_s3 + $0x1c8] ss:$16 sps:$4 sm:$0xff]  }
  0xb4   : > { %v3699_v50 = vsub.f32 %v3457_v18, %v370_v46  ;;  %v3702_v51 = vsub.f32 %v3460_v19, %v370_v46  ;;  %v456_v52 = vadd.f32 %v421_v13, %v420_v12  ;;  %v2923_v46 = vld [vmem:[%s5130_s3 + $0x1c0] ss:$16 sps:$4 sm:$0xff]  }
  0xb5   : > { %v3705_v53 = vsub.f32 %v3463_v20, %v371_v49  ;;  %v3708_v58 = vsub.f32 %v3466_v21, %v371_v49  ;;  %v341_v59 = vpop.xlane.xlu0 %340  ;;  %v459_v62 = vadd.f32 %v423_v15, %v422_v14  ;;  %v2917_v20 = vld [vmem:[%s5130_s3 + $0x1e0] ss:$16 sps:$4 sm:$0xff]   ;;  %v2918_v21 = vld [vmem:[%s5130_s3 + $0x1e8] ss:$16 sps:$4 sm:$0xff]  }
  0xb6   : > { %v372_v60 = vmul.f32 0.00390625, %v341_v59  ;;  %454 = vadd.xlane.f32.xlu1 %v453_v48  ;;  %457 = vadd.xlane.f32.xlu0 %v456_v52  ;;  %v344_v61 = vpop.xlane.xlu1 %343  ;;  %v424_v18 = vmul.f32 %v3699_v50, %v3699_v50  ;;  %v425_v19 = vmul.f32 %v3702_v51, %v3702_v51 }
  0xb7   : > { %v373_v0 = vmul.f32 0.00390625, %v344_v61  ;;  %v426_v1 = vmul.f32 %v3705_v53, %v3705_v53  ;;  %v427_v2 = vmul.f32 %v3708_v58, %v3708_v58  ;;  %1099 = vmatpush2.bf16.msra.mxu0 %v2917_v20  ;;  %1212 = vmatpush2.bf16.msra.mxu1 %v2918_v21  ;;  %v2930_v20 = vld [vmem:[%s5130_s3 + $0x1a8] ss:$16 sps:$4 sm:$0xff]  }
  0xb8   : > { %v3725_v3 = vsub.f32 %v3469_v22, %v372_v60  ;;  %v3728_v11 = vsub.f32 %v3472_v23, %v372_v60  ;;  %v462_v16 = vadd.f32 %v425_v19, %v424_v18  ;;  %v2921_v22 = vld [vmem:[%s5130_s3 + $0x1cc] ss:$16 sps:$4 sm:$0xff]   ;;  %1100 = vmatprep.subr.bf16.mxu0 %v2919_v5  ;;  %v2929_v19 = vld [vmem:[%s5130_s3 + $0x1a0] ss:$16 sps:$4 sm:$0xff]  }
  0xb9   : > { %v3731_v17 = vsub.f32 %v3477_v25, %v373_v0  ;;  %v3734_v24 = vsub.f32 %v3480_v26, %v373_v0  ;;  %v347_v27 = vpop.xlane.xlu0 %346  ;;  %v465_v30 = vadd.f32 %v427_v2, %v426_v1  ;;  %1213 = vmatprep.subr.bf16.mxu1 %v2921_v22 }
  0xba   : > { %v374_v23 = vmul.f32 0.00390625, %v347_v27  ;;  %460 = vadd.xlane.f32.xlu1 %v459_v62  ;;  %463 = vadd.xlane.f32.xlu0 %v462_v16  ;;  %v350_v6 = vpop.xlane.xlu1 %349  ;;  %v428_v25 = vmul.f32 %v3725_v3, %v3725_v3  ;;  %v429_v26 = vmul.f32 %v3728_v11, %v3728_v11 }
  0xbb   : > { %v375_v8 = vmul.f32 0.00390625, %v350_v6  ;;  %v430_v36 = vmul.f32 %v3731_v17, %v3731_v17  ;;  %v431_v45 = vmul.f32 %v3734_v24, %v3734_v24  ;;  %1101 = vmatpush2.bf16.msra.mxu0 %v2923_v46  ;;  %1214 = vmatpush2.bf16.msra.mxu1 %v2924_v47 }
  0xbc   : > { %v3757_v48 = vsub.f32 %v3485_v28, %v374_v23  ;;  %v3760_v12 = vsub.f32 %v3488_v29, %v374_v23  ;;  %v468_v13 = vadd.f32 %v429_v26, %v428_v25  ;;  %v2935_v26 = vld [vmem:[%s5130_s3 + $0x180] ss:$16 sps:$4 sm:$0xff]  }
  0xbd   : > { %v3763_v49 = vsub.f32 %v3493_v31, %v375_v8  ;;  %v3766_v14 = vsub.f32 %v3496_v32, %v375_v8  ;;  %v353_v15 = vpop.xlane.xlu0 %352  ;;  %v471_v60 = vadd.f32 %v431_v45, %v430_v36  ;;  %v2925_v31 = vld [vmem:[%s5130_s3 + $0x1a4] ss:$16 sps:$4 sm:$0xff]   ;;  %v2927_v32 = vld [vmem:[%s5130_s3 + $0x1ac] ss:$16 sps:$4 sm:$0xff]   ;;  %v2936_v8 = vld [vmem:[%s5130_s3 + $0x188] ss:$16 sps:$4 sm:$0xff]  }
  0xbe   : > { %v376_v52 = vmul.f32 0.00390625, %v353_v15  ;;  %466 = vadd.xlane.f32.xlu1 %v465_v30  ;;  %469 = vadd.xlane.f32.xlu0 %v468_v13  ;;  %v356_v59 = vpop.xlane.xlu1 %355  ;;  %v432_v28 = vmul.f32 %v3757_v48, %v3757_v48  ;;  %v433_v29 = vmul.f32 %v3760_v12, %v3760_v12 }
  0xbf   : > { %v377_v61 = vmul.f32 0.00390625, %v356_v59  ;;  %v434_v62 = vmul.f32 %v3763_v49, %v3763_v49  ;;  %v435_v18 = vmul.f32 %v3766_v14, %v3766_v14  ;;  %1102 = vmatprep.subr.bf16.mxu0 %v2925_v31  ;;  %1215 = vmatprep.subr.bf16.mxu1 %v2927_v32  ;;  %v2943_v32 = vld [vmem:[%s5130_s3 + $0x144] ss:$16 sps:$4 sm:$0xff]  }
  0xc0   : > { %v3789_v21 = vsub.f32 %v3501_v34, %v376_v52  ;;  %v3792_v0 = vsub.f32 %v3504_v35, %v376_v52  ;;  %v474_v1 = vadd.f32 %v433_v29, %v432_v28  ;;  %1103 = vmatpush2.bf16.msra.mxu0 %v2929_v19  ;;  %1216 = vmatpush2.bf16.msra.mxu1 %v2930_v20  ;;  %v2937_v52 = vld [vmem:[%s5130_s3 + $0x164] ss:$16 sps:$4 sm:$0xff]   ;;  %v2942_v28 = vld [vmem:[%s5130_s3 + $0x168] ss:$16 sps:$4 sm:$0xff]   ;;  %v2951_v20 = vld [vmem:[%s5130_s3 + $0x12c] ss:$16 sps:$4 sm:$0xff]  }
  0xc1   : > { %v3795_v2 = vsub.f32 %v3509_v37, %v377_v61  ;;  %v3798_v16 = vsub.f32 %v3512_v38, %v377_v61  ;;  %v359_v27 = vpop.xlane.xlu0 %358  ;;  %v477_v22 = vadd.f32 %v435_v18, %v434_v62  ;;  %v2931_v37 = vld [vmem:[%s5130_s3 + $0x184] ss:$16 sps:$4 sm:$0xff]   ;;  %v2933_v38 = vld [vmem:[%s5130_s3 + $0x18c] ss:$16 sps:$4 sm:$0xff]   ;;  %v2947_v62 = vld [vmem:[%s5130_s3 + $0x140] ss:$16 sps:$4 sm:$0xff]  }
  0xc2   : > { %v378_v5 = vmul.f32 0.00390625, %v359_v27  ;;  %472 = vadd.xlane.f32.xlu1 %v471_v60  ;;  %475 = vadd.xlane.f32.xlu0 %v474_v1  ;;  %v362_v34 = vpop.xlane.xlu1 %361  ;;  %v436_v35 = vmul.f32 %v3789_v21, %v3789_v21  ;;  %v437_v23 = vmul.f32 %v3792_v0, %v3792_v0  ;;  %v2941_v60 = vld [vmem:[%s5130_s3 + $0x160] ss:$16 sps:$4 sm:$0xff]   ;;  %v2945_v61 = vld [vmem:[%s5130_s3 + $0x14c] ss:$16 sps:$4 sm:$0xff]  }
  0xc3   : > { %v379_v6 = vmul.f32 0.00390625, %v362_v34  ;;  %v438_v30 = vmul.f32 %v3795_v2, %v3795_v2  ;;  %v439_v25 = vmul.f32 %v3798_v16, %v3798_v16  ;;  %1104 = vmatprep.subr.bf16.mxu0 %v2931_v37  ;;  %1217 = vmatprep.subr.bf16.mxu1 %v2933_v38  ;;  %v2948_v18 = vld [vmem:[%s5130_s3 + $0x148] ss:$16 sps:$4 sm:$0xff]   ;;  %v2949_v19 = vld [vmem:[%s5130_s3 + $0x124] ss:$16 sps:$4 sm:$0xff]  }
  0xc4   : > { %v3821_v36 = vsub.f32 %v3517_v40, %v378_v5  ;;  %v3824_v45 = vsub.f32 %v3520_v41, %v378_v5  ;;  %v480_v46 = vadd.f32 %v437_v23, %v436_v35  ;;  %1105 = vmatpush2.bf16.msra.mxu0 %v2935_v26  ;;  %1218 = vmatpush2.bf16.msra.mxu1 %v2936_v8  ;;  %v2953_v1 = vld [vmem:[%s5130_s3 + $0x120] ss:$16 sps:$4 sm:$0xff]   ;;  %v2954_v27 = vld [vmem:[%s5130_s3 + $0x128] ss:$16 sps:$4 sm:$0xff]   ;;  %v2955_v5 = vld [vmem:[%s5130_s3 + $0x104] ss:$16 sps:$4 sm:$0xff]  }
  0xc5   : > { %v3827_v47 = vsub.f32 %v3525_v43, %v379_v6  ;;  %v3830_v13 = vsub.f32 %v3528_v44, %v379_v6  ;;  %v483_v15 = vadd.f32 %v439_v25, %v438_v30  ;;  %v2939_v43 = vld [vmem:[%s5130_s3 + $0x16c] ss:$16 sps:$4 sm:$0xff]   ;;  %1106 = vmatprep.subr.bf16.mxu0 %v2937_v52  ;;  %v2960_v35 = vld [vmem:[%s5130_s3 + $0x108] ss:$16 sps:$4 sm:$0xff]  }
  0xc6   : > { %478 = vadd.xlane.f32.xlu1 %v477_v22  ;;  %481 = vadd.xlane.f32.xlu0 %v480_v46  ;;  %v440_v40 = vmul.f32 %v3821_v36, %v3821_v36  ;;  %v441_v41 = vmul.f32 %v3824_v45, %v3824_v45  ;;  %v2957_v34 = vld [vmem:[%s5130_s3 + $0x10c] ss:$16 sps:$4 sm:$0xff]   ;;  %v2959_v22 = vld [vmem:[%s5130_s3 + $0x100] ss:$16 sps:$4 sm:$0xff]  }
  0xc7   : > { %v442_v44 = vmul.f32 %v3827_v47, %v3827_v47  ;;  %v443_v59 = vmul.f32 %v3830_v13, %v3830_v13  ;;  %1219 = vmatprep.subr.bf16.mxu1 %v2939_v43  ;;  %v2963_v23 = vld [vmem:[%s5132_s5 + $0x74] ss:$8 sps:$4 sm:$0xff]  }
  0xc8   : > { %v486_v29 = vadd.f32 %v441_v41, %v440_v40  ;;  %1107 = vmatpush2.bf16.msra.mxu0 %v2941_v60  ;;  %1220 = vmatpush2.bf16.msra.mxu1 %v2942_v28  ;;  %v2966_v37 = vld [vmem:[%s5132_s5 + $0x174] ss:$8 sps:$4 sm:$0xff]  }
  0xc9   : > { %v489_v31 = vadd.f32 %v443_v59, %v442_v44  ;;  %1108 = vmatprep.subr.bf16.mxu0 %v2943_v32  ;;  %1221 = vmatprep.subr.bf16.mxu1 %v2945_v61 }
  0xca   : > { %484 = vadd.xlane.f32.xlu1 %v483_v15  ;;  %487 = vadd.xlane.f32.xlu0 %v486_v29  ;;  %v574_v15 = vlaneseq }
  0xcc   : > { %1109 = vmatpush2.bf16.msra.mxu0 %v2947_v62  ;;  %1222 = vmatpush2.bf16.msra.mxu1 %v2948_v18  ;;  %v3894_v60 = vshrl.u32 %v574_v15, 7 }
  0xcd   : > { %1110 = vmatprep.subr.bf16.mxu0 %v2949_v19  ;;  %1223 = vmatprep.subr.bf16.mxu1 %v2951_v20 }
  0xce   : > { %490 = vadd.xlane.f32.xlu1 %v489_v31  ;;  %v3897_v18 = vsub.s32 0, %v3894_v60  ;;  %v3900_v19 = vsub.s32 1, %v3894_v60 }
  0xd0   : > { %1111 = vmatpush2.bf16.msra.mxu0 %v2953_v1  ;;  %1224 = vmatpush2.bf16.msra.mxu1 %v2954_v27  ;;  %5193 = vst [vmem:[#allocation5_spill] sm:$0xff] %v3897_v18  ;;  %5194 = vst [vmem:[#allocation6_spill] sm:$0xff] %v3900_v19  ;;  %v572_v1 = vld [vmem:[%s5128_s1] sm:$0x3] }
  0xd1   : > { %1112 = vmatprep.subr.bf16.mxu0 %v2955_v5  ;;  %1225 = vmatprep.subr.bf16.mxu1 %v2957_v34 }
  0xd4   : > { %1113 = vmatpush2.bf16.msra.mxu0 %v2959_v22  ;;  %1226 = vmatpush2.bf16.msra.mxu1 %v2960_v35 }
  0xd5   : > { %2312 = vmatprep.subr.bf16.mxu0 %v2963_v23  ;;  %2425 = vmatprep.subr.bf16.mxu1 %v2966_v37  ;;  %v3906_v23 = vrot.slane %v572_v1, %v3897_v18  ;;  %v3909_v37 = vrot.slane %v572_v1, %v3900_v19 }
 0x137   : > { %v446_v38 = vpop.xlane.xlu0 %445 }
 0x138   : > { %v492_v6 = vmul.f32 0.00390625, %v446_v38 }
 0x13a   : > { %v508_v30 = vadd.f32 1e-06, %v492_v6 }
 0x13b   : > { %v449_v25 = vpop.xlane.xlu1 %448  ;;  %v452_v26 = vpop.xlane.xlu0 %451 }
 0x13c   : > { %3057 = vrsqrt.f32 %v508_v30  ;;  %v493_v8 = vmul.f32 0.00390625, %v449_v25  ;;  %v494_v46 = vmul.f32 0.00390625, %v452_v26  ;;  %v616_v30 = vld [vmem:[%s5129_s2] sm:$0x3] }
 0x13e   : > { %v509_v40 = vadd.f32 1e-06, %v493_v8  ;;  %v510_v41 = vadd.f32 1e-06, %v494_v46 }
 0x13f   : > { %v455_v52 = vpop.xlane.xlu1 %454  ;;  %v458_v43 = vpop.xlane.xlu0 %457 }
 0x140   : > { %3059 = vrsqrt.f32 %v509_v40  ;;  %v495_v44 = vmul.f32 0.00390625, %v455_v52  ;;  %v496_v59 = vmul.f32 0.00390625, %v458_v43  ;;  %v3921_v52 = vrot.slane %v616_v30, %v3900_v19 }
 0x141   : > { %3061 = vrsqrt.f32 %v510_v41  ;;  %v3918_v41 = vrot.slane %v616_v30, %v3897_v18 }
 0x142   : > { %v511_v28 = vadd.f32 1e-06, %v495_v44  ;;  %v512_v29 = vadd.f32 1e-06, %v496_v59 }
 0x143   : > { %v461_v31 = vpop.xlane.xlu1 %460  ;;  %v464_v32 = vpop.xlane.xlu0 %463 }
 0x144   : > { %3063 = vrsqrt.f32 %v511_v28  ;;  %v497_v61 = vmul.f32 0.00390625, %v461_v31  ;;  %v498_v62 = vmul.f32 0.00390625, %v464_v32 }
 0x145   : > { %3065 = vrsqrt.f32 %v512_v29 }
 0x146   : > { %v513_v20 = vadd.f32 1e-06, %v497_v61  ;;  %v514_v27 = vadd.f32 1e-06, %v498_v62 }
 0x147   : > { %v467_v5 = vpop.xlane.xlu1 %466  ;;  %v470_v35 = vpop.xlane.xlu0 %469 }
 0x148   : > { %3067 = vrsqrt.f32 %v513_v20  ;;  %v499_v34 = vmul.f32 0.00390625, %v467_v5  ;;  %v500_v8 = vmul.f32 0.00390625, %v470_v35 }
 0x149   : > { %v3058_v22 = vpop.eup %3057  ;;  %3069 = vrsqrt.f32 %v514_v27 }
 0x14a   : > { %v515_v38 = vadd.f32 1e-06, %v499_v34  ;;  %v541_v6 = vmul.f32 %v3058_v22, %v3642_v55  ;;  %v540_v25 = vmul.f32 %v3058_v22, %v3639_v54  ;;  %v516_v31 = vadd.f32 1e-06, %v500_v8 }
 0x14b   : > { %v473_v26 = vpop.xlane.xlu1 %472  ;;  %v476_v62 = vpop.xlane.xlu0 %475 }
 0x14c   : > { %3071 = vrsqrt.f32 %v515_v38  ;;  %v501_v46 = vmul.f32 0.00390625, %v473_v26  ;;  %v585_v40 = vmul.f32 %v3909_v37, %v541_v6  ;;  %v584_v55 = vmul.f32 %v3906_v23, %v540_v25  ;;  %v2961_v25 = vld [vmem:[%s5132_s5 + $0x70] ss:$8 sps:$4 sm:$0xff]  }
 0x14d   : > { %v3060_v15 = vpop.eup %3059  ;;  %v502_v6 = vmul.f32 0.00390625, %v476_v62 }
 0x14e   : > { %v3062_v43 = vpop.eup %3061  ;;  %v517_v44 = vadd.f32 1e-06, %v501_v46  ;;  %v543_v54 = vmul.f32 %v3060_v15, %v3662_v4  ;;  %v542_v28 = vmul.f32 %v3060_v15, %v3659_v63  ;;  %v629_v20 = vadd.f32 %v3921_v52, %v585_v40 }
 0x14f   : > { %v479_v59 = vpop.xlane.xlu1 %478  ;;  %v545_v29 = vmul.f32 %v3062_v43, %v3648_v57  ;;  %v628_v27 = vadd.f32 %v3918_v41, %v584_v55  ;;  %v544_v35 = vmul.f32 %v3062_v43, %v3645_v56  ;;  %v2969_v56 = vld [vmem:[%s5132_s5 + $0x64] ss:$8 sps:$4 sm:$0xff]  }
 0x150   : > { %v587_v32 = vmul.f32 %v3909_v37, %v543_v54  ;;  %v586_v1 = vmul.f32 %v3906_v23, %v542_v28  ;;  %3073 = vrsqrt.f32 %v517_v44  ;;  %v503_v5 = vmul.f32 0.00390625, %v479_v59 }
 0x151   : > { %v3064_v61 = vpop.eup %3063  ;;  %v589_v22 = vmul.f32 %v3909_v37, %v545_v29  ;;  %3075 = vrsqrt.f32 %v516_v31  ;;  %v588_v28 = vmul.f32 %v3906_v23, %v544_v35  ;;  %v518_v31 = vadd.f32 1e-06, %v502_v6 }
 0x152   : > { %v631_v4 = vadd.f32 %v3921_v52, %v587_v32  ;;  %v547_v34 = vmul.f32 %v3064_v61, %v3668_v10  ;;  %v3066_v63 = vpop.eup %3065  ;;  %v630_v57 = vadd.f32 %v3918_v41, %v586_v1  ;;  %v546_v38 = vmul.f32 %v3064_v61, %v3665_v7  ;;  %v2964_v10 = vld [vmem:[%s5132_s5 + $0x170] ss:$8 sps:$4 sm:$0xff]   ;;  %v2972_v7 = vld [vmem:[%s5132_s5 + $0x164] ss:$8 sps:$4 sm:$0xff]  }
 0x153   : > { %v519_v40 = vadd.f32 1e-06, %v503_v5  ;;  %v549_v55 = vmul.f32 %v3066_v63, %v3682_v33  ;;  %v485_v44 = vpop.xlane.xlu1 %484  ;;  %v633_v54 = vadd.f32 %v3921_v52, %v589_v22  ;;  %v2967_v33 = vld [vmem:[%s5132_s5 + $0x60] ss:$8 sps:$4 sm:$0xff]   ;;  %v2978_v22 = vld [vmem:[%s5132_s5 + $0x154] ss:$8 sps:$4 sm:$0xff]   ;;  %v632_v35 = vadd.f32 %v3918_v41, %v588_v28 }
 0x154   : > { %v661_v30 = vpack.c.bf16 %v631_v4, %v629_v20  ;;  %v660_v8 = vpack.c.bf16 %v630_v57, %v628_v27  ;;  %v591_v46 = vmul.f32 %v3909_v37, %v547_v34  ;;  %v590_v15 = vmul.f32 %v3906_v23, %v546_v38  ;;  %v482_v20 = vpop.xlane.xlu0 %481  ;;  %v2975_v4 = vld [vmem:[%s5132_s5 + $0x54] ss:$8 sps:$4 sm:$0xff]  }
 0x155   : > { %v3068_v26 = vpop.eup %3067  ;;  %v593_v32 = vmul.f32 %v3909_v37, %v549_v55  ;;  %3077 = vrsqrt.f32 %v519_v40  ;;  %v505_v34 = vmul.f32 0.00390625, %v485_v44  ;;  %v504_v6 = vmul.f32 0.00390625, %v482_v20 }
 0x156   : > { %1114 = vmatprep.mubr.bf16.mxu0 %v661_v30  ;;  %1227 = vmatprep.mubr.bf16.mxu1 %v661_v30  ;;  %v551_v43 = vmul.f32 %v3068_v26, %v3688_v42  ;;  %v635_v59 = vadd.f32 %v3921_v52, %v591_v46  ;;  %v3956_v29 = vpop.eup %3069  ;;  %v2970_v42 = vld [vmem:[%s5132_s5 + $0x160] ss:$8 sps:$4 sm:$0xff]   ;;  %v634_v27 = vadd.f32 %v3918_v41, %v590_v15  ;;  %3079 = vrsqrt.f32 %v518_v31  ;;  %v2976_v46 = vld [vmem:[%s5132_s5 + $0x150] ss:$8 sps:$4 sm:$0xff]  }
 0x157   : > { %1115 = vmatmul.mubr.bf16.vlgmr.msra.gmra.mxu0 %v660_v8  ;;  %1228 = vmatmul.mubr.bf16.vlgmr.msra.gmra.mxu1 %v660_v8  ;;  %v550_v5 = vmul.f32 %v3068_v26, %v3685_v39  ;;  %v548_v39 = vmul.f32 %v3066_v63, %v3679_v9  ;;  %v637_v30 = vadd.f32 %v3921_v52, %v593_v32  ;;  %v2973_v8 = vld [vmem:[%s5132_s5 + $0x50] ss:$8 sps:$4 sm:$0xff]   ;;  %v521_v9 = vadd.f32 1e-06, %v505_v34  ;;  %v491_v15 = vpop.xlane.xlu1 %490  ;;  %v2979_v31 = vld [vmem:[%s5132_s5 + $0x40] ss:$8 sps:$4 sm:$0xff]  }
 0x158   : > { %v595_v61 = vmul.f32 %v3909_v37, %v551_v43  ;;  %2313 = vmatpush1.bf16.msra.mxu0 %v2961_v25  ;;  %2426 = vmatpush1.bf16.msra.mxu1 %v2964_v10  ;;  %v663_v1 = vpack.c.bf16 %v635_v59, %v633_v54  ;;  %v553_v25 = vmul.f32 %v3956_v29, %v3702_v51  ;;  %v520_v40 = vadd.f32 1e-06, %v504_v6  ;;  %v2984_v43 = vld [vmem:[%s5132_s5 + $0x144] ss:$8 sps:$4 sm:$0xff]   ;;  %v488_v54 = vpop.xlane.xlu0 %487  ;;  %v2988_v6 = vld [vmem:[%s5132_s5 + $0x130] ss:$8 sps:$4 sm:$0xff]  }
 0x159   : > { %v3072_v62 = vpop.eup %3071  ;;  %2314 = vmatprep.subr.bf16.mxu0 %v2969_v56  ;;  %2427 = vmatprep.subr.bf16.mxu1 %v2972_v7  ;;  %v662_v10 = vpack.c.bf16 %v634_v27, %v632_v35  ;;  %v594_v26 = vmul.f32 %v3906_v23, %v550_v5  ;;  %v592_v56 = vmul.f32 %v3906_v23, %v548_v39  ;;  %v2981_v7 = vld [vmem:[%s5132_s5 + $0x44] ss:$8 sps:$4 sm:$0xff]   ;;  %3081 = vrsqrt.f32 %v521_v9  ;;  %v2990_v35 = vld [vmem:[%s5132_s5 + $0x134] ss:$8 sps:$4 sm:$0xff]  }
 0x15a   : > { %v639_v57 = vadd.f32 %v3921_v52, %v595_v61  ;;  %1124 = vmatprep.mubr.bf16.mxu0 %v663_v1  ;;  %1237 = vmatprep.mubr.bf16.mxu1 %v663_v1  ;;  %v555_v38 = vmul.f32 %v3072_v62, %v3708_v58  ;;  %v597_v55 = vmul.f32 %v3909_v37, %v553_v25  ;;  %v507_v32 = vmul.f32 0.00390625, %v491_v15 }
 0x15b   : > { %v638_v59 = vadd.f32 %v3918_v41, %v594_v26  ;;  %v554_v28 = vmul.f32 %v3072_v62, %v3705_v53  ;;  %v636_v20 = vadd.f32 %v3918_v41, %v592_v56  ;;  %v552_v53 = vmul.f32 %v3956_v29, %v3699_v50  ;;  %v2985_v29 = vld [vmem:[%s5132_s5 + $0x30] ss:$8 sps:$4 sm:$0xff]  }
 0x15c   : > { %2315 = vmatpush1.bf16.msra.mxu0 %v2967_v33  ;;  %2428 = vmatpush1.bf16.msra.mxu1 %v2970_v42  ;;  %v665_v63 = vpack.c.bf16 %v639_v57, %v637_v30  ;;  %v599_v58 = vmul.f32 %v3909_v37, %v555_v38  ;;  %v2982_v42 = vld [vmem:[%s5132_s5 + $0x140] ss:$8 sps:$4 sm:$0xff]   ;;  %3083 = vrsqrt.f32 %v520_v40  ;;  %v506_v62 = vmul.f32 0.00390625, %v488_v54  ;;  %v2993_v30 = vld [vmem:[%s5132_s5 + $0x24] ss:$8 sps:$4 sm:$0xff]  }
 0x15d   : > { %2316 = vmatprep.subr.bf16.mxu0 %v2975_v4  ;;  %2429 = vmatprep.subr.bf16.mxu1 %v2978_v22  ;;  %v3074_v51 = vpop.eup %3073  ;;  %v641_v1 = vadd.f32 %v3921_v52, %v597_v55  ;;  %v664_v5 = vpack.c.bf16 %v638_v59, %v636_v20  ;;  %v2987_v4 = vld [vmem:[%s5132_s5 + $0x34] ss:$8 sps:$4 sm:$0xff]   ;;  %v523_v34 = vadd.f32 1e-06, %v507_v32 }
 0x15e   : > { %v3076_v44 = vpop.eup %3075  ;;  %v643_v61 = vadd.f32 %v3921_v52, %v599_v58  ;;  %v559_v33 = vmul.f32 %v3074_v51, %v3734_v24  ;;  %v598_v24 = vmul.f32 %v3906_v23, %v554_v28  ;;  %v522_v39 = vadd.f32 1e-06, %v506_v62  ;;  %v2991_v58 = vld [vmem:[%s5132_s5 + $0x20] ss:$8 sps:$4 sm:$0xff]  }
 0x15f   : > { %1125 = vmatmul.mubr.bf16.gmra.mxu0 %v662_v10  ;;  %1238 = vmatmul.mubr.bf16.gmra.mxu1 %v662_v10  ;;  %v557_v27 = vmul.f32 %v3076_v44, %v3728_v11  ;;  %v596_v11 = vmul.f32 %v3906_v23, %v552_v53  ;;  %v558_v26 = vmul.f32 %v3074_v51, %v3731_v17  ;;  %3085 = vrsqrt.f32 %v523_v34 }
 0x160   : > { %1134 = vmatprep.mubr.bf16.mxu0 %v665_v63  ;;  %1247 = vmatprep.mubr.bf16.mxu1 %v665_v63  ;;  %v667_v57 = vpack.c.bf16 %v643_v61, %v641_v1  ;;  %v603_v50 = vmul.f32 %v3909_v37, %v559_v33  ;;  %v642_v10 = vadd.f32 %v3918_v41, %v598_v24  ;;  %3087 = vrsqrt.f32 %v522_v39 }
 0x161   : > { %2317 = vmatpush1.bf16.msra.mxu0 %v2973_v8  ;;  %2430 = vmatpush1.bf16.msra.mxu1 %v2976_v46  ;;  %v601_v38 = vmul.f32 %v3909_v37, %v557_v27  ;;  %v2996_v8 = vld [vmem:[%s5132_s5 + $0x124] ss:$8 sps:$4 sm:$0xff]   ;;  %v640_v46 = vadd.f32 %v3918_v41, %v596_v11  ;;  %v556_v15 = vmul.f32 %v3076_v44, %v3725_v3  ;;  %v2999_v3 = vld [vmem:[%s5132_s5 + $0x14] ss:$8 sps:$4 sm:$0xff]  }
 0x162   : > { %2318 = vmatprep.subr.bf16.mxu0 %v2981_v7  ;;  %2431 = vmatprep.subr.bf16.mxu1 %v2984_v43  ;;  %v3078_v22 = vpop.eup %3077  ;;  %v647_v9 = vadd.f32 %v3921_v52, %v603_v50  ;;  %v2994_v7 = vld [vmem:[%s5132_s5 + $0x120] ss:$8 sps:$4 sm:$0xff]  }
 0x163   : > { %v3080_v25 = vpop.eup %3079  ;;  %v563_v63 = vmul.f32 %v3078_v22, %v3766_v14  ;;  %v645_v17 = vadd.f32 %v3921_v52, %v601_v38  ;;  %v666_v56 = vpack.c.bf16 %v642_v10, %v640_v46  ;;  %v602_v14 = vmul.f32 %v3906_v23, %v558_v26 }
 0x164   : > { %v561_v51 = vmul.f32 %v3080_v25, %v3760_v12  ;;  %v2997_v12 = vld [vmem:[%s5132_s5 + $0x10] ss:$8 sps:$4 sm:$0xff]   ;;  %v600_v44 = vmul.f32 %v3906_v23, %v556_v15  ;;  %v3003_v15 = vld [vmem:[%s5132_s5] ss:$8 sps:$4 sm:$0xff]  }
 0x165   : > { %2319 = vmatpush1.bf16.msra.mxu0 %v2979_v31  ;;  %2432 = vmatpush1.bf16.msra.mxu1 %v2982_v42  ;;  %v669_v40 = vpack.c.bf16 %v647_v9, %v645_v17  ;;  %v607_v55 = vmul.f32 %v3909_v37, %v563_v63  ;;  %v646_v28 = vadd.f32 %v3918_v41, %v602_v14  ;;  %v3006_v17 = vld [vmem:[%s5132_s5 + $0x100] ss:$8 sps:$4 sm:$0xff]   ;;  %v3009_v14 = vld [vmem:[%s5132_s5 + $0xf0] ss:$8 sps:$4 sm:$0xff]  }
 0x166   : > { %2320 = vmatprep.subr.bf16.mxu0 %v2987_v4  ;;  %2433 = vmatprep.subr.bf16.mxu1 %v2990_v35  ;;  %v3082_v43 = vpop.eup %3081  ;;  %v605_v54 = vmul.f32 %v3909_v37, %v561_v51  ;;  %v562_v31 = vmul.f32 %v3078_v22, %v3763_v49  ;;  %v644_v33 = vadd.f32 %v3918_v41, %v600_v44  ;;  %v3011_v51 = vld [vmem:[%s5132_s5 + $0xf4] ss:$8 sps:$4 sm:$0xff]  }
 0x167   : > { %1135 = vmatmul.mubr.bf16.gmra.mxu0 %v664_v5  ;;  %1248 = vmatmul.mubr.bf16.gmra.mxu1 %v664_v5  ;;  %v651_v32 = vadd.f32 %v3921_v52, %v607_v55  ;;  %v567_v61 = vmul.f32 %v3082_v43, %v3798_v16  ;;  %v560_v42 = vmul.f32 %v3080_v25, %v3757_v48  ;;  %v3015_v55 = vld [vmem:[%s5132_s5 + $0xe0] ss:$8 sps:$4 sm:$0xff]   ;;  %v3026_v44 = vld [vmem:[%s5132_s5 + $0x1d4] ss:$8 sps:$4 sm:$0xff]  }
 0x168   : > { %1144 = vmatprep.mubr.bf16.mxu0 %v667_v57  ;;  %1257 = vmatprep.mubr.bf16.mxu1 %v667_v57  ;;  %v649_v20 = vadd.f32 %v3921_v52, %v605_v54  ;;  %v668_v62 = vpack.c.bf16 %v646_v28, %v644_v33  ;;  %v606_v1 = vmul.f32 %v3906_v23, %v562_v31  ;;  %v3021_v54 = vld [vmem:[%s5132_s5 + $0xd0] ss:$8 sps:$4 sm:$0xff]   ;;  %v3029_v28 = vld [vmem:[%s5132_s5 + $0xc4] ss:$8 sps:$4 sm:$0xff]   ;;  %v3035_v33 = vld [vmem:[%s5132_s5 + $0xb4] ss:$8 sps:$4 sm:$0xff]  }
 0x169   : > { %2321 = vmatpush1.bf16.msra.mxu0 %v2985_v29  ;;  %2434 = vmatpush1.bf16.msra.mxu1 %v2988_v6  ;;  %v3084_v59 = vpop.eup %3083  ;;  %v611_v49 = vmul.f32 %v3909_v37, %v567_v61  ;;  %v604_v16 = vmul.f32 %v3906_v23, %v560_v42  ;;  %v3032_v31 = vld [vmem:[%s5132_s5 + $0x1c4] ss:$8 sps:$4 sm:$0xff]   ;;  %v3030_v61 = vld [vmem:[%s5132_s5 + $0x1c0] ss:$8 sps:$4 sm:$0xff]   ;;  %v3038_v42 = vld [vmem:[%s5132_s5 + $0x1b4] ss:$8 sps:$4 sm:$0xff]  }
 0x16a   : > { %2322 = vmatprep.subr.bf16.mxu0 %v2993_v30  ;;  %2435 = vmatprep.subr.bf16.mxu1 %v2996_v8  ;;  %v565_v53 = vmul.f32 %v3084_v59, %v3792_v0  ;;  %v671_v27 = vpack.c.bf16 %v651_v32, %v649_v20  ;;  %v650_v4 = vadd.f32 %v3918_v41, %v606_v1  ;;  %v3027_v32 = vld [vmem:[%s5132_s5 + $0xc0] ss:$8 sps:$4 sm:$0xff]   ;;  %v3033_v20 = vld [vmem:[%s5132_s5 + $0xb0] ss:$8 sps:$4 sm:$0xff]   ;;  %v3044_v1 = vld [vmem:[%s5132_s5 + $0x1a4] ss:$8 sps:$4 sm:$0xff]  }
 0x16b   : > { %v566_v0 = vmul.f32 %v3082_v43, %v3795_v2  ;;  %v655_v34 = vadd.f32 %v3921_v52, %v611_v49  ;;  %v648_v50 = vadd.f32 %v3918_v41, %v604_v16  ;;  %v564_v29 = vmul.f32 %v3084_v59, %v3789_v21  ;;  %v3023_v43 = vld [vmem:[%s5132_s5 + $0xd4] ss:$8 sps:$4 sm:$0xff]   ;;  %v3024_v59 = vld [vmem:[%s5132_s5 + $0x1d0] ss:$8 sps:$4 sm:$0xff]   ;;  %v3042_v49 = vld [vmem:[%s5132_s5 + $0x1a0] ss:$8 sps:$4 sm:$0xff]  }
 0x16c   : > { %v3086_v5 = vpop.eup %3085  ;;  %v609_v24 = vmul.f32 %v3909_v37, %v565_v53  ;;  %v3036_v53 = vld [vmem:[%s5132_s5 + $0x1b0] ss:$8 sps:$4 sm:$0xff]   ;;  %v3050_v16 = vld [vmem:[%s5132_s5 + $0x194] ss:$8 sps:$4 sm:$0xff]  }
 0x16d   : > { %2323 = vmatpush1.bf16.msra.mxu0 %v2991_v58  ;;  %2436 = vmatpush1.bf16.msra.mxu1 %v2994_v7  ;;  %v3088_v48 = vpop.eup %3087  ;;  %v571_v57 = vmul.f32 %v3086_v5, %v3830_v13  ;;  %v670_v35 = vpack.c.bf16 %v650_v4, %v648_v50  ;;  %v610_v39 = vmul.f32 %v3906_v23, %v566_v0  ;;  %v3012_v7 = vld [vmem:[%s5132_s5 + $0x1f0] ss:$8 sps:$4 sm:$0xff]   ;;  %v3053_v4 = vld [vmem:[%s5132_s5 + $0x84] ss:$8 sps:$4 sm:$0xff]   ;;  %v752_v50 = vsub.s32 2, %v3894_v60 }
 0x16e   : > { %2324 = vmatprep.subr.bf16.mxu0 %v2999_v3  ;;  %v653_v22 = vadd.f32 %v3921_v52, %v609_v24  ;;  %v569_v11 = vmul.f32 %v3088_v48, %v3824_v45  ;;  %v608_v2 = vmul.f32 %v3906_v23, %v564_v29  ;;  %v570_v30 = vmul.f32 %v3086_v5, %v3827_v47  ;;  %v3017_v3 = vld [vmem:[%s5132_s5 + $0xe4] ss:$8 sps:$4 sm:$0xff]   ;;  %v3047_v5 = vld [vmem:[%s5132_s5 + $0x94] ss:$8 sps:$4 sm:$0xff]   ;;  %v3045_v24 = vld [vmem:[%s5132_s5 + $0x90] ss:$8 sps:$4 sm:$0xff]  }
 0x16f   : > { %1145 = vmatmul.mubr.bf16.gmra.mxu0 %v666_v56  ;;  %1258 = vmatmul.mubr.bf16.gmra.mxu1 %v666_v56  ;;  %v615_v6 = vmul.f32 %v3909_v37, %v571_v57  ;;  %v654_v21 = vadd.f32 %v3918_v41, %v610_v39  ;;  %v568_v10 = vmul.f32 %v3088_v48, %v3821_v36  ;;  %v3002_v36 = vld [vmem:[%s5132_s5 + $0x114] ss:$8 sps:$4 sm:$0xff]   ;;  %v3048_v48 = vld [vmem:[%s5132_s5 + $0x190] ss:$8 sps:$4 sm:$0xff]   ;;  %v3056_v0 = vld [vmem:[%s5132_s5 + $0x184] ss:$8 sps:$4 sm:$0xff]  }
 0x170   : > { %1154 = vmatprep.mubr.bf16.mxu0 %v669_v40  ;;  %1267 = vmatprep.mubr.bf16.mxu1 %v669_v40  ;;  %v673_v38 = vpack.c.bf16 %v655_v34, %v653_v22  ;;  %v613_v13 = vmul.f32 %v3909_v37, %v569_v11  ;;  %v652_v25 = vadd.f32 %v3918_v41, %v608_v2  ;;  %v3014_v56 = vld [vmem:[%s5132_s5 + $0x1f4] ss:$8 sps:$4 sm:$0xff]   ;;  %v3020_v40 = vld [vmem:[%s5132_s5 + $0x1e4] ss:$8 sps:$4 sm:$0xff]   ;;  %v3051_v34 = vld [vmem:[%s5132_s5 + $0x80] ss:$8 sps:$4 sm:$0xff]  }
 0x171   : > { %2325 = vmatpush1.bf16.msra.mxu0 %v2997_v12  ;;  %v659_v45 = vadd.f32 %v3921_v52, %v615_v6  ;;  %v614_v9 = vmul.f32 %v3906_v23, %v570_v30  ;;  %v612_v37 = vmul.f32 %v3906_v23, %v568_v10  ;;  %2437 = vmatprep.subr.bf16.mxu1 %v3002_v36  ;;  %v3005_v23 = vld [vmem:[%s5132_s5 + $0x4] ss:$8 sps:$4 sm:$0xff]   ;;  %v3018_v12 = vld [vmem:[%s5132_s5 + $0x1e0] ss:$8 sps:$4 sm:$0xff]   ;;  %v756_v22 = vsub.s32 3, %v3894_v60 }
 0x172   : > { %v657_v26 = vadd.f32 %v3921_v52, %v613_v13  ;;  %v672_v8 = vpack.c.bf16 %v654_v21, %v652_v25  ;;  %v3000_v52 = vld [vmem:[%s5132_s5 + $0x110] ss:$8 sps:$4 sm:$0xff]   ;;  %2326 = vmatprep.subr.bf16.mxu0 %v3005_v23  ;;  %v3054_v57 = vld [vmem:[%s5132_s5 + $0x180] ss:$8 sps:$4 sm:$0xff]  }
 0x173   : > { %v658_v47 = vadd.f32 %v3918_v41, %v614_v9  ;;  %v656_v58 = vadd.f32 %v3918_v41, %v612_v37  ;;  %2438 = vmatpush1.bf16.msra.mxu1 %v3000_v52  ;;  %v3008_v41 = vld [vmem:[%s5132_s5 + $0x104] ss:$8 sps:$4 sm:$0xff]   ;;  %v740_v29 = vld [vmem:[%s5131_s4] sm:$0xf] }
 0x174   : > { %v675_v63 = vpack.c.bf16 %v659_v45, %v657_v26  ;;  %2439 = vmatprep.subr.bf16.mxu1 %v3008_v41  ;;  %v4212_v11 = vrot.slane %v740_v29, %v3897_v18  ;;  %v4217_v6 = vrot.slane %v740_v29, %v3900_v19  ;;  %v4219_v2 = vrot.slane %v740_v29, %v756_v22 }
 0x175   : > { %v674_v46 = vpack.c.bf16 %v658_v47, %v656_v58  ;;  %2327 = vmatpush1.bf16.msra.mxu0 %v3003_v15 }
 0x176   : > { %2328 = vmatprep.subr.bf16.mxu0 %v3011_v51 }
 0x177   : > { %1155 = vmatmul.mubr.bf16.gmra.mxu0 %v668_v62  ;;  %1268 = vmatmul.mubr.bf16.gmra.mxu1 %v668_v62  ;;  %v3041_v62 = vld [vmem:[%s5132_s5 + $0xa4] ss:$8 sps:$4 sm:$0xff]  }
 0x178   : > { %1164 = vmatprep.mubr.bf16.mxu0 %v671_v27  ;;  %1277 = vmatprep.mubr.bf16.mxu1 %v671_v27  ;;  %v3039_v27 = vld [vmem:[%s5132_s5 + $0xa0] ss:$8 sps:$4 sm:$0xff]  }
 0x179   : > { %2440 = vmatpush1.bf16.msra.mxu1 %v3006_v17  ;;  %2329 = vmatpush2.bf16.msra.mxu0 %v3009_v14 }
 0x17a   : > { %2441 = vmatprep.subr.bf16.mxu1 %v3014_v56  ;;  %2330 = vmatprep.subr.bf16.mxu0 %v3017_v3 }
 0x17d   : > { %2442 = vmatpush2.bf16.msra.mxu1 %v3012_v7  ;;  %2331 = vmatpush2.bf16.msra.mxu0 %v3015_v55 }
 0x17e   : > { %2443 = vmatprep.subr.bf16.mxu1 %v3020_v40  ;;  %2332 = vmatprep.subr.bf16.mxu0 %v3023_v43 }
 0x17f   : > { %1165 = vmatmul.mubr.bf16.gmra.mxu0 %v670_v35  ;;  %1278 = vmatmul.mubr.bf16.gmra.mxu1 %v670_v35  ;;  %v4214_v35 = vrot.slane %v740_v29, %v752_v50 }
 0x180   : > { %1174 = vmatprep.mubr.bf16.mxu0 %v673_v38  ;;  %1287 = vmatprep.mubr.bf16.mxu1 %v673_v38 }
 0x181   : > { %2444 = vmatpush2.bf16.msra.mxu1 %v3018_v12  ;;  %2333 = vmatpush2.bf16.msra.mxu0 %v3021_v54 }
 0x182   : > { %2445 = vmatprep.subr.bf16.mxu1 %v3026_v44  ;;  %2334 = vmatprep.subr.bf16.mxu0 %v3029_v28 }
 0x185   : > { %2446 = vmatpush2.bf16.msra.mxu1 %v3024_v59  ;;  %2335 = vmatpush2.bf16.msra.mxu0 %v3027_v32 }
 0x186   : > { %2447 = vmatprep.subr.bf16.mxu1 %v3032_v31  ;;  %2336 = vmatprep.subr.bf16.mxu0 %v3035_v33 }
 0x187   : > { %1175 = vmatmul.mubr.bf16.gmra.mxu0 %v672_v8  ;;  %1288 = vmatmul.mubr.bf16.gmra.mxu1 %v672_v8 }
 0x188   : > { %1184 = vmatprep.mubr.bf16.mxu0 %v675_v63  ;;  %1297 = vmatprep.mubr.bf16.mxu1 %v675_v63 }
 0x189   : > { %2448 = vmatpush2.bf16.msra.mxu1 %v3030_v61  ;;  %2337 = vmatpush2.bf16.msra.mxu0 %v3033_v20 }
 0x18a   : > { %2449 = vmatprep.subr.bf16.mxu1 %v3038_v42  ;;  %2338 = vmatprep.subr.bf16.mxu0 %v3041_v62 }
 0x18d   : > { %2450 = vmatpush2.bf16.msra.mxu1 %v3036_v53  ;;  %2339 = vmatpush2.bf16.msra.mxu0 %v3039_v27 }
 0x18e   : > { %2451 = vmatprep.subr.bf16.mxu1 %v3044_v1  ;;  %2340 = vmatprep.subr.bf16.mxu0 %v3047_v5 }
 0x18f   : > { %1185 = vmatmul.mubr.bf16.gmra.mxu0 %v674_v46  ;;  %1298 = vmatmul.mubr.bf16.gmra.mxu1 %v674_v46 }
 0x191   : > { %2452 = vmatpush2.bf16.msra.mxu1 %v3042_v49  ;;  %2341 = vmatpush2.bf16.msra.mxu0 %v3045_v24 }
 0x192   : > { %2453 = vmatprep.subr.bf16.mxu1 %v3050_v16  ;;  %2342 = vmatprep.subr.bf16.mxu0 %v3053_v4 }
 0x195   : > { %2454 = vmatpush2.bf16.msra.mxu1 %v3048_v48  ;;  %2343 = vmatpush2.bf16.msra.mxu0 %v3051_v34 }
 0x196   : > { %2455 = vmatprep.subr.bf16.mxu1 %v3056_v0 }
 0x199   : > { %2456 = vmatpush2.bf16.msra.mxu1 %v3054_v57 }
 0x217   : > { %v1116_v39 = vpop.f32.mrf.mxu0  ;;  %v1229_v38 = vpop.f32.mrf.mxu1 }
 0x218   : > { %v1117_v13 = vadd.f32 %v1116_v39, %v4212_v11  ;;  %v1230_v21 = vadd.f32 %v1229_v38, %v4214_v35 }
 0x219   : > { %v1118_v30 = vpop.f32.mrf.mxu0  ;;  %v1231_v45 = vpop.f32.mrf.mxu1 }
 0x21a   : > { %v1372_v25 = vmul.f32 0.044715, %v1117_v13  ;;  %v1374_v60 = vmul.f32 0.044715, %v1230_v21  ;;  %v4224_v10 = vadd.f32 %v1118_v30, %v4217_v6  ;;  %v4227_v26 = vadd.f32 %v1231_v45, %v4219_v2 }
 0x21b   : > { %v1120_v8 = vpop.f32.mrf.mxu0  ;;  %v1233_v9 = vpop.f32.mrf.mxu1  ;;  %v4239_v54 = vmul.f32 0.5, %v1117_v13  ;;  %v4241_v31 = vmul.f32 0.5, %v1230_v21 }
 0x21c   : > { %v1436_v63 = vmul.f32 %v1372_v25, %v1117_v13  ;;  %v1438_v37 = vmul.f32 %v1374_v60, %v1230_v21  ;;  %v1121_v47 = vadd.f32 %v1120_v8, %v4212_v11  ;;  %v1234_v58 = vadd.f32 %v1233_v9, %v4214_v35 }
 0x21d   : > { %v1122_v46 = vpop.f32.mrf.mxu0  ;;  %v1235_v36 = vpop.f32.mrf.mxu1  ;;  %v1373_v15 = vmul.f32 0.044715, %v4224_v10  ;;  %v1375_v7 = vmul.f32 0.044715, %v4227_v26  ;;  %v4250_v27 = vmul.f32 0.5, %v4224_v10  ;;  %v4260_v4 = vmul.f32 0.5, %v4227_v26 }
 0x21e   : > { %v1500_v52 = vmul.f32 %v1436_v63, %v1117_v13  ;;  %v1502_v23 = vmul.f32 %v1438_v37, %v1230_v21  ;;  %v1376_v41 = vmul.f32 0.044715, %v1121_v47  ;;  %v1378_v17 = vmul.f32 0.044715, %v1234_v58 }
 0x21f   : > { %v1126_v51 = vpop.f32.mrf.mxu0  ;;  %v1239_v56 = vpop.f32.mrf.mxu1  ;;  %v4234_v40 = vadd.f32 %v1122_v46, %v4217_v6  ;;  %v4237_v12 = vadd.f32 %v1235_v36, %v4219_v2  ;;  %v1437_v32 = vmul.f32 %v1373_v15, %v4224_v10  ;;  %v1439_v62 = vmul.f32 %v1375_v7, %v4227_v26  ;;  %5196 = vst [vmem:[#allocation8_spill] sm:$0xff] %v4250_v27 }
 0x220   : > { %v1564_v14 = vadd.f32 %v1500_v52, %v1117_v13  ;;  %v1440_v3 = vmul.f32 %v1376_v41, %v1121_v47  ;;  %v1442_v55 = vmul.f32 %v1378_v17, %v1234_v58  ;;  %v1566_v59 = vadd.f32 %v1502_v23, %v1230_v21  ;;  %5198 = vst [vmem:[#allocation10_spill] sm:$0xff] %v4260_v4 }
 0x221   : > { %v1128_v43 = vpop.f32.mrf.mxu0  ;;  %v1241_v44 = vpop.f32.mrf.mxu1  ;;  %v1377_v33 = vmul.f32 0.044715, %v4234_v40  ;;  %v4247_v1 = vadd.f32 %v1126_v51, %v4212_v11  ;;  %v1379_v49 = vmul.f32 0.044715, %v4237_v12  ;;  %v4254_v5 = vadd.f32 %v1239_v56, %v4214_v35 }
 0x222   : > { %v1504_v28 = vmul.f32 %v1440_v3, %v1121_v47  ;;  %v1506_v61 = vmul.f32 %v1442_v55, %v1234_v58  ;;  %v1628_v53 = vmul.f32 0.7978846, %v1564_v14  ;;  %v4257_v16 = vadd.f32 %v1128_v43, %v4217_v6 }
 0x223   : > { %v1130_v42 = vpop.f32.mrf.mxu0  ;;  %v1243_v20 = vpop.f32.mrf.mxu1  ;;  %5195 = vst [vmem:[#allocation7_spill] sm:$0xff] %v4247_v1  ;;  %5197 = vst [vmem:[#allocation9_spill] sm:$0xff] %v4254_v5  ;;  %v1630_v0 = vmul.f32 0.7978846, %v1566_v59  ;;  %v4262_v34 = vmul.f32 0.5, %v1121_v47  ;;  %v4264_v50 = vmul.f32 0.5, %v1234_v58  ;;  %v4267_v29 = vmul.f32 %v1437_v32, %v4224_v10 }
 0x224   : > { %v1568_v57 = vadd.f32 %v1504_v28, %v1121_v47  ;;  %v1570_v22 = vadd.f32 %v1506_v61, %v1234_v58  ;;  %v1441_v39 = vmul.f32 %v1377_v33, %v4234_v40  ;;  %v4271_v38 = vadd.f32 %v1241_v44, %v4219_v2 }
 0x225   : > { %v1132_v24 = vpop.f32.mrf.mxu0  ;;  %v1245_v48 = vpop.f32.mrf.mxu1  ;;  %3089 = vtanh.f32 %v1628_v53  ;;  %v4274_v30 = vmul.f32 %v1439_v62, %v4227_v26  ;;  %v1380_v45 = vmul.f32 0.044715, %v4247_v1  ;;  %v4278_v25 = vadd.f32 %v1130_v42, %v4212_v11 }
 0x226   : > { %5199 = vst [vmem:[#allocation11_spill] sm:$0xff] %v4271_v38  ;;  %v1443_v60 = vmul.f32 %v1379_v49, %v4237_v12  ;;  %v1382_v8 = vmul.f32 0.044715, %v4254_v5  ;;  %v1381_v9 = vmul.f32 0.044715, %v4257_v16  ;;  %v4284_v63 = vadd.f32 %v1243_v20, %v4214_v35 }
 0x227   : > { %v1136_v13 = vpop.f32.mrf.mxu0  ;;  %v1249_v21 = vpop.f32.mrf.mxu1  ;;  %5200 = vst [vmem:[#allocation12_spill] sm:$0xff] %v4278_v25  ;;  %3091 = vtanh.f32 %v1630_v0  ;;  %v1632_v58 = vmul.f32 0.7978846, %v1568_v57  ;;  %v1383_v46 = vmul.f32 0.044715, %v4271_v38  ;;  %v4288_v36 = vadd.f32 %v1132_v24, %v4217_v6 }
 0x228   : > { %5201 = vst [vmem:[#allocation13_spill] sm:$0xff] %v4284_v63  ;;  %v1634_v52 = vmul.f32 0.7978846, %v1570_v22  ;;  %v4291_v23 = vmul.f32 %v1441_v39, %v4234_v40  ;;  %v4294_v41 = vadd.f32 %v1245_v48, %v4219_v2  ;;  %v4297_v15 = vadd.f32 %v1136_v13, %v4212_v11 }
 0x229   : > { %v1138_v37 = vpop.f32.mrf.mxu0  ;;  %v1251_v47 = vpop.f32.mrf.mxu1  ;;  %v1444_v56 = vmul.f32 %v1380_v45, %v4247_v1  ;;  %v1384_v14 = vmul.f32 0.044715, %v4278_v25  ;;  %v4302_v7 = vadd.f32 %v1249_v21, %v4214_v35  ;;  %v4308_v55 = vmul.f32 %v1443_v60, %v4237_v12 }
 0x22a   : > { %5202 = vst [vmem:[#allocation14_spill] sm:$0xff] %v4294_v41  ;;  %5203 = vst [vmem:[#allocation15_spill] sm:$0xff] %v4297_v15  ;;  %v4305_v3 = vadd.f32 %v1138_v37, %v4217_v6  ;;  %v1446_v43 = vmul.f32 %v1382_v8, %v4254_v5  ;;  %v1445_v44 = vmul.f32 %v1381_v9, %v4257_v16  ;;  %v1386_v59 = vmul.f32 0.044715, %v4284_v63 }
 0x22b   : > { %v1140_v17 = vpop.f32.mrf.mxu0  ;;  %v1253_v51 = vpop.f32.mrf.mxu1  ;;  %5204 = vst [vmem:[#allocation16_spill] sm:$0xff] %v4302_v7  ;;  %3093 = vtanh.f32 %v1632_v58  ;;  %v1447_v61 = vmul.f32 %v1383_v46, %v4271_v38  ;;  %v1385_v33 = vmul.f32 0.044715, %v4288_v36  ;;  %v1387_v42 = vmul.f32 0.044715, %v4294_v41 }
 0x22c   : > { %5205 = vst [vmem:[#allocation17_spill] sm:$0xff] %v4305_v3  ;;  %3095 = vtanh.f32 %v1634_v52  ;;  %v1388_v20 = vmul.f32 0.044715, %v4297_v15  ;;  %v1390_v53 = vmul.f32 0.044715, %v4302_v7  ;;  %v4320_v48 = vmul.f32 %v1444_v56, %v4247_v1 }
 0x22d   : > { %v1142_v28 = vpop.f32.mrf.mxu0  ;;  %v1255_v32 = vpop.f32.mrf.mxu1  ;;  %v1389_v62 = vmul.f32 0.044715, %v4305_v3  ;;  %v1448_v0 = vmul.f32 %v1384_v14, %v4278_v25  ;;  %v4324_v57 = vadd.f32 %v1251_v47, %v4219_v2  ;;  %v4327_v22 = vadd.f32 %v1140_v17, %v4212_v11 }
 0x22e   : > { %5206 = vst [vmem:[#allocation18_spill] sm:$0xff] %v4320_v48  ;;  %v4330_v39 = vmul.f32 %v1446_v43, %v4254_v5  ;;  %v4333_v13 = vmul.f32 %v1445_v44, %v4257_v16  ;;  %v1450_v21 = vmul.f32 %v1386_v59, %v4284_v63  ;;  %v4337_v45 = vadd.f32 %v1253_v51, %v4214_v35 }
 0x22f   : > { %v1146_v49 = vpop.f32.mrf.mxu0  ;;  %v1259_v24 = vpop.f32.mrf.mxu1  ;;  %5207 = vst [vmem:[#allocation19_spill] sm:$0xff] %v4324_v57  ;;  %v4340_v9 = vmul.f32 %v1447_v61, %v4271_v38  ;;  %v1449_v37 = vmul.f32 %v1385_v33, %v4288_v36  ;;  %v1451_v47 = vmul.f32 %v1387_v42, %v4294_v41  ;;  %v4345_v58 = vadd.f32 %v1142_v28, %v4217_v6 }
 0x230   : > { %5208 = vst [vmem:[#allocation20_spill] sm:$0xff] %v4330_v39  ;;  %v1452_v46 = vmul.f32 %v1388_v20, %v4297_v15  ;;  %v1454_v52 = vmul.f32 %v1390_v53, %v4302_v7  ;;  %v1453_v17 = vmul.f32 %v1389_v62, %v4305_v3  ;;  %v4351_v51 = vadd.f32 %v1255_v32, %v4219_v2 }
 0x231   : > { %v1148_v60 = vpop.f32.mrf.mxu0  ;;  %v1261_v8 = vpop.f32.mrf.mxu1  ;;  %5209 = vst [vmem:[#allocation21_spill] sm:$0xff] %v4340_v9  ;;  %v4354_v43 = vmul.f32 %v1448_v0, %v4278_v25  ;;  %v1391_v44 = vmul.f32 0.044715, %v4324_v57  ;;  %v1392_v59 = vmul.f32 0.044715, %v4327_v22  ;;  %v4359_v28 = vadd.f32 %v1146_v49, %v4212_v11 }
 0x232   : > { %v4361_v61 = vpop.eup %3089  ;;  %v4364_v33 = vmul.f32 %v1450_v21, %v4284_v63  ;;  %v1394_v32 = vmul.f32 0.044715, %v4337_v45  ;;  %v1393_v42 = vmul.f32 0.044715, %v4345_v58  ;;  %v4369_v20 = vadd.f32 %v1259_v24, %v4214_v35 }
 0x233   : > { %v1150_v56 = vpop.f32.mrf.mxu0  ;;  %v1263_v14 = vpop.f32.mrf.mxu1  ;;  %5210 = vst [vmem:[#allocation22_spill] sm:$0xff] %v4354_v43  ;;  %v4372_v0 = vmul.f32 %v1449_v37, %v4288_v36  ;;  %v4375_v49 = vmul.f32 %v1451_v47, %v4294_v41  ;;  %v1395_v19 = vmul.f32 0.044715, %v4351_v51  ;;  %v4379_v21 = vadd.f32 %v1148_v60, %v4217_v6 }
 0x234   : > { %5211 = vst [vmem:[#allocation23_spill] sm:$0xff] %v4364_v33  ;;  %v4381_v18 = vpop.eup %3091  ;;  %v4384_v33 = vmul.f32 %v1452_v46, %v4297_v15  ;;  %v4387_v24 = vmul.f32 %v1454_v52, %v4302_v7  ;;  %v4390_v63 = vmul.f32 %v1453_v17, %v4305_v3  ;;  %v4393_v37 = vadd.f32 %v1261_v8, %v4219_v2 }
 0x235   : > { %v1152_v53 = vpop.f32.mrf.mxu0  ;;  %v1265_v62 = vpop.f32.mrf.mxu1  ;;  %5212 = vst [vmem:[#allocation24_spill] sm:$0xff] %v4372_v0  ;;  %5213 = vst [vmem:[#allocation25_spill] sm:$0xff] %v4375_v49  ;;  %v1455_v5 = vmul.f32 %v1391_v44, %v4324_v57  ;;  %v1456_v60 = vmul.f32 %v1392_v59, %v4327_v22  ;;  %v1396_v43 = vmul.f32 0.044715, %v4359_v28  ;;  %v4399_v46 = vadd.f32 %v1150_v56, %v4212_v11 }
 0x236   : > { %5214 = vst [vmem:[#allocation26_spill] sm:$0xff] %v4384_v33  ;;  %5215 = vst [vmem:[#allocation27_spill] sm:$0xff] %v4387_v24  ;;  %v1458_v52 = vmul.f32 %v1394_v32, %v4337_v45  ;;  %v1457_v24 = vmul.f32 %v1393_v42, %v4345_v58  ;;  %v1398_v17 = vmul.f32 0.044715, %v4369_v20  ;;  %v4405_v8 = vadd.f32 %v1263_v14, %v4214_v35 }
 0x237   : > { %5216 = vst [vmem:[#allocation28_spill] sm:$0xff] %v4390_v63  ;;  %v1156_v47 = vpop.f32.mrf.mxu0  ;;  %v1269_v39 = vpop.f32.mrf.mxu1  ;;  %v1459_v44 = vmul.f32 %v1395_v19, %v4351_v51  ;;  %v1397_v59 = vmul.f32 0.044715, %v4379_v21  ;;  %v1399_v15 = vmul.f32 0.044715, %v4393_v37  ;;  %v4411_v56 = vadd.f32 %v1152_v53, %v4217_v6 }
 0x238   : > { %5217 = vst [vmem:[#allocation29_spill] sm:$0xff] %v4405_v8  ;;  %v4413_v63 = vpop.eup %3093  ;;  %v1400_v32 = vmul.f32 0.044715, %v4399_v46  ;;  %v1402_v42 = vmul.f32 0.044715, %v4405_v8  ;;  %v4418_v14 = vadd.f32 %v1265_v62, %v4219_v2  ;;  %v4421_v3 = vadd.f32 %v1156_v47, %v4212_v11 }
 0x239   : > { %v1158_v7 = vpop.f32.mrf.mxu0  ;;  %v1271_v33 = vpop.f32.mrf.mxu1  ;;  %v1460_v48 = vmul.f32 %v1396_v43, %v4359_v28  ;;  %v1401_v53 = vmul.f32 0.044715, %v4411_v56  ;;  %v4428_v1 = vadd.f32 %v1269_v39, %v4214_v35  ;;  %v4434_v27 = vmul.f32 %v1455_v5, %v4324_v57 }
 0x23a   : > { %5218 = vst [vmem:[#allocation30_spill] sm:$0xff] %v4421_v3  ;;  %v4423_v25 = vpop.eup %3095  ;;  %v4431_v4 = vadd.f32 %v1158_v7, %v4217_v6  ;;  %v1462_v62 = vmul.f32 %v1398_v17, %v4369_v20  ;;  %v1403_v47 = vmul.f32 0.044715, %v4418_v14  ;;  %v1404_v49 = vmul.f32 0.044715, %v4421_v3 }
 0x23b   : > { %v1160_v19 = vpop.f32.mrf.mxu0  ;;  %5219 = vst [vmem:[#allocation31_spill] sm:$0xff] %v4428_v1  ;;  %5221 = vst [vmem:[#allocation33_spill] sm:$0xff] %v4434_v27  ;;  %v1273_v41 = vpop.f32.mrf.mxu1  ;;  %v1461_v43 = vmul.f32 %v1397_v59, %v4379_v21  ;;  %v1463_v9 = vmul.f32 %v1399_v15, %v4393_v37  ;;  %v1406_v39 = vmul.f32 0.044715, %v4428_v1  ;;  %v4444_v7 = vmul.f32 %v1456_v60, %v4327_v22 }
 0x23c   : > { %5220 = vst [vmem:[#allocation32_spill] sm:$0xff] %v4431_v4  ;;  %v1405_v38 = vmul.f32 0.044715, %v4431_v4  ;;  %v4447_v5 = vmul.f32 %v1458_v52, %v4337_v45  ;;  %v1464_v17 = vmul.f32 %v1400_v32, %v4399_v46  ;;  %v1466_v27 = vmul.f32 %v1402_v42, %v4405_v8 }
 0x23d   : > { %5222 = vst [vmem:[#allocation34_spill] sm:$0xff] %v4444_v7  ;;  %v1162_v57 = vpop.f32.mrf.mxu0  ;;  %v4452_v0 = vmul.f32 %v1457_v24, %v4345_v58  ;;  %v4455_v15 = vmul.f32 %v1459_v44, %v4351_v51  ;;  %v4458_v59 = vmul.f32 %v1460_v48, %v4359_v28  ;;  %v1465_v60 = vmul.f32 %v1401_v53, %v4411_v56  ;;  %v1275_v24 = vpop.f32.mrf.mxu1 }
 0x23e   : > { %5223 = vst [vmem:[#allocation35_spill] sm:$0xff] %v4447_v5  ;;  %v4462_v7 = vmul.f32 %v1462_v62, %v4369_v20  ;;  %v1467_v52 = vmul.f32 %v1403_v47, %v4418_v14  ;;  %v1468_v32 = vmul.f32 %v1404_v49, %v4421_v3  ;;  %v4467_v42 = vadd.f32 %v1271_v33, %v4219_v2 }
 0x23f   : > { %v4470_v5 = vmul.f32 %v1461_v43, %v4379_v21  ;;  %v4473_v44 = vmul.f32 %v1463_v9, %v4393_v37  ;;  %v1470_v48 = vmul.f32 %v1406_v39, %v4428_v1  ;;  %v1469_v53 = vmul.f32 %v1405_v38, %v4431_v4  ;;  %v1166_v43 = vpop.f32.mrf.mxu0 }
 0x240   : > { %5224 = vst [vmem:[#allocation36_spill] sm:$0xff] %v4462_v7  ;;  %5225 = vst [vmem:[#allocation37_spill] sm:$0xff] %v4467_v42  ;;  %v4478_v62 = vmul.f32 %v1464_v17, %v4399_v46  ;;  %v4481_v47 = vmul.f32 %v1466_v27, %v4405_v8  ;;  %v4484_v33 = vadd.f32 %v1160_v19, %v4212_v11 }
 0x241   : > { %v4487_v49 = vadd.f32 %v1273_v41, %v4214_v35  ;;  %v4490_v9 = vmul.f32 %v1465_v60, %v4411_v56  ;;  %v4493_v39 = vadd.f32 %v1162_v57, %v4217_v6  ;;  %v1565_v38 = vadd.f32 %v4267_v29, %v4224_v10 }
 0x242   : > { %5226 = vst [vmem:[#allocation38_spill] sm:$0xff] %v4481_v47  ;;  %5227 = vst [vmem:[#allocation39_spill] sm:$0xff] %v4484_v33  ;;  %v1569_v27 = vadd.f32 %v4291_v23, %v4234_v40  ;;  %v4500_v17 = vmul.f32 %v1467_v52, %v4418_v14  ;;  %v4503_v19 = vmul.f32 %v1468_v32, %v4421_v3  ;;  %v1407_v41 = vmul.f32 0.044715, %v4467_v42  ;;  %v1279_v47 = vpop.f32.mrf.mxu1 }
 0x243   : > { %5228 = vst [vmem:[#allocation40_spill] sm:$0xff] %v4487_v49  ;;  %v4507_v60 = vadd.f32 %v1275_v24, %v4219_v2  ;;  %v4510_v57 = vmul.f32 %v1470_v48, %v4428_v1  ;;  %v4513_v10 = vmul.f32 %v1469_v53, %v4431_v4  ;;  %v1629_v29 = vmul.f32 0.7978846, %v1565_v38 }
 0x244   : > { %5229 = vst [vmem:[#allocation41_spill] sm:$0xff] %v4503_v19  ;;  %v1633_v23 = vmul.f32 0.7978846, %v1569_v27  ;;  %v1408_v52 = vmul.f32 0.044715, %v4484_v33  ;;  %v1567_v32 = vadd.f32 %v4274_v30, %v4227_v26  ;;  %v1571_v24 = vadd.f32 %v4308_v55, %v4237_v12  ;;  %v1168_v19 = vpop.f32.mrf.mxu0  ;;  %v1281_v1 = vpop.f32.mrf.mxu1 }
 0x245   : > { %5230 = vst [vmem:[#allocation42_spill] sm:$0xff] %v4507_v60  ;;  %5231 = vst [vmem:[#allocation43_spill] sm:$0xff] %v4510_v57  ;;  %v1410_v8 = vmul.f32 0.044715, %v4487_v49  ;;  %v1409_v3 = vmul.f32 0.044715, %v4493_v39  ;;  %3097 = vtanh.f32 %v1629_v29  ;;  %v4523_v48 = vadd.f32 %v1166_v43, %v4212_v11 }
 0x246   : > { %5232 = vst [vmem:[#allocation44_spill] sm:$0xff] %v4513_v10  ;;  %v4526_v53 = vadd.f32 %v1279_v47, %v4214_v35  ;;  %v1411_v38 = vmul.f32 0.044715, %v4507_v60  ;;  %3099 = vtanh.f32 %v1633_v23  ;;  %v1631_v27 = vmul.f32 0.7978846, %v1567_v32  ;;  %v1170_v23 = vpop.f32.mrf.mxu0 }
 0x247   : > { %5233 = vst [vmem:[#allocation45_spill] sm:$0xff] %v4523_v48  ;;  %v1635_v57 = vmul.f32 0.7978846, %v1571_v24  ;;  %v1471_v26 = vmul.f32 %v1407_v41, %v4467_v42  ;;  %v4531_v30 = vmul.f32 0.5, %v4234_v40  ;;  %v1412_v55 = vmul.f32 0.044715, %v4523_v48 }
 0x248   : > { %5234 = vst [vmem:[#allocation46_spill] sm:$0xff] %v4526_v53  ;;  %v1414_v29 = vmul.f32 0.044715, %v4526_v53  ;;  %v1472_v43 = vmul.f32 %v1408_v52, %v4484_v33  ;;  %3101 = vtanh.f32 %v1631_v27  ;;  %v1760_v47 = vadd.f32 1.0, %v4413_v63  ;;  %v1283_v63 = vpop.f32.mrf.mxu1 }
 0x249   : > { %v4538_v10 = vadd.f32 %v1168_v19, %v4217_v6  ;;  %v1474_v32 = vmul.f32 %v1410_v8, %v4487_v49  ;;  %v1473_v41 = vmul.f32 %v1409_v3, %v4493_v39  ;;  %3103 = vtanh.f32 %v1635_v57 }
 0x24a   : > { %v1762_v40 = vadd.f32 1.0, %v4423_v25  ;;  %v1475_v24 = vmul.f32 %v1411_v38, %v4507_v60  ;;  %v1756_v4 = vadd.f32 1.0, %v4361_v61  ;;  %v1758_v52 = vadd.f32 1.0, %v4381_v18 }
 0x24b   : > { %5235 = vst [vmem:[#allocation47_spill] sm:$0xff] %v4538_v10  ;;  %v1413_v27 = vmul.f32 0.044715, %v4538_v10  ;;  %v1476_v19 = vmul.f32 %v1412_v55, %v4523_v48  ;;  %v1478_v7 = vmul.f32 %v1414_v29, %v4526_v53  ;;  %v4550_v8 = vadd.f32 %v1281_v1, %v4219_v2 }
 0x24c   : > { %v4553_v3 = vadd.f32 %v1170_v23, %v4212_v11  ;;  %v4556_v25 = vmul.f32 %v1471_v26, %v4467_v42  ;;  %v4559_v61 = vmul.f32 %v1472_v43, %v4484_v33  ;;  %v1315_v18 = vmul.f32 0.5, %v4237_v12  ;;  %v1172_v26 = vpop.f32.mrf.mxu0  ;;  %v1285_v23 = vpop.f32.mrf.mxu1  ;;  %v5252_v33 = vld [vmem:[#allocation8_spill] sm:$0xff] }
 0x24d   : > { %v4563_v57 = vmul.f32 %v1760_v47, %v4262_v34  ;;  %v4566_v38 = vmul.f32 %v1474_v32, %v4487_v49  ;;  %v4569_v1 = vmul.f32 %v1762_v40, %v4264_v50  ;;  %v1477_v55 = vmul.f32 %v1413_v27, %v4538_v10  ;;  %v5249_v49 = vld [vmem:[#allocation14_spill] sm:$0xff] }
 0x24e   : > { %5236 = vst [vmem:[#allocation48_spill] sm:$0xff] %v4553_v3  ;;  %5237 = vst [vmem:[#allocation49_spill] sm:$0xff] %v4556_v25  ;;  %v4573_v29 = vadd.f32 %v1283_v63, %v4214_v35  ;;  %v4576_v43 = vmul.f32 %v1473_v41, %v4493_v39  ;;  %v4579_v12 = vmul.f32 %v1475_v24, %v4507_v60  ;;  %v1415_v40 = vmul.f32 0.044715, %v4550_v8 }
 0x24f   : > { %5238 = vst [vmem:[#allocation50_spill] sm:$0xff] %v4559_v61  ;;  %5239 = vst [vmem:[#allocation51_spill] sm:$0xff] %v4566_v38  ;;  %v1820_v34 = vmul.f32 %v1756_v4, %v4239_v54  ;;  %v4583_v47 = vmul.f32 %v1758_v52, %v4241_v31  ;;  %v4586_v50 = vmul.f32 %v1476_v19, %v4523_v48  ;;  %v1416_v41 = vmul.f32 0.044715, %v4553_v3  ;;  %v5245_v31 = vld [vmem:[#allocation24_spill] sm:$0xff]  ;;  %v5247_v48 = vld [vmem:[#allocation11_spill] sm:$0xff] }
 0x250   : > { %5240 = vst [vmem:[#allocation52_spill] sm:$0xff] %v4573_v29  ;;  %5241 = vst [vmem:[#allocation53_spill] sm:$0xff] %v4576_v43  ;;  %v4589_v32 = vmul.f32 %v1478_v7, %v4526_v53  ;;  %v4595_v24 = vadd.f32 %v1172_v26, %v4217_v6  ;;  %v1573_v54 = vadd.f32 %v4333_v13, %v4257_v16  ;;  %v1418_v63 = vmul.f32 0.044715, %v4573_v29 }
 0x251   : > { %5242 = vst [vmem:[#allocation54_spill] sm:$0xff] %v4579_v12  ;;  %5243 = vst [vmem:[#allocation55_spill] sm:$0xff] %v4586_v50  ;;  %v1884_v27 = vpack.c.bf16 %v4563_v57, %v1820_v34  ;;  %v1577_v4 = vadd.f32 %v5245_v31, %v4288_v36  ;;  %v4604_v7 = vmul.f32 %v1477_v55, %v4538_v10  ;;  %v4611_v26 = vmul.f32 0.5, %v4257_v16  ;;  %v1289_v10 = vpop.f32.mrf.mxu1 }
 0x252   : > { %5244 = vst [vmem:[#allocation56_spill] sm:$0xff] %v4589_v32  ;;  %v4608_v19 = vadd.f32 %v1285_v23, %v4219_v2  ;;  %v3098_v57 = vpop.eup %3097  ;;  %v4614_v13 = vmul.f32 0.5, %v4288_v36  ;;  %v1637_v34 = vmul.f32 0.7978846, %v1573_v54  ;;  %v1176_v32 = vpop.f32.mrf.mxu0  ;;  %v1479_v55 = vmul.f32 %v1415_v40, %v4550_v8  ;;  %v5250_v36 = vld [vmem:[#allocation25_spill] sm:$0xff] }
 0x253   : > { %5246 = vst [vmem:[#allocation24_spill] sm:$0xff] %v4604_v7  ;;  %v1641_v31 = vmul.f32 0.7978846, %v1577_v4  ;;  %v3100_v53 = vpop.eup %3099  ;;  %v1757_v52 = vadd.f32 1.0, %v3098_v57  ;;  %v1480_v50 = vmul.f32 %v1416_v41, %v4553_v3  ;;  %v5248_v7 = vld [vmem:[#allocation21_spill] sm:$0xff]  ;;  %v1579_v61 = vadd.f32 %v5250_v36, %v5249_v49 }
 0x254   : > { %v1575_v23 = vadd.f32 %v5248_v7, %v5247_v48  ;;  %v1761_v38 = vadd.f32 1.0, %v3100_v53  ;;  %v1417_v16 = vmul.f32 0.044715, %v4595_v24  ;;  %3105 = vtanh.f32 %v1637_v34  ;;  %v1178_v25 = vpop.f32.mrf.mxu0 }
 0x255   : > { %v3102_v54 = vpop.eup %3101  ;;  %v1419_v4 = vmul.f32 0.044715, %v4608_v19  ;;  %3107 = vtanh.f32 %v1641_v31  ;;  %v4625_v40 = vadd.f32 %v1176_v32, %v4212_v11  ;;  %v1821_v12 = vmul.f32 %v1757_v52, %v5252_v33  ;;  %v1291_v31 = vpop.f32.mrf.mxu1  ;;  %v5255_v33 = vld [vmem:[#allocation10_spill] sm:$0xff]  ;;  %v5256_v52 = vld [vmem:[#allocation7_spill] sm:$0xff] }
 0x256   : > { %v1639_v57 = vmul.f32 0.7978846, %v1575_v23  ;;  %v3104_v41 = vpop.eup %3103  ;;  %v1825_v7 = vmul.f32 %v1761_v38, %v4531_v30  ;;  %v1759_v53 = vadd.f32 1.0, %v3102_v54  ;;  %v1643_v60 = vmul.f32 0.7978846, %v1579_v61 }
 0x257   : > { %5251 = vst [vmem:[#allocation11_spill] sm:$0xff] %v4625_v40  ;;  %v1763_v34 = vadd.f32 1.0, %v3104_v41  ;;  %v1482_v42 = vmul.f32 %v1418_v63, %v4573_v29  ;;  %v4631_v36 = vadd.f32 %v1289_v10, %v4214_v35  ;;  %v4634_v32 = vmul.f32 %v1479_v55, %v4550_v8  ;;  %v5257_v63 = vld [vmem:[#allocation18_spill] sm:$0xff] }
 0x258   : > { %3109 = vtanh.f32 %v1639_v57  ;;  %v1885_v23 = vpack.c.bf16 %v1825_v7, %v1821_v12  ;;  %v4637_v43 = vmul.f32 0.5, %v5247_v48  ;;  %v1823_v30 = vmul.f32 %v1759_v53, %v5255_v33  ;;  %v5259_v57 = vld [vmem:[#allocation12_spill] sm:$0xff]  ;;  %v5260_v48 = vld [vmem:[#allocation22_spill] sm:$0xff] }
 0x259   : > { %5253 = vst [vmem:[#allocation21_spill] sm:$0xff] %v4631_v36  ;;  %5254 = vst [vmem:[#allocation14_spill] sm:$0xff] %v4634_v32  ;;  %3111 = vtanh.f32 %v1643_v60  ;;  %v1827_v61 = vmul.f32 %v1763_v34, %v1315_v18  ;;  %v1420_v38 = vmul.f32 0.044715, %v4625_v40  ;;  %v1572_v54 = vadd.f32 %v5257_v63, %v5256_v52  ;;  %v1180_v60 = vpop.f32.mrf.mxu0  ;;  %v5261_v34 = vld [vmem:[#allocation9_spill] sm:$0xff]  ;;  %v5262_v33 = vld [vmem:[#allocation20_spill] sm:$0xff] }
 0x25a   : > { %2344 = vmatprep.mubr.bf16.mxu0 %v1885_v23  ;;  %v4644_v10 = vmul.f32 %v1480_v50, %v4553_v3  ;;  %v1481_v12 = vmul.f32 %v1417_v16, %v4595_v24  ;;  %v1483_v55 = vmul.f32 %v1419_v4, %v4608_v19  ;;  %v1576_v41 = vadd.f32 %v5260_v48, %v5259_v57  ;;  %v1293_v23 = vpop.f32.mrf.mxu1  ;;  %v5263_v50 = vld [vmem:[#allocation13_spill] sm:$0xff] }
 0x25b   : > { %v1887_v7 = vpack.c.bf16 %v1827_v61, %v1823_v30  ;;  %2345 = vmatmul.mubr.bf16.vlgmr.msra.gmra.mxu0 %v1884_v27  ;;  %v1422_v18 = vmul.f32 0.044715, %v4631_v36  ;;  %v1636_v53 = vmul.f32 0.7978846, %v1572_v54  ;;  %v1574_v63 = vadd.f32 %v5262_v33, %v5261_v34 }
 0x25c   : > { %5258 = vst [vmem:[#allocation25_spill] sm:$0xff] %v4644_v10  ;;  %v1640_v32 = vmul.f32 0.7978846, %v1576_v41  ;;  %v5264_v10 = vld [vmem:[#allocation23_spill] sm:$0xff]  ;;  %v4656_v16 = vadd.f32 %v1178_v25, %v4217_v6  ;;  %v4659_v4 = vadd.f32 %v1291_v31, %v4219_v2  ;;  %v1484_v27 = vmul.f32 %v1420_v38, %v4625_v40 }
 0x25d   : > { %v1578_v3 = vadd.f32 %v5264_v10, %v5263_v50  ;;  %2457 = vmatprep.mubr.bf16.mxu1 %v1887_v7  ;;  %3113 = vtanh.f32 %v1636_v53  ;;  %v1638_v30 = vmul.f32 0.7978846, %v1574_v63  ;;  %v4663_v61 = vadd.f32 %v1180_v60, %v4212_v11  ;;  %v1182_v60 = vpop.f32.mrf.mxu0 }
 0x25e   : > { %5265 = vst [vmem:[#allocation8_spill] sm:$0xff] %v4659_v4  ;;  %v5267_v54 = vpack.c.bf16 %v4569_v1, %v4583_v47  ;;  %v4669_v10 = vmul.f32 %v1482_v42, %v4573_v29  ;;  %3115 = vtanh.f32 %v1640_v32  ;;  %v4672_v31 = vadd.f32 %v1293_v23, %v4214_v35 }
 0x25f   : > { %5266 = vst [vmem:[#allocation10_spill] sm:$0xff] %v4663_v61  ;;  %v1642_v25 = vmul.f32 0.7978846, %v1578_v3  ;;  %v1323_v48 = vmul.f32 0.5, %v5249_v49  ;;  %v1486_v38 = vmul.f32 %v1422_v18, %v4631_v36  ;;  %3117 = vtanh.f32 %v1638_v30 }
 0x260   : > { %2458 = vmatmul.mubr.bf16.vlgmr.msra.gmra.mxu1 %v5267_v54  ;;  %5268 = vst [vmem:[#allocation7_spill] sm:$0xff] %v4669_v10  ;;  %v1421_v41 = vmul.f32 0.044715, %v4656_v16  ;;  %v4678_v7 = vmul.f32 %v1481_v12, %v4595_v24  ;;  %v1423_v42 = vmul.f32 0.044715, %v4659_v4  ;;  %v4683_v47 = vmul.f32 %v1483_v55, %v4608_v19  ;;  %v1295_v12 = vpop.f32.mrf.mxu1 }
 0x261   : > { %3119 = vtanh.f32 %v1642_v25  ;;  %v1424_v1 = vmul.f32 0.044715, %v4663_v61  ;;  %v3106_v3 = vpop.eup %3105  ;;  %v4686_v49 = vmul.f32 %v1484_v27, %v4625_v40  ;;  %v4689_v32 = vmul.f32 0.5, %v5256_v52 }
 0x262   : > { %5269 = vst [vmem:[#allocation18_spill] sm:$0xff] %v4683_v47  ;;  %v4692_v18 = vmul.f32 0.5, %v5259_v57  ;;  %v3108_v53 = vpop.eup %3107  ;;  %v1765_v33 = vadd.f32 1.0, %v3106_v3  ;;  %v4695_v63 = vmul.f32 0.5, %v5261_v34  ;;  %v1426_v23 = vmul.f32 0.044715, %v4672_v31 }
 0x263   : > { %5270 = vst [vmem:[#allocation12_spill] sm:$0xff] %v4686_v49  ;;  %v4699_v55 = vadd.f32 %v1182_v60, %v4217_v6  ;;  %v1769_v30 = vadd.f32 1.0, %v3108_v53  ;;  %v4702_v27 = vmul.f32 %v1486_v38, %v4631_v36  ;;  %v4705_v52 = vmul.f32 0.5, %v5263_v50  ;;  %v5272_v49 = vld [vmem:[#allocation17_spill] sm:$0xff]  ;;  %v5273_v60 = vld [vmem:[#allocation28_spill] sm:$0xff] }
 0x264   : > { %v1485_v57 = vmul.f32 %v1421_v41, %v4656_v16  ;;  %v1487_v25 = vmul.f32 %v1423_v42, %v4659_v4  ;;  %v1488_v34 = vmul.f32 %v1424_v1, %v4663_v61  ;;  %v4711_v3 = vadd.f32 %v1295_v12, %v4219_v2  ;;  %v1186_v12 = vpop.f32.mrf.mxu0 }
 0x265   : > { %5271 = vst [vmem:[#allocation22_spill] sm:$0xff] %v4702_v27  ;;  %v3110_v54 = vpop.eup %3109  ;;  %v1581_v40 = vadd.f32 %v5273_v60, %v5272_v49  ;;  %v1829_v38 = vmul.f32 %v1765_v33, %v4611_v26  ;;  %v1833_v27 = vmul.f32 %v1769_v30, %v4614_v13  ;;  %v1585_v41 = vadd.f32 %v4452_v0, %v4345_v58  ;;  %v5274_v13 = vld [vmem:[#allocation19_spill] sm:$0xff]  ;;  %v5275_v30 = vld [vmem:[#allocation33_spill] sm:$0xff] }
 0x266   : > { %v3112_v53 = vpop.eup %3111  ;;  %v1767_v50 = vadd.f32 1.0, %v3110_v54  ;;  %v1490_v42 = vmul.f32 %v1426_v23, %v4672_v31  ;;  %v1425_v1 = vmul.f32 0.044715, %v4699_v55  ;;  %v4723_v60 = vmul.f32 0.5, %v5272_v49  ;;  %v1299_v23 = vpop.f32.mrf.mxu1 }
 0x267   : > { %v1771_v36 = vadd.f32 1.0, %v3112_v53  ;;  %v1645_v10 = vmul.f32 0.7978846, %v1581_v40  ;;  %v1889_v29 = vpack.c.bf16 %v1833_v27, %v1829_v38  ;;  %v1649_v26 = vmul.f32 0.7978846, %v1585_v41  ;;  %v1188_v38 = vpop.f32.mrf.mxu0  ;;  %v5278_v41 = vld [vmem:[#allocation15_spill] sm:$0xff] }
 0x268   : > { %v1831_v47 = vmul.f32 %v1767_v50, %v4637_v43  ;;  %v1583_v54 = vadd.f32 %v5275_v30, %v5274_v13  ;;  %v1587_v0 = vadd.f32 %v4455_v15, %v4351_v51  ;;  %v4730_v40 = vmul.f32 %v1485_v57, %v4656_v16 }
 0x269   : > { %v1835_v33 = vmul.f32 %v1771_v36, %v1323_v48  ;;  %3121 = vtanh.f32 %v1645_v10  ;;  %2354 = vmatprep.mubr.bf16.mxu0 %v1889_v29  ;;  %v1427_v27 = vmul.f32 0.044715, %v4711_v3  ;;  %v4734_v43 = vadd.f32 %v1186_v12, %v4212_v11 }
 0x26a   : > { %3123 = vtanh.f32 %v1649_v26  ;;  %v3114_v49 = vpop.eup %3113  ;;  %v4737_v10 = vmul.f32 %v1487_v25, %v4659_v4  ;;  %v1647_v48 = vmul.f32 0.7978846, %v1583_v54  ;;  %v1651_v53 = vmul.f32 0.7978846, %v1587_v0  ;;  %v5279_v26 = vld [vmem:[#allocation26_spill] sm:$0xff] }
 0x26b   : > { %v1891_v36 = vpack.c.bf16 %v1835_v33, %v1831_v47  ;;  %v3116_v15 = vpop.eup %3115  ;;  %v1764_v50 = vadd.f32 1.0, %v3114_v49  ;;  %v4740_v29 = vmul.f32 %v1488_v34, %v4663_v61  ;;  %v4743_v57 = vadd.f32 %v1299_v23, %v4214_v35  ;;  %v5280_v33 = vld [vmem:[#allocation34_spill] sm:$0xff] }
 0x26c   : > { %5276 = vst [vmem:[#allocation9_spill] sm:$0xff] %v4737_v10  ;;  %v1580_v12 = vadd.f32 %v5279_v26, %v5278_v41  ;;  %v3118_v30 = vpop.eup %3117  ;;  %v1768_v47 = vadd.f32 1.0, %v3116_v15  ;;  %v1489_v25 = vmul.f32 %v1425_v1, %v4699_v55  ;;  %3125 = vtanh.f32 %v1647_v48  ;;  %v1190_v10 = vpop.f32.mrf.mxu0 }
 0x26d   : > { %5277 = vst [vmem:[#allocation20_spill] sm:$0xff] %v4740_v29  ;;  %2467 = vmatprep.mubr.bf16.mxu1 %v1891_v36  ;;  %v1584_v54 = vadd.f32 %v5280_v33, %v4327_v22  ;;  %v1766_v49 = vadd.f32 1.0, %v3118_v30  ;;  %v1491_v34 = vmul.f32 %v1427_v27, %v4711_v3  ;;  %3127 = vtanh.f32 %v1651_v53  ;;  %v1301_v29 = vpop.f32.mrf.mxu1 }
 0x26e   : > { %v3120_v0 = vpop.eup %3119  ;;  %v1428_v23 = vmul.f32 0.044715, %v4734_v43  ;;  %v1828_v61 = vmul.f32 %v1764_v50, %v4689_v32  ;;  %v1832_v26 = vmul.f32 %v1768_v47, %v4692_v18  ;;  %v1644_v15 = vmul.f32 0.7978846, %v1580_v12  ;;  %v5281_v32 = vld [vmem:[#allocation16_spill] sm:$0xff]  ;;  %v5282_v18 = vld [vmem:[#allocation27_spill] sm:$0xff] }
 0x26f   : > { %v1770_v36 = vadd.f32 1.0, %v3120_v0  ;;  %v4755_v1 = vmul.f32 %v1490_v42, %v4672_v31  ;;  %v1329_v48 = vmul.f32 0.5, %v4345_v58  ;;  %v1430_v30 = vmul.f32 0.044715, %v4743_v57  ;;  %v5283_v12 = vld [vmem:[#allocation35_spill] sm:$0xff]  ;;  %v1303_v58 = vpop.f32.mrf.mxu1 }
 0x270   : > { %v1648_v33 = vmul.f32 0.7978846, %v1584_v54  ;;  %v1888_v27 = vpack.c.bf16 %v1832_v26, %v1828_v61  ;;  %v1830_v53 = vmul.f32 %v1766_v49, %v4695_v63  ;;  %3129 = vtanh.f32 %v1644_v15  ;;  %v1192_v54 = vpop.f32.mrf.mxu0 }
 0x271   : > { %v1834_v4 = vmul.f32 %v1770_v36, %v4705_v52  ;;  %v1582_v50 = vadd.f32 %v5282_v18, %v5281_v32  ;;  %v1586_v47 = vadd.f32 %v5283_v12, %v4337_v45  ;;  %v4766_v42 = vadd.f32 %v1188_v38, %v4217_v6 }
 0x272   : > { %3131 = vtanh.f32 %v1648_v33  ;;  %2355 = vmatmul.mubr.bf16.gmra.mxu0 %v1888_v27  ;;  %v4769_v61 = vmul.f32 %v1489_v25, %v4699_v55  ;;  %v4772_v63 = vmul.f32 %v1491_v34, %v4711_v3  ;;  %v1492_v52 = vmul.f32 %v1428_v23, %v4734_v43 }
 0x273   : > { %v1890_v0 = vpack.c.bf16 %v1834_v4, %v1830_v53  ;;  %v1646_v49 = vmul.f32 0.7978846, %v1582_v50  ;;  %v1650_v26 = vmul.f32 0.7978846, %v1586_v47  ;;  %v4776_v36 = vadd.f32 %v1301_v29, %v4219_v2  ;;  %v1305_v53 = vpop.f32.mrf.mxu1 }
 0x274   : > { %v4779_v38 = vadd.f32 %v1190_v10, %v4212_v11  ;;  %v1327_v4 = vmul.f32 0.5, %v5274_v13  ;;  %v1494_v25 = vmul.f32 %v1430_v30, %v4743_v57  ;;  %v1429_v15 = vmul.f32 0.044715, %v4766_v42 }
 0x275   : > { %2468 = vmatmul.mubr.bf16.gmra.mxu1 %v1890_v0  ;;  %v4785_v34 = vadd.f32 %v1303_v58, %v4214_v35  ;;  %v1331_v33 = vmul.f32 0.5, %v4351_v51  ;;  %v1324_v27 = vmul.f32 0.5, %v5278_v41  ;;  %3133 = vtanh.f32 %v1646_v49 }
 0x276   : > { %v3122_v23 = vpop.eup %3121  ;;  %v4790_v29 = vadd.f32 %v1192_v54, %v4217_v6  ;;  %v1328_v13 = vmul.f32 0.5, %v4327_v22  ;;  %v4794_v30 = vmul.f32 0.5, %v5281_v32  ;;  %3135 = vtanh.f32 %v1650_v26 }
 0x277   : > { %v3124_v11 = vpop.eup %3123  ;;  %v1773_v10 = vadd.f32 1.0, %v3122_v23  ;;  %v4797_v18 = vmul.f32 %v1492_v52, %v4734_v43  ;;  %v1431_v51 = vmul.f32 0.044715, %v4776_v36  ;;  %v1432_v41 = vmul.f32 0.044715, %v4779_v38 }
 0x278   : > { %v1777_v35 = vadd.f32 1.0, %v3124_v11  ;;  %v4802_v6 = vmul.f32 %v1494_v25, %v4743_v57  ;;  %v4805_v50 = vmul.f32 0.5, %v4337_v45  ;;  %v1493_v22 = vmul.f32 %v1429_v15, %v4766_v42 }
 0x279   : > { %v1434_v32 = vmul.f32 0.044715, %v4785_v34  ;;  %v3126_v12 = vpop.eup %3125  ;;  %v1837_v47 = vmul.f32 %v1773_v10, %v4723_v60  ;;  %v1433_v0 = vmul.f32 0.044715, %v4790_v29  ;;  %v4812_v52 = vadd.f32 %v1305_v53, %v4219_v2 }
 0x27a   : > { %v1841_v58 = vmul.f32 %v1777_v35, %v1329_v48  ;;  %v3128_v54 = vpop.eup %3127  ;;  %v1775_v49 = vadd.f32 1.0, %v3126_v12  ;;  %v4815_v26 = vmul.f32 0.5, %v4379_v21  ;;  %v1589_v45 = vadd.f32 %v4470_v5, %v4379_v21 }
 0x27b   : > { %v1593_v25 = vadd.f32 %v4490_v9, %v4411_v56  ;;  %v1779_v23 = vadd.f32 1.0, %v3128_v54  ;;  %v1495_v60 = vmul.f32 %v1431_v51, %v4776_v36  ;;  %v1496_v48 = vmul.f32 %v1432_v41, %v4779_v38 }
 0x27c   : > { %v1893_v15 = vpack.c.bf16 %v1841_v58, %v1837_v47  ;;  %v4824_v2 = vmul.f32 %v1493_v22, %v4766_v42  ;;  %v1498_v11 = vmul.f32 %v1434_v32, %v4785_v34  ;;  %v1653_v10 = vmul.f32 0.7978846, %v1589_v45 }
 0x27d   : > { %v1657_v53 = vmul.f32 0.7978846, %v1593_v25  ;;  %v3130_v35 = vpop.eup %3129  ;;  %v1839_v12 = vmul.f32 %v1775_v49, %v1327_v4  ;;  %v1843_v21 = vmul.f32 %v1779_v23, %v1331_v33  ;;  %v1591_v5 = vadd.f32 %v4473_v44, %v4393_v37 }
 0x27e   : > { %2364 = vmatprep.mubr.bf16.mxu0 %v1893_v15  ;;  %v1595_v9 = vadd.f32 %v4500_v17, %v4418_v14  ;;  %v1772_v47 = vadd.f32 1.0, %v3130_v35  ;;  %v4832_v41 = vmul.f32 %v1433_v0, %v4790_v29  ;;  %3137 = vtanh.f32 %v1653_v10  ;;  %v5284_v15 = vld [vmem:[#allocation36_spill] sm:$0xff]  ;;  %v5286_v10 = vld [vmem:[#allocation38_spill] sm:$0xff] }
 0x27f   : > { %v3132_v51 = vpop.eup %3131  ;;  %v1588_v22 = vadd.f32 %v4458_v59, %v4359_v28  ;;  %v1895_v32 = vpack.c.bf16 %v1843_v21, %v1839_v12  ;;  %3139 = vtanh.f32 %v1657_v53  ;;  %v1655_v4 = vmul.f32 0.7978846, %v1591_v5 }
 0x280   : > { %v1776_v58 = vadd.f32 1.0, %v3132_v51  ;;  %v4837_v33 = vmul.f32 %v1495_v60, %v4776_v36  ;;  %v1659_v44 = vmul.f32 0.7978846, %v1595_v9  ;;  %v1592_v17 = vadd.f32 %v4478_v62, %v4399_v46  ;;  %v5285_v60 = vld [vmem:[#allocation29_spill] sm:$0xff]  ;;  %v5288_v51 = vld [vmem:[#allocation32_spill] sm:$0xff] }
 0x281   : > { %v1652_v54 = vmul.f32 0.7978846, %v1588_v22  ;;  %2477 = vmatprep.mubr.bf16.mxu1 %v1895_v32  ;;  %v1836_v49 = vmul.f32 %v1772_v47, %v1324_v27  ;;  %v4842_v45 = vmul.f32 %v1496_v48, %v4779_v38  ;;  %3141 = vtanh.f32 %v1655_v4  ;;  %v5289_v47 = vld [vmem:[#allocation44_spill] sm:$0xff]  ;;  %v5290_v32 = vld [vmem:[#allocation53_spill] sm:$0xff] }
 0x282   : > { %v1840_v0 = vmul.f32 %v1776_v58, %v1328_v13  ;;  %v3134_v59 = vpop.eup %3133  ;;  %3143 = vtanh.f32 %v1659_v44  ;;  %v1656_v25 = vmul.f32 0.7978846, %v1592_v17  ;;  %v1590_v23 = vadd.f32 %v5284_v15, %v4369_v20 }
 0x283   : > { %v1594_v53 = vadd.f32 %v5286_v10, %v5285_v60  ;;  %v3136_v35 = vpop.eup %3135  ;;  %v1774_v62 = vadd.f32 1.0, %v3134_v59  ;;  %v4849_v21 = vmul.f32 0.044715, %v4812_v52  ;;  %3145 = vtanh.f32 %v1652_v54  ;;  %v5294_v10 = vld [vmem:[#allocation54_spill] sm:$0xff] }
 0x284   : > { %v1892_v12 = vpack.c.bf16 %v1840_v0, %v1836_v49  ;;  %v1778_v27 = vadd.f32 1.0, %v3136_v35  ;;  %3147 = vtanh.f32 %v1656_v25  ;;  %v1654_v13 = vmul.f32 0.7978846, %v1590_v23  ;;  %v5292_v0 = vld [vmem:[#allocation49_spill] sm:$0xff]  ;;  %v5293_v23 = vld [vmem:[#allocation42_spill] sm:$0xff] }
 0x285   : > { %v1658_v48 = vmul.f32 0.7978846, %v1594_v53  ;;  %v4852_v5 = vmul.f32 %v1498_v11, %v4785_v34  ;;  %v1337_v9 = vmul.f32 0.5, %v4411_v56  ;;  %v1597_v22 = vadd.f32 %v5289_v47, %v5288_v51  ;;  %v5291_v11 = vld [vmem:[#allocation37_spill] sm:$0xff] }
 0x286   : > { %2365 = vmatmul.mubr.bf16.gmra.mxu0 %v1892_v12  ;;  %v1601_v58 = vadd.f32 %v5290_v32, %v4493_v39  ;;  %v1838_v4 = vmul.f32 %v1774_v62, %v4794_v30  ;;  %v1842_v44 = vmul.f32 %v1778_v27, %v4805_v50  ;;  %v1335_v17 = vmul.f32 0.5, %v4393_v37  ;;  %v5295_v50 = vld [vmem:[#allocation30_spill] sm:$0xff]  ;;  %v5296_v35 = vld [vmem:[#allocation41_spill] sm:$0xff]  ;;  %v5297_v12 = vld [vmem:[#allocation39_spill] sm:$0xff] }
 0x287   : > { %5287 = vst [vmem:[#allocation13_spill] sm:$0xff] %v4852_v5  ;;  %3149 = vtanh.f32 %v1654_v13  ;;  %v1661_v54 = vmul.f32 0.7978846, %v1597_v22  ;;  %v1599_v59 = vadd.f32 %v5292_v0, %v5291_v11  ;;  %v1339_v25 = vmul.f32 0.5, %v4418_v14  ;;  %v5298_v62 = vld [vmem:[#allocation50_spill] sm:$0xff]  ;;  %v5299_v32 = vld [vmem:[#allocation31_spill] sm:$0xff] }
 0x288   : > { %3151 = vtanh.f32 %v1658_v48  ;;  %v1665_v49 = vmul.f32 0.7978846, %v1601_v58  ;;  %v1894_v56 = vpack.c.bf16 %v1842_v44, %v1838_v4  ;;  %v1332_v15 = vmul.f32 0.5, %v4359_v28  ;;  %v5300_v58 = vld [vmem:[#allocation43_spill] sm:$0xff] }
 0x289   : > { %v1603_v53 = vadd.f32 %v5294_v10, %v5293_v23  ;;  %3153 = vtanh.f32 %v1661_v54  ;;  %v1663_v30 = vmul.f32 0.7978846, %v1599_v59  ;;  %v1596_v37 = vadd.f32 %v5296_v35, %v5295_v50  ;;  %v5301_v59 = vld [vmem:[#allocation40_spill] sm:$0xff] }
 0x28a   : > { %v1600_v27 = vadd.f32 %v5298_v62, %v5297_v12  ;;  %2478 = vmatmul.mubr.bf16.gmra.mxu1 %v1894_v56  ;;  %v1336_v13 = vmul.f32 0.5, %v4399_v46  ;;  %v4874_v48 = vmul.f32 0.5, %v4369_v20  ;;  %3155 = vtanh.f32 %v1665_v49  ;;  %v5302_v56 = vld [vmem:[#allocation51_spill] sm:$0xff]  ;;  %v5304_v62 = vld [vmem:[#allocation24_spill] sm:$0xff] }
 0x28b   : > { %v1667_v14 = vmul.f32 0.7978846, %v1603_v53  ;;  %v3138_v28 = vpop.eup %3137  ;;  %3157 = vtanh.f32 %v1663_v30  ;;  %v1660_v47 = vmul.f32 0.7978846, %v1596_v37  ;;  %v1598_v4 = vadd.f32 %v5300_v58, %v5299_v32  ;;  %v5303_v37 = vld [vmem:[#allocation47_spill] sm:$0xff] }
 0x28c   : > { %v1664_v22 = vmul.f32 0.7978846, %v1600_v27  ;;  %v3140_v44 = vpop.eup %3139  ;;  %v1781_v54 = vadd.f32 1.0, %v3138_v28  ;;  %v1338_v0 = vmul.f32 0.5, %v5285_v60  ;;  %v1602_v46 = vadd.f32 %v5302_v56, %v5301_v59 }
 0x28d   : > { %3159 = vtanh.f32 %v1667_v14  ;;  %v1785_v10 = vadd.f32 1.0, %v3140_v44  ;;  %v1341_v20 = vmul.f32 0.5, %v5288_v51  ;;  %v1662_v49 = vmul.f32 0.7978846, %v1598_v4 }
 0x28e   : > { %3161 = vtanh.f32 %v1660_v47  ;;  %v3142_v53 = vpop.eup %3141  ;;  %v1845_v30 = vmul.f32 %v1781_v54, %v4815_v26  ;;  %v1666_v35 = vmul.f32 0.7978846, %v1602_v46  ;;  %v1605_v27 = vadd.f32 %v5304_v62, %v5303_v37 }
 0x28f   : > { %3163 = vtanh.f32 %v1664_v22  ;;  %v3144_v28 = vpop.eup %3143  ;;  %v1849_v58 = vmul.f32 %v1785_v10, %v1337_v9  ;;  %v1783_v60 = vadd.f32 1.0, %v3142_v53  ;;  %v1609_v14 = vadd.f32 %v4678_v7, %v4595_v24  ;;  %v5306_v53 = vld [vmem:[#allocation18_spill] sm:$0xff] }
 0x290   : > { %3165 = vtanh.f32 %v1662_v49  ;;  %v3146_v44 = vpop.eup %3145  ;;  %v1787_v56 = vadd.f32 1.0, %v3144_v28  ;;  %v1345_v51 = vmul.f32 0.5, %v4493_v39  ;;  %v1669_v47 = vmul.f32 0.7978846, %v1605_v27  ;;  %v5305_v49 = vld [vmem:[#allocation14_spill] sm:$0xff] }
 0x291   : > { %3167 = vtanh.f32 %v1666_v35  ;;  %v3148_v4 = vpop.eup %3147  ;;  %v1897_v26 = vpack.c.bf16 %v1849_v58, %v1845_v30  ;;  %v1780_v22 = vadd.f32 1.0, %v3146_v44  ;;  %v1343_v54 = vmul.f32 0.5, %v5291_v11 }
 0x292   : > { %v1673_v46 = vmul.f32 0.7978846, %v1609_v14  ;;  %v1847_v62 = vmul.f32 %v1783_v60, %v1335_v17  ;;  %v1851_v5 = vmul.f32 %v1787_v56, %v1339_v25  ;;  %v1784_v9 = vadd.f32 1.0, %v3148_v4  ;;  %v5308_v4 = vld [vmem:[#allocation55_spill] sm:$0xff] }
 0x293   : > { %3169 = vtanh.f32 %v1669_v47  ;;  %2374 = vmatprep.mubr.bf16.mxu0 %v1897_v26  ;;  %v1347_v7 = vmul.f32 0.5, %v5293_v23  ;;  %v1607_v39 = vadd.f32 %v5305_v49, %v4550_v8  ;;  %v1611_v35 = vadd.f32 %v5306_v53, %v4608_v19  ;;  %v5307_v47 = vld [vmem:[#allocation45_spill] sm:$0xff] }
 0x294   : > { %v3150_v10 = vpop.eup %3149  ;;  %3171 = vtanh.f32 %v1673_v46  ;;  %v1899_v27 = vpack.c.bf16 %v1851_v5, %v1847_v62  ;;  %v1844_v28 = vmul.f32 %v1780_v22, %v1332_v15  ;;  %v1848_v11 = vmul.f32 %v1784_v9, %v1336_v13  ;;  %v5309_v46 = vld [vmem:[#allocation48_spill] sm:$0xff]  ;;  %v5310_v49 = vld [vmem:[#allocation25_spill] sm:$0xff] }
 0x295   : > { %v3152_v30 = vpop.eup %3151  ;;  %v1782_v58 = vadd.f32 1.0, %v3150_v10  ;;  %v1340_v25 = vmul.f32 0.5, %v5295_v50  ;;  %v1671_v60 = vmul.f32 0.7978846, %v1607_v39  ;;  %v1675_v14 = vmul.f32 0.7978846, %v1611_v35 }
 0x296   : > { %v1786_v17 = vadd.f32 1.0, %v3152_v30  ;;  %v3154_v44 = vpop.eup %3153  ;;  %2487 = vmatprep.mubr.bf16.mxu1 %v1899_v27  ;;  %v1896_v23 = vpack.c.bf16 %v1848_v11, %v1844_v28  ;;  %v1344_v56 = vmul.f32 0.5, %v5297_v12  ;;  %v1604_v26 = vadd.f32 %v5308_v4, %v5307_v47 }
 0x297   : > { %v1608_v53 = vadd.f32 %v5310_v49, %v5309_v46  ;;  %v3156_v5 = vpop.eup %3155  ;;  %v1846_v15 = vmul.f32 %v1782_v58, %v4874_v48  ;;  %v1789_v22 = vadd.f32 1.0, %v3154_v44  ;;  %3173 = vtanh.f32 %v1671_v60  ;;  %v5311_v48 = vld [vmem:[#allocation46_spill] sm:$0xff] }
 0x298   : > { %v1850_v13 = vmul.f32 %v1786_v17, %v1338_v0  ;;  %v3158_v50 = vpop.eup %3157  ;;  %2375 = vmatmul.mubr.bf16.gmra.mxu0 %v1896_v23  ;;  %v1793_v62 = vadd.f32 1.0, %v3156_v5  ;;  %3175 = vtanh.f32 %v1675_v14  ;;  %v1668_v9 = vmul.f32 0.7978846, %v1604_v26  ;;  %v5312_v0 = vld [vmem:[#allocation56_spill] sm:$0xff]  ;;  %v5314_v23 = vld [vmem:[#allocation7_spill] sm:$0xff] }
 0x299   : > { %v1672_v10 = vmul.f32 0.7978846, %v1608_v53  ;;  %v1853_v35 = vmul.f32 %v1789_v22, %v1341_v20  ;;  %v1791_v30 = vadd.f32 1.0, %v3158_v50  ;;  %v1342_v27 = vmul.f32 0.5, %v5299_v32  ;;  %v5313_v14 = vld [vmem:[#allocation52_spill] sm:$0xff] }
 0x29a   : > { %v3160_v39 = vpop.eup %3159  ;;  %v1898_v12 = vpack.c.bf16 %v1850_v13, %v1846_v15  ;;  %v1857_v11 = vmul.f32 %v1793_v62, %v1345_v51  ;;  %3177 = vtanh.f32 %v1668_v9  ;;  %v1606_v58 = vadd.f32 %v5312_v0, %v5311_v48 }
 0x29b   : > { %v3162_v28 = vpop.eup %3161  ;;  %v1795_v4 = vadd.f32 1.0, %v3160_v39  ;;  %v1855_v60 = vmul.f32 %v1791_v30, %v1343_v54  ;;  %3179 = vtanh.f32 %v1672_v10  ;;  %v1610_v26 = vadd.f32 %v5314_v23, %v5313_v14 }
 0x29c   : > { %v3164_v17 = vpop.eup %3163  ;;  %2488 = vmatmul.mubr.bf16.gmra.mxu1 %v1898_v12  ;;  %v1788_v44 = vadd.f32 1.0, %v3162_v28  ;;  %v1901_v20 = vpack.c.bf16 %v1857_v11, %v1853_v35  ;;  %v1670_v32 = vmul.f32 0.7978846, %v1606_v58  ;;  %v1346_v13 = vmul.f32 0.5, %v5301_v59  ;;  %v5315_v58 = vld [vmem:[#allocation8_spill] sm:$0xff] }
 0x29d   : > { %v3166_v49 = vpop.eup %3165  ;;  %v1859_v53 = vmul.f32 %v1795_v4, %v1347_v7  ;;  %v1792_v5 = vadd.f32 1.0, %v3164_v17  ;;  %v1674_v50 = vmul.f32 0.7978846, %v1610_v26  ;;  %v1561_v39 = vmul.f32 %v4832_v41, %v4790_v29  ;;  %v5316_v17 = vld [vmem:[#allocation9_spill] sm:$0xff] }
 0x29e   : > { %v3168_v15 = vpop.eup %3167  ;;  %v1852_v51 = vmul.f32 %v1788_v44, %v1340_v25  ;;  %v1790_v22 = vadd.f32 1.0, %v3166_v49  ;;  %2384 = vmatprep.mubr.bf16.mxu0 %v1901_v20  ;;  %3181 = vtanh.f32 %v1670_v32  ;;  %v1613_v7 = vadd.f32 %v4730_v40, %v4656_v16  ;;  %v5317_v49 = vld [vmem:[#allocation11_spill] sm:$0xff] }
 0x29f   : > { %v1903_v62 = vpack.c.bf16 %v1859_v53, %v1855_v60  ;;  %v1856_v9 = vmul.f32 %v1792_v5, %v1344_v56  ;;  %v1794_v54 = vadd.f32 1.0, %v3168_v15  ;;  %3183 = vtanh.f32 %v1674_v50 }
 0x2a0   : > { %v3170_v10 = vpop.eup %3169  ;;  %v1854_v12 = vmul.f32 %v1790_v22, %v1342_v27  ;;  %v1617_v28 = vadd.f32 %v4769_v61, %v4699_v55  ;;  %v1349_v56 = vmul.f32 0.5, %v5303_v37  ;;  %v1353_v11 = vmul.f32 0.5, %v4595_v24 }
 0x2a1   : > { %v3172_v35 = vpop.eup %3171  ;;  %2497 = vmatprep.mubr.bf16.mxu1 %v1903_v62  ;;  %v1900_v25 = vpack.c.bf16 %v1856_v9, %v1852_v51  ;;  %v1858_v59 = vmul.f32 %v1794_v54, %v1346_v13  ;;  %v1797_v30 = vadd.f32 1.0, %v3170_v10  ;;  %v1677_v0 = vmul.f32 0.7978846, %v1613_v7  ;;  %v5319_v51 = vld [vmem:[#allocation10_spill] sm:$0xff]  ;;  %v5320_v13 = vld [vmem:[#allocation20_spill] sm:$0xff] }
 0x2a2   : > { %v1801_v4 = vadd.f32 1.0, %v3172_v35  ;;  %v1499_v41 = vmul.f32 %v4849_v21, %v4812_v52  ;;  %v1681_v40 = vmul.f32 0.7978846, %v1617_v28  ;;  %v1615_v60 = vadd.f32 %v5316_v17, %v5315_v58  ;;  %v5318_v21 = vld [vmem:[#allocation12_spill] sm:$0xff] }
 0x2a3   : > { %2385 = vmatmul.mubr.bf16.gmra.mxu0 %v1900_v25  ;;  %v1902_v27 = vpack.c.bf16 %v1858_v59, %v1854_v12  ;;  %v1861_v44 = vmul.f32 %v1797_v30, %v1349_v56  ;;  %3185 = vtanh.f32 %v1677_v0  ;;  %v1619_v61 = vadd.f32 %v4772_v63, %v4711_v3  ;;  %v5321_v25 = vld [vmem:[#allocation21_spill] sm:$0xff]  ;;  %v5322_v59 = vld [vmem:[#allocation22_spill] sm:$0xff] }
 0x2a4   : > { %v1865_v23 = vmul.f32 %v1801_v4, %v1353_v11  ;;  %v3174_v37 = vpop.eup %3173  ;;  %v1351_v24 = vmul.f32 0.5, %v4550_v8  ;;  %3187 = vtanh.f32 %v1681_v40  ;;  %v1679_v26 = vmul.f32 0.7978846, %v1615_v60 }
 0x2a5   : > { %2498 = vmatmul.mubr.bf16.gmra.mxu1 %v1902_v27  ;;  %v1612_v20 = vadd.f32 %v5318_v21, %v5317_v49  ;;  %v3176_v53 = vpop.eup %3175  ;;  %v1799_v32 = vadd.f32 1.0, %v3174_v37  ;;  %v1683_v15 = vmul.f32 0.7978846, %v1619_v61  ;;  %v1616_v22 = vadd.f32 %v5320_v13, %v5319_v51 }
 0x2a6   : > { %v1905_v5 = vpack.c.bf16 %v1865_v23, %v1861_v44  ;;  %v1355_v50 = vmul.f32 0.5, %v4608_v19  ;;  %v1803_v62 = vadd.f32 1.0, %v3176_v53  ;;  %3189 = vtanh.f32 %v1679_v26 }
 0x2a7   : > { %v1676_v63 = vmul.f32 0.7978846, %v1612_v20  ;;  %v3178_v9 = vpop.eup %3177  ;;  %v1863_v8 = vmul.f32 %v1799_v32, %v1351_v24  ;;  %v1348_v54 = vmul.f32 0.5, %v5307_v47  ;;  %3191 = vtanh.f32 %v1683_v15 }
 0x2a8   : > { %2394 = vmatprep.mubr.bf16.mxu0 %v1905_v5  ;;  %v1680_v10 = vmul.f32 0.7978846, %v1616_v22  ;;  %v3180_v12 = vpop.eup %3179  ;;  %v1867_v7 = vmul.f32 %v1803_v62, %v1355_v50  ;;  %v1796_v35 = vadd.f32 1.0, %v3178_v9  ;;  %v1614_v30 = vadd.f32 %v5322_v59, %v5321_v25 }
 0x2a9   : > { %3193 = vtanh.f32 %v1676_v63  ;;  %v1352_v28 = vmul.f32 0.5, %v5309_v46  ;;  %v1800_v19 = vadd.f32 1.0, %v3180_v12  ;;  %v1618_v56 = vadd.f32 %v4755_v1, %v4672_v31 }
 0x2aa   : > { %3195 = vtanh.f32 %v1680_v10  ;;  %v1563_v11 = vmul.f32 %v1499_v41, %v4812_v52  ;;  %v1907_v4 = vpack.c.bf16 %v1867_v7, %v1863_v8  ;;  %v1860_v47 = vmul.f32 %v1796_v35, %v1348_v54 }
 0x2ab   : > { %v1678_v0 = vmul.f32 0.7978846, %v1614_v30  ;;  %v3182_v27 = vpop.eup %3181  ;;  %v1864_v40 = vmul.f32 %v1800_v19, %v1352_v28  ;;  %v1682_v17 = vmul.f32 0.7978846, %v1618_v56  ;;  %v1621_v60 = vadd.f32 %v4824_v2, %v4766_v42 }
 0x2ac   : > { %v1625_v44 = vadd.f32 %v1561_v39, %v4790_v29  ;;  %v3184_v23 = vpop.eup %3183  ;;  %2507 = vmatprep.mubr.bf16.mxu1 %v1907_v4  ;;  %v1350_v46 = vmul.f32 0.5, %v5311_v48  ;;  %v1354_v61 = vmul.f32 0.5, %v5313_v14  ;;  %v1798_v1 = vadd.f32 1.0, %v3182_v27 }
 0x2ad   : > { %3197 = vtanh.f32 %v1678_v0  ;;  %v1904_v41 = vpack.c.bf16 %v1864_v40, %v1860_v47  ;;  %v1802_v37 = vadd.f32 1.0, %v3184_v23  ;;  %v1685_v24 = vmul.f32 0.7978846, %v1621_v60 }
 0x2ae   : > { %3199 = vtanh.f32 %v1682_v17  ;;  %v1357_v26 = vmul.f32 0.5, %v4656_v16  ;;  %v1689_v21 = vmul.f32 0.7978846, %v1625_v44  ;;  %v1623_v2 = vadd.f32 %v4837_v33, %v4776_v36 }
 0x2af   : > { %v1627_v39 = vadd.f32 %v1563_v11, %v4812_v52  ;;  %2395 = vmatmul.mubr.bf16.gmra.mxu0 %v1904_v41  ;;  %v1862_v20 = vmul.f32 %v1798_v1, %v1350_v46  ;;  %v1866_v53 = vmul.f32 %v1802_v37, %v1354_v61  ;;  %v1361_v48 = vmul.f32 0.5, %v4699_v55 }
 0x2b0   : > { %3201 = vtanh.f32 %v1685_v24  ;;  %v3186_v14 = vpop.eup %3185  ;;  %v1687_v5 = vmul.f32 0.7978846, %v1623_v2  ;;  %v1620_v15 = vadd.f32 %v4797_v18, %v4734_v43  ;;  %v1359_v33 = vmul.f32 0.5, %v5315_v58  ;;  %v5323_v58 = vld [vmem:[#allocation13_spill] sm:$0xff] }
 0x2b1   : > { %3203 = vtanh.f32 %v1689_v21  ;;  %v1691_v32 = vmul.f32 0.7978846, %v1627_v39  ;;  %v3188_v16 = vpop.eup %3187  ;;  %v1906_v13 = vpack.c.bf16 %v1866_v53, %v1862_v20  ;;  %v1805_v22 = vadd.f32 1.0, %v3186_v14 }
 0x2b2   : > { %v1624_v50 = vadd.f32 %v4842_v45, %v4779_v38  ;;  %v1809_v62 = vadd.f32 1.0, %v3188_v16  ;;  %v1363_v63 = vmul.f32 0.5, %v4711_v3  ;;  %3205 = vtanh.f32 %v1687_v5 }
 0x2b3   : > { %v1684_v55 = vmul.f32 0.7978846, %v1620_v15  ;;  %v3190_v9 = vpop.eup %3189  ;;  %2508 = vmatmul.mubr.bf16.gmra.mxu1 %v1906_v13  ;;  %v1869_v8 = vmul.f32 %v1805_v22, %v1357_v26  ;;  %3207 = vtanh.f32 %v1691_v32  ;;  %v1622_v18 = vadd.f32 %v4802_v6, %v4743_v57 }
 0x2b4   : > { %v1688_v54 = vmul.f32 0.7978846, %v1624_v50  ;;  %v3192_v10 = vpop.eup %3191  ;;  %v1873_v12 = vmul.f32 %v1809_v62, %v1361_v48  ;;  %v1807_v7 = vadd.f32 1.0, %v3190_v9  ;;  %v1626_v45 = vadd.f32 %v5323_v58, %v4785_v34 }
 0x2b5   : > { %3209 = vtanh.f32 %v1684_v55  ;;  %v1811_v59 = vadd.f32 1.0, %v3192_v10  ;;  %v1356_v3 = vmul.f32 0.5, %v5317_v49  ;;  %v1686_v30 = vmul.f32 0.7978846, %v1622_v18 }
 0x2b6   : > { %v3194_v35 = vpop.eup %3193  ;;  %3211 = vtanh.f32 %v1688_v54  ;;  %v1909_v19 = vpack.c.bf16 %v1873_v12, %v1869_v8  ;;  %v1360_v56 = vmul.f32 0.5, %v5319_v51  ;;  %v1690_v4 = vmul.f32 0.7978846, %v1626_v45  ;;  %v1980_v45 = vld [vmem:[%s5133_s6] sm:$0x3] }
 0x2b7   : > { %v3196_v28 = vpop.eup %3195  ;;  %v1804_v11 = vadd.f32 1.0, %v3194_v35  ;;  %v1871_v6 = vmul.f32 %v1807_v7, %v1359_v33  ;;  %v1875_v47 = vmul.f32 %v1811_v59, %v1363_v63  ;;  %3213 = vtanh.f32 %v1686_v30  ;;  %v5324_v35 = vld [vmem:[#allocation5_spill] sm:$0xff] }
 0x2b8   : > { %v1808_v0 = vadd.f32 1.0, %v3196_v28  ;;  %2404 = vmatprep.mubr.bf16.mxu0 %v1909_v19  ;;  %3215 = vtanh.f32 %v1690_v4  ;;  %v1358_v46 = vmul.f32 0.5, %v5321_v25  ;;  %v1362_v51 = vmul.f32 0.5, %v4672_v31 }
 0x2b9   : > { %v1911_v40 = vpack.c.bf16 %v1875_v47, %v1871_v6  ;;  %v1868_v17 = vmul.f32 %v1804_v11, %v1356_v3  ;;  %v1365_v21 = vmul.f32 0.5, %v4766_v42  ;;  %v1369_v2 = vmul.f32 0.5, %v4790_v29 }
 0x2ba   : > { %v3198_v27 = vpop.eup %3197  ;;  %v1872_v60 = vmul.f32 %v1808_v0, %v1360_v56  ;;  %v1367_v31 = vmul.f32 0.5, %v4776_v36  ;;  %v1371_v15 = vmul.f32 0.5, %v4812_v52  ;;  %v1364_v42 = vmul.f32 0.5, %v4734_v43  ;;  %v3217_v0 = vld [vmem:[%s3406_s17] sm:$0xff] }
 0x2bb   : > { %v3200_v44 = vpop.eup %3199  ;;  %v1806_v49 = vadd.f32 1.0, %v3198_v27  ;;  %2517 = vmatprep.mubr.bf16.mxu1 %v1911_v40  ;;  %v1368_v62 = vmul.f32 0.5, %v4779_v38  ;;  %v1366_v52 = vmul.f32 0.5, %v4743_v57  ;;  %v1370_v10 = vmul.f32 0.5, %v4785_v34  ;;  %v5325_v57 = vld [vmem:[#allocation6_spill] sm:$0xff] }
 0x2bc   : > { %v1908_v23 = vpack.c.bf16 %v1872_v60, %v1868_v17  ;;  %v1810_v61 = vadd.f32 1.0, %v3200_v44  ;;  %v4970_v59 = vrot.slane %v1980_v45, %v5324_v35  ;;  %v4974_v3 = vrot.slane %v1980_v45, %v5325_v57 }
 0x2bd   : > { %v3202_v1 = vpop.eup %3201  ;;  %v1870_v37 = vmul.f32 %v1806_v49, %v1358_v46  ;;  %v3218_v49 = vld [vmem:[%s3406_s17 + $0x8] sm:$0xff] }
 0x2be   : > { %v3204_v41 = vpop.eup %3203  ;;  %2405 = vmatmul.mubr.bf16.gmra.mxu0 %v1908_v23  ;;  %v1874_v24 = vmul.f32 %v1810_v61, %v1362_v51  ;;  %v1813_v26 = vadd.f32 1.0, %v3202_v1  ;;  %v3219_v61 = vld [vmem:[%s3406_s17 + $0x10] sm:$0xff] }
 0x2bf   : > { %v1817_v39 = vadd.f32 1.0, %v3204_v41  ;;  %v3206_v20 = vpop.eup %3205 }
 0x2c0   : > { %v1910_v53 = vpack.c.bf16 %v1874_v24, %v1870_v37  ;;  %v3208_v48 = vpop.eup %3207  ;;  %v1877_v14 = vmul.f32 %v1813_v26, %v1365_v21  ;;  %v1815_v25 = vadd.f32 1.0, %v3206_v20  ;;  %v3220_v37 = vld [vmem:[%s3406_s17 + $0x18] sm:$0xff] }
 0x2c1   : > { %v1881_v5 = vmul.f32 %v1817_v39, %v1369_v2  ;;  %v1819_v16 = vadd.f32 1.0, %v3208_v48 }
 0x2c2   : > { %v3210_v32 = vpop.eup %3209  ;;  %2518 = vmatmul.mubr.bf16.gmra.mxu1 %v1910_v53  ;;  %v1879_v29 = vmul.f32 %v1815_v25, %v1367_v31 }
 0x2c3   : > { %v3212_v13 = vpop.eup %3211  ;;  %v1913_v22 = vpack.c.bf16 %v1881_v5, %v1877_v14  ;;  %v1812_v33 = vadd.f32 1.0, %v3210_v32  ;;  %v1883_v50 = vmul.f32 %v1819_v16, %v1371_v15  ;;  %v3221_v5 = vld [vmem:[%s3406_s17 + $0x20] sm:$0xff] }
 0x2c4   : > { %v1816_v63 = vadd.f32 1.0, %v3212_v13  ;;  %v3214_v55 = vpop.eup %3213  ;;  %v3222_v13 = vld [vmem:[%s3406_s17 + $0x28] sm:$0xff] }
 0x2c5   : > { %2414 = vmatprep.mubr.bf16.mxu0 %v1913_v22  ;;  %v3216_v9 = vpop.eup %3215  ;;  %v1915_v8 = vpack.c.bf16 %v1883_v50, %v1879_v29  ;;  %v1876_v54 = vmul.f32 %v1812_v33, %v1364_v42  ;;  %v1814_v18 = vadd.f32 1.0, %v3214_v55  ;;  %v3223_v50 = vld [vmem:[%s3406_s17 + $0x30] sm:$0xff]  ;;  %v3224_v55 = vld [vmem:[%s3406_s17 + $0x38] sm:$0xff] }
 0x2c6   : > { %v1880_v36 = vmul.f32 %v1816_v63, %v1368_v62  ;;  %v1818_v43 = vadd.f32 1.0, %v3216_v9 }
 0x2c7   : > { %2527 = vmatprep.mubr.bf16.mxu1 %v1915_v8  ;;  %v1878_v7 = vmul.f32 %v1814_v18, %v1366_v52 }
 0x2c8   : > { %v1912_v12 = vpack.c.bf16 %v1880_v36, %v1876_v54  ;;  %v1882_v58 = vmul.f32 %v1818_v43, %v1370_v10 }
 0x2ca   : > { %2415 = vmatmul.mubr.bf16.gmra.mxu0 %v1912_v12  ;;  %v1914_v38 = vpack.c.bf16 %v1882_v58, %v1878_v7 }
 0x2cc   : > { %2528 = vmatmul.mubr.bf16.gmra.mxu1 %v1914_v38  ;;  %v3225_v38 = vld [vmem:[%s3406_s17 + $0x40] sm:$0xff] }
 0x31b   : > { %v2346_v34 = vpop.f32.mrf.mxu0 }
 0x31c   : > { %v2347_v30 = vadd.f32 %v2346_v34, %v4970_v59 }
 0x31d   : > { %v2348_v28 = vpop.f32.mrf.mxu0 }
 0x31e   : > { %v2349_v56 = vadd.f32 %v2348_v28, %v4974_v3 }
 0x31f   : > { %v2350_v4 = vpop.f32.mrf.mxu0 }
 0x320   : > { %v2459_v19 = vpop.f32.mrf.mxu1  ;;  %v2351_v47 = vadd.f32 %v2350_v4, %v4970_v59 }
 0x321   : > { %v2460_v11 = vadd.f32 %v2459_v19, %v2347_v30  ;;  %v2352_v17 = vpop.f32.mrf.mxu0  ;;  %v3226_v30 = vld [vmem:[%s3406_s17 + $0x48] sm:$0xff] }
 0x322   : > { %v2461_v6 = vpop.f32.mrf.mxu1  ;;  %v2353_v44 = vadd.f32 %v2352_v17, %v4974_v3 }
 0x323   : > { %v2538_v27 = vadd.f32 %v3217_v0, %v2460_v11  ;;  %v2462_v40 = vadd.f32 %v2461_v6, %v2349_v56  ;;  %v3227_v11 = vld [vmem:[%s3406_s17 + $0x50] sm:$0xff] }
 0x324   : > { %v2463_v60 = vpop.f32.mrf.mxu1 }
 0x325   : > { %2570 = vst [vmem:[%s4983_s29] sm:$0xff] %v2538_v27  ;;  %v2539_v23 = vadd.f32 %v3218_v49, %v2462_v40  ;;  %v2464_v46 = vadd.f32 %v2463_v60, %v2351_v47  ;;  %v3228_v47 = vld [vmem:[%s3406_s17 + $0x58] sm:$0xff] }
 0x326   : > { %v2465_v51 = vpop.f32.mrf.mxu1 }
 0x327   : > { %2571 = vst [vmem:[%s4983_s29 + $0x8] sm:$0xff] %v2539_v23  ;;  %v2540_v1 = vadd.f32 %v3219_v61, %v2464_v46  ;;  %v2466_v41 = vadd.f32 %v2465_v51, %v2353_v44  ;;  %v3229_v61 = vld [vmem:[%s3406_s17 + $0x60] sm:$0xff] }
 0x329   : > { %2572 = vst [vmem:[%s4983_s29 + $0x10] sm:$0xff] %v2540_v1  ;;  %v2541_v24 = vadd.f32 %v3220_v37, %v2466_v41 }
 0x32b   : > { %2573 = vst [vmem:[%s4983_s29 + $0x18] sm:$0xff] %v2541_v24 }
 0x332   : > { %v2356_v26 = vpop.f32.mrf.mxu0 }
 0x333   : > { %v2357_v21 = vadd.f32 %v2356_v26, %v4970_v59 }
 0x334   : > { %v2358_v39 = vpop.f32.mrf.mxu0 }
 0x335   : > { %v2469_v2 = vpop.f32.mrf.mxu1  ;;  %v2359_v53 = vadd.f32 %v2358_v39, %v4974_v3 }
 0x336   : > { %v2470_v20 = vadd.f32 %v2469_v2, %v2357_v21  ;;  %v2360_v14 = vpop.f32.mrf.mxu0  ;;  %v3230_v21 = vld [vmem:[%s3406_s17 + $0x68] sm:$0xff] }
 0x337   : > { %v2471_v48 = vpop.f32.mrf.mxu1  ;;  %v2361_v31 = vadd.f32 %v2360_v14, %v4970_v59 }
 0x338   : > { %v2542_v25 = vadd.f32 %v3221_v5, %v2470_v20  ;;  %v2472_v32 = vadd.f32 %v2471_v48, %v2359_v53  ;;  %v2362_v16 = vpop.f32.mrf.mxu0  ;;  %v3231_v53 = vld [vmem:[%s3406_s17 + $0x70] sm:$0xff] }
 0x339   : > { %v2473_v15 = vpop.f32.mrf.mxu1  ;;  %v2363_v33 = vadd.f32 %v2362_v16, %v4974_v3 }
 0x33a   : > { %2574 = vst [vmem:[%s4983_s29 + $0x20] sm:$0xff] %v2542_v25  ;;  %v2543_v22 = vadd.f32 %v3222_v13, %v2472_v32  ;;  %v2474_v42 = vadd.f32 %v2473_v15, %v2361_v31  ;;  %v3232_v32 = vld [vmem:[%s3406_s17 + $0x78] sm:$0xff] }
 0x33b   : > { %v2475_v29 = vpop.f32.mrf.mxu1 }
 0x33c   : > { %2575 = vst [vmem:[%s4983_s29 + $0x28] sm:$0xff] %v2543_v22  ;;  %v2544_v62 = vadd.f32 %v3223_v50, %v2474_v42  ;;  %v2476_v63 = vadd.f32 %v2475_v29, %v2363_v33  ;;  %v3233_v29 = vld [vmem:[%s3406_s17 + $0x80] sm:$0xff] }
 0x33e   : > { %2576 = vst [vmem:[%s4983_s29 + $0x30] sm:$0xff] %v2544_v62  ;;  %v2545_v9 = vadd.f32 %v3224_v55, %v2476_v63 }
 0x340   : > { %2577 = vst [vmem:[%s4983_s29 + $0x38] sm:$0xff] %v2545_v9 }
 0x346   : > { %v2366_v8 = vpop.f32.mrf.mxu0 }
 0x347   : > { %v2367_v54 = vadd.f32 %v2366_v8, %v4970_v59  ;;  %v3234_v8 = vld [vmem:[%s3406_s17 + $0x88] sm:$0xff] }
 0x348   : > { %v2368_v36 = vpop.f32.mrf.mxu0 }
 0x349   : > { %v2369_v18 = vadd.f32 %v2368_v36, %v4974_v3 }
 0x34a   : > { %v2370_v52 = vpop.f32.mrf.mxu0  ;;  %v2479_v10 = vpop.f32.mrf.mxu1 }
 0x34b   : > { %v2480_v43 = vadd.f32 %v2479_v10, %v2367_v54  ;;  %v2371_v12 = vadd.f32 %v2370_v52, %v4970_v59  ;;  %v3235_v10 = vld [vmem:[%s3406_s17 + $0x90] sm:$0xff] }
 0x34c   : > { %v2372_v7 = vpop.f32.mrf.mxu0  ;;  %v2481_v58 = vpop.f32.mrf.mxu1 }
 0x34d   : > { %v2546_v45 = vadd.f32 %v3225_v38, %v2480_v43  ;;  %v2482_v35 = vadd.f32 %v2481_v58, %v2369_v18  ;;  %v2373_v57 = vadd.f32 %v2372_v7, %v4974_v3  ;;  %v3236_v7 = vld [vmem:[%s3406_s17 + $0x98] sm:$0xff] }
 0x34e   : > { %v2483_v34 = vpop.f32.mrf.mxu1 }
 0x34f   : > { %2578 = vst [vmem:[%s4983_s29 + $0x40] sm:$0xff] %v2546_v45  ;;  %v2547_v28 = vadd.f32 %v3226_v30, %v2482_v35  ;;  %v2484_v19 = vadd.f32 %v2483_v34, %v2371_v12 }
 0x350   : > { %v2485_v56 = vpop.f32.mrf.mxu1 }
 0x351   : > { %2579 = vst [vmem:[%s4983_s29 + $0x48] sm:$0xff] %v2547_v28  ;;  %v2548_v4 = vadd.f32 %v3227_v11, %v2484_v19  ;;  %v2486_v6 = vadd.f32 %v2485_v56, %v2373_v57 }
 0x353   : > { %2580 = vst [vmem:[%s4983_s29 + $0x50] sm:$0xff] %v2548_v4  ;;  %v2549_v0 = vadd.f32 %v3228_v47, %v2486_v6  ;;  %v3237_v4 = vld [vmem:[%s3406_s17 + $0xa0] sm:$0xff] }
 0x355   : > { %2581 = vst [vmem:[%s4983_s29 + $0x58] sm:$0xff] %v2549_v0 }
 0x358   : > { %v2376_v27 = vpop.f32.mrf.mxu0 }
 0x359   : > { %v2377_v40 = vadd.f32 %v2376_v27, %v4970_v59 }
 0x35a   : > { %v2378_v17 = vpop.f32.mrf.mxu0 }
 0x35b   : > { %v2379_v44 = vadd.f32 %v2378_v17, %v4974_v3 }
 0x35c   : > { %v2489_v60 = vpop.f32.mrf.mxu1  ;;  %v2380_v23 = vpop.f32.mrf.mxu0 }
 0x35d   : > { %v2490_v49 = vadd.f32 %v2489_v60, %v2377_v40  ;;  %v2381_v51 = vadd.f32 %v2380_v23, %v4970_v59  ;;  %v3238_v40 = vld [vmem:[%s3406_s17 + $0xa8] sm:$0xff] }
 0x35e   : > { %v2491_v46 = vpop.f32.mrf.mxu1  ;;  %v2382_v37 = vpop.f32.mrf.mxu0 }
 0x35f   : > { %v2550_v1 = vadd.f32 %v3229_v61, %v2490_v49  ;;  %v2492_v41 = vadd.f32 %v2491_v46, %v2379_v44  ;;  %v2383_v26 = vadd.f32 %v2382_v37, %v4974_v3  ;;  %v3239_v49 = vld [vmem:[%s3406_s17 + $0xb0] sm:$0xff] }
 0x360   : > { %v2493_v24 = vpop.f32.mrf.mxu1 }
 0x361   : > { %2582 = vst [vmem:[%s4983_s29 + $0x60] sm:$0xff] %v2550_v1  ;;  %v2551_v2 = vadd.f32 %v3230_v21, %v2492_v41  ;;  %v2494_v39 = vadd.f32 %v2493_v24, %v2381_v51  ;;  %v3240_v51 = vld [vmem:[%s3406_s17 + $0xb8] sm:$0xff] }
 0x362   : > { %v2495_v20 = vpop.f32.mrf.mxu1 }
 0x363   : > { %2583 = vst [vmem:[%s4983_s29 + $0x68] sm:$0xff] %v2551_v2  ;;  %v2552_v48 = vadd.f32 %v3231_v53, %v2494_v39  ;;  %v2496_v14 = vadd.f32 %v2495_v20, %v2383_v26  ;;  %v2386_v5 = vpop.f32.mrf.mxu0 }
 0x364   : > { %v2387_v25 = vadd.f32 %v2386_v5, %v4970_v59 }
 0x365   : > { %2584 = vst [vmem:[%s4983_s29 + $0x70] sm:$0xff] %v2552_v48  ;;  %v2553_v31 = vadd.f32 %v3232_v32, %v2496_v14  ;;  %v2499_v15 = vpop.f32.mrf.mxu1  ;;  %v2388_v16 = vpop.f32.mrf.mxu0  ;;  %v3241_v48 = vld [vmem:[%s3406_s17 + $0xc0] sm:$0xff] }
 0x366   : > { %v2500_v13 = vadd.f32 %v2499_v15, %v2387_v25  ;;  %v2389_v22 = vadd.f32 %v2388_v16, %v4974_v3 }
 0x367   : > { %2585 = vst [vmem:[%s4983_s29 + $0x78] sm:$0xff] %v2553_v31  ;;  %v2501_v42 = vpop.f32.mrf.mxu1  ;;  %v2390_v33 = vpop.f32.mrf.mxu0  ;;  %v3242_v31 = vld [vmem:[%s3406_s17 + $0xc8] sm:$0xff] }
 0x368   : > { %v2554_v50 = vadd.f32 %v3233_v29, %v2500_v13  ;;  %v2502_v62 = vadd.f32 %v2501_v42, %v2389_v22  ;;  %v2391_v63 = vadd.f32 %v2390_v33, %v4970_v59  ;;  %v3243_v22 = vld [vmem:[%s3406_s17 + $0xd0] sm:$0xff] }
 0x369   : > { %v2503_v55 = vpop.f32.mrf.mxu1  ;;  %v2392_v9 = vpop.f32.mrf.mxu0 }
 0x36a   : > { %2586 = vst [vmem:[%s4983_s29 + $0x80] sm:$0xff] %v2554_v50  ;;  %v2555_v54 = vadd.f32 %v3234_v8, %v2502_v62  ;;  %v2504_v36 = vadd.f32 %v2503_v55, %v2391_v63  ;;  %v2393_v18 = vadd.f32 %v2392_v9, %v4974_v3  ;;  %v3244_v50 = vld [vmem:[%s3406_s17 + $0xd8] sm:$0xff] }
 0x36b   : > { %v2505_v52 = vpop.f32.mrf.mxu1 }
 0x36c   : > { %2587 = vst [vmem:[%s4983_s29 + $0x88] sm:$0xff] %v2555_v54  ;;  %v2556_v43 = vadd.f32 %v3235_v10, %v2504_v36  ;;  %v2506_v12 = vadd.f32 %v2505_v52, %v2393_v18  ;;  %v3245_v10 = vld [vmem:[%s3406_s17 + $0xe0] sm:$0xff] }
 0x36e   : > { %2588 = vst [vmem:[%s4983_s29 + $0x90] sm:$0xff] %v2556_v43  ;;  %v2557_v58 = vadd.f32 %v3236_v7, %v2506_v12 }
 0x36f   : > { %v2396_v38 = vpop.f32.mrf.mxu0 }
 0x370   : > { %2589 = vst [vmem:[%s4983_s29 + $0x98] sm:$0xff] %v2557_v58  ;;  %v2397_v45 = vadd.f32 %v2396_v38, %v4970_v59 }
 0x371   : > { %v2398_v35 = vpop.f32.mrf.mxu0 }
 0x372   : > { %v2399_v57 = vadd.f32 %v2398_v35, %v4974_v3 }
 0x373   : > { %v2509_v34 = vpop.f32.mrf.mxu1  ;;  %v2400_v30 = vpop.f32.mrf.mxu0 }
 0x374   : > { %v2510_v28 = vadd.f32 %v2509_v34, %v2397_v45  ;;  %v2401_v19 = vadd.f32 %v2400_v30, %v4970_v59  ;;  %v3246_v45 = vld [vmem:[%s3406_s17 + $0xe8] sm:$0xff] }
 0x375   : > { %v2511_v56 = vpop.f32.mrf.mxu1  ;;  %v2402_v11 = vpop.f32.mrf.mxu0 }
 0x376   : > { %v2558_v6 = vadd.f32 %v3237_v4, %v2510_v28  ;;  %v2512_v47 = vadd.f32 %v2511_v56, %v2399_v57  ;;  %v2403_v0 = vadd.f32 %v2402_v11, %v4974_v3 }
 0x377   : > { %v2513_v27 = vpop.f32.mrf.mxu1 }
 0x378   : > { %2590 = vst [vmem:[%s4983_s29 + $0xa0] sm:$0xff] %v2558_v6  ;;  %v2559_v17 = vadd.f32 %v3238_v40, %v2512_v47  ;;  %v2514_v60 = vadd.f32 %v2513_v27, %v2401_v19 }
 0x379   : > { %v2515_v44 = vpop.f32.mrf.mxu1 }
 0x37a   : > { %2591 = vst [vmem:[%s4983_s29 + $0xa8] sm:$0xff] %v2559_v17  ;;  %v2560_v23 = vadd.f32 %v3239_v49, %v2514_v60  ;;  %v2516_v46 = vadd.f32 %v2515_v44, %v2403_v0 }
 0x37c   : > { %2592 = vst [vmem:[%s4983_s29 + $0xb0] sm:$0xff] %v2560_v23  ;;  %v2561_v61 = vadd.f32 %v3240_v51, %v2516_v46 }
 0x37e   : > { %v2406_v1 = vpop.f32.mrf.mxu0  ;;  %2593 = vst [vmem:[%s4983_s29 + $0xb8] sm:$0xff] %v2561_v61 }
 0x37f   : > { %v2407_v41 = vadd.f32 %v2406_v1, %v4970_v59 }
 0x380   : > { %v2408_v37 = vpop.f32.mrf.mxu0 }
 0x381   : > { %v2409_v24 = vadd.f32 %v2408_v37, %v4974_v3 }
 0x382   : > { %v2519_v26 = vpop.f32.mrf.mxu1  ;;  %v2410_v21 = vpop.f32.mrf.mxu0 }
 0x383   : > { %v2520_v2 = vadd.f32 %v2519_v26, %v2407_v41  ;;  %v2411_v39 = vadd.f32 %v2410_v21, %v4970_v59 }
 0x384   : > { %v2521_v20 = vpop.f32.mrf.mxu1  ;;  %v2412_v53 = vpop.f32.mrf.mxu0 }
 0x385   : > { %v2562_v14 = vadd.f32 %v3241_v48, %v2520_v2  ;;  %v2522_v5 = vadd.f32 %v2521_v20, %v2409_v24  ;;  %v2413_v25 = vadd.f32 %v2412_v53, %v4974_v3 }
 0x386   : > { %v2523_v32 = vpop.f32.mrf.mxu1 }
 0x387   : > { %2594 = vst [vmem:[%s4983_s29 + $0xc0] sm:$0xff] %v2562_v14  ;;  %v2563_v15 = vadd.f32 %v3242_v31, %v2522_v5  ;;  %v2524_v16 = vadd.f32 %v2523_v32, %v2411_v39 }
 0x388   : > { %v2525_v13 = vpop.f32.mrf.mxu1 }
 0x389   : > { %2595 = vst [vmem:[%s4983_s29 + $0xc8] sm:$0xff] %v2563_v15  ;;  %v2564_v42 = vadd.f32 %v3243_v22, %v2524_v16  ;;  %v2526_v33 = vadd.f32 %v2525_v13, %v2413_v25 }
 0x38a   : > { %v2416_v29 = vpop.f32.mrf.mxu0 }
 0x38b   : > { %2596 = vst [vmem:[%s4983_s29 + $0xd0] sm:$0xff] %v2564_v42  ;;  %v2565_v62 = vadd.f32 %v3244_v50, %v2526_v33  ;;  %v2417_v63 = vadd.f32 %v2416_v29, %v4970_v59 }
 0x38c   : > { %v2418_v55 = vpop.f32.mrf.mxu0  ;;  %v2529_v9 = vpop.f32.mrf.mxu1 }
 0x38d   : > { %2597 = vst [vmem:[%s4983_s29 + $0xd8] sm:$0xff] %v2565_v62  ;;  %v2419_v8 = vadd.f32 %v2418_v55, %v4974_v3  ;;  %v2530_v54 = vadd.f32 %v2529_v9, %v2417_v63 }
 0x38e   : > { %v2420_v36 = vpop.f32.mrf.mxu0  ;;  %v2531_v18 = vpop.f32.mrf.mxu1 }
 0x38f   : > { %v2421_v52 = vadd.f32 %v2420_v36, %v4970_v59  ;;  %v2566_v43 = vadd.f32 %v3245_v10, %v2530_v54  ;;  %v2532_v12 = vadd.f32 %v2531_v18, %v2419_v8  ;;  %v3247_v59 = vld [vmem:[%s3406_s17 + $0xf0] sm:$0xff] }
 0x390   : > { %v2422_v7 = vpop.f32.mrf.mxu0  ;;  %v2533_v58 = vpop.f32.mrf.mxu1 }
 0x391   : > { %v2423_v38 = vadd.f32 %v2422_v7, %v4974_v3  ;;  %2598 = vst [vmem:[%s4983_s29 + $0xe0] sm:$0xff] %v2566_v43  ;;  %v2567_v35 = vadd.f32 %v3246_v45, %v2532_v12  ;;  %v2534_v57 = vadd.f32 %v2533_v58, %v2421_v52  ;;  %v3248_v3 = vld [vmem:[%s3406_s17 + $0xf8] sm:$0xff] }
 0x392   : > { %v2535_v34 = vpop.f32.mrf.mxu1 }
 0x393   : > { %2599 = vst [vmem:[%s4983_s29 + $0xe8] sm:$0xff] %v2567_v35  ;;  %v2568_v30 = vadd.f32 %v3247_v59, %v2534_v57  ;;  %v2536_v28 = vadd.f32 %v2535_v34, %v2423_v38 }
 0x395   : > { %2600 = vst [vmem:[%s4983_s29 + $0xf0] sm:$0xff] %v2568_v30  ;;  %v2569_v19 = vadd.f32 %v3248_v3, %v2536_v28 }
 0x397   : > { %2601 = vst [vmem:[%s4983_s29 + $0xf8] sm:$0xff] %v2569_v19 }
 0x398   : > { %3262 = shalt.err (!%p3259_p3)
}
 0x399   : > { %s3263_s17 = scalar_lea.hbm %s5078_s15, 4096  ;;  %s3267_s23 = scalar_lea.hbm %s5134_s7, 16384 }
 0x39a   : > { %p3264_p4 = scmp.ne.s32.totalorder %s5078_s15, %s3263_s17  ;;  %p3268_p9 = scmp.lt.s32.totalorder %s5078_s15, %s5134_s7 }
 0x39b   : > { %p3269_p10 = scmp.lt.s32.totalorder %s3267_s23, %s3263_s17 }
 0x39c   : > { %p3265_p7 = pnand %p3264_p4, %p3392_p5 }
 0x39d   : > { %p3270_p11 = por %p3269_p10, %p3268_p9 }
 0x39e   : > { %p3266_p8 = pneg %p3265_p7 }
 0x3a0   : > { %p3271_p12 = pnand %p3270_p11, %p3266_p8 }
 0x3a2   : > { %3274 = shalt.err (!%p3271_p12)
}
 0x3a3   : > { %s3312_s13 = smov 256   ;;  %s3313_s14 = smov 16  }
 0x3a4   : > { %2824 = dma.vmem_to_hbm [thread:$0]  (%p3392_p5), %s5080_s9, 4096, %s5078_s15, %s5087_s28, %s3312_s13, %s3312_s13, %s3313_s14  }
 0x3a5 PF: > { %p2830_p13 = scmp.ge.s32.totalorder %s3309_s27, 2  ;;  %s2632_s16 = sand.u32 1, %s3297_s24  }
 0x3a6   : > { %s2633_s18 = scalar_lea.sflag [#allocation3], %s2632_s16 }
 0x3a7   : > { %p2827_p0 = pnand %p2830_p13, %p3396_p6 }
 0x3a9   : > { %p2828_p1 = pneg %p2827_p0 }
 0x3ab   : > { %3292 = dma.done.wait (%p2828_p1), %s2633_s18, 4096  }
 0x3ac   : > { %3294 = vsyncadd (%p2828_p1), %s2633_s18, 4294963200  ;;  %p17_p2 = scmp.ge.s32.totalorder %s3379_s30, 6   ;;  %s5326_s24 = smov %s3301_s25 }
 0x3ad   : > { %s5327_s25 = smov %s3305_s26  ;;  %s5328_s26 = smov %s3390_s10 }
 0x3ae   : > { %s5329_s27 = smov %s3379_s30  ;;  %19 = sbr.rel (!%p17_p2) target bundleno = 3 (0x3), region = 83 }
 0x3b3   :  { %2638 = vsyncpa [#allocation3], 1 }
 0x3b4   :  { %2640 = vsyncpa [#allocation3 + $0x1], 1 }

// kernel: transformer_block.2
= control target key start
LH: loop header
LB: loop body
LE: loop exit
PB: predicated region body
PF: predicated region fallthrough
CT: control target
= control target key end

     0   :  { %s7468_s30 = smov 0   ;;  %s12133_s0 = inlined_call_operand.vmem [shape: f32[2,256,256], index: 0, kind: input, shape index: {}]   ;;  %s12134_s1 = inlined_call_operand.vmem [shape: f32[1,256], index: 1, kind: input, shape index: {}]   ;;  %s12135_s2 = inlined_call_operand.vmem [shape: f32[1,256], index: 2, kind: input, shape index: {}]   ;;  %s12136_s3 = inlined_call_operand.vmem [shape: bf16[256,768], index: 3, kind: input, shape index: {}]   ;;  %s12137_s4 = inlined_call_operand.vmem [shape: f32[1,768], index: 4, kind: input, shape index: {}]   ;;  %s12138_s5 = inlined_call_operand.vmem [shape: bf16[256,256], index: 5, kind: input, shape index: {}]   ;;  %s12139_s6 = inlined_call_operand.vmem [shape: f32[1,256], index: 6, kind: input, shape index: {}]   ;;  %s12140_s7 = inlined_call_operand.vmem [shape: f32[256,128], index: 7, kind: input, shape index: {}]   ;;  %s12141_s8 = inlined_call_operand.vmem [shape: f32[256,128], index: 8, kind: input, shape index: {}]   ;;  %s12142_s9 = inlined_call_operand.vmem [shape: f32[2,256,256], index: 9, kind: output, shape index: {}]  }
   0x1 LB: > { %s5970_s10 = sadd.s32 4294967295, %s7415_s30   ;;  %p5974_p0 = scmp.ge.s32.totalorder %s7415_s30, 1  ;;  %s7415_s30 = sphi %s7468_s30, %s19_s30  }
   0x2   : > { %p287_p1 = scmp.lt.s32.totalorder %s7415_s30, 3 }
   0x4   : > { %p288_p2 = pnand %p5974_p0, %p287_p1 }
   0x6   : > { %291 = sbr.rel (%p288_p2) target bundleno = 1946 (0x79a), region = 56 }
   0xb   : > { %p323_p3 = scmp.lt.s32.totalorder %s5970_s10, 1  ;;  %v6600_v60 = vld [vmem:[%s12136_s3 + $0x154] ss:$24 sps:$4 sm:$0xff]   ;;  %v6604_v62 = vld [vmem:[%s12136_s3 + $0x150] ss:$24 sps:$4 sm:$0xff]   ;;  %s7417_s26 = smov 64  }
   0xc   : > { %v6602_v61 = vld [vmem:[%s12136_s3 + $0x15c] ss:$24 sps:$4 sm:$0xff]   ;;  %v6605_v63 = vld [vmem:[%s12136_s3 + $0x158] ss:$24 sps:$4 sm:$0xff]   ;;  %1703 = vmatprep.subr.bf16.mxu0 %v6600_v60 }
   0xd   : > { %s13129_s10 = smov (!%p323_p3, %s5970_s10), 1  ;;  %1896 = vmatprep.subr.bf16.mxu1 %v6602_v61  ;;  %1704 = vmatpush1.bf16.msra.mxu0 %v6604_v62  ;;  %v6636_v60 = vld [vmem:[%s12136_s3 + $0x34] ss:$24 sps:$4 sm:$0xff]   ;;  %v6640_v62 = vld [vmem:[%s12136_s3 + $0x30] ss:$24 sps:$4 sm:$0xff]  }
   0xe   : > { %s6205_s11 = sshll.u32 %s13129_s10, 9  ;;  %1897 = vmatpush1.bf16.msra.mxu1 %v6605_v63  ;;  %v6638_v61 = vld [vmem:[%s12136_s3 + $0x3c] ss:$24 sps:$4 sm:$0xff]   ;;  %v6641_v63 = vld [vmem:[%s12136_s3 + $0x38] ss:$24 sps:$4 sm:$0xff]  }
   0xf   : > { %s7484_s14 = scalar_lea.vmem %s12133_s0, %s6205_s11  ;;  %s11937_s21 = scalar_lea.vmem %s12142_s9, %s6205_s11 }
  0x10   : > { %v7487_v0 = vld [vmem:[%s7484_s14] sm:$0xff]  ;;  %v7490_v1 = vld [vmem:[%s7484_s14 + $0x8] sm:$0xff]  ;;  %v7493_v2 = vld [vmem:[%s7484_s14 + $0x10] sm:$0xff] }
  0x11   : > { %v398_v3 = vadd.f32 %v7490_v1, %v7487_v0  ;;  %v7498_v4 = vld [vmem:[%s7484_s14 + $0x18] sm:$0xff]  ;;  %v7501_v5 = vld [vmem:[%s7484_s14 + $0x20] sm:$0xff]  ;;  %v7504_v6 = vld [vmem:[%s7484_s14 + $0x28] sm:$0xff] }
  0x12   : > { %v404_v7 = vadd.f32 %v7504_v6, %v7501_v5  ;;  %v7509_v8 = vld [vmem:[%s7484_s14 + $0x30] sm:$0xff]  ;;  %v7512_v9 = vld [vmem:[%s7484_s14 + $0x38] sm:$0xff]  ;;  %v401_v10 = vadd.f32 %v7498_v4, %v7493_v2  ;;  %v7519_v12 = vld [vmem:[%s7484_s14 + $0x40] sm:$0xff] }
  0x13   : > { %399 = vadd.xlane.f32.xlu0 %v398_v3  ;;  %v407_v11 = vadd.f32 %v7512_v9, %v7509_v8  ;;  %v7522_v13 = vld [vmem:[%s7484_s14 + $0x48] sm:$0xff]  ;;  %v7525_v14 = vld [vmem:[%s7484_s14 + $0x50] sm:$0xff]  ;;  %v7528_v15 = vld [vmem:[%s7484_s14 + $0x58] sm:$0xff] }
  0x14   : > { %405 = vadd.xlane.f32.xlu1 %v404_v7  ;;  %v410_v16 = vadd.f32 %v7522_v13, %v7519_v12  ;;  %v413_v17 = vadd.f32 %v7528_v15, %v7525_v14  ;;  %v7535_v18 = vld [vmem:[%s7484_s14 + $0x60] sm:$0xff]  ;;  %v7538_v19 = vld [vmem:[%s7484_s14 + $0x68] sm:$0xff]  ;;  %v7541_v20 = vld [vmem:[%s7484_s14 + $0x70] sm:$0xff] }
  0x15   : > { %v7544_v21 = vld [vmem:[%s7484_s14 + $0x78] sm:$0xff]  ;;  %v416_v22 = vadd.f32 %v7538_v19, %v7535_v18  ;;  %v7551_v24 = vld [vmem:[%s7484_s14 + $0x80] sm:$0xff]  ;;  %v7554_v25 = vld [vmem:[%s7484_s14 + $0x88] sm:$0xff] }
  0x16   : > { %v419_v23 = vadd.f32 %v7544_v21, %v7541_v20  ;;  %v7557_v26 = vld [vmem:[%s7484_s14 + $0x90] sm:$0xff]  ;;  %v7560_v27 = vld [vmem:[%s7484_s14 + $0x98] sm:$0xff]  ;;  %v7563_v28 = vld [vmem:[%s7484_s14 + $0xa0] sm:$0xff]  ;;  %v422_v30 = vadd.f32 %v7554_v25, %v7551_v24 }
  0x17   : > { %402 = vadd.xlane.f32.xlu0 %v401_v10  ;;  %v7566_v29 = vld [vmem:[%s7484_s14 + $0xa8] sm:$0xff]  ;;  %v7571_v31 = vld [vmem:[%s7484_s14 + $0xb0] sm:$0xff]  ;;  %v7574_v32 = vld [vmem:[%s7484_s14 + $0xb8] sm:$0xff]  ;;  %v425_v33 = vadd.f32 %v7560_v27, %v7557_v26 }
  0x18   : > { %408 = vadd.xlane.f32.xlu1 %v407_v11  ;;  %v7579_v34 = vld [vmem:[%s7484_s14 + $0xc0] sm:$0xff]  ;;  %v7582_v35 = vld [vmem:[%s7484_s14 + $0xc8] sm:$0xff]  ;;  %v428_v36 = vadd.f32 %v7566_v29, %v7563_v28  ;;  %v431_v37 = vadd.f32 %v7574_v32, %v7571_v31  ;;  %v7589_v38 = vld [vmem:[%s7484_s14 + $0xd0] sm:$0xff] }
  0x19   : > { %v7592_v39 = vld [vmem:[%s7484_s14 + $0xd8] sm:$0xff]  ;;  %v7595_v40 = vld [vmem:[%s7484_s14 + $0xe0] sm:$0xff]  ;;  %v7598_v41 = vld [vmem:[%s7484_s14 + $0xe8] sm:$0xff]  ;;  %v434_v42 = vadd.f32 %v7582_v35, %v7579_v34 }
  0x1a   : > { %v7603_v43 = vld [vmem:[%s7484_s14 + $0xf0] sm:$0xff]  ;;  %v7606_v44 = vld [vmem:[%s7484_s14 + $0xf8] sm:$0xff]  ;;  %v437_v45 = vadd.f32 %v7592_v39, %v7589_v38  ;;  %v7611_v46 = vld [vmem:[%s7484_s14 + $0x100] sm:$0xff]  ;;  %v440_v48 = vadd.f32 %v7598_v41, %v7595_v40 }
  0x1b   : > { %411 = vadd.xlane.f32.xlu0 %v410_v16  ;;  %v7614_v47 = vld [vmem:[%s7484_s14 + $0x108] sm:$0xff]  ;;  %v443_v49 = vadd.f32 %v7606_v44, %v7603_v43  ;;  %v7621_v50 = vld [vmem:[%s7484_s14 + $0x110] sm:$0xff]  ;;  %v7624_v51 = vld [vmem:[%s7484_s14 + $0x118] sm:$0xff] }
  0x1c   : > { %414 = vadd.xlane.f32.xlu1 %v413_v17  ;;  %v7627_v52 = vld [vmem:[%s7484_s14 + $0x120] sm:$0xff]  ;;  %v7630_v53 = vld [vmem:[%s7484_s14 + $0x128] sm:$0xff]  ;;  %v446_v54 = vadd.f32 %v7614_v47, %v7611_v46  ;;  %v449_v55 = vadd.f32 %v7624_v51, %v7621_v50  ;;  %v7637_v56 = vld [vmem:[%s7484_s14 + $0x130] sm:$0xff] }
  0x1d   : > { %v7640_v57 = vld [vmem:[%s7484_s14 + $0x138] sm:$0xff]  ;;  %v452_v58 = vadd.f32 %v7630_v53, %v7627_v52  ;;  %v6608_v7 = vld [vmem:[%s12136_s3 + $0x12c] ss:$24 sps:$4 sm:$0xff]   ;;  %v6611_v11 = vld [vmem:[%s12136_s3 + $0x128] ss:$24 sps:$4 sm:$0xff]  }
  0x1e   : > { %v455_v59 = vadd.f32 %v7640_v57, %v7637_v56  ;;  %v6606_v3 = vld [vmem:[%s12136_s3 + $0x124] ss:$24 sps:$4 sm:$0xff]   ;;  %v6610_v10 = vld [vmem:[%s12136_s3 + $0x120] ss:$24 sps:$4 sm:$0xff]   ;;  %1898 = vmatprep.subr.bf16.mxu1 %v6608_v7  ;;  %v6612_v16 = vld [vmem:[%s12136_s3 + $0xf4] ss:$24 sps:$4 sm:$0xff]  }
  0x1f   : > { %417 = vadd.xlane.f32.xlu0 %v416_v22  ;;  %1705 = vmatprep.subr.bf16.mxu0 %v6606_v3  ;;  %v6614_v17 = vld [vmem:[%s12136_s3 + $0xfc] ss:$24 sps:$4 sm:$0xff]   ;;  %v6616_v22 = vld [vmem:[%s12136_s3 + $0xf0] ss:$24 sps:$4 sm:$0xff]   ;;  %v6644_v7 = vld [vmem:[%s12136_s3 + $0xc] ss:$24 sps:$4 sm:$0xff]  }
  0x20   : > { %420 = vadd.xlane.f32.xlu1 %v419_v23  ;;  %1706 = vmatpush1.bf16.msra.mxu0 %v6610_v10  ;;  %v6617_v23 = vld [vmem:[%s12136_s3 + $0xf8] ss:$24 sps:$4 sm:$0xff]   ;;  %v6642_v3 = vld [vmem:[%s12136_s3 + $0x4] ss:$24 sps:$4 sm:$0xff]  }
  0x21   : > { %1899 = vmatpush1.bf16.msra.mxu1 %v6611_v11  ;;  %1707 = vmatprep.subr.bf16.mxu0 %v6612_v16  ;;  %v6646_v10 = vld [vmem:[%s12136_s3] ss:$24 sps:$4 sm:$0xff]   ;;  %v6648_v16 = vld [vmem:[%s12136_s3 + $0x2d4] ss:$24 sps:$4 sm:$0xff]  }
  0x22   : > { %1900 = vmatprep.subr.bf16.mxu1 %v6614_v17  ;;  %v6647_v11 = vld [vmem:[%s12136_s3 + $0x8] ss:$24 sps:$4 sm:$0xff]   ;;  %v6650_v17 = vld [vmem:[%s12136_s3 + $0x2dc] ss:$24 sps:$4 sm:$0xff]  }
  0x23   : > { %423 = vadd.xlane.f32.xlu0 %v422_v30  ;;  %v6618_v30 = vld [vmem:[%s12136_s3 + $0xc4] ss:$24 sps:$4 sm:$0xff]  }
  0x24   : > { %426 = vadd.xlane.f32.xlu1 %v425_v33  ;;  %v6620_v33 = vld [vmem:[%s12136_s3 + $0xcc] ss:$24 sps:$4 sm:$0xff]   ;;  %1708 = vmatpush1.bf16.msra.mxu0 %v6616_v22 }
  0x25   : > { %1901 = vmatpush1.bf16.msra.mxu1 %v6617_v23  ;;  %1709 = vmatprep.subr.bf16.mxu0 %v6618_v30 }
  0x26   : > { %1902 = vmatprep.subr.bf16.mxu1 %v6620_v33 }
  0x27   : > { %429 = vadd.xlane.f32.xlu0 %v428_v36  ;;  %v6622_v36 = vld [vmem:[%s12136_s3 + $0xc0] ss:$24 sps:$4 sm:$0xff]  }
  0x28   : > { %432 = vadd.xlane.f32.xlu1 %v431_v37  ;;  %v6623_v37 = vld [vmem:[%s12136_s3 + $0xc8] ss:$24 sps:$4 sm:$0xff]   ;;  %1710 = vmatpush1.bf16.msra.mxu0 %v6622_v36 }
  0x29   : > { %1903 = vmatpush1.bf16.msra.mxu1 %v6623_v37 }
  0x2b   : > { %435 = vadd.xlane.f32.xlu0 %v434_v42  ;;  %v6624_v42 = vld [vmem:[%s12136_s3 + $0x94] ss:$24 sps:$4 sm:$0xff]  }
  0x2c   : > { %438 = vadd.xlane.f32.xlu1 %v437_v45  ;;  %v6626_v45 = vld [vmem:[%s12136_s3 + $0x9c] ss:$24 sps:$4 sm:$0xff]   ;;  %1711 = vmatprep.subr.bf16.mxu0 %v6624_v42 }
  0x2d   : > { %1904 = vmatprep.subr.bf16.mxu1 %v6626_v45 }
  0x2f   : > { %441 = vadd.xlane.f32.xlu0 %v440_v48  ;;  %v6628_v48 = vld [vmem:[%s12136_s3 + $0x90] ss:$24 sps:$4 sm:$0xff]  }
  0x30   : > { %444 = vadd.xlane.f32.xlu1 %v443_v49  ;;  %v6629_v49 = vld [vmem:[%s12136_s3 + $0x98] ss:$24 sps:$4 sm:$0xff]   ;;  %1712 = vmatpush1.bf16.msra.mxu0 %v6628_v48 }
  0x31   : > { %1905 = vmatpush1.bf16.msra.mxu1 %v6629_v49 }
  0x33   : > { %447 = vadd.xlane.f32.xlu0 %v446_v54  ;;  %v6630_v54 = vld [vmem:[%s12136_s3 + $0x64] ss:$24 sps:$4 sm:$0xff]  }
  0x34   : > { %450 = vadd.xlane.f32.xlu1 %v449_v55  ;;  %v6632_v55 = vld [vmem:[%s12136_s3 + $0x6c] ss:$24 sps:$4 sm:$0xff]   ;;  %1713 = vmatprep.subr.bf16.mxu0 %v6630_v54 }
  0x35   : > { %1906 = vmatprep.subr.bf16.mxu1 %v6632_v55 }
  0x37   : > { %453 = vadd.xlane.f32.xlu0 %v452_v58  ;;  %v6634_v58 = vld [vmem:[%s12136_s3 + $0x60] ss:$24 sps:$4 sm:$0xff]  }
  0x38   : > { %456 = vadd.xlane.f32.xlu1 %v455_v59  ;;  %v6635_v59 = vld [vmem:[%s12136_s3 + $0x68] ss:$24 sps:$4 sm:$0xff]   ;;  %1714 = vmatpush1.bf16.msra.mxu0 %v6634_v58 }
  0x39   : > { %1907 = vmatpush1.bf16.msra.mxu1 %v6635_v59  ;;  %1715 = vmatprep.subr.bf16.mxu0 %v6636_v60 }
  0x3a   : > { %1908 = vmatprep.subr.bf16.mxu1 %v6638_v61 }
  0x3c   : > { %1716 = vmatpush1.bf16.msra.mxu0 %v6640_v62 }
  0x3d   : > { %1909 = vmatpush1.bf16.msra.mxu1 %v6641_v63  ;;  %1717 = vmatprep.subr.bf16.mxu0 %v6642_v3 }
  0x3e   : > { %1910 = vmatprep.subr.bf16.mxu1 %v6644_v7 }
  0x40   : > { %1718 = vmatpush1.bf16.msra.mxu0 %v6646_v10 }
  0x41   : > { %1911 = vmatpush1.bf16.msra.mxu1 %v6647_v11  ;;  %1719 = vmatprep.subr.bf16.mxu0 %v6648_v16  ;;  %v7793_v11 = vld [vmem:[%s7484_s14 + $0x150] sm:$0xff]  ;;  %v7796_v16 = vld [vmem:[%s7484_s14 + $0x158] sm:$0xff] }
  0x42   : > { %1912 = vmatprep.subr.bf16.mxu1 %v6650_v17 }
  0x9c   : > { %v400_v22 = vpop.xlane.xlu0 %399 }
  0x9d   : > { %v495_v23 = vmul.f32 0.00390625, %v400_v22  ;;  %v406_v30 = vpop.xlane.xlu1 %405 }
  0x9e   : > { %v497_v33 = vmul.f32 0.00390625, %v406_v30 }
  0x9f   : > { %v7749_v36 = vsub.f32 %v7487_v0, %v495_v23  ;;  %v7752_v37 = vsub.f32 %v7490_v1, %v495_v23  ;;  %v7765_v0 = vld [vmem:[%s7484_s14 + $0x140] sm:$0xff]  ;;  %v7768_v1 = vld [vmem:[%s7484_s14 + $0x148] sm:$0xff] }
  0xa0   : > { %v403_v42 = vpop.xlane.xlu0 %402  ;;  %v7755_v45 = vsub.f32 %v7501_v5, %v497_v33  ;;  %v7758_v48 = vsub.f32 %v7504_v6, %v497_v33  ;;  %v458_v62 = vadd.f32 %v7768_v1, %v7765_v0 }
  0xa1   : > { %v496_v49 = vmul.f32 0.00390625, %v403_v42  ;;  %v591_v54 = vmul.f32 %v7749_v36, %v7749_v36  ;;  %v592_v55 = vmul.f32 %v7752_v37, %v7752_v37  ;;  %v409_v58 = vpop.xlane.xlu1 %408 }
  0xa2   : > { %v498_v59 = vmul.f32 0.00390625, %v409_v58  ;;  %v595_v3 = vmul.f32 %v7755_v45, %v7755_v45  ;;  %v596_v7 = vmul.f32 %v7758_v48, %v7758_v48 }
  0xa3   : > { %v7771_v5 = vsub.f32 %v7493_v2, %v496_v49  ;;  %v7774_v6 = vsub.f32 %v7498_v4, %v496_v49  ;;  %v655_v60 = vadd.f32 %v592_v55, %v591_v54  ;;  %v7809_v54 = vld [vmem:[%s7484_s14 + $0x160] sm:$0xff]  ;;  %v7812_v55 = vld [vmem:[%s7484_s14 + $0x168] sm:$0xff] }
  0xa4   : > { %v7777_v61 = vsub.f32 %v7509_v8, %v498_v59  ;;  %v412_v63 = vpop.xlane.xlu0 %411  ;;  %v7786_v2 = vsub.f32 %v7512_v9, %v498_v59  ;;  %v661_v23 = vadd.f32 %v596_v7, %v595_v3  ;;  %v461_v9 = vadd.f32 %v7796_v16, %v7793_v11  ;;  %v7828_v7 = vld [vmem:[%s7484_s14 + $0x178] sm:$0xff] }
  0xa5   : > { %656 = vadd.xlane.f32.xlu0 %v655_v60  ;;  %v593_v4 = vmul.f32 %v7771_v5, %v7771_v5  ;;  %v594_v8 = vmul.f32 %v7774_v6, %v7774_v6  ;;  %v499_v10 = vmul.f32 0.00390625, %v412_v63  ;;  %v415_v17 = vpop.xlane.xlu1 %414  ;;  %v7825_v63 = vld [vmem:[%s7484_s14 + $0x170] sm:$0xff] }
  0xa6   : > { %v500_v30 = vmul.f32 0.00390625, %v415_v17  ;;  %v597_v33 = vmul.f32 %v7777_v61, %v7777_v61  ;;  %v598_v58 = vmul.f32 %v7786_v2, %v7786_v2  ;;  %v467_v17 = vadd.f32 %v7828_v7, %v7825_v63 }
  0xa7   : > { %v658_v22 = vadd.f32 %v594_v8, %v593_v4  ;;  %v7803_v42 = vsub.f32 %v7519_v12, %v499_v10  ;;  %v7806_v49 = vsub.f32 %v7522_v13, %v499_v10  ;;  %v464_v12 = vadd.f32 %v7812_v55, %v7809_v54  ;;  %v6652_v8 = vld [vmem:[%s12136_s3 + $0x2d0] ss:$24 sps:$4 sm:$0xff]  }
  0xa8   : > { %v418_v59 = vpop.xlane.xlu0 %417  ;;  %v7817_v60 = vsub.f32 %v7525_v14, %v500_v30  ;;  %v664_v13 = vadd.f32 %v598_v58, %v597_v33  ;;  %v6653_v10 = vld [vmem:[%s12136_s3 + $0x2d8] ss:$24 sps:$4 sm:$0xff]   ;;  %1720 = vmatpush2.bf16.msra.mxu0 %v6652_v8  ;;  %v6654_v33 = vld [vmem:[%s12136_s3 + $0x2a4] ss:$24 sps:$4 sm:$0xff]  }
  0xa9   : > { %459 = vadd.xlane.f32.xlu0 %v458_v62  ;;  %659 = vadd.xlane.f32.xlu1 %v658_v22  ;;  %12405 = vst [vmem:[#allocation3_spill] sm:$0xff] %v7803_v42  ;;  %12406 = vst [vmem:[#allocation4_spill] sm:$0xff] %v7806_v49  ;;  %v7820_v62 = vsub.f32 %v7528_v15, %v500_v30  ;;  %v501_v3 = vmul.f32 0.00390625, %v418_v59  ;;  %v599_v4 = vmul.f32 %v7803_v42, %v7803_v42  ;;  %v421_v15 = vpop.xlane.xlu1 %420  ;;  %v7847_v30 = vld [vmem:[%s7484_s14 + $0x180] sm:$0xff] }
  0xaa   : > { %12407 = vst [vmem:[#allocation5_spill] sm:$0xff] %v7817_v60  ;;  %v600_v14 = vmul.f32 %v7806_v49, %v7806_v49  ;;  %1913 = vmatpush2.bf16.msra.mxu1 %v6653_v10  ;;  %v502_v22 = vmul.f32 0.00390625, %v421_v15  ;;  %v6656_v58 = vld [vmem:[%s12136_s3 + $0x2ac] ss:$24 sps:$4 sm:$0xff]   ;;  %v6659_v42 = vld [vmem:[%s12136_s3 + $0x2a8] ss:$24 sps:$4 sm:$0xff]   ;;  %1721 = vmatprep.subr.bf16.mxu0 %v6654_v33 }
  0xab   : > { %12408 = vst [vmem:[#allocation6_spill] sm:$0xff] %v7820_v62  ;;  %v7856_v59 = vsub.f32 %v7535_v18, %v501_v3  ;;  %v7859_v15 = vsub.f32 %v7538_v19, %v501_v3  ;;  %v7862_v10 = vld [vmem:[%s7484_s14 + $0x188] sm:$0xff]  ;;  %1914 = vmatprep.subr.bf16.mxu1 %v6656_v58  ;;  %v7879_v3 = vld [vmem:[%s7484_s14 + $0x190] sm:$0xff] }
  0xac   : > { %v667_v8 = vadd.f32 %v600_v14, %v599_v4  ;;  %v7871_v18 = vsub.f32 %v7541_v20, %v502_v22  ;;  %v7874_v19 = vsub.f32 %v7544_v21, %v502_v22  ;;  %v6660_v4 = vld [vmem:[%s12136_s3 + $0x274] ss:$24 sps:$4 sm:$0xff]   ;;  %v7888_v21 = vld [vmem:[%s7484_s14 + $0x198] sm:$0xff]  ;;  %v6664_v58 = vld [vmem:[%s12136_s3 + $0x270] ss:$24 sps:$4 sm:$0xff]  }
  0xad   : > { %662 = vadd.xlane.f32.xlu0 %v661_v23  ;;  %462 = vadd.xlane.f32.xlu1 %v461_v9  ;;  %v601_v23 = vmul.f32 %v7817_v60, %v7817_v60  ;;  %v602_v9 = vmul.f32 %v7820_v62, %v7820_v62  ;;  %12409 = vst [vmem:[#allocation7_spill] sm:$0xff] %v7856_v59  ;;  %12410 = vst [vmem:[#allocation8_spill] sm:$0xff] %v7859_v15  ;;  %v6658_v60 = vld [vmem:[%s12136_s3 + $0x2a0] ss:$24 sps:$4 sm:$0xff]   ;;  %v427_v33 = vpop.xlane.xlu1 %426 }
  0xae   : > { %1722 = vmatpush2.bf16.msra.mxu0 %v6658_v60  ;;  %1915 = vmatpush2.bf16.msra.mxu1 %v6659_v42  ;;  %12411 = vst [vmem:[#allocation9_spill] sm:$0xff] %v7871_v18  ;;  %12412 = vst [vmem:[#allocation10_spill] sm:$0xff] %v7874_v19  ;;  %v6662_v60 = vld [vmem:[%s12136_s3 + $0x27c] ss:$24 sps:$4 sm:$0xff]   ;;  %v603_v14 = vmul.f32 %v7856_v59, %v7856_v59  ;;  %v604_v22 = vmul.f32 %v7859_v15, %v7859_v15  ;;  %v7907_v59 = vld [vmem:[%s7484_s14 + $0x1a0] sm:$0xff] }
  0xaf   : > { %v670_v20 = vadd.f32 %v602_v9, %v601_v23  ;;  %1723 = vmatprep.subr.bf16.mxu0 %v6660_v4  ;;  %1916 = vmatprep.subr.bf16.mxu1 %v6662_v60  ;;  %v473_v23 = vadd.f32 %v7888_v21, %v7879_v3  ;;  %v504_v9 = vmul.f32 0.00390625, %v427_v33  ;;  %v6666_v4 = vld [vmem:[%s12136_s3 + $0x244] ss:$24 sps:$4 sm:$0xff]  }
  0xb0   : > { %v6668_v60 = vld [vmem:[%s12136_s3 + $0x24c] ss:$24 sps:$4 sm:$0xff]  }
  0xb1   : > { %465 = vadd.xlane.f32.xlu0 %v464_v12  ;;  %665 = vadd.xlane.f32.xlu1 %v664_v13  ;;  %v424_v12 = vpop.xlane.xlu0 %423  ;;  %v470_v13 = vadd.f32 %v7862_v10, %v7847_v30 }
  0xb2   : > { %v503_v42 = vmul.f32 0.00390625, %v424_v12  ;;  %1724 = vmatpush2.bf16.msra.mxu0 %v6664_v58  ;;  %v606_v12 = vmul.f32 %v7874_v19, %v7874_v19  ;;  %v6670_v19 = vld [vmem:[%s12136_s3 + $0x240] ss:$24 sps:$4 sm:$0xff]  }
  0xb3   : > { %1725 = vmatprep.subr.bf16.mxu0 %v6666_v4 }
  0xb4   : > { %v7916_v33 = vsub.f32 %v7551_v24, %v503_v42  ;;  %v7919_v58 = vsub.f32 %v7554_v25, %v503_v42  ;;  %v7931_v24 = vsub.f32 %v7557_v26, %v504_v9  ;;  %v7934_v25 = vsub.f32 %v7560_v27, %v504_v9  ;;  %v6677_v9 = vld [vmem:[%s12136_s3 + $0x218] ss:$24 sps:$4 sm:$0xff]  }
  0xb5   : > { %468 = vadd.xlane.f32.xlu1 %v467_v17  ;;  %668 = vadd.xlane.f32.xlu0 %v667_v8  ;;  %v6665_v17 = vld [vmem:[%s12136_s3 + $0x278] ss:$24 sps:$4 sm:$0xff]   ;;  %v605_v8 = vmul.f32 %v7871_v18, %v7871_v18  ;;  %v430_v15 = vpop.xlane.xlu0 %429  ;;  %v7922_v18 = vld [vmem:[%s7484_s14 + $0x1a8] sm:$0xff] }
  0xb6   : > { %1917 = vmatpush2.bf16.msra.mxu1 %v6665_v17  ;;  %12413 = vst [vmem:[#allocation11_spill] sm:$0xff] %v7916_v33  ;;  %12414 = vst [vmem:[#allocation12_spill] sm:$0xff] %v7919_v58  ;;  %v673_v17 = vadd.f32 %v604_v22, %v603_v14  ;;  %1726 = vmatpush2.bf16.msra.mxu0 %v6670_v19  ;;  %v476_v42 = vadd.f32 %v7922_v18, %v7907_v59  ;;  %v7939_v14 = vld [vmem:[%s7484_s14 + $0x1b0] sm:$0xff]  ;;  %v505_v4 = vmul.f32 0.00390625, %v430_v15 }
  0xb7   : > { %1918 = vmatprep.subr.bf16.mxu1 %v6668_v60  ;;  %12415 = vst [vmem:[#allocation13_spill] sm:$0xff] %v7931_v24  ;;  %12416 = vst [vmem:[#allocation14_spill] sm:$0xff] %v7934_v25  ;;  %v676_v62 = vadd.f32 %v606_v12, %v605_v8  ;;  %v7942_v60 = vld [vmem:[%s7484_s14 + $0x1b8] sm:$0xff]  ;;  %v607_v26 = vmul.f32 %v7916_v33, %v7916_v33  ;;  %v608_v27 = vmul.f32 %v7919_v58, %v7919_v58  ;;  %v6672_v19 = vld [vmem:[%s12136_s3 + $0x214] ss:$24 sps:$4 sm:$0xff]  }
  0xb8   : > { %v6676_v15 = vld [vmem:[%s12136_s3 + $0x210] ss:$24 sps:$4 sm:$0xff]   ;;  %1727 = vmatprep.subr.bf16.mxu0 %v6672_v19  ;;  %v479_v12 = vadd.f32 %v7942_v60, %v7939_v14  ;;  %v610_v33 = vmul.f32 %v7934_v25, %v7934_v25  ;;  %v7967_v58 = vld [vmem:[%s7484_s14 + $0x1c0] sm:$0xff]  ;;  %v7970_v49 = vsub.f32 %v7563_v28, %v505_v4  ;;  %v7973_v19 = vsub.f32 %v7566_v29, %v505_v4 }
  0xb9   : > { %671 = vadd.xlane.f32.xlu1 %v670_v20  ;;  %471 = vadd.xlane.f32.xlu0 %v470_v13  ;;  %v6671_v20 = vld [vmem:[%s12136_s3 + $0x248] ss:$24 sps:$4 sm:$0xff]   ;;  %v433_v13 = vpop.xlane.xlu1 %432  ;;  %v436_v22 = vpop.xlane.xlu0 %435  ;;  %v7999_v25 = vld [vmem:[%s7484_s14 + $0x1d0] sm:$0xff] }
  0xba   : > { %1919 = vmatpush2.bf16.msra.mxu1 %v6671_v20  ;;  %v609_v20 = vmul.f32 %v7931_v24, %v7931_v24  ;;  %1728 = vmatpush2.bf16.msra.mxu0 %v6676_v15  ;;  %12417 = vst [vmem:[#allocation15_spill] sm:$0xff] %v7970_v49  ;;  %12418 = vst [vmem:[#allocation16_spill] sm:$0xff] %v7973_v19  ;;  %v6678_v24 = vld [vmem:[%s12136_s3 + $0x1e4] ss:$24 sps:$4 sm:$0xff]   ;;  %v6682_v28 = vld [vmem:[%s12136_s3 + $0x1e0] ss:$24 sps:$4 sm:$0xff]  }
  0xbb   : > { %v6680_v15 = vld [vmem:[%s12136_s3 + $0x1ec] ss:$24 sps:$4 sm:$0xff]   ;;  %v6683_v29 = vld [vmem:[%s12136_s3 + $0x1e8] ss:$24 sps:$4 sm:$0xff]   ;;  %1729 = vmatprep.subr.bf16.mxu0 %v6678_v24  ;;  %v611_v24 = vmul.f32 %v7970_v49, %v7970_v49 }
  0xbd   : > { %474 = vadd.xlane.f32.xlu1 %v473_v23  ;;  %674 = vadd.xlane.f32.xlu0 %v673_v17  ;;  %v6674_v23 = vld [vmem:[%s12136_s3 + $0x21c] ss:$24 sps:$4 sm:$0xff]   ;;  %v439_v8 = vpop.xlane.xlu1 %438  ;;  %v506_v17 = vmul.f32 0.00390625, %v433_v13  ;;  %v7976_v13 = vld [vmem:[%s7484_s14 + $0x1c8] sm:$0xff] }
  0xbe   : > { %1920 = vmatprep.subr.bf16.mxu1 %v6674_v23  ;;  %v679_v23 = vadd.f32 %v608_v27, %v607_v26  ;;  %12419 = vst [vmem:[#allocation17_spill] sm:$0xff] %v7976_v13  ;;  %v482_v26 = vadd.f32 %v7976_v13, %v7967_v58  ;;  %v507_v27 = vmul.f32 0.00390625, %v436_v22  ;;  %1730 = vmatpush2.bf16.msra.mxu0 %v6682_v28  ;;  %v6686_v22 = vld [vmem:[%s12136_s3 + $0x1bc] ss:$24 sps:$4 sm:$0xff]   ;;  %v8036_v13 = vld [vmem:[%s7484_s14 + $0x1e8] sm:$0xff] }
  0xbf   : > { %1921 = vmatpush2.bf16.msra.mxu1 %v6677_v9  ;;  %v7994_v4 = vsub.f32 %v7574_v32, %v506_v17  ;;  %v682_v9 = vadd.f32 %v610_v33, %v609_v20  ;;  %v508_v33 = vmul.f32 0.00390625, %v439_v8  ;;  %v6688_v20 = vld [vmem:[%s12136_s3 + $0x1b0] ss:$24 sps:$4 sm:$0xff]  }
  0xc0   : > { %1922 = vmatprep.subr.bf16.mxu1 %v6680_v15  ;;  %v8021_v15 = vsub.f32 %v7579_v34, %v507_v27 }
  0xc1   : > { %677 = vadd.xlane.f32.xlu1 %v676_v62  ;;  %477 = vadd.xlane.f32.xlu0 %v476_v42  ;;  %v442_v62 = vpop.xlane.xlu0 %441  ;;  %v7991_v42 = vsub.f32 %v7571_v31, %v506_v17  ;;  %12421 = vst [vmem:[#allocation19_spill] sm:$0xff] %v7994_v4  ;;  %v612_v31 = vmul.f32 %v7973_v19, %v7973_v19  ;;  %v445_v32 = vpop.xlane.xlu1 %444  ;;  %v6684_v17 = vld [vmem:[%s12136_s3 + $0x1b4] ss:$24 sps:$4 sm:$0xff]  }
  0xc2   : > { %1731 = vmatprep.subr.bf16.mxu0 %v6684_v17  ;;  %v614_v8 = vmul.f32 %v7994_v4, %v7994_v4  ;;  %v8031_v19 = vsub.f32 %v7582_v35, %v507_v27  ;;  %v6694_v35 = vld [vmem:[%s12136_s3 + $0x180] ss:$24 sps:$4 sm:$0xff]   ;;  %v8054_v27 = vsub.f32 %v7592_v39, %v508_v33  ;;  %v615_v4 = vmul.f32 %v8021_v15, %v8021_v15 }
  0xc3   : > { %12420 = vst [vmem:[#allocation18_spill] sm:$0xff] %v7991_v42  ;;  %1923 = vmatpush2.bf16.msra.mxu1 %v6683_v29  ;;  %v613_v28 = vmul.f32 %v7991_v42, %v7991_v42  ;;  %v8028_v29 = vld [vmem:[%s7484_s14 + $0x1e0] sm:$0xff]  ;;  %1732 = vmatpush2.bf16.msra.mxu0 %v6688_v20  ;;  %v685_v17 = vadd.f32 %v612_v31, %v611_v24 }
  0xc4   : > { %1924 = vmatprep.subr.bf16.mxu1 %v6686_v22  ;;  %v509_v22 = vmul.f32 0.00390625, %v442_v62  ;;  %v6690_v42 = vld [vmem:[%s12136_s3 + $0x184] ss:$24 sps:$4 sm:$0xff]   ;;  %v6695_v62 = vld [vmem:[%s12136_s3 + $0x188] ss:$24 sps:$4 sm:$0xff]  }
  0xc5   : > { %480 = vadd.xlane.f32.xlu1 %v479_v12  ;;  %680 = vadd.xlane.f32.xlu0 %v679_v23  ;;  %v8012_v12 = vld [vmem:[%s7484_s14 + $0x1d8] sm:$0xff]  ;;  %v448_v49 = vpop.xlane.xlu0 %447  ;;  %v6692_v20 = vld [vmem:[%s12136_s3 + $0x18c] ss:$24 sps:$4 sm:$0xff]   ;;  %v451_v24 = vpop.xlane.xlu1 %450  ;;  %v688_v31 = vadd.f32 %v614_v8, %v613_v28 }
  0xc6   : > { %v6689_v23 = vld [vmem:[%s12136_s3 + $0x1b8] ss:$24 sps:$4 sm:$0xff]   ;;  %v485_v34 = vadd.f32 %v8012_v12, %v7999_v25  ;;  %1733 = vmatprep.subr.bf16.mxu0 %v6690_v42  ;;  %v8061_v39 = vsub.f32 %v7595_v40, %v509_v22 }
  0xc7   : > { %1925 = vmatpush2.bf16.msra.mxu1 %v6689_v23  ;;  %v511_v23 = vmul.f32 0.00390625, %v448_v49  ;;  %1734 = vmatpush2.bf16.msra.mxu0 %v6694_v35  ;;  %v8067_v42 = vld [vmem:[%s7484_s14 + $0x1f0] sm:$0xff]  ;;  %v616_v49 = vmul.f32 %v8031_v19, %v8031_v19 }
  0xc8   : > { %1926 = vmatprep.subr.bf16.mxu1 %v6692_v20 }
  0xc9   : > { %683 = vadd.xlane.f32.xlu1 %v682_v9  ;;  %483 = vadd.xlane.f32.xlu0 %v482_v26  ;;  %v8045_v26 = vsub.f32 %v7589_v38, %v508_v33  ;;  %v510_v9 = vmul.f32 0.00390625, %v445_v32  ;;  %v488_v38 = vadd.f32 %v8036_v13, %v8028_v29  ;;  %v8064_v32 = vsub.f32 %v7598_v41, %v509_v22  ;;  %v8070_v33 = vld [vmem:[%s7484_s14 + $0x1f8] sm:$0xff]  ;;  %v454_v28 = vpop.xlane.xlu0 %453 }
  0xca   : > { %v618_v41 = vmul.f32 %v8054_v27, %v8054_v27  ;;  %v8085_v22 = vsub.f32 %v7611_v46, %v511_v23  ;;  %v8088_v20 = vsub.f32 %v7614_v47, %v511_v23  ;;  %v491_v35 = vadd.f32 %v8070_v33, %v8067_v42 }
  0xcb   : > { %12422 = vst [vmem:[#allocation20_spill] sm:$0xff] %v8045_v26  ;;  %1927 = vmatpush2.bf16.msra.mxu1 %v6695_v62  ;;  %v617_v8 = vmul.f32 %v8045_v26, %v8045_v26  ;;  %v8080_v40 = vsub.f32 %v7606_v44, %v510_v9  ;;  %v513_v62 = vmul.f32 0.00390625, %v454_v28  ;;  %v619_v44 = vmul.f32 %v8061_v39, %v8061_v39 }
  0xcc   : > { %12423 = vst [vmem:[#allocation21_spill] sm:$0xff] %v8085_v22  ;;  %v623_v23 = vmul.f32 %v8085_v22, %v8085_v22 }
  0xcd   : > { %486 = vadd.xlane.f32.xlu1 %v485_v34  ;;  %686 = vadd.xlane.f32.xlu0 %v685_v17  ;;  %v8077_v34 = vsub.f32 %v7603_v43, %v510_v9  ;;  %v512_v17 = vmul.f32 0.00390625, %v451_v24  ;;  %v691_v43 = vadd.f32 %v616_v49, %v615_v4  ;;  %v620_v9 = vmul.f32 %v8064_v32, %v8064_v32  ;;  %v457_v24 = vpop.xlane.xlu1 %456 }
  0xce   : > { %v694_v26 = vadd.f32 %v618_v41, %v617_v8  ;;  %v624_v49 = vmul.f32 %v8088_v20, %v8088_v20  ;;  %v8114_v28 = vsub.f32 %v7630_v53, %v513_v62 }
  0xcf   : > { %v8097_v46 = vsub.f32 %v7621_v50, %v512_v17  ;;  %v621_v47 = vmul.f32 %v8077_v34, %v8077_v34  ;;  %v8104_v4 = vsub.f32 %v7624_v51, %v512_v17  ;;  %v8111_v50 = vsub.f32 %v7627_v52, %v513_v62 }
  0xd0   : > { %v697_v8 = vadd.f32 %v620_v9, %v619_v44  ;;  %v703_v17 = vadd.f32 %v624_v49, %v623_v23  ;;  %v913_v49 = vlaneseq }
  0xd1   : > { %689 = vadd.xlane.f32.xlu1 %v688_v31  ;;  %489 = vadd.xlane.f32.xlu0 %v488_v38  ;;  %v622_v31 = vmul.f32 %v8080_v40, %v8080_v40  ;;  %v514_v38 = vmul.f32 0.00390625, %v457_v24  ;;  %v625_v24 = vmul.f32 %v8097_v46, %v8097_v46  ;;  %v626_v22 = vmul.f32 %v8104_v4, %v8104_v4 }
  0xd2   : > { %v627_v53 = vmul.f32 %v8111_v50, %v8111_v50 }
  0xd3   : > { %v700_v41 = vadd.f32 %v622_v31, %v621_v47  ;;  %v8117_v51 = vsub.f32 %v7637_v56, %v514_v38  ;;  %v8124_v52 = vsub.f32 %v7640_v57, %v514_v38  ;;  %v706_v56 = vadd.f32 %v626_v22, %v625_v24 }
  0xd5   : > { %492 = vadd.xlane.f32.xlu1 %v491_v35  ;;  %692 = vadd.xlane.f32.xlu0 %v691_v43  ;;  %v628_v35 = vmul.f32 %v8114_v28, %v8114_v28  ;;  %v629_v62 = vmul.f32 %v8117_v51, %v8117_v51 }
  0xd7   : > { %v709_v43 = vadd.f32 %v628_v35, %v627_v53 }
  0xd9   : > { %695 = vadd.xlane.f32.xlu1 %v694_v26  ;;  %698 = vadd.xlane.f32.xlu0 %v697_v8  ;;  %v630_v26 = vmul.f32 %v8124_v52, %v8124_v52 }
  0xdb   : > { %v712_v57 = vadd.f32 %v630_v26, %v629_v62  ;;  %v8144_v26 = vshrl.u32 %v913_v49, 7 }
  0xdd   : > { %701 = vadd.xlane.f32.xlu1 %v700_v41  ;;  %704 = vadd.xlane.f32.xlu0 %v703_v17  ;;  %12424 = vst [vmem:[#allocation22_spill] sm:$0xff] %v8144_v26 }
  0xe1   : > { %707 = vadd.xlane.f32.xlu1 %v706_v56  ;;  %710 = vadd.xlane.f32.xlu0 %v709_v43 }
  0xe5   : > { %713 = vadd.xlane.f32.xlu1 %v712_v57 }
 0x12e   : > { %v657_v44 = vpop.xlane.xlu0 %656 }
 0x12f   : > { %v751_v9 = vmul.f32 0.00390625, %v657_v44 }
 0x131   : > { %v783_v47 = vadd.f32 1e-06, %v751_v9 }
 0x132   : > { %v660_v31 = vpop.xlane.xlu1 %659  ;;  %v460_v38 = vpop.xlane.xlu0 %459 }
 0x133   : > { %6840 = vrsqrt.f32 %v783_v47  ;;  %v752_v22 = vmul.f32 0.00390625, %v660_v31  ;;  %v515_v23 = vmul.f32 0.00390625, %v460_v38 }
 0x135   : > { %v784_v8 = vadd.f32 1e-06, %v752_v22  ;;  %v8135_v41 = vsub.f32 %v7765_v0, %v515_v23  ;;  %v8138_v17 = vsub.f32 %v7768_v1, %v515_v23 }
 0x136   : > { %v463_v24 = vpop.xlane.xlu1 %462  ;;  %v663_v53 = vpop.xlane.xlu0 %662 }
 0x137   : > { %6842 = vrsqrt.f32 %v784_v8  ;;  %v516_v35 = vmul.f32 0.00390625, %v463_v24  ;;  %v753_v56 = vmul.f32 0.00390625, %v663_v53  ;;  %v631_v43 = vmul.f32 %v8135_v41, %v8135_v41  ;;  %v911_v53 = vld [vmem:[%s12134_s1] sm:$0x3] }
 0x138   : > { %v632_v62 = vmul.f32 %v8138_v17, %v8138_v17 }
 0x139   : > { %v8147_v57 = vsub.f32 %v7793_v11, %v516_v35  ;;  %v8150_v0 = vsub.f32 %v7796_v16, %v516_v35  ;;  %v785_v1 = vadd.f32 1e-06, %v753_v56  ;;  %v8157_v11 = vsub.s32 1, %v8144_v26 }
 0x13a   : > { %v666_v44 = vpop.xlane.xlu1 %665  ;;  %v466_v9 = vpop.xlane.xlu0 %465  ;;  %v715_v47 = vadd.f32 %v632_v62, %v631_v43  ;;  %v8160_v16 = vsub.s32 0, %v8144_v26 }
 0x13b   : > { %12425 = vst [vmem:[#allocation23_spill] sm:$0xff] %v8147_v57  ;;  %6844 = vrsqrt.f32 %v785_v1  ;;  %v754_v31 = vmul.f32 0.00390625, %v666_v44  ;;  %v517_v38 = vmul.f32 0.00390625, %v466_v9  ;;  %v633_v22 = vmul.f32 %v8147_v57, %v8147_v57  ;;  %12426 = vst [vmem:[#allocation24_spill] sm:$0xff] %v8157_v11 }
 0x13c   : > { %716 = vadd.xlane.f32.xlu0 %v715_v47  ;;  %v634_v23 = vmul.f32 %v8150_v0, %v8150_v0  ;;  %12427 = vst [vmem:[#allocation25_spill] sm:$0xff] %v8160_v16  ;;  %v8179_v47 = vrot.slane %v911_v53, %v8157_v11 }
 0x13d   : > { %v786_v49 = vadd.f32 1e-06, %v754_v31  ;;  %v8163_v8 = vsub.f32 %v7809_v54, %v517_v38  ;;  %v8166_v24 = vsub.f32 %v7812_v55, %v517_v38  ;;  %v987_v54 = vld [vmem:[%s12135_s2] sm:$0x3]  ;;  %v8182_v31 = vrot.slane %v911_v53, %v8160_v16 }
 0x13e   : > { %v469_v35 = vpop.xlane.xlu1 %468  ;;  %v669_v56 = vpop.xlane.xlu0 %668  ;;  %v718_v43 = vadd.f32 %v634_v23, %v633_v22  ;;  %v8192_v26 = vrot.slane %v987_v54, %v8157_v11 }
 0x13f   : > { %12428 = vst [vmem:[#allocation26_spill] sm:$0xff] %v8163_v8  ;;  %12429 = vst [vmem:[#allocation27_spill] sm:$0xff] %v8166_v24  ;;  %6846 = vrsqrt.f32 %v786_v49  ;;  %v518_v62 = vmul.f32 0.00390625, %v469_v35  ;;  %v755_v1 = vmul.f32 0.00390625, %v669_v56  ;;  %v635_v44 = vmul.f32 %v8163_v8, %v8163_v8 }
 0x140   : > { %v6841_v9 = vpop.eup %6840  ;;  %719 = vadd.xlane.f32.xlu1 %v718_v43  ;;  %v636_v55 = vmul.f32 %v8166_v24, %v8166_v24 }
 0x141   : > { %v8185_v38 = vsub.f32 %v7825_v63, %v518_v62  ;;  %v8188_v22 = vsub.f32 %v7828_v7, %v518_v62  ;;  %v787_v23 = vadd.f32 1e-06, %v755_v1  ;;  %v848_v49 = vmul.f32 %v6841_v9, %v7752_v37 }
 0x142   : > { %v672_v35 = vpop.xlane.xlu1 %671  ;;  %v472_v56 = vpop.xlane.xlu0 %471  ;;  %v721_v43 = vadd.f32 %v636_v55, %v635_v44  ;;  %v847_v8 = vmul.f32 %v6841_v9, %v7749_v36  ;;  %v8202_v1 = vrot.slane %v987_v54, %v8160_v16 }
 0x143   : > { %6848 = vrsqrt.f32 %v787_v23  ;;  %v756_v53 = vmul.f32 0.00390625, %v672_v35  ;;  %v519_v24 = vmul.f32 0.00390625, %v472_v56  ;;  %v637_v63 = vmul.f32 %v8185_v38, %v8185_v38 }
 0x144   : > { %v6843_v57 = vpop.eup %6842  ;;  %722 = vadd.xlane.f32.xlu0 %v721_v43  ;;  %v638_v7 = vmul.f32 %v8188_v22, %v8188_v22  ;;  %v924_v37 = vmul.f32 %v8179_v47, %v848_v49  ;;  %v923_v62 = vmul.f32 %v8182_v31, %v847_v8 }
 0x145   : > { %v788_v44 = vadd.f32 1e-06, %v756_v53  ;;  %v8205_v36 = vsub.f32 %v7847_v30, %v519_v24  ;;  %v8208_v9 = vsub.f32 %v7862_v10, %v519_v24  ;;  %v850_v55 = vmul.f32 %v6843_v57, %v7774_v6 }
 0x146   : > { %v475_v23 = vpop.xlane.xlu1 %474  ;;  %v675_v35 = vpop.xlane.xlu0 %674  ;;  %v724_v56 = vadd.f32 %v638_v7, %v637_v63  ;;  %v1000_v43 = vadd.f32 %v8192_v26, %v924_v37  ;;  %v849_v49 = vmul.f32 %v6843_v57, %v7771_v5  ;;  %v999_v63 = vadd.f32 %v8202_v1, %v923_v62 }
 0x147   : > { %6850 = vrsqrt.f32 %v788_v44  ;;  %v520_v8 = vmul.f32 0.00390625, %v475_v23  ;;  %v757_v54 = vmul.f32 0.00390625, %v675_v35  ;;  %v639_v53 = vmul.f32 %v8205_v36, %v8205_v36 }
 0x148   : > { %v6845_v30 = vpop.eup %6844  ;;  %725 = vadd.xlane.f32.xlu1 %v724_v56  ;;  %v640_v10 = vmul.f32 %v8208_v9, %v8208_v9  ;;  %v926_v6 = vmul.f32 %v8179_v47, %v850_v55  ;;  %v925_v24 = vmul.f32 %v8182_v31, %v849_v49 }
 0x149   : > { %v8221_v7 = vsub.f32 %v7879_v3, %v520_v8  ;;  %v8224_v5 = vsub.f32 %v7888_v21, %v520_v8  ;;  %v789_v57 = vadd.f32 1e-06, %v757_v54  ;;  %v852_v37 = vmul.f32 %v6845_v30, %v7758_v48 }
 0x14a   : > { %v678_v44 = vpop.xlane.xlu1 %677  ;;  %v478_v23 = vpop.xlane.xlu0 %477  ;;  %v727_v35 = vadd.f32 %v640_v10, %v639_v53  ;;  %v1002_v56 = vadd.f32 %v8192_v26, %v926_v6  ;;  %v1001_v55 = vadd.f32 %v8202_v1, %v925_v24  ;;  %v851_v49 = vmul.f32 %v6845_v30, %v7755_v45 }
 0x14b   : > { %6852 = vrsqrt.f32 %v789_v57  ;;  %v758_v62 = vmul.f32 0.00390625, %v678_v44  ;;  %v521_v11 = vmul.f32 0.00390625, %v478_v23  ;;  %v641_v3 = vmul.f32 %v8221_v7, %v8221_v7 }
 0x14c   : > { %v6847_v21 = vpop.eup %6846  ;;  %728 = vadd.xlane.f32.xlu0 %v727_v35  ;;  %v8232_v8 = vpack.c.bf16 %v1002_v56, %v1000_v43  ;;  %v8234_v48 = vpack.c.bf16 %v1001_v55, %v999_v63  ;;  %v642_v54 = vmul.f32 %v8224_v5, %v8224_v5  ;;  %v928_v53 = vmul.f32 %v8179_v47, %v852_v37 }
 0x14d   : > { %v790_v10 = vadd.f32 1e-06, %v758_v62  ;;  %v8240_v45 = vsub.f32 %v7907_v59, %v521_v11  ;;  %v8243_v30 = vsub.f32 %v7922_v18, %v521_v11  ;;  %v854_v6 = vmul.f32 %v6847_v21, %v7786_v2 }
 0x14e   : > { %12430 = vst [vmem:[#allocation28_spill] sm:$0xff] %v8234_v48  ;;  %1735 = vmatprep.mubr.bf16.mxu0 %v8232_v8  ;;  %1928 = vmatprep.mubr.bf16.mxu1 %v8232_v8  ;;  %v481_v43 = vpop.xlane.xlu1 %480  ;;  %v681_v24 = vpop.xlane.xlu0 %680  ;;  %v730_v63 = vadd.f32 %v642_v54, %v641_v3  ;;  %v1004_v57 = vadd.f32 %v8192_v26, %v928_v53  ;;  %v12431_v3 = vld [vmem:[#allocation4_spill] sm:$0xff] }
 0x14f   : > { %v853_v37 = vmul.f32 %v6847_v21, %v7777_v61  ;;  %6854 = vrsqrt.f32 %v790_v10  ;;  %v522_v44 = vmul.f32 0.00390625, %v481_v43  ;;  %1736 = vmatmul.mubr.bf16.vlgmr.msra.gmra.mxu0 %v8234_v48  ;;  %1929 = vmatmul.mubr.bf16.vlgmr.msra.gmra.mxu1 %v8234_v48  ;;  %v759_v59 = vmul.f32 0.00390625, %v681_v24 }
 0x150   : > { %v643_v2 = vmul.f32 %v8240_v45, %v8240_v45  ;;  %v6849_v18 = vpop.eup %6848  ;;  %731 = vadd.xlane.f32.xlu1 %v730_v63  ;;  %v644_v11 = vmul.f32 %v8243_v30, %v8243_v30  ;;  %v930_v23 = vmul.f32 %v8179_v47, %v854_v6  ;;  %v927_v35 = vmul.f32 %v8182_v31, %v851_v49 }
 0x151   : > { %v929_v61 = vmul.f32 %v8182_v31, %v853_v37  ;;  %v8260_v56 = vsub.f32 %v7939_v14, %v522_v44  ;;  %v8263_v55 = vsub.f32 %v7942_v60, %v522_v44  ;;  %v791_v62 = vadd.f32 1e-06, %v759_v59 }
 0x152   : > { %v856_v21 = vmul.f32 %v6849_v18, %v12431_v3  ;;  %v684_v54 = vpop.xlane.xlu1 %683  ;;  %v484_v53 = vpop.xlane.xlu0 %483  ;;  %v733_v10 = vadd.f32 %v644_v11, %v643_v2  ;;  %v1006_v43 = vadd.f32 %v8192_v26, %v930_v23  ;;  %v1003_v6 = vadd.f32 %v8202_v1, %v927_v35  ;;  %v12434_v35 = vld [vmem:[#allocation17_spill] sm:$0xff] }
 0x153   : > { %v1005_v49 = vadd.f32 %v8202_v1, %v929_v61  ;;  %6856 = vrsqrt.f32 %v791_v62  ;;  %v760_v24 = vmul.f32 0.00390625, %v684_v54  ;;  %v523_v63 = vmul.f32 0.00390625, %v484_v53  ;;  %v12435_v62 = vld [vmem:[#allocation6_spill] sm:$0xff] }
 0x154   : > { %v645_v14 = vmul.f32 %v8260_v56, %v8260_v56  ;;  %v6851_v60 = vpop.eup %6850  ;;  %734 = vadd.xlane.f32.xlu0 %v733_v10  ;;  %v8271_v37 = vpack.c.bf16 %v1006_v43, %v1004_v57  ;;  %v646_v59 = vmul.f32 %v8263_v55, %v8263_v55  ;;  %v932_v2 = vmul.f32 %v8179_v47, %v856_v21  ;;  %v12436_v43 = vld [vmem:[#allocation3_spill] sm:$0xff] }
 0x155   : > { %v8273_v44 = vpack.c.bf16 %v1005_v49, %v1003_v6  ;;  %v792_v11 = vadd.f32 1e-06, %v760_v24  ;;  %v8279_v23 = vsub.f32 %v7967_v58, %v523_v63  ;;  %v8282_v61 = vsub.f32 %v12434_v35, %v523_v63  ;;  %v6696_v58 = vld [vmem:[%s12136_s3 + $0x160] ss:$24 sps:$4 sm:$0xff]   ;;  %v6698_v6 = vld [vmem:[%s12136_s3 + $0x164] ss:$24 sps:$4 sm:$0xff]  }
 0x156   : > { %12432 = vst [vmem:[#allocation4_spill] sm:$0xff] %v8271_v37  ;;  %v858_v3 = vmul.f32 %v6851_v60, %v12435_v62  ;;  %1745 = vmatprep.mubr.bf16.mxu0 %v8271_v37  ;;  %1938 = vmatprep.mubr.bf16.mxu1 %v8271_v37  ;;  %v487_v57 = vpop.xlane.xlu1 %486  ;;  %v687_v54 = vpop.xlane.xlu0 %686  ;;  %v736_v53 = vadd.f32 %v646_v59, %v645_v14 }
 0x157   : > { %12433 = vst [vmem:[#allocation29_spill] sm:$0xff] %v8273_v44  ;;  %v1008_v10 = vadd.f32 %v8192_v26, %v932_v2  ;;  %v855_v21 = vmul.f32 %v6849_v18, %v12436_v43  ;;  %6858 = vrsqrt.f32 %v792_v11  ;;  %v524_v49 = vmul.f32 0.00390625, %v487_v57  ;;  %1746 = vmatmul.mubr.bf16.gmra.mxu0 %v8273_v44  ;;  %1939 = vmatmul.mubr.bf16.gmra.mxu1 %v8273_v44  ;;  %v12437_v2 = vld [vmem:[#allocation5_spill] sm:$0xff]  ;;  %v12438_v43 = vld [vmem:[#allocation8_spill] sm:$0xff] }
 0x158   : > { %v761_v24 = vmul.f32 0.00390625, %v687_v54  ;;  %v647_v63 = vmul.f32 %v8279_v23, %v8279_v23  ;;  %v6853_v14 = vpop.eup %6852  ;;  %737 = vadd.xlane.f32.xlu1 %v736_v53  ;;  %v648_v18 = vmul.f32 %v8282_v61, %v8282_v61  ;;  %v934_v59 = vmul.f32 %v8179_v47, %v858_v3  ;;  %2089 = vmatprep.subr.bf16.mxu0 %v6698_v6 }
 0x159   : > { %v857_v35 = vmul.f32 %v6851_v60, %v12437_v2  ;;  %v931_v11 = vmul.f32 %v8182_v31, %v855_v21  ;;  %v8305_v62 = vsub.f32 %v7999_v25, %v524_v49  ;;  %v8308_v57 = vsub.f32 %v8012_v12, %v524_v49  ;;  %2090 = vmatpush1.bf16.msra.mxu0 %v6696_v58  ;;  %v12440_v2 = vld [vmem:[#allocation10_spill] sm:$0xff] }
 0x15a   : > { %v793_v54 = vadd.f32 1e-06, %v761_v24  ;;  %v860_v16 = vmul.f32 %v6853_v14, %v12438_v43  ;;  %v690_v53 = vpop.xlane.xlu1 %689  ;;  %v490_v44 = vpop.xlane.xlu0 %489  ;;  %v739_v37 = vadd.f32 %v648_v18, %v647_v63  ;;  %v1010_v48 = vadd.f32 %v8192_v26, %v934_v59 }
 0x15b   : > { %v933_v3 = vmul.f32 %v8182_v31, %v857_v35  ;;  %v1007_v60 = vadd.f32 %v8202_v1, %v931_v11  ;;  %v762_v25 = vmul.f32 0.00390625, %v690_v53  ;;  %v525_v21 = vmul.f32 0.00390625, %v490_v44 }
 0x15c   : > { %6860 = vrsqrt.f32 %v793_v54  ;;  %v649_v12 = vmul.f32 %v8305_v62, %v8305_v62  ;;  %v6855_v49 = vpop.eup %6854  ;;  %740 = vadd.xlane.f32.xlu0 %v739_v37  ;;  %v8316_v24 = vpack.c.bf16 %v1010_v48, %v1008_v10  ;;  %v650_v63 = vmul.f32 %v8308_v57, %v8308_v57  ;;  %v6701_v48 = vld [vmem:[%s12136_s3 + $0x134] ss:$24 sps:$4 sm:$0xff]   ;;  %v6704_v54 = vld [vmem:[%s12136_s3 + $0x104] ss:$24 sps:$4 sm:$0xff]  }
 0x15d   : > { %v1009_v6 = vadd.f32 %v8202_v1, %v933_v3  ;;  %v936_v18 = vmul.f32 %v8179_v47, %v860_v16  ;;  %v794_v59 = vadd.f32 1e-06, %v762_v25  ;;  %v8323_v58 = vsub.f32 %v8028_v29, %v525_v21  ;;  %2091 = vmatprep.subr.bf16.mxu0 %v6701_v48 }
 0x15e   : > { %12439 = vst [vmem:[#allocation17_spill] sm:$0xff] %v8316_v24  ;;  %v8326_v44 = vsub.f32 %v8036_v13, %v525_v21  ;;  %v862_v35 = vmul.f32 %v6855_v49, %v12440_v2  ;;  %1755 = vmatprep.mubr.bf16.mxu0 %v8316_v24  ;;  %1948 = vmatprep.mubr.bf16.mxu1 %v8316_v24  ;;  %v493_v37 = vpop.xlane.xlu1 %492  ;;  %v693_v16 = vpop.xlane.xlu0 %692  ;;  %v6699_v13 = vld [vmem:[%s12136_s3 + $0x130] ss:$24 sps:$4 sm:$0xff]  }
 0x15f   : > { %v8334_v10 = vpack.c.bf16 %v1009_v6, %v1007_v60  ;;  %v742_v11 = vadd.f32 %v650_v63, %v649_v12  ;;  %v1012_v29 = vadd.f32 %v8192_v26, %v936_v18  ;;  %6862 = vrsqrt.f32 %v794_v59  ;;  %v12442_v12 = vld [vmem:[#allocation7_spill] sm:$0xff]  ;;  %v12443_v2 = vld [vmem:[#allocation9_spill] sm:$0xff]  ;;  %2092 = vmatpush1.bf16.msra.mxu0 %v6699_v13 }
 0x160   : > { %v526_v43 = vmul.f32 0.00390625, %v493_v37  ;;  %v763_v53 = vmul.f32 0.00390625, %v693_v16  ;;  %v651_v3 = vmul.f32 %v8323_v58, %v8323_v58  ;;  %v6857_v60 = vpop.eup %6856  ;;  %v652_v25 = vmul.f32 %v8326_v44, %v8326_v44  ;;  %v6702_v37 = vld [vmem:[%s12136_s3 + $0x100] ss:$24 sps:$4 sm:$0xff]   ;;  %2093 = vmatprep.subr.bf16.mxu0 %v6704_v54 }
 0x161   : > { %12441 = vst [vmem:[#allocation6_spill] sm:$0xff] %v8334_v10  ;;  %1756 = vmatmul.mubr.bf16.gmra.mxu0 %v8334_v10  ;;  %1949 = vmatmul.mubr.bf16.gmra.mxu1 %v8334_v10  ;;  %v938_v21 = vmul.f32 %v8179_v47, %v862_v35  ;;  %v859_v6 = vmul.f32 %v6853_v14, %v12442_v12  ;;  %v12444_v12 = vld [vmem:[#allocation12_spill] sm:$0xff] }
 0x162   : > { %v8352_v63 = vsub.f32 %v8067_v42, %v526_v43  ;;  %v8355_v18 = vsub.f32 %v8070_v33, %v526_v43  ;;  %v795_v59 = vadd.f32 1e-06, %v763_v53  ;;  %743 = vadd.xlane.f32.xlu1 %v742_v11  ;;  %v861_v48 = vmul.f32 %v6855_v49, %v12443_v2  ;;  %v696_v16 = vpop.xlane.xlu1 %695  ;;  %v699_v10 = vpop.xlane.xlu0 %698 }
 0x163   : > { %v745_v35 = vadd.f32 %v652_v25, %v651_v3  ;;  %v1014_v14 = vadd.f32 %v8192_v26, %v938_v21  ;;  %v935_v42 = vmul.f32 %v8182_v31, %v859_v6  ;;  %v864_v24 = vmul.f32 %v6857_v60, %v12444_v12  ;;  %2094 = vmatpush1.bf16.msra.mxu0 %v6702_v37  ;;  %v6705_v12 = vld [vmem:[%s12136_s3 + $0xd0] ss:$24 sps:$4 sm:$0xff]  }
 0x164   : > { %6864 = vrsqrt.f32 %v795_v59  ;;  %v764_v33 = vmul.f32 0.00390625, %v696_v16  ;;  %v765_v11 = vmul.f32 0.00390625, %v699_v10  ;;  %v937_v49 = vmul.f32 %v8182_v31, %v861_v48  ;;  %v6859_v13 = vpop.eup %6858  ;;  %v12445_v59 = vld [vmem:[#allocation14_spill] sm:$0xff] }
 0x165   : > { %746 = vadd.xlane.f32.xlu0 %v745_v35  ;;  %v8365_v43 = vpack.c.bf16 %v1014_v14, %v1012_v29  ;;  %v1011_v53 = vadd.f32 %v8202_v1, %v935_v42  ;;  %v653_v3 = vmul.f32 %v8352_v63, %v8352_v63  ;;  %v654_v25 = vmul.f32 %v8355_v18, %v8355_v18  ;;  %v6707_v29 = vld [vmem:[%s12136_s3 + $0xd4] ss:$24 sps:$4 sm:$0xff]   ;;  %v12446_v14 = vld [vmem:[#allocation11_spill] sm:$0xff] }
 0x166   : > { %v796_v21 = vadd.f32 1e-06, %v764_v33  ;;  %v797_v6 = vadd.f32 1e-06, %v765_v11  ;;  %v1013_v54 = vadd.f32 %v8202_v1, %v937_v49  ;;  %v866_v10 = vmul.f32 %v6859_v13, %v12445_v59  ;;  %v702_v2 = vpop.xlane.xlu1 %701  ;;  %v705_v48 = vpop.xlane.xlu0 %704  ;;  %2095 = vmatprep.subr.bf16.mxu0 %v6707_v29  ;;  %v6710_v49 = vld [vmem:[%s12136_s3 + $0xa4] ss:$24 sps:$4 sm:$0xff]  }
 0x167   : > { %1765 = vmatprep.mubr.bf16.mxu0 %v8365_v43  ;;  %1958 = vmatprep.mubr.bf16.mxu1 %v8365_v43  ;;  %v748_v16 = vadd.f32 %v654_v25, %v653_v3  ;;  %v940_v35 = vmul.f32 %v8179_v47, %v864_v24  ;;  %v863_v42 = vmul.f32 %v6857_v60, %v12446_v14  ;;  %v766_v37 = vmul.f32 0.00390625, %v702_v2  ;;  %v12447_v60 = vld [vmem:[#allocation13_spill] sm:$0xff] }
 0x168   : > { %6866 = vrsqrt.f32 %v796_v21  ;;  %v8384_v33 = vpack.c.bf16 %v1013_v54, %v1011_v53  ;;  %v767_v11 = vmul.f32 0.00390625, %v705_v48  ;;  %v942_v24 = vmul.f32 %v8179_v47, %v866_v10  ;;  %v12448_v54 = vld [vmem:[#allocation16_spill] sm:$0xff]  ;;  %v12449_v10 = vld [vmem:[#allocation15_spill] sm:$0xff]  ;;  %2096 = vmatpush1.bf16.msra.mxu0 %v6705_v12 }
 0x169   : > { %v6861_v59 = vpop.eup %6860  ;;  %6868 = vrsqrt.f32 %v797_v6  ;;  %749 = vadd.xlane.f32.xlu1 %v748_v16  ;;  %v865_v3 = vmul.f32 %v6859_v13, %v12447_v60  ;;  %v798_v25 = vadd.f32 1e-06, %v766_v37  ;;  %v1016_v53 = vadd.f32 %v8192_v26, %v940_v35  ;;  %v6708_v35 = vld [vmem:[%s12136_s3 + $0xa0] ss:$24 sps:$4 sm:$0xff]   ;;  %2097 = vmatprep.subr.bf16.mxu0 %v6710_v49 }
 0x16a   : > { %1766 = vmatmul.mubr.bf16.gmra.mxu0 %v8384_v33  ;;  %1959 = vmatmul.mubr.bf16.gmra.mxu1 %v8384_v33  ;;  %v939_v21 = vmul.f32 %v8182_v31, %v863_v42  ;;  %v868_v29 = vmul.f32 %v6861_v59, %v12448_v54  ;;  %v799_v2 = vadd.f32 1e-06, %v767_v11  ;;  %v708_v48 = vpop.xlane.xlu1 %707  ;;  %v1018_v6 = vadd.f32 %v8192_v26, %v942_v24  ;;  %v711_v37 = vpop.xlane.xlu0 %710 }
 0x16b   : > { %v941_v16 = vmul.f32 %v8182_v31, %v865_v3  ;;  %v867_v14 = vmul.f32 %v6861_v59, %v12449_v10  ;;  %6870 = vrsqrt.f32 %v798_v25  ;;  %v768_v13 = vmul.f32 0.00390625, %v708_v48  ;;  %v12450_v59 = vld [vmem:[#allocation19_spill] sm:$0xff]  ;;  %v12451_v25 = vld [vmem:[#allocation18_spill] sm:$0xff]  ;;  %v6713_v10 = vld [vmem:[%s12136_s3 + $0x74] ss:$24 sps:$4 sm:$0xff]  }
 0x16c   : > { %v6863_v42 = vpop.eup %6862  ;;  %v8402_v60 = vpack.c.bf16 %v1018_v6, %v1016_v53  ;;  %v1015_v11 = vadd.f32 %v8202_v1, %v939_v21  ;;  %v944_v3 = vmul.f32 %v8179_v47, %v868_v29  ;;  %6872 = vrsqrt.f32 %v799_v2  ;;  %2098 = vmatpush1.bf16.msra.mxu0 %v6708_v35  ;;  %v6711_v2 = vld [vmem:[%s12136_s3 + $0x70] ss:$24 sps:$4 sm:$0xff]  }
 0x16d   : > { %v1017_v24 = vadd.f32 %v8202_v1, %v941_v16  ;;  %v800_v54 = vadd.f32 1e-06, %v768_v13  ;;  %v870_v12 = vmul.f32 %v6863_v42, %v12450_v59  ;;  %v869_v48 = vmul.f32 %v6863_v42, %v12451_v25  ;;  %2099 = vmatprep.subr.bf16.mxu0 %v6713_v10 }
 0x16e   : > { %v769_v49 = vmul.f32 0.00390625, %v711_v37  ;;  %1775 = vmatprep.mubr.bf16.mxu0 %v8402_v60  ;;  %1968 = vmatprep.mubr.bf16.mxu1 %v8402_v60  ;;  %v714_v53 = vpop.xlane.xlu1 %713  ;;  %v943_v29 = vmul.f32 %v8182_v31, %v867_v14  ;;  %v1020_v42 = vadd.f32 %v8192_v26, %v944_v3 }
 0x16f   : > { %v8414_v21 = vpack.c.bf16 %v1017_v24, %v1015_v11  ;;  %6874 = vrsqrt.f32 %v800_v54  ;;  %v770_v6 = vmul.f32 0.00390625, %v714_v53  ;;  %v946_v16 = vmul.f32 %v8179_v47, %v870_v12  ;;  %v6716_v11 = vld [vmem:[%s12136_s3 + $0x44] ss:$24 sps:$4 sm:$0xff]  }
 0x170   : > { %v945_v13 = vmul.f32 %v8182_v31, %v869_v48  ;;  %v801_v59 = vadd.f32 1e-06, %v769_v49  ;;  %v1019_v3 = vadd.f32 %v8202_v1, %v943_v29  ;;  %2100 = vmatpush1.bf16.msra.mxu0 %v6711_v2  ;;  %v6714_v48 = vld [vmem:[%s12136_s3 + $0x40] ss:$24 sps:$4 sm:$0xff]  }
 0x171   : > { %v6865_v37 = vpop.eup %6864  ;;  %v802_v14 = vadd.f32 1e-06, %v770_v6  ;;  %v1022_v24 = vadd.f32 %v8192_v26, %v946_v16  ;;  %2101 = vmatprep.subr.bf16.mxu0 %v6716_v11  ;;  %v6719_v16 = vld [vmem:[%s12136_s3 + $0x14] ss:$24 sps:$4 sm:$0xff]  }
 0x172   : > { %1776 = vmatmul.mubr.bf16.gmra.mxu0 %v8414_v21  ;;  %1969 = vmatmul.mubr.bf16.gmra.mxu1 %v8414_v21  ;;  %v1021_v35 = vadd.f32 %v8202_v1, %v945_v13  ;;  %v872_v54 = vmul.f32 %v6865_v37, %v8031_v19  ;;  %v871_v25 = vmul.f32 %v6865_v37, %v8021_v15  ;;  %v12452_v15 = vld [vmem:[#allocation20_spill] sm:$0xff] }
 0x173   : > { %v8431_v12 = vpack.c.bf16 %v1022_v24, %v1020_v42  ;;  %6876 = vrsqrt.f32 %v802_v14 }
 0x174   : > { %v948_v53 = vmul.f32 %v8179_v47, %v872_v54  ;;  %v8441_v19 = vpack.c.bf16 %v1021_v35, %v1019_v3  ;;  %6878 = vrsqrt.f32 %v801_v59  ;;  %v947_v37 = vmul.f32 %v8182_v31, %v871_v25  ;;  %2102 = vmatpush1.bf16.msra.mxu0 %v6714_v48 }
 0x175   : > { %v6867_v10 = vpop.eup %6866  ;;  %1785 = vmatprep.mubr.bf16.mxu0 %v8431_v12  ;;  %1978 = vmatprep.mubr.bf16.mxu1 %v8431_v12 }
 0x176   : > { %v6869_v6 = vpop.eup %6868  ;;  %v874_v49 = vmul.f32 %v6867_v10, %v8054_v27  ;;  %v873_v29 = vmul.f32 %v6867_v10, %v12452_v15  ;;  %v6717_v27 = vld [vmem:[%s12136_s3 + $0x10] ss:$24 sps:$4 sm:$0xff]   ;;  %v1024_v14 = vadd.f32 %v8192_v26, %v948_v53  ;;  %2103 = vmatprep.subr.bf16.mxu0 %v6719_v16  ;;  %v1023_v48 = vadd.f32 %v8202_v1, %v947_v37 }
 0x177   : > { %v876_v13 = vmul.f32 %v6869_v6, %v8064_v32  ;;  %v6722_v32 = vld [vmem:[%s12136_s3 + $0x2e4] ss:$24 sps:$4 sm:$0xff]   ;;  %v875_v16 = vmul.f32 %v6869_v6, %v8061_v39  ;;  %v6723_v6 = vld [vmem:[%s12136_s3 + $0x2b0] ss:$24 sps:$4 sm:$0xff]  }
 0x178   : > { %v950_v2 = vmul.f32 %v8179_v47, %v874_v49  ;;  %v949_v42 = vmul.f32 %v8182_v31, %v873_v29  ;;  %v6871_v11 = vpop.eup %6870  ;;  %2104 = vmatpush1.bf16.msra.mxu0 %v6717_v27  ;;  %v6720_v49 = vld [vmem:[%s12136_s3 + $0x2e0] ss:$24 sps:$4 sm:$0xff]  }
 0x179   : > { %v952_v24 = vmul.f32 %v8179_v47, %v876_v13  ;;  %v878_v59 = vmul.f32 %v6871_v11, %v8080_v40  ;;  %v6873_v3 = vpop.eup %6872  ;;  %v877_v53 = vmul.f32 %v6871_v11, %v8077_v34  ;;  %2105 = vmatprep.subr.bf16.mxu0 %v6722_v32  ;;  %v6725_v40 = vld [vmem:[%s12136_s3 + $0x2b4] ss:$24 sps:$4 sm:$0xff]   ;;  %v6728_v11 = vld [vmem:[%s12136_s3 + $0x284] ss:$24 sps:$4 sm:$0xff]  }
 0x17a   : > { %1786 = vmatmul.mubr.bf16.gmra.mxu0 %v8441_v19  ;;  %1979 = vmatmul.mubr.bf16.gmra.mxu1 %v8441_v19  ;;  %v1026_v35 = vadd.f32 %v8192_v26, %v950_v2  ;;  %v1025_v54 = vadd.f32 %v8202_v1, %v949_v42  ;;  %v880_v37 = vmul.f32 %v6873_v3, %v8088_v20 }
 0x17b   : > { %v954_v10 = vmul.f32 %v8179_v47, %v878_v59  ;;  %v1028_v29 = vadd.f32 %v8192_v26, %v952_v24  ;;  %v953_v39 = vmul.f32 %v8182_v31, %v877_v53  ;;  %v951_v20 = vmul.f32 %v8182_v31, %v875_v16 }
 0x17c   : > { %v8465_v25 = vpack.c.bf16 %v1026_v35, %v1024_v14  ;;  %v6875_v15 = vpop.eup %6874  ;;  %v8480_v34 = vpack.c.bf16 %v1025_v54, %v1023_v48  ;;  %2106 = vmatpush2.bf16.msra.mxu0 %v6720_v49  ;;  %v6726_v54 = vld [vmem:[%s12136_s3 + $0x280] ss:$24 sps:$4 sm:$0xff]   ;;  %v12453_v49 = vld [vmem:[#allocation21_spill] sm:$0xff] }
 0x17d   : > { %v1030_v13 = vadd.f32 %v8192_v26, %v954_v10  ;;  %v882_v2 = vmul.f32 %v6875_v15, %v8104_v4  ;;  %2107 = vmatprep.subr.bf16.mxu0 %v6725_v40  ;;  %v956_v4 = vmul.f32 %v8179_v47, %v880_v37  ;;  %v1029_v32 = vadd.f32 %v8202_v1, %v953_v39  ;;  %v6731_v10 = vld [vmem:[%s12136_s3 + $0x254] ss:$24 sps:$4 sm:$0xff]  }
 0x17e   : > { %1795 = vmatprep.mubr.bf16.mxu0 %v8465_v25  ;;  %1988 = vmatprep.mubr.bf16.mxu1 %v8465_v25  ;;  %v881_v35 = vmul.f32 %v6875_v15, %v8097_v46  ;;  %v1027_v53 = vadd.f32 %v8202_v1, %v951_v20  ;;  %v6737_v20 = vld [vmem:[%s12136_s3 + $0x1f4] ss:$24 sps:$4 sm:$0xff]  }
 0x17f   : > { %v8485_v42 = vpack.c.bf16 %v1030_v13, %v1028_v29  ;;  %v958_v27 = vmul.f32 %v8179_v47, %v882_v2  ;;  %v879_v29 = vmul.f32 %v6873_v3, %v12453_v49  ;;  %v1032_v46 = vadd.f32 %v8192_v26, %v956_v4  ;;  %v6734_v3 = vld [vmem:[%s12136_s3 + $0x224] ss:$24 sps:$4 sm:$0xff]  }
 0x180   : > { %v6877_v14 = vpop.eup %6876  ;;  %2108 = vmatpush2.bf16.msra.mxu0 %v6723_v6  ;;  %v8515_v16 = vpack.c.bf16 %v1029_v32, %v1027_v53  ;;  %v957_v40 = vmul.f32 %v8182_v31, %v881_v35  ;;  %v6743_v53 = vld [vmem:[%s12136_s3 + $0x194] ss:$24 sps:$4 sm:$0xff]  }
 0x181   : > { %v6879_v24 = vpop.eup %6878  ;;  %v1034_v59 = vadd.f32 %v8192_v26, %v958_v27  ;;  %v886_v48 = vmul.f32 %v6877_v14, %v8124_v52  ;;  %2109 = vmatprep.subr.bf16.mxu0 %v6728_v11  ;;  %v6729_v52 = vld [vmem:[%s12136_s3 + $0x250] ss:$24 sps:$4 sm:$0xff]   ;;  %v885_v6 = vmul.f32 %v6877_v14, %v8117_v51  ;;  %v6732_v27 = vld [vmem:[%s12136_s3 + $0x220] ss:$24 sps:$4 sm:$0xff]  }
 0x182   : > { %1796 = vmatmul.mubr.bf16.gmra.mxu0 %v8480_v34  ;;  %1989 = vmatmul.mubr.bf16.gmra.mxu1 %v8480_v34  ;;  %v884_v15 = vmul.f32 %v6879_v24, %v8114_v28  ;;  %v955_v28 = vmul.f32 %v8182_v31, %v879_v29  ;;  %v1033_v39 = vadd.f32 %v8202_v1, %v957_v40  ;;  %v6735_v14 = vld [vmem:[%s12136_s3 + $0x1f0] ss:$24 sps:$4 sm:$0xff]  }
 0x183   : > { %1805 = vmatprep.mubr.bf16.mxu0 %v8485_v42  ;;  %1998 = vmatprep.mubr.bf16.mxu1 %v8485_v42  ;;  %v8521_v13 = vpack.c.bf16 %v1034_v59, %v1032_v46  ;;  %v962_v2 = vmul.f32 %v8179_v47, %v886_v48  ;;  %v883_v32 = vmul.f32 %v6879_v24, %v8111_v50  ;;  %v6740_v48 = vld [vmem:[%s12136_s3 + $0x1c4] ss:$24 sps:$4 sm:$0xff]   ;;  %v6741_v46 = vld [vmem:[%s12136_s3 + $0x190] ss:$24 sps:$4 sm:$0xff]  }
 0x184   : > { %2110 = vmatpush2.bf16.msra.mxu0 %v6726_v54  ;;  %v960_v37 = vmul.f32 %v8179_v47, %v884_v15  ;;  %v1031_v4 = vadd.f32 %v8202_v1, %v955_v28  ;;  %v961_v51 = vmul.f32 %v8182_v31, %v885_v6 }
 0x185   : > { %2111 = vmatprep.subr.bf16.mxu0 %v6731_v10  ;;  %v1038_v11 = vadd.f32 %v8192_v26, %v962_v2  ;;  %v959_v50 = vmul.f32 %v8182_v31, %v883_v32  ;;  %v6738_v10 = vld [vmem:[%s12136_s3 + $0x1c0] ss:$24 sps:$4 sm:$0xff]  }
 0x186   : > { %v1036_v35 = vadd.f32 %v8192_v26, %v960_v37  ;;  %v8545_v54 = vpack.c.bf16 %v1033_v39, %v1031_v4  ;;  %v1037_v24 = vadd.f32 %v8202_v1, %v961_v51 }
 0x187   : > { %v1035_v49 = vadd.f32 %v8202_v1, %v959_v50 }
 0x188   : > { %2112 = vmatpush2.bf16.msra.mxu0 %v6729_v52  ;;  %v8551_v59 = vpack.c.bf16 %v1038_v11, %v1036_v35 }
 0x189   : > { %2113 = vmatprep.subr.bf16.mxu0 %v6734_v3  ;;  %v8569_v29 = vpack.c.bf16 %v1037_v24, %v1035_v49 }
 0x18a   : > { %1806 = vmatmul.mubr.bf16.gmra.mxu0 %v8515_v16  ;;  %1999 = vmatmul.mubr.bf16.gmra.mxu1 %v8515_v16 }
 0x18b   : > { %1815 = vmatprep.mubr.bf16.mxu0 %v8521_v13  ;;  %2008 = vmatprep.mubr.bf16.mxu1 %v8521_v13 }
 0x18c   : > { %2114 = vmatpush2.bf16.msra.mxu0 %v6732_v27 }
 0x18d   : > { %2115 = vmatprep.subr.bf16.mxu0 %v6737_v20 }
 0x190   : > { %2116 = vmatpush2.bf16.msra.mxu0 %v6735_v14 }
 0x191   : > { %2117 = vmatprep.subr.bf16.mxu0 %v6740_v48 }
 0x192   : > { %1816 = vmatmul.mubr.bf16.gmra.mxu0 %v8545_v54  ;;  %2009 = vmatmul.mubr.bf16.gmra.mxu1 %v8545_v54 }
 0x193   : > { %1825 = vmatprep.mubr.bf16.mxu0 %v8551_v59  ;;  %2018 = vmatprep.mubr.bf16.mxu1 %v8551_v59 }
 0x194   : > { %2118 = vmatpush2.bf16.msra.mxu0 %v6738_v10 }
 0x195   : > { %2119 = vmatprep.subr.bf16.mxu0 %v6743_v53 }
 0x198   : > { %2120 = vmatpush2.bf16.msra.mxu0 %v6741_v46 }
 0x19a   : > { %1826 = vmatmul.mubr.bf16.gmra.mxu0 %v8569_v29  ;;  %2019 = vmatmul.mubr.bf16.gmra.mxu1 %v8569_v29 }
 0x1c5   : > { %v717_v15 = vpop.xlane.xlu0 %716 }
 0x1c6   : > { %v771_v40 = vmul.f32 0.00390625, %v717_v15 }
 0x1c8   : > { %v803_v52 = vadd.f32 1e-06, %v771_v40  ;;  %v12454_v40 = vld [vmem:[#allocation23_spill] sm:$0xff] }
 0x1c9   : > { %v720_v2 = vpop.xlane.xlu1 %719 }
 0x1ca   : > { %6880 = vrsqrt.f32 %v803_v52  ;;  %v772_v3 = vmul.f32 0.00390625, %v720_v2 }
 0x1cc   : > { %v804_v28 = vadd.f32 1e-06, %v772_v3 }
 0x1cd   : > { %v723_v37 = vpop.xlane.xlu0 %722 }
 0x1ce   : > { %6882 = vrsqrt.f32 %v804_v28  ;;  %v773_v39 = vmul.f32 0.00390625, %v723_v37 }
 0x1d0   : > { %v805_v6 = vadd.f32 1e-06, %v773_v39 }
 0x1d1   : > { %v726_v27 = vpop.xlane.xlu1 %725 }
 0x1d2   : > { %6884 = vrsqrt.f32 %v805_v6  ;;  %v774_v11 = vmul.f32 0.00390625, %v726_v27 }
 0x1d4   : > { %v806_v20 = vadd.f32 1e-06, %v774_v11 }
 0x1d5   : > { %v729_v4 = vpop.xlane.xlu0 %728 }
 0x1d6   : > { %6886 = vrsqrt.f32 %v806_v20  ;;  %v775_v32 = vmul.f32 0.00390625, %v729_v4 }
 0x1d7   : > { %v6881_v35 = vpop.eup %6880 }
 0x1d8   : > { %v807_v51 = vadd.f32 1e-06, %v775_v32  ;;  %v888_v14 = vmul.f32 %v6881_v35, %v8138_v17  ;;  %v887_v48 = vmul.f32 %v6881_v35, %v8135_v41  ;;  %v12456_v32 = vld [vmem:[#allocation26_spill] sm:$0xff] }
 0x1d9   : > { %v732_v50 = vpop.xlane.xlu1 %731 }
 0x1da   : > { %6888 = vrsqrt.f32 %v807_v51  ;;  %v776_v24 = vmul.f32 0.00390625, %v732_v50  ;;  %v964_v53 = vmul.f32 %v8179_v47, %v888_v14  ;;  %v963_v49 = vmul.f32 %v8182_v31, %v887_v48 }
 0x1db   : > { %v6883_v10 = vpop.eup %6882 }
 0x1dc   : > { %v808_v46 = vadd.f32 1e-06, %v776_v24  ;;  %v890_v15 = vmul.f32 %v6883_v10, %v8150_v0  ;;  %v889_v52 = vmul.f32 %v6883_v10, %v12454_v40  ;;  %v1040_v37 = vadd.f32 %v8192_v26, %v964_v53  ;;  %v12455_v0 = vld [vmem:[#allocation27_spill] sm:$0xff] }
 0x1dd   : > { %v735_v2 = vpop.xlane.xlu0 %734  ;;  %v1039_v39 = vadd.f32 %v8202_v1, %v963_v49 }
 0x1de   : > { %6890 = vrsqrt.f32 %v808_v46  ;;  %v777_v3 = vmul.f32 0.00390625, %v735_v2  ;;  %v966_v17 = vmul.f32 %v8179_v47, %v890_v15  ;;  %v965_v41 = vmul.f32 %v8182_v31, %v889_v52 }
 0x1df   : > { %v6885_v28 = vpop.eup %6884 }
 0x1e0   : > { %v809_v6 = vadd.f32 1e-06, %v777_v3  ;;  %v1042_v27 = vadd.f32 %v8192_v26, %v966_v17  ;;  %v1041_v11 = vadd.f32 %v8202_v1, %v965_v41  ;;  %v892_v20 = vmul.f32 %v6885_v28, %v12455_v0 }
 0x1e1   : > { %v738_v4 = vpop.xlane.xlu1 %737  ;;  %v891_v35 = vmul.f32 %v6885_v28, %v12456_v32 }
 0x1e2   : > { %6892 = vrsqrt.f32 %v809_v6  ;;  %v778_v51 = vmul.f32 0.00390625, %v738_v4  ;;  %v8590_v14 = vpack.c.bf16 %v1042_v27, %v1040_v37  ;;  %v8592_v48 = vpack.c.bf16 %v1041_v11, %v1039_v39 }
 0x1e3   : > { %v6887_v50 = vpop.eup %6886  ;;  %v968_v24 = vmul.f32 %v8179_v47, %v892_v20  ;;  %v967_v10 = vmul.f32 %v8182_v31, %v891_v35 }
 0x1e4   : > { %v810_v53 = vadd.f32 1e-06, %v778_v51  ;;  %1835 = vmatprep.mubr.bf16.mxu0 %v8590_v14  ;;  %2028 = vmatprep.mubr.bf16.mxu1 %v8590_v14  ;;  %v894_v49 = vmul.f32 %v6887_v50, %v8188_v22  ;;  %v893_v46 = vmul.f32 %v6887_v50, %v8185_v38 }
 0x1e5   : > { %1836 = vmatmul.mubr.bf16.gmra.mxu0 %v8592_v48  ;;  %2029 = vmatmul.mubr.bf16.gmra.mxu1 %v8592_v48  ;;  %v741_v15 = vpop.xlane.xlu0 %740  ;;  %v1044_v17 = vadd.f32 %v8192_v26, %v968_v24  ;;  %v1043_v41 = vadd.f32 %v8202_v1, %v967_v10 }
 0x1e6   : > { %6894 = vrsqrt.f32 %v810_v53  ;;  %v779_v40 = vmul.f32 0.00390625, %v741_v15  ;;  %v970_v52 = vmul.f32 %v8179_v47, %v894_v49  ;;  %v969_v2 = vmul.f32 %v8182_v31, %v893_v46 }
 0x1e7   : > { %v6889_v3 = vpop.eup %6888 }
 0x1e8   : > { %v811_v28 = vadd.f32 1e-06, %v779_v40  ;;  %v1046_v22 = vadd.f32 %v8192_v26, %v970_v52  ;;  %v1045_v38 = vadd.f32 %v8202_v1, %v969_v2  ;;  %v896_v37 = vmul.f32 %v6889_v3, %v8208_v9 }
 0x1e9   : > { %v895_v39 = vmul.f32 %v6889_v3, %v8205_v36 }
 0x1ea   : > { %6896 = vrsqrt.f32 %v811_v28  ;;  %v8610_v27 = vpack.c.bf16 %v1046_v22, %v1044_v17  ;;  %v8612_v11 = vpack.c.bf16 %v1045_v38, %v1043_v41  ;;  %v972_v4 = vmul.f32 %v8179_v47, %v896_v37 }
 0x1eb   : > { %v744_v6 = vpop.xlane.xlu1 %743  ;;  %v6891_v0 = vpop.eup %6890  ;;  %v971_v32 = vmul.f32 %v8182_v31, %v895_v39 }
 0x1ec   : > { %v780_v20 = vmul.f32 0.00390625, %v744_v6  ;;  %1845 = vmatprep.mubr.bf16.mxu0 %v8610_v27  ;;  %2038 = vmatprep.mubr.bf16.mxu1 %v8610_v27  ;;  %v898_v9 = vmul.f32 %v6891_v0, %v8224_v5  ;;  %v897_v36 = vmul.f32 %v6891_v0, %v8221_v7  ;;  %v1048_v49 = vadd.f32 %v8192_v26, %v972_v4 }
 0x1ed   : > { %1846 = vmatmul.mubr.bf16.gmra.mxu0 %v8612_v11  ;;  %2039 = vmatmul.mubr.bf16.gmra.mxu1 %v8612_v11  ;;  %v1047_v46 = vadd.f32 %v8202_v1, %v971_v32 }
 0x1ee   : > { %v812_v35 = vadd.f32 1e-06, %v780_v20  ;;  %v747_v51 = vpop.xlane.xlu0 %746  ;;  %v974_v24 = vmul.f32 %v8179_v47, %v898_v9  ;;  %v973_v10 = vmul.f32 %v8182_v31, %v897_v36 }
 0x1ef   : > { %v781_v50 = vmul.f32 0.00390625, %v747_v51  ;;  %v6893_v53 = vpop.eup %6892 }
 0x1f0   : > { %6898 = vrsqrt.f32 %v812_v35  ;;  %v1050_v7 = vadd.f32 %v8192_v26, %v974_v24  ;;  %v1049_v15 = vadd.f32 %v8202_v1, %v973_v10  ;;  %v900_v40 = vmul.f32 %v6893_v53, %v8243_v30 }
 0x1f1   : > { %v813_v5 = vadd.f32 1e-06, %v781_v50  ;;  %v899_v2 = vmul.f32 %v6893_v53, %v8240_v45 }
 0x1f2   : > { %v750_v52 = vpop.xlane.xlu1 %749  ;;  %v8630_v17 = vpack.c.bf16 %v1050_v7, %v1048_v49  ;;  %v8632_v41 = vpack.c.bf16 %v1049_v15, %v1047_v46  ;;  %v976_v22 = vmul.f32 %v8179_v47, %v900_v40 }
 0x1f3   : > { %6900 = vrsqrt.f32 %v813_v5  ;;  %v782_v3 = vmul.f32 0.00390625, %v750_v52  ;;  %v6895_v28 = vpop.eup %6894  ;;  %v975_v45 = vmul.f32 %v8182_v31, %v899_v2 }
 0x1f4   : > { %1855 = vmatprep.mubr.bf16.mxu0 %v8630_v17  ;;  %2048 = vmatprep.mubr.bf16.mxu1 %v8630_v17  ;;  %v902_v37 = vmul.f32 %v6895_v28, %v8263_v55  ;;  %v901_v30 = vmul.f32 %v6895_v28, %v8260_v56  ;;  %v1052_v20 = vadd.f32 %v8192_v26, %v976_v22 }
 0x1f5   : > { %v814_v38 = vadd.f32 1e-06, %v782_v3  ;;  %1856 = vmatmul.mubr.bf16.gmra.mxu0 %v8632_v41  ;;  %2049 = vmatmul.mubr.bf16.gmra.mxu1 %v8632_v41  ;;  %v1051_v55 = vadd.f32 %v8202_v1, %v975_v45 }
 0x1f6   : > { %v978_v39 = vmul.f32 %v8179_v47, %v902_v37  ;;  %v977_v6 = vmul.f32 %v8182_v31, %v901_v30 }
 0x1f7   : > { %6902 = vrsqrt.f32 %v814_v38  ;;  %v6897_v0 = vpop.eup %6896 }
 0x1f8   : > { %v1054_v4 = vadd.f32 %v8192_v26, %v978_v39  ;;  %v1053_v56 = vadd.f32 %v8202_v1, %v977_v6  ;;  %v904_v32 = vmul.f32 %v6897_v0, %v8282_v61  ;;  %v903_v9 = vmul.f32 %v6897_v0, %v8279_v23 }
 0x1fa   : > { %v8650_v36 = vpack.c.bf16 %v1054_v4, %v1052_v20  ;;  %v8652_v35 = vpack.c.bf16 %v1053_v56, %v1051_v55  ;;  %v980_v50 = vmul.f32 %v8179_v47, %v904_v32  ;;  %v979_v23 = vmul.f32 %v8182_v31, %v903_v9  ;;  %v12461_v55 = vld [vmem:[#allocation28_spill] sm:$0xff] }
 0x1fb   : > { %v12462_v56 = vld [vmem:[#allocation4_spill] sm:$0xff] }
 0x1fc   : > { %1865 = vmatprep.mubr.bf16.mxu0 %v8650_v36  ;;  %2058 = vmatprep.mubr.bf16.mxu1 %v8650_v36  ;;  %v1056_v7 = vadd.f32 %v8192_v26, %v980_v50  ;;  %v1055_v40 = vadd.f32 %v8202_v1, %v979_v23 }
 0x1fd   : > { %v6899_v51 = vpop.eup %6898  ;;  %1866 = vmatmul.mubr.bf16.gmra.mxu0 %v8652_v35  ;;  %2059 = vmatmul.mubr.bf16.gmra.mxu1 %v8652_v35 }
 0x1fe   : > { %v906_v24 = vmul.f32 %v6899_v51, %v8308_v57  ;;  %v905_v61 = vmul.f32 %v6899_v51, %v8305_v62 }
 0x200   : > { %v6901_v10 = vpop.eup %6900  ;;  %v982_v53 = vmul.f32 %v8179_v47, %v906_v24  ;;  %v981_v49 = vmul.f32 %v8182_v31, %v905_v61  ;;  %v12466_v61 = vld [vmem:[#allocation29_spill] sm:$0xff] }
 0x201   : > { %v908_v46 = vmul.f32 %v6901_v10, %v8326_v44  ;;  %v907_v5 = vmul.f32 %v6901_v10, %v8323_v58  ;;  %v12467_v10 = vld [vmem:[#allocation17_spill] sm:$0xff] }
 0x202   : > { %v1058_v15 = vadd.f32 %v8192_v26, %v982_v53  ;;  %v1057_v57 = vadd.f32 %v8202_v1, %v981_v49 }
 0x203   : > { %v984_v28 = vmul.f32 %v8179_v47, %v908_v46  ;;  %v983_v58 = vmul.f32 %v8182_v31, %v907_v5 }
 0x204   : > { %v6903_v62 = vpop.eup %6902  ;;  %v8670_v52 = vpack.c.bf16 %v1058_v15, %v1056_v7  ;;  %v8672_v2 = vpack.c.bf16 %v1057_v57, %v1055_v40  ;;  %v12471_v15 = vld [vmem:[#allocation6_spill] sm:$0xff] }
 0x205   : > { %v910_v3 = vmul.f32 %v6903_v62, %v8355_v18  ;;  %v909_v44 = vmul.f32 %v6903_v62, %v8352_v63  ;;  %v1060_v18 = vadd.f32 %v8192_v26, %v984_v28  ;;  %v1059_v63 = vadd.f32 %v8202_v1, %v983_v58 }
 0x206   : > { %1875 = vmatprep.mubr.bf16.mxu0 %v8670_v52  ;;  %2068 = vmatprep.mubr.bf16.mxu1 %v8670_v52 }
 0x207   : > { %1876 = vmatmul.mubr.bf16.gmra.mxu0 %v8672_v2  ;;  %2069 = vmatmul.mubr.bf16.gmra.mxu1 %v8672_v2  ;;  %v986_v22 = vmul.f32 %v8179_v47, %v910_v3  ;;  %v985_v38 = vmul.f32 %v8182_v31, %v909_v44 }
 0x209   : > { %v1062_v37 = vadd.f32 %v8192_v26, %v986_v22  ;;  %v1061_v30 = vadd.f32 %v8202_v1, %v985_v38 }
 0x20b   : > { %v8688_v45 = vpack.c.bf16 %v1062_v37, %v1060_v18  ;;  %v8690_v39 = vpack.c.bf16 %v1061_v30, %v1059_v63 }
 0x20d   : > { %1885 = vmatprep.mubr.bf16.mxu0 %v8688_v45  ;;  %2078 = vmatprep.mubr.bf16.mxu1 %v8688_v45 }
 0x20f   : > { %1886 = vmatmul.mubr.bf16.gmra.mxu0 %v8690_v39  ;;  %2079 = vmatmul.mubr.bf16.gmra.mxu1 %v8690_v39  ;;  %v8697_v47 = vpop.f32.mrf.mxu0  ;;  %v8699_v26 = vpop.f32.mrf.mxu1 }
 0x210   : > { %2121 = vmatprep.mubr.bf16.mxu0 %v8232_v8 }
 0x211   : > { %v8701_v31 = vpop.f32.mrf.mxu0  ;;  %v8703_v1 = vpop.f32.mrf.mxu1 }
 0x212   : > { %12457 = vst [vmem:[#allocation3_spill] sm:$0xff] %v8701_v31  ;;  %12458 = vst [vmem:[#allocation5_spill] sm:$0xff] %v8703_v1 }
 0x213   : > { %v8705_v6 = vpop.f32.mrf.mxu0  ;;  %v8707_v0 = vpop.f32.mrf.mxu1 }
 0x215   : > { %v8709_v20 = vpop.f32.mrf.mxu0  ;;  %v8711_v4 = vpop.f32.mrf.mxu1 }
 0x216   : > { %12459 = vst [vmem:[#allocation8_spill] sm:$0xff] %v8709_v20  ;;  %12460 = vst [vmem:[#allocation10_spill] sm:$0xff] %v8711_v4 }
 0x217   : > { %2122 = vmatmul.mubr.bf16.vlgmr.msra.gmra.mxu0 %v12461_v55  ;;  %v8715_v8 = vpop.f32.mrf.mxu0  ;;  %v8717_v32 = vpop.f32.mrf.mxu1 }
 0x218   : > { %2131 = vmatprep.mubr.bf16.mxu0 %v12462_v56 }
 0x219   : > { %v8719_v9 = vpop.f32.mrf.mxu1  ;;  %v8721_v51 = vpop.f32.mrf.mxu0 }
 0x21a   : > { %12463 = vst [vmem:[#allocation7_spill] sm:$0xff] %v8719_v9  ;;  %12464 = vst [vmem:[#allocation9_spill] sm:$0xff] %v8721_v51 }
 0x21b   : > { %v8723_v50 = vpop.f32.mrf.mxu1  ;;  %v8728_v23 = vpop.f32.mrf.mxu0 }
 0x21d   : > { %v8725_v24 = vpop.f32.mrf.mxu1  ;;  %v8735_v46 = vpop.f32.mrf.mxu0 }
 0x21e   : > { %12465 = vst [vmem:[#allocation12_spill] sm:$0xff] %v8725_v24  ;;  %12469 = vst [vmem:[#allocation11_spill] sm:$0xff] %v8735_v46 }
 0x21f   : > { %2132 = vmatmul.mubr.bf16.gmra.mxu0 %v12466_v61 }
 0x220   : > { %2141 = vmatprep.mubr.bf16.mxu0 %v12467_v10 }
 0x221   : > { %v8731_v53 = vpop.f32.mrf.mxu1  ;;  %v8742_v40 = vpop.f32.mrf.mxu0 }
 0x223   : > { %v8733_v49 = vpop.f32.mrf.mxu1  ;;  %v8747_v62 = vpop.f32.mrf.mxu0 }
 0x224   : > { %12468 = vst [vmem:[#allocation14_spill] sm:$0xff] %v8733_v49  ;;  %12472 = vst [vmem:[#allocation16_spill] sm:$0xff] %v8747_v62 }
 0x225   : > { %v8737_v5 = vpop.f32.mrf.mxu1  ;;  %v8754_v44 = vpop.f32.mrf.mxu0 }
 0x227   : > { %v8739_v7 = vpop.f32.mrf.mxu1  ;;  %2142 = vmatmul.mubr.bf16.gmra.mxu0 %v12471_v15  ;;  %v8761_v38 = vpop.f32.mrf.mxu0  ;;  %v12483_v15 = vld [vmem:[#allocation22_spill] sm:$0xff] }
 0x228   : > { %12470 = vst [vmem:[#allocation13_spill] sm:$0xff] %v8739_v7  ;;  %2151 = vmatprep.mubr.bf16.mxu0 %v8365_v43  ;;  %12475 = vst [vmem:[#allocation18_spill] sm:$0xff] %v8761_v38  ;;  %v1203_v38 = vsub.s32 2, %v12483_v15 }
 0x22a   : > { %v8745_v57 = vpop.f32.mrf.mxu1  ;;  %v8768_v37 = vpop.f32.mrf.mxu0 }
 0x22c   : > { %v8749_v3 = vpop.f32.mrf.mxu1  ;;  %v8775_v30 = vpop.f32.mrf.mxu0 }
 0x22d   : > { %12473 = vst [vmem:[#allocation15_spill] sm:$0xff] %v8749_v3  ;;  %12478 = vst [vmem:[#allocation23_spill] sm:$0xff] %v8775_v30  ;;  %v8797_v30 = vld [vmem:[%s12137_s4] sm:$0x3f] }
 0x22e   : > { %v8751_v28 = vpop.f32.mrf.mxu1  ;;  %v8782_v56 = vpop.f32.mrf.mxu0 }
 0x22f   : > { %2152 = vmatmul.mubr.bf16.gmra.mxu0 %v8384_v33 }
 0x230   : > { %v8756_v58 = vpop.f32.mrf.mxu1  ;;  %2161 = vmatprep.mubr.bf16.mxu0 %v8402_v60  ;;  %v8789_v10 = vpop.f32.mrf.mxu0 }
 0x231   : > { %12474 = vst [vmem:[#allocation19_spill] sm:$0xff] %v8756_v58  ;;  %12481 = vst [vmem:[#allocation28_spill] sm:$0xff] %v8789_v10  ;;  %v8808_v10 = vrot.slane %v8797_v30, %v1203_v38 }
 0x232   : > { %v8759_v22 = vpop.f32.mrf.mxu1  ;;  %v8802_v46 = vpop.f32.mrf.mxu0 }
 0x234   : > { %v8763_v43 = vpop.f32.mrf.mxu1  ;;  %v8813_v51 = vpop.f32.mrf.mxu0 }
 0x235   : > { %12476 = vst [vmem:[#allocation20_spill] sm:$0xff] %v8763_v43  ;;  %12486 = vst [vmem:[#allocation6_spill] sm:$0xff] %v8813_v51 }
 0x236   : > { %v8765_v18 = vpop.f32.mrf.mxu1 }
 0x237   : > { %2162 = vmatmul.mubr.bf16.gmra.mxu0 %v8414_v21 }
 0x238   : > { %v8770_v63 = vpop.f32.mrf.mxu1  ;;  %2171 = vmatprep.mubr.bf16.mxu0 %v8431_v12 }
 0x239   : > { %12477 = vst [vmem:[#allocation21_spill] sm:$0xff] %v8770_v63 }
 0x23a   : > { %v8773_v33 = vpop.f32.mrf.mxu1 }
 0x23c   : > { %v8777_v60 = vpop.f32.mrf.mxu1 }
 0x23d   : > { %12479 = vst [vmem:[#allocation27_spill] sm:$0xff] %v8777_v60 }
 0x23e   : > { %v8779_v55 = vpop.f32.mrf.mxu1 }
 0x23f   : > { %2172 = vmatmul.mubr.bf16.gmra.mxu0 %v8441_v19 }
 0x240   : > { %v8784_v61 = vpop.f32.mrf.mxu1  ;;  %2181 = vmatprep.mubr.bf16.mxu0 %v8465_v25 }
 0x241   : > { %12480 = vst [vmem:[#allocation26_spill] sm:$0xff] %v8784_v61 }
 0x242   : > { %v8787_v21 = vpop.f32.mrf.mxu1 }
 0x244   : > { %v8791_v12 = vpop.f32.mrf.mxu1 }
 0x245   : > { %12482 = vst [vmem:[#allocation4_spill] sm:$0xff] %v8791_v12 }
 0x246   : > { %v8799_v19 = vpop.f32.mrf.mxu1 }
 0x247   : > { %2182 = vmatmul.mubr.bf16.gmra.mxu0 %v8480_v34  ;;  %v8818_v34 = vpop.f32.mrf.mxu0 }
 0x248   : > { %v8804_v25 = vpop.f32.mrf.mxu1  ;;  %2191 = vmatprep.mubr.bf16.mxu0 %v8485_v42 }
 0x249   : > { %12484 = vst [vmem:[#allocation29_spill] sm:$0xff] %v8804_v25  ;;  %v8821_v42 = vpop.f32.mrf.mxu0 }
 0x24a   : > { %v2000_v62 = vpop.f32.mrf.mxu1  ;;  %12487 = vst [vmem:[#allocation22_spill] sm:$0xff] %v8821_v42 }
 0x24b   : > { %v8811_v20 = vadd.f32 %v2000_v62, %v8808_v10  ;;  %v8824_v38 = vpop.f32.mrf.mxu0 }
 0x24d   : > { %12485 = vst [vmem:[#allocation17_spill] sm:$0xff] %v8811_v20  ;;  %2582 = vrot.lane.b32.xlu1 %v8811_v20, %s7417_s26  ;;  %v8827_v62 = vpop.f32.mrf.mxu0 }
 0x24e   : > { %12488 = vst [vmem:[#allocation30_spill] sm:$0xff] %v8827_v62 }
 0x24f   : > { %2192 = vmatmul.mubr.bf16.gmra.mxu0 %v8515_v16  ;;  %v8830_v51 = vpop.f32.mrf.mxu0 }
 0x250   : > { %2201 = vmatprep.mubr.bf16.mxu0 %v8521_v13 }
 0x251   : > { %v8833_v16 = vpop.f32.mrf.mxu0 }
 0x252   : > { %12489 = vst [vmem:[#allocation31_spill] sm:$0xff] %v8833_v16  ;;  %v8853_v16 = vpop.f32.mrf.mxu1 }
 0x253   : > { %v8836_v13 = vpop.f32.mrf.mxu0 }
 0x257   : > { %2202 = vmatmul.mubr.bf16.gmra.mxu0 %v8545_v54  ;;  %v8839_v54 = vpop.f32.mrf.mxu0 }
 0x258   : > { %2211 = vmatprep.mubr.bf16.mxu0 %v8551_v59  ;;  %12490 = vst [vmem:[#allocation32_spill] sm:$0xff] %v8839_v54 }
 0x259   : > { %v8842_v59 = vpop.f32.mrf.mxu0 }
 0x25f   : > { %2212 = vmatmul.mubr.bf16.gmra.mxu0 %v8569_v29  ;;  %v8845_v29 = vpop.f32.mrf.mxu0 }
 0x260   : > { %2221 = vmatprep.mubr.bf16.mxu0 %v8590_v14  ;;  %12491 = vst [vmem:[#allocation33_spill] sm:$0xff] %v8845_v29 }
 0x261   : > { %v8848_v14 = vpop.f32.mrf.mxu0 }
 0x267   : > { %2222 = vmatmul.mubr.bf16.gmra.mxu0 %v8592_v48  ;;  %v8851_v48 = vpop.f32.mrf.mxu0 }
 0x268   : > { %2231 = vmatprep.mubr.bf16.mxu0 %v8610_v27  ;;  %12492 = vst [vmem:[#allocation34_spill] sm:$0xff] %v8851_v48 }
 0x269   : > { %v8856_v27 = vpop.f32.mrf.mxu0 }
 0x26f   : > { %2232 = vmatmul.mubr.bf16.gmra.mxu0 %v8612_v11  ;;  %v8858_v11 = vpop.f32.mrf.mxu1 }
 0x270   : > { %2241 = vmatprep.mubr.bf16.mxu0 %v8630_v17  ;;  %v8861_v17 = vpop.f32.mrf.mxu0 }
 0x271   : > { %12493 = vst [vmem:[#allocation35_spill] sm:$0xff] %v8861_v17  ;;  %v8863_v29 = vpop.f32.mrf.mxu1 }
 0x277   : > { %2242 = vmatmul.mubr.bf16.gmra.mxu0 %v8632_v41  ;;  %v8866_v41 = vpop.f32.mrf.mxu0 }
 0x278   : > { %2251 = vmatprep.mubr.bf16.mxu0 %v8650_v36  ;;  %v8868_v36 = vpop.f32.mrf.mxu1 }
 0x279   : > { %v8871_v48 = vpop.f32.mrf.mxu0 }
 0x27a   : > { %12494 = vst [vmem:[#allocation36_spill] sm:$0xff] %v8871_v48 }
 0x27b   : > { %v8876_v54 = vpop.f32.mrf.mxu0 }
 0x27d   : > { %v8880_v17 = vpop.f32.mrf.mxu0 }
 0x27e   : > { %12496 = vst [vmem:[#allocation38_spill] sm:$0xff] %v8880_v17 }
 0x27f   : > { %2252 = vmatmul.mubr.bf16.gmra.mxu0 %v8652_v35  ;;  %v8873_v35 = vpop.f32.mrf.mxu1 }
 0x280   : > { %2261 = vmatprep.mubr.bf16.mxu0 %v8670_v52  ;;  %12495 = vst [vmem:[#allocation37_spill] sm:$0xff] %v8873_v35 }
 0x281   : > { %v8878_v52 = vpop.f32.mrf.mxu1 }
 0x283   : > { %v8882_v42 = vpop.f32.mrf.mxu1 }
 0x284   : > { %12497 = vst [vmem:[#allocation39_spill] sm:$0xff] %v8882_v42 }
 0x285   : > { %v8886_v62 = vpop.f32.mrf.mxu1 }
 0x287   : > { %2262 = vmatmul.mubr.bf16.gmra.mxu0 %v8672_v2  ;;  %v8884_v2 = vpop.f32.mrf.mxu0 }
 0x288   : > { %2271 = vmatprep.mubr.bf16.mxu0 %v8688_v45  ;;  %v8890_v45 = vpop.f32.mrf.mxu1 }
 0x289   : > { %v8888_v4 = vpop.f32.mrf.mxu0  ;;  %12499 = vst [vmem:[#allocation41_spill] sm:$0xff] %v8890_v45 }
 0x28a   : > { %12498 = vst [vmem:[#allocation40_spill] sm:$0xff] %v8888_v4  ;;  %v8894_v31 = vpop.f32.mrf.mxu1 }
 0x28b   : > { %v8892_v48 = vpop.f32.mrf.mxu0 }
 0x28c   : > { %v8898_v1 = vpop.f32.mrf.mxu1 }
 0x28d   : > { %12501 = vst [vmem:[#allocation43_spill] sm:$0xff] %v8898_v1 }
 0x28f   : > { %2272 = vmatmul.mubr.bf16.gmra.mxu0 %v8690_v39  ;;  %v8896_v39 = vpop.f32.mrf.mxu0 }
 0x290   : > { %12500 = vst [vmem:[#allocation42_spill] sm:$0xff] %v8896_v39 }
 0x2a5   : > { %v8900_v35 = vpop.f32.mrf.mxu0  ;;  %v8902_v17 = vpop.f32.mrf.mxu1 }
 0x2a6   : > { %12502 = vst [vmem:[#allocation44_spill] sm:$0xff] %v8900_v35 }
 0x2a7   : > { %v8904_v42 = vpop.f32.mrf.mxu0  ;;  %v8906_v24 = vpop.f32.mrf.mxu1 }
 0x2a8   : > { %12503 = vst [vmem:[#allocation45_spill] sm:$0xff] %v8904_v42  ;;  %12504 = vst [vmem:[#allocation46_spill] sm:$0xff] %v8906_v24 }
 0x2a9   : > { %v8908_v9 = vpop.f32.mrf.mxu0  ;;  %v8910_v4 = vpop.f32.mrf.mxu1 }
 0x2aa   : > { %12505 = vst [vmem:[#allocation47_spill] sm:$0xff] %v8908_v9 }
 0x2ab   : > { %v8912_v45 = vpop.f32.mrf.mxu0  ;;  %v8914_v7 = vpop.f32.mrf.mxu1 }
 0x2ac   : > { %12506 = vst [vmem:[#allocation48_spill] sm:$0xff] %v8912_v45  ;;  %12507 = vst [vmem:[#allocation49_spill] sm:$0xff] %v8914_v7 }
 0x2ad   : > { %v8916_v49 = vpop.f32.mrf.mxu0  ;;  %v8918_v39 = vpop.f32.mrf.mxu1 }
 0x2ae   : > { %12508 = vst [vmem:[#allocation50_spill] sm:$0xff] %v8916_v49 }
 0x2af   : > { %v8920_v1 = vpop.f32.mrf.mxu0  ;;  %v8922_v58 = vpop.f32.mrf.mxu1 }
 0x2b0   : > { %12509 = vst [vmem:[#allocation51_spill] sm:$0xff] %v8920_v1  ;;  %12510 = vst [vmem:[#allocation52_spill] sm:$0xff] %v8922_v58 }
 0x2b1   : > { %v8924_v3 = vpop.f32.mrf.mxu0  ;;  %v8926_v42 = vpop.f32.mrf.mxu1 }
 0x2b2   : > { %12511 = vst [vmem:[#allocation53_spill] sm:$0xff] %v8924_v3 }
 0x2b3   : > { %v8928_v24 = vpop.f32.mrf.mxu0  ;;  %v8930_v63 = vpop.f32.mrf.mxu1 }
 0x2b4   : > { %12512 = vst [vmem:[#allocation54_spill] sm:$0xff] %v8928_v24  ;;  %12513 = vst [vmem:[#allocation55_spill] sm:$0xff] %v8930_v63 }
 0x2b5   : > { %v8932_v43 = vpop.f32.mrf.mxu0  ;;  %v8934_v45 = vpop.f32.mrf.mxu1 }
 0x2b6   : > { %12514 = vst [vmem:[#allocation56_spill] sm:$0xff] %v8932_v43 }
 0x2b7   : > { %v8936_v7 = vpop.f32.mrf.mxu0  ;;  %v8938_v49 = vpop.f32.mrf.mxu1 }
 0x2b8   : > { %12515 = vst [vmem:[#allocation57_spill] sm:$0xff] %v8936_v7  ;;  %12516 = vst [vmem:[#allocation58_spill] sm:$0xff] %v8938_v49 }
 0x2b9   : > { %v8940_v61 = vpop.f32.mrf.mxu0  ;;  %v8942_v1 = vpop.f32.mrf.mxu1 }
 0x2ba   : > { %12517 = vst [vmem:[#allocation59_spill] sm:$0xff] %v8940_v61 }
 0x2bb   : > { %v8944_v58 = vpop.f32.mrf.mxu0  ;;  %v8946_v3 = vpop.f32.mrf.mxu1 }
 0x2bc   : > { %12518 = vst [vmem:[#allocation60_spill] sm:$0xff] %v8944_v58  ;;  %12519 = vst [vmem:[#allocation61_spill] sm:$0xff] %v8946_v3 }
 0x2bd   : > { %v8948_v20 = vpop.f32.mrf.mxu0  ;;  %v2060_v24 = vpop.f32.mrf.mxu1 }
 0x2be   : > { %12520 = vst [vmem:[#allocation62_spill] sm:$0xff] %v8948_v20 }
 0x2bf   : > { %v8950_v63 = vpop.f32.mrf.mxu0  ;;  %v8952_v43 = vpop.f32.mrf.mxu1 }
 0x2c0   : > { %12521 = vst [vmem:[#allocation63_spill] sm:$0xff] %v8950_v63  ;;  %12522 = vst [vmem:[#allocation64_spill] sm:$0xff] %v8952_v43 }
 0x2c1   : > { %v8954_v60 = vpop.f32.mrf.mxu0  ;;  %v2064_v7 = vpop.f32.mrf.mxu1 }
 0x2c2   : > { %12523 = vst [vmem:[#allocation65_spill] sm:$0xff] %v8954_v60 }
 0x2c3   : > { %v8956_v9 = vpop.f32.mrf.mxu0  ;;  %v8958_v49 = vpop.f32.mrf.mxu1 }
 0x2c4   : > { %12524 = vst [vmem:[#allocation66_spill] sm:$0xff] %v8956_v9  ;;  %12525 = vst [vmem:[#allocation67_spill] sm:$0xff] %v8958_v49 }
 0x2c7   : > { %v8960_v61 = vpop.f32.mrf.mxu0  ;;  %v2070_v35 = vpop.f32.mrf.mxu1 }
 0x2c8   : > { %12526 = vst [vmem:[#allocation68_spill] sm:$0xff] %v8960_v61 }
 0x2c9   : > { %v8962_v58 = vpop.f32.mrf.mxu0  ;;  %v8964_v3 = vpop.f32.mrf.mxu1 }
 0x2ca   : > { %12527 = vst [vmem:[#allocation69_spill] sm:$0xff] %v8962_v58 }
 0x2cb   : > { %v8966_v20 = vpop.f32.mrf.mxu0  ;;  %v2074_v25 = vpop.f32.mrf.mxu1 }
 0x2cc   : > { %12528 = vst [vmem:[#allocation70_spill] sm:$0xff] %v8966_v20 }
 0x2cd   : > { %v8968_v63 = vpop.f32.mrf.mxu0  ;;  %v8970_v43 = vpop.f32.mrf.mxu1 }
 0x2ce   : > { %12529 = vst [vmem:[#allocation71_spill] sm:$0xff] %v8968_v63  ;;  %12530 = vst [vmem:[#allocation72_spill] sm:$0xff] %v8970_v43  ;;  %v1211_v43 = vsub.s32 4, %v12483_v15 }
 0x2cf   : > { %v8972_v60 = vpop.f32.mrf.mxu0  ;;  %v2080_v12 = vpop.f32.mrf.mxu1 }
 0x2d0   : > { %12531 = vst [vmem:[#allocation73_spill] sm:$0xff] %v8972_v60  ;;  %v8975_v9 = vadd.f32 %v2080_v12, %v8808_v10  ;;  %v8990_v60 = vadd.f32 %v2070_v35, %v8808_v10  ;;  %v9007_v35 = vadd.f32 %v8787_v21, %v8808_v10  ;;  %v9025_v21 = vadd.f32 %v2060_v24, %v8808_v10 }
 0x2d1   : > { %v8977_v49 = vpop.f32.mrf.mxu0  ;;  %v8979_v61 = vpop.f32.mrf.mxu1  ;;  %v9041_v24 = vadd.f32 %v8773_v33, %v8808_v10  ;;  %v9060_v33 = vadd.f32 %v8934_v45, %v8808_v10  ;;  %v9076_v45 = vadd.f32 %v8759_v22, %v8808_v10  ;;  %v9096_v22 = vadd.f32 %v8918_v39, %v8808_v10 }
 0x2d2   : > { %12532 = vst [vmem:[#allocation74_spill] sm:$0xff] %v8975_v9  ;;  %12533 = vst [vmem:[#allocation75_spill] sm:$0xff] %v8977_v49  ;;  %2614 = vrot.lane.b32.xlu0 %v8975_v9, %s7417_s26  ;;  %v9112_v39 = vadd.f32 %v8745_v57, %v8808_v10  ;;  %v9132_v57 = vadd.f32 %v8902_v17, %v8808_v10  ;;  %v9148_v17 = vadd.f32 %v8731_v53, %v8808_v10 }
 0x2d3   : > { %v8983_v58 = vpop.f32.mrf.mxu0  ;;  %v2084_v20 = vpop.f32.mrf.mxu1  ;;  %12535 = vst [vmem:[#allocation77_spill] sm:$0xff] %v8990_v60  ;;  %v9168_v53 = vadd.f32 %v8886_v62, %v8808_v10  ;;  %v9184_v62 = vadd.f32 %v8717_v32, %v8808_v10  ;;  %v9204_v32 = vadd.f32 %v8868_v36, %v8808_v10 }
 0x2d4   : > { %12534 = vst [vmem:[#allocation76_spill] sm:$0xff] %v8983_v58  ;;  %v8986_v63 = vadd.f32 %v2084_v20, %v8808_v10  ;;  %v9000_v58 = vadd.f32 %v8858_v11, %v8808_v10  ;;  %v9003_v20 = vrot.slane %v8797_v30, %v1211_v43  ;;  %12551 = vst [vmem:[#allocation93_spill] sm:$0xff] %v9132_v57 }
 0x2d5   : > { %v8992_v12 = vpop.f32.mrf.mxu0  ;;  %12553 = vst [vmem:[#allocation95_spill] sm:$0xff] %v9148_v17  ;;  %12556 = vst [vmem:[#allocation98_spill] sm:$0xff] %v9168_v53 }
 0x2d6   : > { %12536 = vst [vmem:[#allocation78_spill] sm:$0xff] %v8992_v12  ;;  %2616 = vrot.lane.b32.xlu1 %v8986_v63, %s7417_s26  ;;  %2610 = vrot.lane.b32.xlu0 %v8990_v60, %s7417_s26  ;;  %12537 = vst [vmem:[#allocation79_spill] sm:$0xff] %v9000_v58  ;;  %v9016_v60 = vadd.f32 %v2074_v25, %v8808_v10 }
 0x2d7   : > { %v2123_v49 = vpop.f32.mrf.mxu0  ;;  %12559 = vst [vmem:[#allocation101_spill] sm:$0xff] %v9184_v62  ;;  %12562 = vst [vmem:[#allocation104_spill] sm:$0xff] %v9204_v32 }
 0x2d8   : > { %v9019_v11 = vadd.f32 %v2123_v49, %v9003_v20  ;;  %v9037_v49 = vadd.f32 %v8799_v19, %v8808_v10 }
 0x2d9   : > { %v9009_v9 = vpop.f32.mrf.mxu0 }
 0x2da   : > { %12538 = vst [vmem:[#allocation80_spill] sm:$0xff] %v9009_v9  ;;  %2584 = vrot.lane.b32.xlu1 %v9000_v58, %s7417_s26  ;;  %2578 = vrot.lane.b32.xlu0 %v9007_v35, %s7417_s26  ;;  %12539 = vst [vmem:[#allocation81_spill] sm:$0xff] %v9019_v11 }
 0x2db   : > { %v2127_v12 = vpop.f32.mrf.mxu0 }
 0x2dc   : > { %v9022_v43 = vadd.f32 %v2127_v12, %v9003_v20 }
 0x2dd   : > { %v9027_v9 = vpop.f32.mrf.mxu0 }
 0x2de   : > { %12540 = vst [vmem:[#allocation82_spill] sm:$0xff] %v9022_v43  ;;  %12541 = vst [vmem:[#allocation83_spill] sm:$0xff] %v9027_v9  ;;  %2612 = vrot.lane.b32.xlu1 %v9016_v60, %s7417_s26  ;;  %2606 = vrot.lane.b32.xlu0 %v9025_v21, %s7417_s26  ;;  %v9050_v9 = vadd.f32 %v2064_v7, %v8808_v10 }
 0x2df   : > { %v2133_v25 = vpop.f32.mrf.mxu0 }
 0x2e0   : > { %v9053_v11 = vadd.f32 %v2133_v25, %v9003_v20 }
 0x2e1   : > { %v9043_v12 = vpop.f32.mrf.mxu0 }
 0x2e2   : > { %12542 = vst [vmem:[#allocation84_spill] sm:$0xff] %v9043_v12  ;;  %2580 = vrot.lane.b32.xlu1 %v9037_v49, %s7417_s26  ;;  %2574 = vrot.lane.b32.xlu0 %v9041_v24, %s7417_s26  ;;  %12543 = vst [vmem:[#allocation85_spill] sm:$0xff] %v9053_v11 }
 0x2e3   : > { %v2137_v58 = vpop.f32.mrf.mxu0 }
 0x2e4   : > { %v9056_v19 = vadd.f32 %v2137_v58, %v9003_v20  ;;  %v9072_v58 = vadd.f32 %v8779_v55, %v8808_v10 }
 0x2e5   : > { %v9062_v12 = vpop.f32.mrf.mxu0 }
 0x2e6   : > { %12544 = vst [vmem:[#allocation86_spill] sm:$0xff] %v9056_v19  ;;  %12545 = vst [vmem:[#allocation87_spill] sm:$0xff] %v9062_v12  ;;  %2608 = vrot.lane.b32.xlu1 %v9050_v9, %s7417_s26  ;;  %2602 = vrot.lane.b32.xlu0 %v9060_v33, %s7417_s26  ;;  %v9086_v12 = vadd.f32 %v8942_v1, %v8808_v10 }
 0x2e7   : > { %v2143_v7 = vpop.f32.mrf.mxu0 }
 0x2e8   : > { %v9089_v55 = vadd.f32 %v2143_v7, %v9003_v20 }
 0x2e9   : > { %v9078_v25 = vpop.f32.mrf.mxu0 }
 0x2ea   : > { %12546 = vst [vmem:[#allocation88_spill] sm:$0xff] %v9078_v25  ;;  %2576 = vrot.lane.b32.xlu1 %v9072_v58, %s7417_s26  ;;  %2570 = vrot.lane.b32.xlu0 %v9076_v45, %s7417_s26  ;;  %12547 = vst [vmem:[#allocation89_spill] sm:$0xff] %v9089_v55 }
 0x2eb   : > { %v2147_v43 = vpop.f32.mrf.mxu0 }
 0x2ec   : > { %v9092_v11 = vadd.f32 %v2147_v43, %v9003_v20  ;;  %v9108_v43 = vadd.f32 %v8765_v18, %v8808_v10 }
 0x2ed   : > { %v9098_v25 = vpop.f32.mrf.mxu0 }
 0x2ee   : > { %12548 = vst [vmem:[#allocation90_spill] sm:$0xff] %v9092_v11  ;;  %12549 = vst [vmem:[#allocation91_spill] sm:$0xff] %v9098_v25  ;;  %2604 = vrot.lane.b32.xlu1 %v9086_v12, %s7417_s26  ;;  %2598 = vrot.lane.b32.xlu0 %v9096_v22, %s7417_s26  ;;  %v9122_v25 = vadd.f32 %v8926_v42, %v8808_v10 }
 0x2ef   : > { %v2153_v1 = vpop.f32.mrf.mxu0 }
 0x2f0   : > { %v9125_v18 = vadd.f32 %v2153_v1, %v9003_v20 }
 0x2f1   : > { %v9114_v7 = vpop.f32.mrf.mxu0 }
 0x2f2   : > { %12550 = vst [vmem:[#allocation92_spill] sm:$0xff] %v9114_v7  ;;  %2572 = vrot.lane.b32.xlu1 %v9108_v43, %s7417_s26  ;;  %2566 = vrot.lane.b32.xlu0 %v9112_v39, %s7417_s26 }
 0x2f3   : > { %v2157_v19 = vpop.f32.mrf.mxu0 }
 0x2f4   : > { %v9128_v55 = vadd.f32 %v2157_v19, %v9003_v20  ;;  %v9144_v19 = vadd.f32 %v8751_v28, %v8808_v10 }
 0x2f5   : > { %v9134_v7 = vpop.f32.mrf.mxu0 }
 0x2f6   : > { %12552 = vst [vmem:[#allocation94_spill] sm:$0xff] %v9134_v7  ;;  %2600 = vrot.lane.b32.xlu1 %v9122_v25, %s7417_s26  ;;  %2594 = vrot.lane.b32.xlu0 %v9132_v57, %s7417_s26  ;;  %v9158_v7 = vadd.f32 %v8910_v4, %v8808_v10 }
 0x2f7   : > { %v2163_v42 = vpop.f32.mrf.mxu0 }
 0x2f8   : > { %12555 = vst [vmem:[#allocation97_spill] sm:$0xff] %v9158_v7  ;;  %v9161_v28 = vadd.f32 %v2163_v42, %v9003_v20 }
 0x2f9   : > { %v9150_v1 = vpop.f32.mrf.mxu0 }
 0x2fa   : > { %12554 = vst [vmem:[#allocation96_spill] sm:$0xff] %v9150_v1  ;;  %2568 = vrot.lane.b32.xlu1 %v9144_v19, %s7417_s26  ;;  %2562 = vrot.lane.b32.xlu0 %v9148_v17, %s7417_s26 }
 0x2fb   : > { %v2167_v11 = vpop.f32.mrf.mxu0 }
 0x2fc   : > { %v9164_v57 = vadd.f32 %v2167_v11, %v9003_v20  ;;  %v9180_v11 = vadd.f32 %v8737_v5, %v8808_v10 }
 0x2fd   : > { %v9170_v1 = vpop.f32.mrf.mxu0 }
 0x2fe   : > { %12557 = vst [vmem:[#allocation99_spill] sm:$0xff] %v9170_v1  ;;  %2596 = vrot.lane.b32.xlu1 %v9158_v7, %s7417_s26  ;;  %2590 = vrot.lane.b32.xlu0 %v9168_v53, %s7417_s26  ;;  %12558 = vst [vmem:[#allocation100_spill] sm:$0xff] %v9180_v11  ;;  %v9194_v1 = vadd.f32 %v8894_v31, %v8808_v10  ;;  %v9615_v7 = vld [vmem:[%s12140_s7 + $0x68] sm:$0xff] }
 0x2ff   : > { %v2173_v4 = vpop.f32.mrf.mxu0 }
 0x300   : > { %12561 = vst [vmem:[#allocation103_spill] sm:$0xff] %v9194_v1  ;;  %v9197_v5 = vadd.f32 %v2173_v4, %v9003_v20  ;;  %v12565_v4 = vld [vmem:[#allocation25_spill] sm:$0xff] }
 0x301   : > { %v9186_v42 = vpop.f32.mrf.mxu0  ;;  %v9220_v36 = vrot.slane %v8797_v30, %v12565_v4 }
 0x302   : > { %12560 = vst [vmem:[#allocation102_spill] sm:$0xff] %v9186_v42  ;;  %2564 = vrot.lane.b32.xlu1 %v9180_v11, %s7417_s26  ;;  %2558 = vrot.lane.b32.xlu0 %v9184_v62, %s7417_s26 }
 0x303   : > { %v2177_v17 = vpop.f32.mrf.mxu0 }
 0x304   : > { %v9200_v53 = vadd.f32 %v2177_v17, %v9003_v20  ;;  %v9216_v17 = vadd.f32 %v8723_v50, %v8808_v10  ;;  %v9234_v50 = vadd.f32 %v8878_v52, %v8808_v10 }
 0x305   : > { %v9206_v42 = vpop.f32.mrf.mxu0 }
 0x306   : > { %12563 = vst [vmem:[#allocation105_spill] sm:$0xff] %v9206_v42  ;;  %2592 = vrot.lane.b32.xlu1 %v9194_v1, %s7417_s26  ;;  %2586 = vrot.lane.b32.xlu0 %v9204_v32, %s7417_s26  ;;  %12564 = vst [vmem:[#allocation106_spill] sm:$0xff] %v9216_v17  ;;  %v9224_v42 = vadd.f32 %v8699_v26, %v8808_v10  ;;  %v9244_v26 = vadd.f32 %v8697_v47, %v9220_v36 }
 0x307   : > { %v2183_v31 = vpop.f32.mrf.mxu0  ;;  %12568 = vst [vmem:[#allocation109_spill] sm:$0xff] %v9234_v50  ;;  %v9260_v47 = vadd.f32 %v8715_v8, %v9220_v36  ;;  %v9280_v8 = vadd.f32 %v8742_v40, %v9220_v36  ;;  %v9296_v40 = vadd.f32 %v8768_v37, %v9220_v36  ;;  %v9316_v37 = vadd.f32 %v8802_v46, %v9220_v36 }
 0x308   : > { %12566 = vst [vmem:[#allocation107_spill] sm:$0xff] %v9224_v42  ;;  %v9237_v4 = vadd.f32 %v2183_v31, %v9003_v20  ;;  %12569 = vst [vmem:[#allocation110_spill] sm:$0xff] %v9244_v26  ;;  %v9332_v46 = vadd.f32 %v8824_v38, %v9220_v36  ;;  %v9352_v38 = vadd.f32 %v8836_v13, %v9220_v36 }
 0x309   : > { %v9226_v62 = vpop.f32.mrf.mxu0  ;;  %12572 = vst [vmem:[#allocation113_spill] sm:$0xff] %v9260_v47  ;;  %12575 = vst [vmem:[#allocation116_spill] sm:$0xff] %v9280_v8  ;;  %v9370_v13 = vadd.f32 %v8848_v14, %v9220_v36  ;;  %v9387_v14 = vadd.f32 %v8866_v41, %v9220_v36 }
 0x30a   : > { %12567 = vst [vmem:[#allocation108_spill] sm:$0xff] %v9226_v62  ;;  %2560 = vrot.lane.b32.xlu1 %v9216_v17, %s7417_s26  ;;  %2554 = vrot.lane.b32.xlu0 %v9224_v42, %s7417_s26  ;;  %12578 = vst [vmem:[#allocation119_spill] sm:$0xff] %v9296_v40  ;;  %v9556_v17 = vld [vmem:[%s12141_s8 + $0xe0] sm:$0xff] }
 0x30b   : > { %v2187_v32 = vpop.f32.mrf.mxu0  ;;  %12583 = vst [vmem:[#allocation124_spill] sm:$0xff] %v9316_v37  ;;  %12586 = vst [vmem:[#allocation127_spill] sm:$0xff] %v9332_v46 }
 0x30c   : > { %v9240_v1 = vadd.f32 %v2187_v32, %v9003_v20  ;;  %v9256_v32 = vadd.f32 %v8707_v0, %v8808_v10  ;;  %12589 = vst [vmem:[#allocation130_spill] sm:$0xff] %v9352_v38  ;;  %12592 = vst [vmem:[#allocation133_spill] sm:$0xff] %v9370_v13 }
 0x30d   : > { %v9246_v62 = vpop.f32.mrf.mxu0  ;;  %12595 = vst [vmem:[#allocation136_spill] sm:$0xff] %v9387_v14  ;;  %12633 = vst [vmem:[#allocation156_spill] sm:$0xff] %v9556_v17 }
 0x30e   : > { %12570 = vst [vmem:[#allocation111_spill] sm:$0xff] %v9246_v62  ;;  %2588 = vrot.lane.b32.xlu1 %v9234_v50, %s7417_s26  ;;  %2394 = vrot.lane.b32.xlu0 %v9244_v26, %s7417_s26  ;;  %12571 = vst [vmem:[#allocation112_spill] sm:$0xff] %v9256_v32  ;;  %v9270_v62 = vadd.f32 %v8705_v6, %v9220_v36  ;;  %v9533_v50 = vld [vmem:[%s12140_s7 + $0x78] sm:$0xff] }
 0x30f   : > { %v2193_v52 = vpop.f32.mrf.mxu0  ;;  %12627 = vst [vmem:[#allocation154_spill] sm:$0xff] %v9533_v50 }
 0x310   : > { %12574 = vst [vmem:[#allocation115_spill] sm:$0xff] %v9270_v62  ;;  %v9273_v0 = vadd.f32 %v2193_v52, %v9003_v20 }
 0x311   : > { %v9262_v31 = vpop.f32.mrf.mxu0 }
 0x312   : > { %12573 = vst [vmem:[#allocation114_spill] sm:$0xff] %v9262_v31  ;;  %2556 = vrot.lane.b32.xlu1 %v9256_v32, %s7417_s26  ;;  %2398 = vrot.lane.b32.xlu0 %v9260_v47, %s7417_s26 }
 0x313   : > { %v2197_v42 = vpop.f32.mrf.mxu0 }
 0x314   : > { %v9276_v10 = vadd.f32 %v2197_v42, %v9003_v20  ;;  %v9292_v42 = vadd.f32 %v8728_v23, %v9220_v36 }
 0x315   : > { %v9282_v31 = vpop.f32.mrf.mxu0 }
 0x316   : > { %12576 = vst [vmem:[#allocation117_spill] sm:$0xff] %v9282_v31  ;;  %2396 = vrot.lane.b32.xlu1 %v9270_v62, %s7417_s26  ;;  %2402 = vrot.lane.b32.xlu0 %v9280_v8, %s7417_s26  ;;  %12577 = vst [vmem:[#allocation118_spill] sm:$0xff] %v9292_v42  ;;  %v9306_v31 = vadd.f32 %v8754_v44, %v9220_v36 }
 0x317   : > { %v2203_v6 = vpop.f32.mrf.mxu0 }
 0x318   : > { %12580 = vst [vmem:[#allocation121_spill] sm:$0xff] %v9306_v31  ;;  %v9309_v23 = vadd.f32 %v2203_v6, %v9003_v20 }
 0x319   : > { %v9298_v52 = vpop.f32.mrf.mxu0 }
 0x31a   : > { %12579 = vst [vmem:[#allocation120_spill] sm:$0xff] %v9298_v52  ;;  %2400 = vrot.lane.b32.xlu1 %v9292_v42, %s7417_s26  ;;  %2406 = vrot.lane.b32.xlu0 %v9296_v40, %s7417_s26  ;;  %12581 = vst [vmem:[#allocation122_spill] sm:$0xff] %v9309_v23  ;;  %v9573_v23 = vld [vmem:[%s12140_s7 + $0xe8] sm:$0xff] }
 0x31b   : > { %v2207_v47 = vpop.f32.mrf.mxu0  ;;  %12638 = vst [vmem:[#allocation157_spill] sm:$0xff] %v9573_v23 }
 0x31c   : > { %v9312_v8 = vadd.f32 %v2207_v47, %v9003_v20  ;;  %v9328_v47 = vadd.f32 %v8782_v56, %v9220_v36 }
 0x31d   : > { %v9318_v52 = vpop.f32.mrf.mxu0 }
 0x31e   : > { %12582 = vst [vmem:[#allocation123_spill] sm:$0xff] %v9312_v8  ;;  %12584 = vst [vmem:[#allocation125_spill] sm:$0xff] %v9318_v52  ;;  %2404 = vrot.lane.b32.xlu1 %v9306_v31, %s7417_s26  ;;  %2410 = vrot.lane.b32.xlu0 %v9316_v37, %s7417_s26  ;;  %v9342_v52 = vadd.f32 %v8818_v34, %v9220_v36  ;;  %v12622_v31 = vld [vmem:[#allocation64_spill] sm:$0xff]  ;;  %v2086_v8 = vpop.f32.mrf.mxu1 }
 0x31f   : > { %v2213_v44 = vpop.f32.mrf.mxu0  ;;  %12585 = vst [vmem:[#allocation126_spill] sm:$0xff] %v9328_v47 }
 0x320   : > { %12588 = vst [vmem:[#allocation129_spill] sm:$0xff] %v9342_v52  ;;  %v9345_v56 = vadd.f32 %v2213_v44, %v9003_v20 }
 0x321   : > { %v9334_v6 = vpop.f32.mrf.mxu0 }
 0x322   : > { %12587 = vst [vmem:[#allocation128_spill] sm:$0xff] %v9334_v6  ;;  %2408 = vrot.lane.b32.xlu1 %v9328_v47, %s7417_s26  ;;  %2414 = vrot.lane.b32.xlu0 %v9332_v46, %s7417_s26  ;;  %v1207_v46 = vsub.s32 3, %v12483_v15 }
 0x323   : > { %v2217_v40 = vpop.f32.mrf.mxu0 }
 0x324   : > { %v9348_v37 = vadd.f32 %v2217_v40, %v9003_v20  ;;  %v9366_v40 = vadd.f32 %v8830_v51, %v9220_v36  ;;  %v9383_v51 = vadd.f32 %v8842_v59, %v9220_v36  ;;  %v9402_v59 = vadd.f32 %v8856_v27, %v9220_v36 }
 0x325   : > { %v9354_v6 = vpop.f32.mrf.mxu0 }
 0x326   : > { %12590 = vst [vmem:[#allocation131_spill] sm:$0xff] %v9354_v6  ;;  %2412 = vrot.lane.b32.xlu1 %v9342_v52, %s7417_s26  ;;  %2418 = vrot.lane.b32.xlu0 %v9352_v38, %s7417_s26  ;;  %12591 = vst [vmem:[#allocation132_spill] sm:$0xff] %v9366_v40  ;;  %v9515_v52 = vld [vmem:[%s12141_s8 + $0x70] sm:$0xff] }
 0x327   : > { %v9362_v34 = vpop.f32.mrf.mxu0  ;;  %12594 = vst [vmem:[#allocation135_spill] sm:$0xff] %v9383_v51  ;;  %12597 = vst [vmem:[#allocation138_spill] sm:$0xff] %v9402_v59 }
 0x328   : > { %12621 = vst [vmem:[#allocation152_spill] sm:$0xff] %v9515_v52 }
 0x329   : > { %v9372_v44 = vpop.f32.mrf.mxu0 }
 0x32a   : > { %12593 = vst [vmem:[#allocation134_spill] sm:$0xff] %v9372_v44  ;;  %2416 = vrot.lane.b32.xlu1 %v9366_v40, %s7417_s26  ;;  %2422 = vrot.lane.b32.xlu0 %v9370_v13, %s7417_s26  ;;  %v9394_v44 = vrot.slane %v8797_v30, %v1207_v46  ;;  %v9418_v46 = vadd.f32 %v8876_v54, %v9220_v36 }
 0x32b   : > { %v9379_v6 = vpop.f32.mrf.mxu0  ;;  %v9438_v54 = vadd.f32 %v8884_v2, %v9220_v36 }
 0x32c   : > { %v9406_v41 = vadd.f32 %v8979_v61, %v9394_v44  ;;  %12600 = vst [vmem:[#allocation141_spill] sm:$0xff] %v9418_v46  ;;  %v9422_v27 = vadd.f32 %v8853_v16, %v9394_v44  ;;  %v9519_v42 = vadd.f32 %v12622_v31, %v9394_v44 }
 0x32d   : > { %v9389_v38 = vpop.f32.mrf.mxu0  ;;  %12604 = vst [vmem:[#allocation145_spill] sm:$0xff] %v9438_v54 }
 0x32e   : > { %12596 = vst [vmem:[#allocation137_spill] sm:$0xff] %v9389_v38  ;;  %2420 = vrot.lane.b32.xlu1 %v9383_v51, %s7417_s26  ;;  %2426 = vrot.lane.b32.xlu0 %v9387_v14, %s7417_s26  ;;  %12598 = vst [vmem:[#allocation139_spill] sm:$0xff] %v9406_v41  ;;  %v2345_v51 = vld [vmem:[%s12141_s8 + $0xf8] sm:$0xff] }
 0x32f   : > { %v9398_v13 = vpop.f32.mrf.mxu0  ;;  %12601 = vst [vmem:[#allocation142_spill] sm:$0xff] %v9422_v27  ;;  %12623 = vst [vmem:[#allocation64_spill] sm:$0xff] %v9519_v42 }
 0x331   : > { %v9408_v38 = vpop.f32.mrf.mxu0 }
 0x332   : > { %12599 = vst [vmem:[#allocation140_spill] sm:$0xff] %v9408_v38  ;;  %2424 = vrot.lane.b32.xlu1 %v9402_v59, %s7417_s26  ;;  %4040 = vrot.lane.b32.xlu0 %v9406_v41, %s7417_s26  ;;  %v9434_v41 = vadd.f32 %v8863_v29, %v9394_v44  ;;  %v9454_v29 = vadd.f32 %v8964_v3, %v9394_v44 }
 0x333   : > { %v9414_v30 = vpop.f32.mrf.mxu0 }
 0x334   : > { %12603 = vst [vmem:[#allocation144_spill] sm:$0xff] %v9434_v41  ;;  %12607 = vst [vmem:[#allocation148_spill] sm:$0xff] %v9454_v29 }
 0x335   : > { %v9424_v61 = vpop.f32.mrf.mxu0 }
 0x336   : > { %12602 = vst [vmem:[#allocation143_spill] sm:$0xff] %v9424_v61  ;;  %2428 = vrot.lane.b32.xlu1 %v9418_v46, %s7417_s26  ;;  %4008 = vrot.lane.b32.xlu0 %v9422_v27, %s7417_s26  ;;  %v9450_v27 = vadd.f32 %v8892_v48, %v9220_v36  ;;  %v12611_v48 = vld [vmem:[#allocation4_spill] sm:$0xff] }
 0x337   : > { %v9430_v38 = vpop.f32.mrf.mxu0  ;;  %v9470_v46 = vadd.f32 %v12611_v48, %v9394_v44  ;;  %v2344_v48 = vld [vmem:[%s12141_s8 + $0xf0] sm:$0xff] }
 0x338   : > { %12606 = vst [vmem:[#allocation147_spill] sm:$0xff] %v9450_v27 }
 0x339   : > { %v9440_v16 = vpop.f32.mrf.mxu0  ;;  %12612 = vst [vmem:[#allocation4_spill] sm:$0xff] %v9470_v46 }
 0x33a   : > { %12605 = vst [vmem:[#allocation146_spill] sm:$0xff] %v9440_v16  ;;  %4010 = vrot.lane.b32.xlu1 %v9434_v41, %s7417_s26  ;;  %2430 = vrot.lane.b32.xlu0 %v9438_v54, %s7417_s26  ;;  %v12609_v54 = vld [vmem:[#allocation72_spill] sm:$0xff] }
 0x33b   : > { %v9446_v61 = vpop.f32.mrf.mxu0  ;;  %v9466_v41 = vadd.f32 %v12609_v54, %v9394_v44  ;;  %v2583_v54 = vpop.permute.xlu1 %2582 }
 0x33c   : > { %v2632_v31 = vmul.f32 %v2583_v54, %v9515_v52 }
 0x33d   : > { %v9456_v2 = vpop.f32.mrf.mxu0  ;;  %12610 = vst [vmem:[#allocation72_spill] sm:$0xff] %v9466_v41 }
 0x33e   : > { %12608 = vst [vmem:[#allocation149_spill] sm:$0xff] %v9456_v2  ;;  %2432 = vrot.lane.b32.xlu1 %v9450_v27, %s7417_s26  ;;  %4036 = vrot.lane.b32.xlu0 %v9454_v29, %s7417_s26  ;;  %v12614_v29 = vld [vmem:[#allocation29_spill] sm:$0xff] }
 0x33f   : > { %v9462_v16 = vpop.f32.mrf.mxu0  ;;  %v9482_v27 = vadd.f32 %v12614_v29, %v9394_v44  ;;  %v2313_v29 = vld [vmem:[%s12140_s7 + $0xf8] sm:$0xff] }
 0x341   : > { %v9472_v3 = vpop.f32.mrf.mxu0  ;;  %12615 = vst [vmem:[#allocation29_spill] sm:$0xff] %v9482_v27 }
 0x342   : > { %12613 = vst [vmem:[#allocation150_spill] sm:$0xff] %v9472_v3  ;;  %4038 = vrot.lane.b32.xlu1 %v9466_v41, %s7417_s26  ;;  %4004 = vrot.lane.b32.xlu0 %v9470_v46, %s7417_s26  ;;  %v12616_v3 = vld [vmem:[#allocation44_spill] sm:$0xff]  ;;  %v2312_v46 = vld [vmem:[%s12140_s7 + $0xf0] sm:$0xff] }
 0x343   : > { %v9478_v2 = vpop.f32.mrf.mxu0  ;;  %v9489_v59 = vadd.f32 %v12616_v3, %v9220_v36 }
 0x344   : > { %v2615_v14 = vpop.permute.xlu0 %2614 }
 0x345   : > { %12617 = vst [vmem:[#allocation44_spill] sm:$0xff] %v9489_v59  ;;  %v9491_v41 = vpop.f32.mrf.mxu0  ;;  %v2648_v40 = vmul.f32 %v2615_v14, %v2344_v48  ;;  %v12624_v14 = vld [vmem:[#allocation74_spill] sm:$0xff] }
 0x346   : > { %12618 = vst [vmem:[#allocation151_spill] sm:$0xff] %v9491_v41  ;;  %4006 = vrot.lane.b32.xlu1 %v9482_v27, %s7417_s26  ;;  %2434 = vrot.lane.b32.xlu0 %v9489_v59, %s7417_s26  ;;  %v12619_v41 = vld [vmem:[#allocation47_spill] sm:$0xff]  ;;  %v2552_v48 = vmul.f32 %v2312_v46, %v12624_v14  ;;  %v2553_v59 = vmul.f32 %v2313_v29, %v8986_v63  ;;  %v9540_v63 = vld [vmem:[%s12141_s8 + $0x78] sm:$0xff] }
 0x347   : > { %v9506_v3 = vpop.f32.mrf.mxu0  ;;  %v9510_v47 = vadd.f32 %v12619_v41, %v9220_v36  ;;  %v9528_v41 = vld [vmem:[%s12140_s7 + $0x70] sm:$0xff]  ;;  %12628 = vst [vmem:[#allocation155_spill] sm:$0xff] %v9540_v63  ;;  %v12629_v29 = vld [vmem:[#allocation27_spill] sm:$0xff] }
 0x348   : > { %v2617_v27 = vpop.permute.xlu1 %2616  ;;  %v2611_v26 = vpop.permute.xlu0 %2610  ;;  %12626 = vst [vmem:[#allocation153_spill] sm:$0xff] %v9528_v41  ;;  %v9547_v14 = vadd.f32 %v12629_v29, %v9394_v44 }
 0x349   : > { %12620 = vst [vmem:[#allocation47_spill] sm:$0xff] %v9510_v47  ;;  %v2649_v62 = vmul.f32 %v2617_v27, %v2345_v51  ;;  %v9523_v32 = vpop.f32.mrf.mxu0  ;;  %v2680_v51 = vadd.f32 %v2648_v40, %v2552_v48  ;;  %v12634_v40 = vld [vmem:[#allocation17_spill] sm:$0xff] }
 0x34a   : > { %12625 = vst [vmem:[#allocation74_spill] sm:$0xff] %v9523_v32  ;;  %2436 = vrot.lane.b32.xlu1 %v9510_v47, %s7417_s26  ;;  %4032 = vrot.lane.b32.xlu0 %v9519_v42, %s7417_s26  ;;  %12630 = vst [vmem:[#allocation27_spill] sm:$0xff] %v9547_v14  ;;  %v12631_v32 = vld [vmem:[#allocation67_spill] sm:$0xff] }
 0x34b   : > { %v2681_v46 = vadd.f32 %v2649_v62, %v2553_v59  ;;  %v2267_v27 = vpop.f32.mrf.mxu0  ;;  %v9551_v47 = vadd.f32 %v12631_v32, %v9394_v44  ;;  %v2536_v62 = vmul.f32 %v9528_v41, %v12634_v40  ;;  %v12635_v59 = vld [vmem:[#allocation79_spill] sm:$0xff]  ;;  %v2646_v40 = vmul.f32 %v2611_v26, %v9556_v17 }
 0x34c   : > { %v2585_v54 = vpop.permute.xlu1 %2584  ;;  %v2537_v48 = vmul.f32 %v9533_v50, %v12635_v59  ;;  %v2579_v29 = vpop.permute.xlu0 %2578  ;;  %v9568_v32 = vld [vmem:[%s12140_s7 + $0xe0] sm:$0xff]  ;;  %v12642_v50 = vld [vmem:[#allocation50_spill] sm:$0xff] }
 0x34d   : > { %12632 = vst [vmem:[#allocation67_spill] sm:$0xff] %v9551_v47  ;;  %v2633_v42 = vmul.f32 %v2585_v54, %v9540_v63  ;;  %v9563_v52 = vpop.f32.mrf.mxu0  ;;  %v2713_v11 = vpack.c.bf16 %v2681_v46, %v2680_v51  ;;  %12637 = vst [vmem:[#allocation79_spill] sm:$0xff] %v9568_v32  ;;  %v9580_v54 = vld [vmem:[%s12141_s8 + $0xe8] sm:$0xff]  ;;  %v9585_v51 = vld [vmem:[%s12140_s7 + $0x60] sm:$0xff]  ;;  %v2664_v46 = vadd.f32 %v2632_v31, %v2536_v62 }
 0x34e   : > { %12636 = vst [vmem:[#allocation17_spill] sm:$0xff] %v9563_v52  ;;  %4034 = vrot.lane.b32.xlu1 %v9551_v47, %s7417_s26  ;;  %12639 = vst [vmem:[#allocation158_spill] sm:$0xff] %v9580_v54  ;;  %4000 = vrot.lane.b32.xlu0 %v9547_v14, %s7417_s26  ;;  %v12640_v47 = vld [vmem:[#allocation26_spill] sm:$0xff]  ;;  %v9596_v41 = vadd.f32 %v12642_v50, %v9220_v36  ;;  %v9601_v31 = vld [vmem:[%s12141_s8 + $0x60] sm:$0xff]  ;;  %v2534_v50 = vmul.f32 %v9585_v51, %v9007_v35 }
 0x34f   : > { %v2665_v59 = vadd.f32 %v2633_v42, %v2537_v48  ;;  %v2273_v52 = vpop.f32.mrf.mxu0  ;;  %6271 = vmatprep.subr.bf16.mxu1 %v2713_v11  ;;  %v9592_v63 = vadd.f32 %v12640_v47, %v9394_v44  ;;  %v12644_v42 = vld [vmem:[#allocation77_spill] sm:$0xff]  ;;  %v2551_v11 = vmul.f32 %v9573_v23, %v9016_v60  ;;  %v9622_v60 = vld [vmem:[%s12141_s8 + $0x68] sm:$0xff] }
 0x350   : > { %12643 = vst [vmem:[#allocation50_spill] sm:$0xff] %v9596_v41  ;;  %v2613_v26 = vpop.permute.xlu1 %2612  ;;  %v2550_v62 = vmul.f32 %v9568_v32, %v12644_v42  ;;  %v2607_v14 = vpop.permute.xlu0 %2606  ;;  %12645 = vst [vmem:[#allocation77_spill] sm:$0xff] %v9622_v60  ;;  %v9628_v42 = vadd.f32 %v2086_v8, %v9394_v44  ;;  %v9635_v23 = vld [vmem:[%s12141_s8 + $0xd0] sm:$0xff]  ;;  %v12650_v32 = vld [vmem:[#allocation20_spill] sm:$0xff] }
 0x351   : > { %12641 = vst [vmem:[#allocation26_spill] sm:$0xff] %v9592_v63  ;;  %v2705_v48 = vpack.c.bf16 %v2665_v59, %v2664_v46  ;;  %v2647_v47 = vmul.f32 %v2613_v26, %v9580_v54  ;;  %v9608_v17 = vpop.f32.mrf.mxu0  ;;  %v2630_v59 = vmul.f32 %v2579_v29, %v9601_v31  ;;  %v2268_v54 = vadd.f32 %v2267_v27, %v9003_v20 }
 0x352   : > { %4002 = vrot.lane.b32.xlu1 %v9592_v63, %s7417_s26  ;;  %v2678_v46 = vadd.f32 %v2646_v40, %v2550_v62  ;;  %2438 = vrot.lane.b32.xlu0 %v9596_v41, %s7417_s26  ;;  %12646 = vst [vmem:[#allocation159_spill] sm:$0xff] %v9628_v42  ;;  %v2274_v63 = vadd.f32 %v2273_v52, %v9003_v20  ;;  %v9648_v52 = vld [vmem:[%s12140_s7 + $0xd0] sm:$0xff] }
 0x353   : > { %v2679_v26 = vadd.f32 %v2647_v47, %v2551_v11  ;;  %v2277_v35 = vpop.f32.mrf.mxu0  ;;  %6272 = vmatpush3.bf16.xpose.msra.mxu1 %v2705_v48  ;;  %v2535_v62 = vmul.f32 %v9615_v7, %v9037_v49  ;;  %v12647_v11 = vld [vmem:[#allocation58_spill] sm:$0xff]  ;;  %v2264_v49 = vadd.f32 %v9506_v3, %v9003_v20  ;;  %v9669_v3 = vadd.f32 %v12650_v32, %v9394_v44  ;;  %v9685_v32 = vld [vmem:[%s12140_s7 + $0x50] sm:$0xff] }
 0x354   : > { %v2278_v29 = vadd.f32 %v2277_v35, %v9003_v20  ;;  %v2581_v40 = vpop.permute.xlu1 %2580  ;;  %v9642_v48 = vadd.f32 %v12647_v11, %v9394_v44  ;;  %v2575_v27 = vpop.permute.xlu0 %2574  ;;  %v9653_v35 = vld [vmem:[%s12140_s7 + $0xd8] sm:$0xff] }
 0x355   : > { %v2631_v8 = vmul.f32 %v2581_v40, %v9622_v60  ;;  %v2712_v47 = vpack.c.bf16 %v2679_v26, %v2678_v46  ;;  %v9662_v46 = vld [vmem:[%s12141_s8 + $0xd8] sm:$0xff]  ;;  %v2662_v26 = vadd.f32 %v2630_v59, %v2534_v50  ;;  %v2644_v40 = vmul.f32 %v2607_v14, %v9635_v23  ;;  %12651 = vst [vmem:[#allocation20_spill] sm:$0xff] %v9669_v3  ;;  %v9680_v14 = vld [vmem:[%s12141_s8 + $0x50] sm:$0xff] }
 0x356   : > { %12648 = vst [vmem:[#allocation58_spill] sm:$0xff] %v9642_v48  ;;  %v2361_v41 = vpack.c.bf16 %v2278_v29, %v2274_v63  ;;  %4042 = vrot.lane.b32.xlu1 %v9628_v42, %s7417_s26  ;;  %12649 = vst [vmem:[#allocation160_spill] sm:$0xff] %v9662_v46  ;;  %4028 = vrot.lane.b32.xlu0 %v9642_v48, %s7417_s26  ;;  %v12652_v63 = vld [vmem:[#allocation53_spill] sm:$0xff]  ;;  %v2258_v42 = vadd.f32 %v9478_v2, %v9003_v20 }
 0x357   : > { %v2663_v11 = vadd.f32 %v2631_v8, %v2535_v62  ;;  %6273 = vmatprep.subr.bf16.mxu1 %v2712_v47  ;;  %v9673_v29 = vadd.f32 %v12652_v63, %v9220_v36  ;;  %v2360_v60 = vpack.c.bf16 %v2268_v54, %v2264_v49  ;;  %v2548_v59 = vmul.f32 %v9648_v52, %v9025_v21 }
 0x358   : > { %v2609_v50 = vpop.permute.xlu1 %2608  ;;  %6319 = vmatprep.subr.bf16.mxu0 %v2361_v41  ;;  %v2549_v62 = vmul.f32 %v9653_v35, %v9050_v9  ;;  %v2603_v8 = vpop.permute.xlu0 %2602  ;;  %v12654_v47 = vpack.c.bf16 %v9276_v10, %v9273_v0  ;;  %v9698_v41 = vld [vmem:[%s12140_s7 + $0x58] sm:$0xff]  ;;  %v2254_v49 = vadd.f32 %v9462_v16, %v9003_v20  ;;  %v2628_v0 = vmul.f32 %v2575_v27, %v9680_v14  ;;  %v9723_v27 = vld [vmem:[%s12141_s8 + $0xc0] sm:$0xff] }
 0x359   : > { %12653 = vst [vmem:[#allocation53_spill] sm:$0xff] %v9673_v29  ;;  %v2704_v2 = vpack.c.bf16 %v2663_v11, %v2662_v26  ;;  %v2645_v54 = vmul.f32 %v2609_v50, %v9662_v46  ;;  %v9707_v9 = vld [vmem:[%s12141_s8 + $0x58] sm:$0xff]  ;;  %v2676_v21 = vadd.f32 %v2644_v40, %v2548_v59  ;;  %v2532_v16 = vmul.f32 %v9685_v32, %v9041_v24  ;;  %v12655_v26 = vld [vmem:[#allocation61_spill] sm:$0xff]  ;;  %v12658_v59 = vld [vmem:[#allocation56_spill] sm:$0xff] }
 0x35a   : > { %6320 = vmatpush3.bf16.msra.mxu0 %v12654_v47  ;;  %2440 = vrot.lane.b32.xlu1 %v9673_v29, %s7417_s26  ;;  %v9716_v11 = vadd.f32 %v12655_v26, %v9394_v44  ;;  %v2359_v63 = vpack.c.bf16 %v2258_v42, %v2254_v49  ;;  %12657 = vst [vmem:[#allocation161_spill] sm:$0xff] %v9723_v27  ;;  %v12666_v26 = vld [vmem:[#allocation52_spill] sm:$0xff] }
 0x35b   : > { %6321 = vmatprep.subr.bf16.mxu0 %v2360_v60  ;;  %v2677_v10 = vadd.f32 %v2645_v54, %v2549_v62  ;;  %3996 = vrot.lane.b32.xlu0 %v9669_v3, %s7417_s26  ;;  %v2248_v60 = vadd.f32 %v9446_v61, %v9003_v20  ;;  %v2533_v50 = vmul.f32 %v9698_v41, %v9072_v58  ;;  %v9738_v54 = vld [vmem:[%s12140_s7 + $0xc0] sm:$0xff]  ;;  %v9743_v58 = vld [vmem:[%s12140_s7 + $0xc8] sm:$0xff]  ;;  %v12722_v3 = vld [vmem:[#allocation70_spill] sm:$0xff] }
 0x35c   : > { %6274 = vmatpush3.bf16.xpose.msra.mxu1 %v2704_v2  ;;  %12656 = vst [vmem:[#allocation61_spill] sm:$0xff] %v9716_v11  ;;  %v2577_v40 = vpop.permute.xlu1 %2576  ;;  %v9729_v24 = vadd.f32 %v12658_v59, %v9220_v36  ;;  %v2571_v2 = vpop.permute.xlu0 %2570  ;;  %v12660_v61 = vpack.c.bf16 %v9240_v1, %v9237_v4  ;;  %12661 = vst [vmem:[#allocation162_spill] sm:$0xff] %v9738_v54  ;;  %v2244_v47 = vadd.f32 %v9430_v38, %v9003_v20  ;;  %v9752_v1 = vld [vmem:[%s12141_s8 + $0xc8] sm:$0xff] }
 0x35d   : > { %v2629_v62 = vmul.f32 %v2577_v40, %v9707_v9  ;;  %v2711_v42 = vpack.c.bf16 %v2677_v10, %v2676_v21  ;;  %12662 = vst [vmem:[#allocation163_spill] sm:$0xff] %v9743_v58  ;;  %12663 = vst [vmem:[#allocation164_spill] sm:$0xff] %v9752_v1  ;;  %v2660_v4 = vadd.f32 %v2628_v0, %v2532_v16  ;;  %v12664_v10 = vld [vmem:[#allocation21_spill] sm:$0xff] }
 0x35e   : > { %12659 = vst [vmem:[#allocation56_spill] sm:$0xff] %v9729_v24  ;;  %6322 = vmatpush3.bf16.msra.mxu0 %v12660_v61  ;;  %4030 = vrot.lane.b32.xlu1 %v9716_v11, %s7417_s26  ;;  %v2642_v49 = vmul.f32 %v2603_v8, %v9723_v27  ;;  %v9759_v38 = vadd.f32 %v12664_v10, %v9394_v44  ;;  %v9770_v8 = vld [vmem:[%s12141_s8 + $0x40] sm:$0xff]  ;;  %v10131_v27 = vld [vmem:[%s12140_s7 + $0x8] sm:$0xff] }
 0x35f   : > { %6323 = vmatprep.subr.bf16.mxu0 %v2359_v63  ;;  %v2661_v21 = vadd.f32 %v2629_v62, %v2533_v50  ;;  %2442 = vrot.lane.b32.xlu0 %v9729_v24, %s7417_s26  ;;  %v9763_v63 = vadd.f32 %v12666_v26, %v9394_v44  ;;  %v2238_v40 = vadd.f32 %v9414_v30, %v9003_v20  ;;  %v12671_v10 = vld [vmem:[#allocation59_spill] sm:$0xff] }
 0x360   : > { %6275 = vmatprep.subr.bf16.mxu1 %v2711_v42  ;;  %12665 = vst [vmem:[#allocation21_spill] sm:$0xff] %v9759_v38  ;;  %v2358_v59 = vpack.c.bf16 %v2248_v60, %v2244_v47  ;;  %v2605_v0 = vpop.permute.xlu1 %2604  ;;  %v2546_v16 = vmul.f32 %v9738_v54, %v9060_v33  ;;  %v2547_v50 = vmul.f32 %v9743_v58, %v9086_v12  ;;  %v2599_v42 = vpop.permute.xlu0 %2598  ;;  %v9783_v60 = vld [vmem:[%s12140_s7 + $0x40] sm:$0xff]  ;;  %v9788_v33 = vld [vmem:[%s12140_s7 + $0x48] sm:$0xff] }
 0x361   : > { %12667 = vst [vmem:[#allocation52_spill] sm:$0xff] %v9763_v63  ;;  %v2703_v62 = vpack.c.bf16 %v2661_v21, %v2660_v4  ;;  %v2643_v61 = vmul.f32 %v2605_v0, %v9752_v1  ;;  %v12668_v30 = vpack.c.bf16 %v9200_v53, %v9197_v5  ;;  %v2234_v12 = vadd.f32 %v9398_v13, %v9003_v20  ;;  %v9797_v53 = vld [vmem:[%s12141_s8 + $0x48] sm:$0xff]  ;;  %v12669_v21 = vld [vmem:[#allocation15_spill] sm:$0xff] }
 0x362   : > { %3998 = vrot.lane.b32.xlu1 %v9759_v38, %s7417_s26  ;;  %v2674_v5 = vadd.f32 %v2642_v49, %v2546_v16  ;;  %v2626_v47 = vmul.f32 %v2571_v2, %v9770_v8  ;;  %v9804_v13 = vadd.f32 %v12669_v21, %v9394_v44  ;;  %v9808_v26 = vadd.f32 %v12671_v10, %v9220_v36  ;;  %v9815_v2 = vld [vmem:[%s12141_s8 + $0xb0] sm:$0xff]  ;;  %v10093_v58 = vld [vmem:[%s12140_s7 + $0x88] sm:$0xff] }
 0x363   : > { %6324 = vmatpush3.bf16.msra.mxu0 %v12668_v30  ;;  %v2675_v4 = vadd.f32 %v2643_v61, %v2547_v50  ;;  %4024 = vrot.lane.b32.xlu0 %v9763_v63, %s7417_s26  ;;  %v2357_v0 = vpack.c.bf16 %v2238_v40, %v2234_v12  ;;  %12673 = vst [vmem:[#allocation165_spill] sm:$0xff] %v9815_v2  ;;  %v9842_v12 = vld [vmem:[%s12141_s8 + $0xb8] sm:$0xff]  ;;  %v9856_v10 = vld [vmem:[%s12141_s8 + $0x30] sm:$0xff]  ;;  %v9971_v63 = vld [vmem:[%s12140_s7 + $0x28] sm:$0xff] }
 0x364   : > { %6325 = vmatprep.subr.bf16.mxu0 %v2358_v59  ;;  %6276 = vmatpush3.bf16.xpose.msra.mxu1 %v2703_v62  ;;  %12670 = vst [vmem:[#allocation15_spill] sm:$0xff] %v9804_v13  ;;  %12672 = vst [vmem:[#allocation59_spill] sm:$0xff] %v9808_v26  ;;  %v2228_v59 = vadd.f32 %v9379_v6, %v9003_v20  ;;  %v2573_v49 = vpop.permute.xlu1 %2572  ;;  %v2530_v16 = vmul.f32 %v9783_v60, %v9076_v45  ;;  %v9824_v62 = vld [vmem:[%s12140_s7 + $0xb0] sm:$0xff]  ;;  %v2567_v40 = vpop.permute.xlu0 %2566  ;;  %v9833_v45 = vld [vmem:[%s12140_s7 + $0xb8] sm:$0xff] }
 0x365   : > { %v2531_v50 = vmul.f32 %v9788_v33, %v9108_v43  ;;  %12674 = vst [vmem:[#allocation166_spill] sm:$0xff] %v9824_v62  ;;  %v2627_v6 = vmul.f32 %v2573_v49, %v9797_v53  ;;  %v12675_v61 = vpack.c.bf16 %v9164_v57, %v9161_v28  ;;  %v2710_v30 = vpack.c.bf16 %v2675_v4, %v2674_v5 }
 0x366   : > { %12676 = vst [vmem:[#allocation167_spill] sm:$0xff] %v9833_v45  ;;  %v2224_v43 = vadd.f32 %v9362_v34, %v9003_v20  ;;  %2444 = vrot.lane.b32.xlu1 %v9808_v26, %s7417_s26  ;;  %12677 = vst [vmem:[#allocation168_spill] sm:$0xff] %v9842_v12  ;;  %v2658_v57 = vadd.f32 %v2626_v47, %v2530_v16  ;;  %v2640_v28 = vmul.f32 %v2599_v42, %v9815_v2  ;;  %v12678_v34 = vld [vmem:[#allocation55_spill] sm:$0xff]  ;;  %v9861_v42 = vld [vmem:[%s12140_s7 + $0x30] sm:$0xff] }
 0x367   : > { %6326 = vmatpush3.bf16.msra.mxu0 %v12675_v61  ;;  %v2659_v5 = vadd.f32 %v2627_v6, %v2531_v50  ;;  %3992 = vrot.lane.b32.xlu0 %v9804_v13, %s7417_s26  ;;  %v2544_v20 = vmul.f32 %v9824_v62, %v9096_v22  ;;  %v9851_v4 = vadd.f32 %v12678_v34, %v9394_v44  ;;  %v12680_v22 = vld [vmem:[#allocation62_spill] sm:$0xff]  ;;  %v9898_v34 = vld [vmem:[%s12141_s8 + $0xa0] sm:$0xff]  ;;  %v12699_v13 = vld [vmem:[#allocation85_spill] sm:$0xff] }
 0x368   : > { %6327 = vmatprep.subr.bf16.mxu0 %v2357_v0  ;;  %6277 = vmatprep.subr.bf16.mxu1 %v2710_v30  ;;  %v2356_v21 = vpack.c.bf16 %v2228_v59, %v2224_v43  ;;  %v2601_v47 = vpop.permute.xlu1 %2600  ;;  %v2545_v0 = vmul.f32 %v9833_v45, %v9122_v25  ;;  %v9867_v49 = vadd.f32 %v12680_v22, %v9220_v36  ;;  %v2595_v50 = vpop.permute.xlu0 %2594  ;;  %v9876_v61 = vld [vmem:[%s12140_s7 + $0x38] sm:$0xff]  ;;  %v1215_v30 = vsub.s32 5, %v12483_v15  ;;  %v12742_v45 = vld [vmem:[#allocation12_spill] sm:$0xff] }
 0x369   : > { %12679 = vst [vmem:[#allocation55_spill] sm:$0xff] %v9851_v4  ;;  %v2702_v16 = vpack.c.bf16 %v2659_v5, %v2658_v57  ;;  %v2641_v59 = vmul.f32 %v2601_v47, %v9842_v12  ;;  %v12682_v6 = vpack.c.bf16 %v9128_v55, %v9125_v18  ;;  %v9884_v25 = vld [vmem:[%s12141_s8 + $0x38] sm:$0xff]  ;;  %v2672_v43 = vadd.f32 %v2640_v28, %v2544_v20  ;;  %v12683_v57 = vld [vmem:[#allocation19_spill] sm:$0xff]  ;;  %v2279_v47 = vpop.f32.mrf.mxu0  ;;  %v12744_v62 = vld [vmem:[#allocation112_spill] sm:$0xff] }
 0x36a   : > { %12681 = vst [vmem:[#allocation62_spill] sm:$0xff] %v9867_v49  ;;  %4026 = vrot.lane.b32.xlu1 %v9851_v4, %s7417_s26  ;;  %v2624_v55 = vmul.f32 %v2567_v40, %v9856_v10  ;;  %v2528_v15 = vmul.f32 %v9861_v42, %v9112_v39  ;;  %v9893_v5 = vadd.f32 %v12683_v57, %v9394_v44  ;;  %v12685_v20 = vld [vmem:[#allocation46_spill] sm:$0xff]  ;;  %v9913_v57 = vld [vmem:[%s12140_s7 + $0xa0] sm:$0xff] }
 0x36b   : > { %6328 = vmatpush3.bf16.msra.mxu0 %v12682_v6  ;;  %v2673_v18 = vadd.f32 %v2641_v59, %v2545_v0  ;;  %2446 = vrot.lane.b32.xlu0 %v9867_v49, %s7417_s26  ;;  %v2529_v40 = vmul.f32 %v9876_v61, %v9144_v19  ;;  %v12687_v22 = vld [vmem:[#allocation90_spill] sm:$0xff]  ;;  %v9918_v19 = vld [vmem:[%s12140_s7 + $0xa8] sm:$0xff]  ;;  %v10071_v1 = vadd.f32 %v12722_v3, %v9220_v36 }
 0x36c   : > { %6329 = vmatprep.subr.bf16.mxu0 %v2356_v21  ;;  %6278 = vmatpush3.bf16.xpose.msra.mxu1 %v2702_v16  ;;  %12684 = vst [vmem:[#allocation19_spill] sm:$0xff] %v9893_v5  ;;  %v2569_v28 = vpop.permute.xlu1 %2568  ;;  %v9904_v21 = vadd.f32 %v12685_v20, %v9394_v44  ;;  %v2563_v0 = vpop.permute.xlu0 %2562  ;;  %v12688_v16 = vld [vmem:[#allocation89_spill] sm:$0xff]  ;;  %v10147_v29 = vadd.f32 %v12742_v45, %v9394_v44 }
 0x36d   : > { %v2625_v39 = vmul.f32 %v2569_v28, %v9884_v25  ;;  %v12689_v59 = vpack.c.bf16 %v12687_v22, %v12688_v16  ;;  %v2709_v6 = vpack.c.bf16 %v2673_v18, %v2672_v43  ;;  %v9923_v28 = vld [vmem:[%s12137_s4] sm:$0x3f]  ;;  %v12691_v43 = vpack.c.bf16 %v9348_v37, %v9345_v56  ;;  %v9936_v18 = vld [vmem:[%s12141_s8 + $0xa8] sm:$0xff]  ;;  %v12694_v37 = vld [vmem:[#allocation65_spill] sm:$0xff] }
 0x36e   : > { %12686 = vst [vmem:[#allocation46_spill] sm:$0xff] %v9904_v21  ;;  %v9926_v20 = vrot.slane %v9923_v28, %v1215_v30  ;;  %3994 = vrot.lane.b32.xlu1 %v9893_v5, %s7417_s26  ;;  %v2656_v22 = vadd.f32 %v2624_v55, %v2528_v15  ;;  %v2638_v16 = vmul.f32 %v2595_v50, %v9898_v34  ;;  %v12692_v30 = vld [vmem:[#allocation14_spill] sm:$0xff]  ;;  %v9953_v55 = vld [vmem:[%s12141_s8 + $0x20] sm:$0xff]  ;;  %12743 = vst [vmem:[#allocation70_spill] sm:$0xff] %v10147_v29 }
 0x36f   : > { %6330 = vmatpush3.bf16.msra.mxu0 %v12689_v59  ;;  %v2657_v59 = vadd.f32 %v2625_v39, %v2529_v40  ;;  %4020 = vrot.lane.b32.xlu0 %v9904_v21, %s7417_s26  ;;  %v9943_v49 = vadd.f32 %v12692_v30, %v9394_v44  ;;  %v9947_v56 = vadd.f32 %v12694_v37, %v9220_v36  ;;  %v9958_v15 = vld [vmem:[%s12140_s7 + $0x20] sm:$0xff]  ;;  %v12696_v40 = vld [vmem:[#allocation93_spill] sm:$0xff]  ;;  %v12698_v5 = vld [vmem:[#allocation86_spill] sm:$0xff] }
 0x370   : > { %12690 = vst [vmem:[#allocation90_spill] sm:$0xff] %v9926_v20  ;;  %6331 = vmatprep.subr.bf16.mxu0 %v12691_v43  ;;  %6279 = vmatprep.subr.bf16.mxu1 %v2709_v6  ;;  %v2280_v43 = vadd.f32 %v2279_v47, %v9926_v20  ;;  %v2597_v50 = vpop.permute.xlu1 %2596  ;;  %v2542_v39 = vmul.f32 %v9913_v57, %v12696_v40  ;;  %v12697_v6 = vld [vmem:[#allocation97_spill] sm:$0xff]  ;;  %v2591_v21 = vpop.permute.xlu0 %2590  ;;  %v12701_v40 = vld [vmem:[#allocation123_spill] sm:$0xff] }
 0x371   : > { %12693 = vst [vmem:[#allocation89_spill] sm:$0xff] %v9943_v49  ;;  %12695 = vst [vmem:[#allocation14_spill] sm:$0xff] %v9947_v56  ;;  %v2543_v30 = vmul.f32 %v9918_v19, %v12697_v6  ;;  %v2701_v37 = vpack.c.bf16 %v2657_v59, %v2656_v22  ;;  %v2639_v47 = vmul.f32 %v2597_v50, %v9936_v18  ;;  %v12702_v22 = vld [vmem:[#allocation122_spill] sm:$0xff] }
 0x372   : > { %v12700_v4 = vpack.c.bf16 %v12698_v5, %v12699_v13  ;;  %v2276_v26 = vadd.f32 %v9608_v17, %v9926_v20  ;;  %2448 = vrot.lane.b32.xlu1 %v9947_v56, %s7417_s26  ;;  %v12703_v59 = vpack.c.bf16 %v12701_v40, %v12702_v22  ;;  %v9983_v13 = vld [vmem:[%s12141_s8 + $0x28] sm:$0xff]  ;;  %v2622_v5 = vmul.f32 %v2563_v0, %v9953_v55  ;;  %v12704_v17 = vld [vmem:[#allocation95_spill] sm:$0xff]  ;;  %v12705_v20 = vld [vmem:[#allocation49_spill] sm:$0xff] }
 0x373   : > { %v2671_v50 = vadd.f32 %v2639_v47, %v2543_v30  ;;  %3988 = vrot.lane.b32.xlu0 %v9943_v49, %s7417_s26  ;;  %v2526_v6 = vmul.f32 %v9958_v15, %v12704_v17  ;;  %v9992_v40 = vadd.f32 %v12705_v20, %v9394_v44  ;;  %v12707_v0 = vld [vmem:[#allocation100_spill] sm:$0xff]  ;;  %v10004_v30 = vld [vmem:[%s12140_s7 + $0x90] sm:$0xff]  ;;  %12723 = vst [vmem:[#allocation122_spill] sm:$0xff] %v10071_v1 }
 0x374   : > { %6332 = vmatpush3.bf16.msra.mxu0 %v12700_v4  ;;  %v2670_v4 = vadd.f32 %v2638_v16, %v2542_v39  ;;  %6280 = vmatpush3.bf16.xpose.msra.mxu1 %v2701_v37  ;;  %v3787_v22 = vpack.c.bf16 %v2280_v43, %v2276_v26  ;;  %v2565_v16 = vpop.permute.xlu1 %2564  ;;  %v2527_v39 = vmul.f32 %v9971_v63, %v12707_v0  ;;  %v12708_v37 = vld [vmem:[#allocation68_spill] sm:$0xff]  ;;  %v2559_v20 = vpop.permute.xlu0 %2558  ;;  %v12710_v43 = vld [vmem:[#allocation82_spill] sm:$0xff]  ;;  %v12711_v17 = vld [vmem:[#allocation81_spill] sm:$0xff] }
 0x375   : > { %6333 = vmatprep.subr.bf16.mxu0 %v12703_v59  ;;  %12706 = vst [vmem:[#allocation65_spill] sm:$0xff] %v9992_v40  ;;  %v9997_v59 = vld [vmem:[%s12141_s8 + $0x90] sm:$0xff]  ;;  %v10008_v47 = vadd.f32 %v12708_v37, %v9220_v36  ;;  %v2623_v26 = vmul.f32 %v2565_v16, %v9983_v13  ;;  %v12712_v49 = vpack.c.bf16 %v12710_v43, %v12711_v17  ;;  %v10017_v0 = vld [vmem:[%s12140_s7 + $0x98] sm:$0xff]  ;;  %12729 = vst [vmem:[#allocation68_spill] sm:$0xff] %v10093_v58 }
 0x376   : > { %v2708_v56 = vpack.c.bf16 %v2671_v50, %v2670_v4  ;;  %4022 = vrot.lane.b32.xlu1 %v9992_v40, %s7417_s26  ;;  %v10024_v37 = vld [vmem:[%s12141_s8 + $0x98] sm:$0xff]  ;;  %v2654_v16 = vadd.f32 %v2622_v5, %v2526_v6  ;;  %v2636_v24 = vmul.f32 %v2591_v21, %v9997_v59  ;;  %v10038_v17 = vld [vmem:[%s12141_s8 + $0x10] sm:$0xff]  ;;  %v2523_v2 = vmul.f32 %v10131_v27, %v12744_v62 }
 0x377   : > { %12709 = vst [vmem:[#allocation93_spill] sm:$0xff] %v10008_v47  ;;  %v2655_v43 = vadd.f32 %v2623_v26, %v2527_v39  ;;  %2450 = vrot.lane.b32.xlu0 %v10008_v47, %s7417_s26  ;;  %v12715_v50 = vld [vmem:[#allocation98_spill] sm:$0xff]  ;;  %v10043_v21 = vld [vmem:[%s12140_s7 + $0x10] sm:$0xff]  ;;  %v12718_v39 = vld [vmem:[#allocation103_spill] sm:$0xff] }
 0x378   : > { %6334 = vmatpush3.bf16.msra.mxu0 %v12712_v49  ;;  %6281 = vmatprep.subr.bf16.mxu1 %v2708_v56  ;;  %v12713_v49 = vld [vmem:[#allocation13_spill] sm:$0xff]  ;;  %v2593_v5 = vpop.permute.xlu1 %2592  ;;  %v2541_v26 = vmul.f32 %v10017_v0, %v12718_v39  ;;  %v2587_v47 = vpop.permute.xlu0 %2586  ;;  %v10055_v40 = vld [vmem:[%s12140_s7 + $0x18] sm:$0xff]  ;;  %v2620_v39 = vmul.f32 %v2559_v20, %v10038_v17  ;;  %v12725_v20 = vld [vmem:[#allocation7_spill] sm:$0xff]  ;;  %12739 = vst [vmem:[#allocation103_spill] sm:$0xff] %v10131_v27 }
 0x379   : > { %6479 = vmatprep.subr.bf16.mxu0 %v3787_v22  ;;  %v10031_v4 = vadd.f32 %v12713_v49, %v9394_v44  ;;  %v2540_v22 = vmul.f32 %v10004_v30, %v12715_v50  ;;  %v12716_v56 = vld [vmem:[#allocation41_spill] sm:$0xff]  ;;  %v2700_v49 = vpack.c.bf16 %v2655_v43, %v2654_v16  ;;  %v2637_v50 = vmul.f32 %v2593_v5, %v10024_v37  ;;  %v12747_v62 = vld [vmem:[#allocation110_spill] sm:$0xff] }
 0x37a   : > { %v10047_v6 = vadd.f32 %v12716_v56, %v9394_v44  ;;  %12719 = vst [vmem:[#allocation85_spill] sm:$0xff] %v10055_v40  ;;  %v10062_v56 = vld [vmem:[%s12141_s8 + $0x18] sm:$0xff]  ;;  %v12721_v43 = vld [vmem:[#allocation101_spill] sm:$0xff] }
 0x37b   : > { %12714 = vst [vmem:[#allocation97_spill] sm:$0xff] %v10031_v4  ;;  %3990 = vrot.lane.b32.xlu1 %v10031_v4, %s7417_s26  ;;  %12720 = vst [vmem:[#allocation123_spill] sm:$0xff] %v10062_v56  ;;  %v2668_v38 = vadd.f32 %v2636_v24, %v2540_v22  ;;  %v2669_v16 = vadd.f32 %v2637_v50, %v2541_v26  ;;  %v2524_v5 = vmul.f32 %v10043_v21, %v12721_v43  ;;  %v10076_v4 = vld [vmem:[%s12141_s8 + $0x80] sm:$0xff]  ;;  %v12727_v26 = vld [vmem:[#allocation106_spill] sm:$0xff] }
 0x37c   : > { %12717 = vst [vmem:[#allocation86_spill] sm:$0xff] %v10047_v6  ;;  %4016 = vrot.lane.b32.xlu0 %v10047_v6, %s7417_s26  ;;  %6282 = vmatpush3.bf16.xpose.msra.mxu1 %v2700_v49  ;;  %12724 = vst [vmem:[#allocation95_spill] sm:$0xff] %v10076_v4  ;;  %v2561_v24 = vpop.permute.xlu1 %2560  ;;  %v10080_v22 = vadd.f32 %v12725_v20, %v9394_v44  ;;  %v2525_v49 = vmul.f32 %v10055_v40, %v12727_v26  ;;  %v10087_v50 = vld [vmem:[%s12140_s7 + $0x80] sm:$0xff]  ;;  %v2555_v43 = vpop.permute.xlu0 %2554  ;;  %v10100_v20 = vld [vmem:[%s12141_s8 + $0x88] sm:$0xff] }
 0x37d   : > { %12728 = vst [vmem:[#allocation100_spill] sm:$0xff] %v10087_v50  ;;  %v2621_v3 = vmul.f32 %v2561_v24, %v10062_v56  ;;  %v2707_v6 = vpack.c.bf16 %v2669_v16, %v2668_v38  ;;  %12730 = vst [vmem:[#allocation82_spill] sm:$0xff] %v10100_v20  ;;  %v2652_v26 = vadd.f32 %v2620_v39, %v2524_v5  ;;  %v12731_v38 = vld [vmem:[#allocation104_spill] sm:$0xff]  ;;  %v12732_v24 = vld [vmem:[#allocation43_spill] sm:$0xff] }
 0x37e   : > { %12726 = vst [vmem:[#allocation49_spill] sm:$0xff] %v10080_v22  ;;  %v2634_v11 = vmul.f32 %v2587_v47, %v10076_v4  ;;  %v2538_v16 = vmul.f32 %v10087_v50, %v12731_v38  ;;  %v10109_v48 = vadd.f32 %v12732_v24, %v9394_v44  ;;  %v10119_v47 = vld [vmem:[%s12140_s7] sm:$0xff]  ;;  %v12736_v5 = vld [vmem:[#allocation109_spill] sm:$0xff] }
 0x37f   : > { %2452 = vrot.lane.b32.xlu1 %v10071_v1, %s7417_s26  ;;  %v2653_v54 = vadd.f32 %v2621_v3, %v2525_v49  ;;  %6283 = vmatprep.subr.bf16.mxu1 %v2707_v6  ;;  %v10114_v1 = vld [vmem:[%s12141_s8] sm:$0xff]  ;;  %12735 = vst [vmem:[#allocation98_spill] sm:$0xff] %v10119_v47  ;;  %v2539_v6 = vmul.f32 %v10093_v58, %v12736_v5  ;;  %v12737_v49 = vld [vmem:[#allocation73_spill] sm:$0xff]  ;;  %v10138_v5 = vld [vmem:[%s12141_s8 + $0x8] sm:$0xff] }
 0x380   : > { %3984 = vrot.lane.b32.xlu0 %v10080_v22, %s7417_s26  ;;  %12733 = vst [vmem:[#allocation81_spill] sm:$0xff] %v10109_v48  ;;  %12734 = vst [vmem:[#allocation13_spill] sm:$0xff] %v10114_v1  ;;  %v2589_v39 = vpop.permute.xlu1 %2588  ;;  %v10125_v3 = vadd.f32 %v12737_v49, %v9220_v36  ;;  %v2395_v22 = vpop.permute.xlu0 %2394  ;;  %v2666_v12 = vadd.f32 %v2634_v11, %v2538_v16  ;;  %v2618_v49 = vmul.f32 %v2555_v43, %v10114_v1  ;;  %v12745_v11 = vld [vmem:[#allocation37_spill] sm:$0xff] }
 0x381   : > { %v2699_v38 = vpack.c.bf16 %v2653_v54, %v2652_v26  ;;  %v2635_v24 = vmul.f32 %v2589_v39, %v10100_v20  ;;  %12740 = vst [vmem:[#allocation101_spill] sm:$0xff] %v10138_v5  ;;  %v12741_v26 = vld [vmem:[#allocation107_spill] sm:$0xff]  ;;  %v10153_v16 = vadd.f32 %v12745_v11, %v9394_v44  ;;  %v12748_v11 = vld [vmem:[#allocation24_spill] sm:$0xff] }
 0x382   : > { %12738 = vst [vmem:[#allocation41_spill] sm:$0xff] %v10125_v3  ;;  %v2522_v39 = vmul.f32 %v10119_v47, %v12741_v26  ;;  %v2458_v26 = vmul.f32 %v2395_v22, %v10114_v1  ;;  %v10165_v46 = vrot.slane %v9923_v28, %v12748_v11  ;;  %v12776_v1 = vld [vmem:[#allocation126_spill] sm:$0xff] }
 0x383   : > { %4018 = vrot.lane.b32.xlu1 %v10109_v48, %s7417_s26  ;;  %v2667_v54 = vadd.f32 %v2635_v24, %v2539_v6  ;;  %12746 = vst [vmem:[#allocation7_spill] sm:$0xff] %v10153_v16 }
 0x384   : > { %2454 = vrot.lane.b32.xlu0 %v10125_v3, %s7417_s26  ;;  %6284 = vmatpush3.bf16.xpose.msra.mxu1 %v2699_v38  ;;  %v2557_v48 = vpop.permute.xlu1 %2556  ;;  %v2399_v6 = vpop.permute.xlu0 %2398  ;;  %v2650_v38 = vadd.f32 %v2618_v49, %v2522_v39  ;;  %v2362_v3 = vmul.f32 %v10119_v47, %v12747_v62  ;;  %v12751_v49 = vld [vmem:[#allocation5_spill] sm:$0xff] }
 0x385   : > { %v2619_v43 = vmul.f32 %v2557_v48, %v10138_v5  ;;  %v2706_v24 = vpack.c.bf16 %v2667_v54, %v2666_v12  ;;  %v12749_v48 = vld [vmem:[#allocation76_spill] sm:$0xff]  ;;  %v10173_v22 = vadd.f32 %v12751_v49, %v9394_v44  ;;  %v2460_v11 = vmul.f32 %v2399_v6, %v10038_v17 }
 0x386   : > { %v10169_v12 = vadd.f32 %v12749_v48, %v9220_v36  ;;  %v2490_v28 = vadd.f32 %v2458_v26, %v2362_v3  ;;  %v12754_v48 = vld [vmem:[#allocation3_spill] sm:$0xff]  ;;  %v12759_v3 = vld [vmem:[#allocation118_spill] sm:$0xff] }
 0x387   : > { %3986 = vrot.lane.b32.xlu1 %v10147_v29, %s7417_s26  ;;  %v2651_v45 = vadd.f32 %v2619_v43, %v2523_v2  ;;  %6285 = vmatprep.subr.bf16.mxu1 %v2706_v24  ;;  %12752 = vst [vmem:[#allocation104_spill] sm:$0xff] %v10173_v22  ;;  %v12753_v2 = vld [vmem:[#allocation115_spill] sm:$0xff]  ;;  %v10185_v49 = vadd.f32 %v12754_v48, %v10165_v46 }
 0x388   : > { %4012 = vrot.lane.b32.xlu0 %v10153_v16, %s7417_s26  ;;  %12750 = vst [vmem:[#allocation106_spill] sm:$0xff] %v10169_v12  ;;  %v2397_v54 = vpop.permute.xlu1 %2396  ;;  %v2363_v39 = vmul.f32 %v10131_v27, %v12753_v2  ;;  %v2403_v62 = vpop.permute.xlu0 %2402  ;;  %v12758_v2 = vld [vmem:[#allocation113_spill] sm:$0xff]  ;;  %v2365_v6 = vmul.f32 %v10055_v40, %v12759_v3 }
 0x389   : > { %v2698_v43 = vpack.c.bf16 %v2651_v45, %v2650_v38  ;;  %v2459_v24 = vmul.f32 %v2397_v54, %v10138_v5  ;;  %12755 = vst [vmem:[#allocation43_spill] sm:$0xff] %v10185_v49  ;;  %v12756_v38 = vld [vmem:[#allocation39_spill] sm:$0xff]  ;;  %v2364_v5 = vmul.f32 %v10043_v21, %v12758_v2  ;;  %v12762_v3 = vld [vmem:[#allocation9_spill] sm:$0xff] }
 0x38a   : > { %v10189_v45 = vadd.f32 %v12756_v38, %v9394_v44  ;;  %v12760_v38 = vld [vmem:[#allocation10_spill] sm:$0xff]  ;;  %v10206_v47 = vadd.f32 %v12762_v3, %v10165_v46 }
 0x38b   : > { %2456 = vrot.lane.b32.xlu1 %v10169_v12, %s7417_s26  ;;  %v2491_v36 = vadd.f32 %v2459_v24, %v2363_v39  ;;  %v10202_v27 = vadd.f32 %v12760_v38, %v9394_v44  ;;  %v12765_v44 = vld [vmem:[#allocation8_spill] sm:$0xff] }
 0x38c   : > { %3980 = vrot.lane.b32.xlu0 %v10173_v22, %s7417_s26  ;;  %6286 = vmatpush3.bf16.xpose.msra.mxu1 %v2698_v43  ;;  %12757 = vst [vmem:[#allocation109_spill] sm:$0xff] %v10189_v45  ;;  %v2401_v54 = vpop.permute.xlu1 %2400  ;;  %v2407_v39 = vpop.permute.xlu0 %2406  ;;  %v2492_v43 = vadd.f32 %v2460_v11, %v2364_v5  ;;  %12763 = vst [vmem:[#allocation107_spill] sm:$0xff] %v10206_v47  ;;  %v12764_v5 = vld [vmem:[#allocation121_spill] sm:$0xff] }
 0x38d   : > { %v2461_v26 = vmul.f32 %v2401_v54, %v10062_v56  ;;  %v2682_v24 = vpack.c.bf16 %v2491_v36, %v2490_v28  ;;  %12761 = vst [vmem:[#allocation73_spill] sm:$0xff] %v10202_v27  ;;  %v2367_v11 = vmul.f32 %v9971_v63, %v12764_v5  ;;  %v12775_v22 = vld [vmem:[#allocation129_spill] sm:$0xff] }
 0x38f   : > { %4014 = vrot.lane.b32.xlu1 %v10189_v45, %s7417_s26  ;;  %v2493_v48 = vadd.f32 %v2461_v26, %v2365_v6  ;;  %6287 = vmatprep.mubr.bf16.mxu1 %v2682_v24  ;;  %v2462_v6 = vmul.f32 %v2403_v62, %v9953_v55  ;;  %v10218_v26 = vadd.f32 %v12765_v44, %v10165_v46  ;;  %v12770_v44 = vld [vmem:[#allocation11_spill] sm:$0xff] }
 0x390   : > { %3820 = vrot.lane.b32.xlu0 %v10185_v49, %s7417_s26  ;;  %v2405_v2 = vpop.permute.xlu1 %2404  ;;  %v2411_v36 = vpop.permute.xlu0 %2410  ;;  %v10233_v49 = vadd.f32 %v12770_v44, %v10165_v46  ;;  %v2369_v44 = vmul.f32 %v9876_v61, %v12776_v1  ;;  %v2464_v45 = vmul.f32 %v2407_v39, %v9856_v10  ;;  %v12780_v39 = vld [vmem:[#allocation6_spill] sm:$0xff] }
 0x391   : > { %v2463_v28 = vmul.f32 %v2405_v2, %v9983_v13  ;;  %v2683_v54 = vpack.c.bf16 %v2493_v48, %v2492_v43  ;;  %12766 = vst [vmem:[#allocation12_spill] sm:$0xff] %v10218_v26  ;;  %v12767_v2 = vld [vmem:[#allocation116_spill] sm:$0xff] }
 0x392   : > { %v12768_v43 = vld [vmem:[#allocation16_spill] sm:$0xff]  ;;  %12771 = vst [vmem:[#allocation37_spill] sm:$0xff] %v10233_v49 }
 0x393   : > { %6288 = vmatmul.mubr.bf16.vlgmr.msra.gmra.mxu1 %v2682_v24  ;;  %3982 = vrot.lane.b32.xlu1 %v10202_v27, %s7417_s26  ;;  %v2366_v24 = vmul.f32 %v9958_v15, %v12767_v2  ;;  %v10224_v48 = vadd.f32 %v12768_v43, %v10165_v46  ;;  %v2495_v3 = vadd.f32 %v2463_v28, %v2367_v11  ;;  %v12772_v2 = vld [vmem:[#allocation23_spill] sm:$0xff]  ;;  %v12774_v43 = vld [vmem:[#allocation124_spill] sm:$0xff] }
 0x394   : > { %3824 = vrot.lane.b32.xlu0 %v10206_v47, %s7417_s26  ;;  %6289 = vmatprep.mubr.bf16.mxu1 %v2683_v54  ;;  %v2409_v38 = vpop.permute.xlu1 %2408  ;;  %v2415_v5 = vpop.permute.xlu0 %2414  ;;  %v2466_v47 = vmul.f32 %v2411_v36, %v9770_v8  ;;  %v10237_v27 = vadd.f32 %v12772_v2, %v10165_v46  ;;  %v2370_v28 = vmul.f32 %v9783_v60, %v12774_v43 }
 0x395   : > { %12769 = vst [vmem:[#allocation112_spill] sm:$0xff] %v10224_v48  ;;  %v2494_v62 = vadd.f32 %v2462_v6, %v2366_v24  ;;  %v2371_v6 = vmul.f32 %v9788_v33, %v12775_v22  ;;  %v2465_v36 = vmul.f32 %v2409_v38, %v9884_v25  ;;  %v2468_v43 = vmul.f32 %v2415_v5, %v9680_v14  ;;  %v12777_v22 = vld [vmem:[#allocation18_spill] sm:$0xff] }
 0x396   : > { %12773 = vst [vmem:[#allocation110_spill] sm:$0xff] %v10237_v27  ;;  %v2498_v2 = vadd.f32 %v2466_v47, %v2370_v28  ;;  %v10255_v38 = vadd.f32 %v12777_v22, %v10165_v46  ;;  %v12783_v28 = vld [vmem:[#allocation132_spill] sm:$0xff] }
 0x397   : > { %3822 = vrot.lane.b32.xlu1 %v10218_v26, %s7417_s26  ;;  %v2684_v26 = vpack.c.bf16 %v2495_v3, %v2494_v62  ;;  %v12779_v3 = vld [vmem:[#allocation119_spill] sm:$0xff] }
 0x398   : > { %3828 = vrot.lane.b32.xlu0 %v10224_v48, %s7417_s26  ;;  %v2413_v11 = vpop.permute.xlu1 %2412  ;;  %v2419_v48 = vpop.permute.xlu0 %2418  ;;  %12778 = vst [vmem:[#allocation76_spill] sm:$0xff] %v10255_v38  ;;  %v2368_v1 = vmul.f32 %v9861_v42, %v12779_v3  ;;  %v12782_v62 = vld [vmem:[#allocation127_spill] sm:$0xff] }
 0x399   : > { %v2467_v24 = vmul.f32 %v2413_v11, %v9797_v53  ;;  %v2372_v47 = vmul.f32 %v9685_v32, %v12782_v62  ;;  %v2373_v11 = vmul.f32 %v9698_v41, %v12783_v28  ;;  %v12784_v62 = vld [vmem:[#allocation28_spill] sm:$0xff] }
 0x39a   : > { %v2496_v3 = vadd.f32 %v2464_v45, %v2368_v1  ;;  %v10277_v28 = vadd.f32 %v12784_v62, %v10165_v46  ;;  %v12789_v45 = vld [vmem:[#allocation135_spill] sm:$0xff] }
 0x39b   : > { %6290 = vmatmul.mubr.bf16.gmra.mxu1 %v2683_v54  ;;  %3826 = vrot.lane.b32.xlu1 %v10233_v49, %s7417_s26  ;;  %v2499_v16 = vadd.f32 %v2467_v24, %v2371_v6  ;;  %v10261_v54 = vadd.f32 %v12780_v39, %v10165_v46  ;;  %v2497_v6 = vadd.f32 %v2465_v36, %v2369_v44  ;;  %v12786_v36 = vld [vmem:[#allocation30_spill] sm:$0xff] }
 0x39c   : > { %3832 = vrot.lane.b32.xlu0 %v10237_v27, %s7417_s26  ;;  %6291 = vmatprep.mubr.bf16.mxu1 %v2684_v26  ;;  %v2417_v5 = vpop.permute.xlu1 %2416  ;;  %v2423_v27 = vpop.permute.xlu0 %2422  ;;  %v2500_v49 = vadd.f32 %v2468_v43, %v2372_v47  ;;  %v2470_v39 = vmul.f32 %v2419_v48, %v9601_v31  ;;  %12785 = vst [vmem:[#allocation115_spill] sm:$0xff] %v10277_v28  ;;  %v12790_v48 = vld [vmem:[#allocation77_spill] sm:$0xff] }
 0x39d   : > { %12781 = vst [vmem:[#allocation5_spill] sm:$0xff] %v10261_v54  ;;  %v2469_v24 = vmul.f32 %v2417_v5, %v9707_v9  ;;  %v10268_v22 = vpack.c.bf16 %v2499_v16, %v2498_v2  ;;  %v10281_v44 = vadd.f32 %v12786_v36, %v10165_v46  ;;  %v12788_v16 = vld [vmem:[#allocation130_spill] sm:$0xff]  ;;  %v2375_v43 = vmul.f32 %v9615_v7, %v12789_v45  ;;  %v12791_v36 = vld [vmem:[#allocation152_spill] sm:$0xff] }
 0x39e   : > { %v2374_v2 = vmul.f32 %v9585_v51, %v12788_v16  ;;  %v12792_v16 = vld [vmem:[#allocation22_spill] sm:$0xff] }
 0x39f   : > { %3830 = vrot.lane.b32.xlu1 %v10255_v38, %s7417_s26  ;;  %v2501_v12 = vadd.f32 %v2469_v24, %v2373_v11  ;;  %12787 = vst [vmem:[#allocation3_spill] sm:$0xff] %v10281_v44  ;;  %v2685_v11 = vpack.c.bf16 %v2497_v6, %v2496_v3  ;;  %v10297_v45 = vadd.f32 %v12792_v16, %v10165_v46  ;;  %v12794_v6 = vld [vmem:[#allocation32_spill] sm:$0xff]  ;;  %v12797_v3 = vld [vmem:[#allocation153_spill] sm:$0xff] }
 0x3a0   : > { %3836 = vrot.lane.b32.xlu0 %v10261_v54, %s7417_s26  ;;  %v2421_v5 = vpop.permute.xlu1 %2420  ;;  %v2427_v47 = vpop.permute.xlu0 %2426  ;;  %v2502_v62 = vadd.f32 %v2470_v39, %v2374_v2  ;;  %v2472_v54 = vmul.f32 %v2423_v27, %v12791_v36  ;;  %v12798_v39 = vld [vmem:[#allocation138_spill] sm:$0xff] }
 0x3a1   : > { %v2471_v1 = vmul.f32 %v2421_v5, %v12790_v48  ;;  %v10288_v24 = vpack.c.bf16 %v2501_v12, %v2500_v49  ;;  %12793 = vst [vmem:[#allocation39_spill] sm:$0xff] %v10297_v45  ;;  %v10301_v12 = vadd.f32 %v12794_v6, %v10165_v46  ;;  %v12799_v2 = vld [vmem:[#allocation154_spill] sm:$0xff]  ;;  %v2474_v6 = vmul.f32 %v2427_v47, %v10076_v4 }
 0x3a2   : > { %v2377_v27 = vmul.f32 %v12799_v2, %v12798_v39  ;;  %v12873_v4 = vld [vmem:[#allocation162_spill] sm:$0xff] }
 0x3a3   : > { %6292 = vmatmul.mubr.bf16.gmra.mxu1 %v2684_v26  ;;  %3834 = vrot.lane.b32.xlu1 %v10277_v28, %s7417_s26  ;;  %v2503_v38 = vadd.f32 %v2471_v1, %v2375_v43  ;;  %12795 = vst [vmem:[#allocation113_spill] sm:$0xff] %v10301_v12  ;;  %v12796_v26 = vld [vmem:[#allocation133_spill] sm:$0xff]  ;;  %v12800_v43 = vld [vmem:[#allocation155_spill] sm:$0xff] }
 0x3a4   : > { %3840 = vrot.lane.b32.xlu0 %v10281_v44, %s7417_s26  ;;  %6293 = vmatprep.mubr.bf16.mxu1 %v2685_v11  ;;  %v2425_v49 = vpop.permute.xlu1 %2424  ;;  %v2376_v5 = vmul.f32 %v12797_v3, %v12796_v26  ;;  %v10308_v28 = vpop.permute.xlu0 %4040  ;;  %v12801_v26 = vld [vmem:[#allocation31_spill] sm:$0xff] }
 0x3a5   : > { %v2473_v1 = vmul.f32 %v2425_v49, %v12800_v43  ;;  %v10310_v44 = vpack.c.bf16 %v2503_v38, %v2502_v62  ;;  %v10319_v40 = vadd.f32 %v12801_v26, %v10165_v46  ;;  %v12803_v49 = vld [vmem:[#allocation34_spill] sm:$0xff]  ;;  %v12805_v62 = vld [vmem:[#allocation136_spill] sm:$0xff] }
 0x3a6   : > { %v2504_v16 = vadd.f32 %v2472_v54, %v2376_v5  ;;  %v10323_v39 = vadd.f32 %v12803_v49, %v10165_v46  ;;  %v2378_v29 = vmul.f32 %v10087_v50, %v12805_v62 }
 0x3a7   : > { %3838 = vrot.lane.b32.xlu1 %v10297_v45, %s7417_s26  ;;  %v2505_v56 = vadd.f32 %v2473_v1, %v2377_v27  ;;  %12802 = vst [vmem:[#allocation118_spill] sm:$0xff] %v10319_v40  ;;  %v12806_v45 = vld [vmem:[#allocation141_spill] sm:$0xff] }
 0x3a8   : > { %3844 = vrot.lane.b32.xlu0 %v10301_v12, %s7417_s26  ;;  %12804 = vst [vmem:[#allocation10_spill] sm:$0xff] %v10323_v39  ;;  %v2429_v38 = vpop.permute.xlu1 %2428  ;;  %v2379_v54 = vmul.f32 %v10093_v58, %v12806_v45  ;;  %v4009_v5 = vpop.permute.xlu0 %4008  ;;  %v2506_v1 = vadd.f32 %v2474_v6, %v2378_v29  ;;  %v12807_v45 = vld [vmem:[#allocation33_spill] sm:$0xff]  ;;  %v12811_v29 = vld [vmem:[#allocation36_spill] sm:$0xff] }
 0x3a9   : > { %v2475_v47 = vmul.f32 %v2429_v38, %v10100_v20  ;;  %v10330_v27 = vpack.c.bf16 %v2505_v56, %v2504_v16  ;;  %v4058_v49 = vmul.f32 %v4009_v5, %v12791_v36  ;;  %v10340_v62 = vadd.f32 %v12807_v45, %v10165_v46  ;;  %v12809_v38 = vld [vmem:[#allocation142_spill] sm:$0xff]  ;;  %v12810_v16 = vld [vmem:[#allocation144_spill] sm:$0xff] }
 0x3aa   : > { %v3962_v56 = vmul.f32 %v12797_v3, %v12809_v38  ;;  %v3963_v12 = vmul.f32 %v12799_v2, %v12810_v16  ;;  %v10348_v6 = vadd.f32 %v12811_v29, %v10165_v46  ;;  %v12813_v2 = vld [vmem:[#allocation35_spill] sm:$0xff] }
 0x3ab   : > { %6294 = vmatmul.mubr.bf16.gmra.mxu1 %v2685_v11  ;;  %3842 = vrot.lane.b32.xlu1 %v10319_v40, %s7417_s26  ;;  %v2507_v26 = vadd.f32 %v2475_v47, %v2379_v54  ;;  %12808 = vst [vmem:[#allocation9_spill] sm:$0xff] %v10340_v62  ;;  %v10364_v38 = vadd.f32 %v12813_v2, %v10165_v46 }
 0x3ac   : > { %3848 = vrot.lane.b32.xlu0 %v10323_v39, %s7417_s26  ;;  %6295 = vmatprep.mubr.bf16.mxu1 %v10268_v22  ;;  %v4011_v11 = vpop.permute.xlu1 %4010  ;;  %12812 = vst [vmem:[#allocation121_spill] sm:$0xff] %v10348_v6  ;;  %v2431_v54 = vpop.permute.xlu0 %2430  ;;  %v10355_v5 = vadd.f32 %v4058_v49, %v3962_v56  ;;  %v12818_v49 = vld [vmem:[#allocation147_spill] sm:$0xff]  ;;  %v12824_v39 = vld [vmem:[#allocation148_spill] sm:$0xff] }
 0x3ad   : > { %v4059_v36 = vmul.f32 %v4011_v11, %v12800_v43  ;;  %v10351_v47 = vpack.c.bf16 %v2507_v26, %v2506_v1  ;;  %v2476_v3 = vmul.f32 %v2431_v54, %v9997_v59  ;;  %12814 = vst [vmem:[#allocation8_spill] sm:$0xff] %v10364_v38  ;;  %v12815_v43 = vld [vmem:[#allocation145_spill] sm:$0xff]  ;;  %v12816_v11 = vld [vmem:[#allocation40_spill] sm:$0xff] }
 0x3ae   : > { %v2380_v1 = vmul.f32 %v10004_v30, %v12815_v43  ;;  %v10370_v16 = vadd.f32 %v12816_v11, %v10165_v46  ;;  %v12819_v43 = vld [vmem:[#allocation156_spill] sm:$0xff]  ;;  %v12820_v11 = vld [vmem:[#allocation38_spill] sm:$0xff] }
 0x3af   : > { %3846 = vrot.lane.b32.xlu1 %v10340_v62, %s7417_s26  ;;  %v10357_v45 = vadd.f32 %v4059_v36, %v3963_v12  ;;  %v2381_v12 = vmul.f32 %v10017_v0, %v12818_v49  ;;  %v10386_v49 = vadd.f32 %v12820_v11, %v10165_v46 }
 0x3b0   : > { %3852 = vrot.lane.b32.xlu0 %v10348_v6, %s7417_s26  ;;  %v2433_v26 = vpop.permute.xlu1 %2432  ;;  %12817 = vst [vmem:[#allocation116_spill] sm:$0xff] %v10370_v16  ;;  %v4037_v36 = vpop.permute.xlu0 %4036  ;;  %v2508_v54 = vadd.f32 %v2476_v3, %v2380_v1  ;;  %v12826_v1 = vld [vmem:[#allocation72_spill] sm:$0xff] }
 0x3b1   : > { %v2477_v29 = vmul.f32 %v2433_v26, %v10024_v37  ;;  %v4072_v6 = vmul.f32 %v4037_v36, %v12819_v43  ;;  %12821 = vst [vmem:[#allocation16_spill] sm:$0xff] %v10386_v49  ;;  %v12822_v26 = vld [vmem:[#allocation45_spill] sm:$0xff]  ;;  %v12828_v36 = vld [vmem:[#allocation158_spill] sm:$0xff] }
 0x3b2   : > { %v10390_v56 = vadd.f32 %v12822_v26, %v10165_v46 }
 0x3b3   : > { %6296 = vmatmul.mubr.bf16.gmra.mxu1 %v10268_v22  ;;  %3850 = vrot.lane.b32.xlu1 %v10364_v38, %s7417_s26  ;;  %v2509_v2 = vadd.f32 %v2477_v29, %v2381_v12  ;;  %v12825_v38 = vld [vmem:[#allocation79_spill] sm:$0xff]  ;;  %v12827_v12 = vld [vmem:[#allocation157_spill] sm:$0xff] }
 0x3b4   : > { %3856 = vrot.lane.b32.xlu0 %v10370_v16, %s7417_s26  ;;  %6297 = vmatprep.mubr.bf16.mxu1 %v10288_v24  ;;  %12823 = vst [vmem:[#allocation11_spill] sm:$0xff] %v10390_v56  ;;  %v4039_v22 = vpop.permute.xlu1 %4038  ;;  %v3976_v3 = vmul.f32 %v12825_v38, %v12824_v39  ;;  %v3977_v29 = vmul.f32 %v12827_v12, %v12826_v1  ;;  %v4005_v16 = vpop.permute.xlu0 %4004  ;;  %v12829_v39 = vld [vmem:[#allocation4_spill] sm:$0xff] }
 0x3b5   : > { %v4073_v43 = vmul.f32 %v4039_v22, %v12828_v36  ;;  %v10397_v62 = vpack.c.bf16 %v2509_v2, %v2508_v54  ;;  %v4056_v26 = vmul.f32 %v4005_v16, %v9601_v31  ;;  %v3960_v38 = vmul.f32 %v9585_v51, %v12829_v39  ;;  %v12830_v22 = vld [vmem:[#allocation42_spill] sm:$0xff]  ;;  %v12832_v2 = vld [vmem:[#allocation29_spill] sm:$0xff]  ;;  %v12836_v39 = vld [vmem:[#allocation48_spill] sm:$0xff] }
 0x3b6   : > { %v10401_v11 = vadd.f32 %v4072_v6, %v3976_v3  ;;  %v10412_v1 = vadd.f32 %v12830_v22, %v10165_v46  ;;  %v3961_v12 = vmul.f32 %v9615_v7, %v12832_v2  ;;  %v12833_v6 = vld [vmem:[#allocation51_spill] sm:$0xff] }
 0x3b7   : > { %3854 = vrot.lane.b32.xlu1 %v10386_v49, %s7417_s26  ;;  %v10403_v40 = vadd.f32 %v4073_v43, %v3977_v29  ;;  %v10418_v3 = vadd.f32 %v12833_v6, %v10165_v46  ;;  %v10426_v51 = vadd.f32 %v4056_v26, %v3960_v38  ;;  %v12839_v38 = vld [vmem:[#allocation57_spill] sm:$0xff]  ;;  %v12843_v29 = vld [vmem:[#allocation63_spill] sm:$0xff] }
 0x3b8   : > { %3860 = vrot.lane.b32.xlu0 %v10390_v56, %s7417_s26  ;;  %12831 = vst [vmem:[#allocation23_spill] sm:$0xff] %v10412_v1  ;;  %v4007_v54 = vpop.permute.xlu1 %4006  ;;  %v2435_v16 = vpop.permute.xlu0 %2434  ;;  %v10444_v2 = vadd.f32 %v12839_v38, %v10165_v46  ;;  %v12867_v49 = vld [vmem:[#allocation167_spill] sm:$0xff] }
 0x3b9   : > { %12834 = vst [vmem:[#allocation124_spill] sm:$0xff] %v10418_v3  ;;  %v4057_v31 = vmul.f32 %v4007_v54, %v12790_v48  ;;  %v2478_v7 = vmul.f32 %v2435_v16, %v9898_v34  ;;  %v12835_v48 = vld [vmem:[#allocation44_spill] sm:$0xff]  ;;  %v12838_v54 = vld [vmem:[#allocation47_spill] sm:$0xff] }
 0x3ba   : > { %v2382_v43 = vmul.f32 %v9913_v57, %v12835_v48  ;;  %v2383_v26 = vmul.f32 %v9918_v19, %v12838_v54  ;;  %12840 = vst [vmem:[#allocation126_spill] sm:$0xff] %v10444_v2  ;;  %v12841_v54 = vld [vmem:[#allocation54_spill] sm:$0xff] }
 0x3bb   : > { %6298 = vmatmul.mubr.bf16.gmra.mxu1 %v10288_v24  ;;  %3858 = vrot.lane.b32.xlu1 %v10412_v1, %s7417_s26  ;;  %v10428_v36 = vadd.f32 %v4057_v31, %v3961_v12  ;;  %v10438_v24 = vadd.f32 %v12836_v39, %v10165_v46  ;;  %v10456_v38 = vadd.f32 %v12841_v54, %v10165_v46  ;;  %v12866_v1 = vld [vmem:[#allocation53_spill] sm:$0xff] }
 0x3bc   : > { %3864 = vrot.lane.b32.xlu0 %v10418_v3, %s7417_s26  ;;  %6299 = vmatprep.mubr.bf16.mxu1 %v10310_v44  ;;  %v2437_v22 = vpop.permute.xlu1 %2436  ;;  %v4033_v31 = vpop.permute.xlu0 %4032  ;;  %v2510_v16 = vadd.f32 %v2478_v7, %v2382_v43  ;;  %v10460_v12 = vadd.f32 %v12843_v29, %v10165_v46  ;;  %v12845_v3 = vld [vmem:[#allocation64_spill] sm:$0xff] }
 0x3bd   : > { %12837 = vst [vmem:[#allocation129_spill] sm:$0xff] %v10438_v24  ;;  %v2479_v6 = vmul.f32 %v2437_v22, %v9936_v18  ;;  %v4070_v39 = vmul.f32 %v4033_v31, %v9635_v23  ;;  %12842 = vst [vmem:[#allocation18_spill] sm:$0xff] %v10456_v38  ;;  %v3974_v56 = vmul.f32 %v9648_v52, %v12845_v3  ;;  %v12847_v43 = vld [vmem:[#allocation160_spill] sm:$0xff]  ;;  %v12848_v52 = vld [vmem:[#allocation27_spill] sm:$0xff] }
 0x3be   : > { %12844 = vst [vmem:[#allocation119_spill] sm:$0xff] %v10460_v12  ;;  %v12849_v3 = vld [vmem:[#allocation60_spill] sm:$0xff] }
 0x3bf   : > { %3862 = vrot.lane.b32.xlu1 %v10438_v24, %s7417_s26  ;;  %v2511_v48 = vadd.f32 %v2479_v6, %v2383_v26  ;;  %v12846_v24 = vld [vmem:[#allocation67_spill] sm:$0xff]  ;;  %v10472_v31 = vadd.f32 %v4070_v39, %v3974_v56 }
 0x3c0   : > { %3868 = vrot.lane.b32.xlu0 %v10444_v2, %s7417_s26  ;;  %v4035_v22 = vpop.permute.xlu1 %4034  ;;  %v3975_v7 = vmul.f32 %v9653_v35, %v12846_v24  ;;  %v4001_v26 = vpop.permute.xlu0 %4000  ;;  %v3958_v35 = vmul.f32 %v9685_v32, %v12848_v52  ;;  %v10500_v32 = vld [vmem:[%s12141_s8 + $0xf0] sm:$0xff]  ;;  %v12856_v52 = vld [vmem:[#allocation75_spill] sm:$0xff]  ;;  %v12864_v2 = vld [vmem:[#allocation50_spill] sm:$0xff] }
 0x3c1   : > { %v4071_v23 = vmul.f32 %v4035_v22, %v12847_v43  ;;  %v10467_v6 = vpack.c.bf16 %v2511_v48, %v2510_v16  ;;  %v4054_v54 = vmul.f32 %v4001_v26, %v9680_v14  ;;  %v12851_v16 = vld [vmem:[#allocation26_spill] sm:$0xff]  ;;  %v12852_v48 = vld [vmem:[#allocation69_spill] sm:$0xff] }
 0x3c2   : > { %v3959_v56 = vmul.f32 %v9698_v41, %v12851_v16  ;;  %v10490_v39 = vadd.f32 %v12852_v48, %v10165_v46  ;;  %v4074_v41 = vmul.f32 %v10500_v32, %v10308_v28  ;;  %v10521_v28 = vld [vmem:[%s12140_s7 + $0xf0] sm:$0xff]  ;;  %v10528_v16 = vld [vmem:[%s12140_s7 + $0xf8] sm:$0xff] }
 0x3c3   : > { %6300 = vmatmul.mubr.bf16.gmra.mxu1 %v10310_v44  ;;  %3866 = vrot.lane.b32.xlu1 %v10456_v38, %s7417_s26  ;;  %v10474_v29 = vadd.f32 %v4071_v23, %v3975_v7  ;;  %v10484_v44 = vadd.f32 %v12849_v3, %v10165_v46  ;;  %v10504_v43 = vadd.f32 %v4054_v54, %v3958_v35  ;;  %v12858_v54 = vld [vmem:[#allocation139_spill] sm:$0xff]  ;;  %v12865_v38 = vld [vmem:[#allocation166_spill] sm:$0xff] }
 0x3c4   : > { %3872 = vrot.lane.b32.xlu0 %v10460_v12, %s7417_s26  ;;  %6301 = vmatprep.mubr.bf16.mxu1 %v10330_v27  ;;  %v4003_v24 = vpop.permute.xlu1 %4002  ;;  %12853 = vst [vmem:[#allocation127_spill] sm:$0xff] %v10490_v39  ;;  %v2439_v22 = vpop.permute.xlu0 %2438  ;;  %v10516_v3 = vadd.f32 %v12856_v52, %v10165_v46  ;;  %v3978_v35 = vmul.f32 %v10521_v28, %v12858_v54 }
 0x3c5   : > { %12850 = vst [vmem:[#allocation6_spill] sm:$0xff] %v10484_v44  ;;  %v4055_v14 = vmul.f32 %v4003_v24, %v9707_v9  ;;  %v12854_v9 = vld [vmem:[#allocation66_spill] sm:$0xff] }
 0x3c6   : > { %v10512_v26 = vadd.f32 %v12854_v9, %v10165_v46  ;;  %12857 = vst [vmem:[#allocation28_spill] sm:$0xff] %v10516_v3  ;;  %v10537_v9 = vld [vmem:[%s12141_s8 + $0xf8] sm:$0xff]  ;;  %v4106_v54 = vadd.f32 %v4074_v41, %v3978_v35  ;;  %v12868_v41 = vld [vmem:[#allocation168_spill] sm:$0xff] }
 0x3c7   : > { %3870 = vrot.lane.b32.xlu1 %v10484_v44, %s7417_s26  ;;  %v10506_v23 = vadd.f32 %v4055_v14, %v3959_v56  ;;  %v12859_v56 = vld [vmem:[#allocation159_spill] sm:$0xff]  ;;  %12860 = vst [vmem:[#allocation30_spill] sm:$0xff] %v10537_v9 }
 0x3c8   : > { %3876 = vrot.lane.b32.xlu0 %v10490_v39, %s7417_s26  ;;  %12855 = vst [vmem:[#allocation132_spill] sm:$0xff] %v10512_v26  ;;  %v4043_v24 = vpop.permute.xlu1 %4042  ;;  %v3979_v48 = vmul.f32 %v10528_v16, %v12859_v56  ;;  %v4029_v7 = vpop.permute.xlu0 %4028  ;;  %v12861_v39 = vld [vmem:[#allocation165_spill] sm:$0xff]  ;;  %v12862_v14 = vld [vmem:[#allocation71_spill] sm:$0xff] }
 0x3c9   : > { %v4075_v52 = vmul.f32 %v10537_v9, %v4043_v24  ;;  %v2480_v12 = vmul.f32 %v2439_v22, %v12861_v39  ;;  %v10549_v44 = vadd.f32 %v12862_v14, %v10165_v46  ;;  %v12870_v14 = vld [vmem:[#allocation78_spill] sm:$0xff]  ;;  %v12875_v9 = vld [vmem:[#allocation163_spill] sm:$0xff] }
 0x3ca   : > { %v10561_v50 = vadd.f32 %v12870_v14, %v10165_v46  ;;  %v12878_v14 = vld [vmem:[#allocation20_spill] sm:$0xff] }
 0x3cb   : > { %6302 = vmatmul.mubr.bf16.gmra.mxu1 %v10330_v27  ;;  %3874 = vrot.lane.b32.xlu1 %v10512_v26, %s7417_s26  ;;  %v4107_v56 = vadd.f32 %v4075_v52, %v3979_v48  ;;  %12863 = vst [vmem:[#allocation130_spill] sm:$0xff] %v10549_v44  ;;  %v2384_v27 = vmul.f32 %v12865_v38, %v12864_v2 }
 0x3cc   : > { %3880 = vrot.lane.b32.xlu0 %v10516_v3, %s7417_s26  ;;  %6303 = vmatprep.mubr.bf16.mxu1 %v10351_v47  ;;  %v2441_v24 = vpop.permute.xlu1 %2440  ;;  %v2385_v26 = vmul.f32 %v12867_v49, %v12866_v1  ;;  %v12869_v3 = vld [vmem:[#allocation161_spill] sm:$0xff]  ;;  %v12871_v1 = vpack.c.bf16 %v10357_v45, %v10355_v5 }
 0x3cd   : > { %v2481_v35 = vmul.f32 %v2441_v24, %v12868_v41  ;;  %v3997_v22 = vpop.permute.xlu0 %3996  ;;  %v4139_v48 = vpack.c.bf16 %v4107_v56, %v4106_v54  ;;  %v2512_v52 = vadd.f32 %v2480_v12, %v2384_v27  ;;  %v4068_v20 = vmul.f32 %v4029_v7, %v12869_v3  ;;  %v12872_v24 = vld [vmem:[#allocation58_spill] sm:$0xff]  ;;  %v12874_v56 = vld [vmem:[#allocation61_spill] sm:$0xff]  ;;  %v12876_v12 = vld [vmem:[#allocation164_spill] sm:$0xff] }
 0x3ce   : > { %v3972_v54 = vmul.f32 %v12873_v4, %v12872_v24  ;;  %v4052_v45 = vmul.f32 %v3997_v22, %v9770_v8  ;;  %v12880_v8 = vpack.c.bf16 %v10428_v36, %v10426_v51 }
 0x3cf   : > { %3878 = vrot.lane.b32.xlu1 %v10549_v44, %s7417_s26  ;;  %v2513_v58 = vadd.f32 %v2481_v35, %v2385_v26  ;;  %6431 = vmatprep.subr.bf16.mxu1 %v4139_v48  ;;  %v3973_v44 = vmul.f32 %v12875_v9, %v12874_v56  ;;  %v12877_v26 = vpack.c.bf16 %v10403_v40, %v10401_v11 }
 0x3d0   : > { %v4031_v2 = vpop.permute.xlu1 %4030  ;;  %6432 = vmatpush3.bf16.xpose.msra.mxu1 %v12871_v1  ;;  %v4100_v5 = vadd.f32 %v4068_v20, %v3972_v54  ;;  %v12879_v1 = vld [vmem:[#allocation21_spill] sm:$0xff] }
 0x3d1   : > { %v4069_v27 = vmul.f32 %v4031_v2, %v12876_v12  ;;  %v2443_v7 = vpop.permute.xlu0 %2442  ;;  %6433 = vmatprep.subr.bf16.mxu1 %v12877_v26  ;;  %v10574_v46 = vpack.c.bf16 %v2513_v58, %v2512_v52  ;;  %v3956_v2 = vmul.f32 %v9783_v60, %v12878_v14  ;;  %v3957_v40 = vmul.f32 %v9788_v33, %v12879_v1  ;;  %v12882_v60 = vld [vmem:[#allocation59_spill] sm:$0xff] }
 0x3d2   : > { %v2482_v24 = vmul.f32 %v2443_v7, %v12869_v3  ;;  %v2387_v56 = vmul.f32 %v12875_v9, %v12882_v60  ;;  %v12883_v26 = vpack.c.bf16 %v10474_v29, %v10472_v31  ;;  %v12884_v7 = vld [vmem:[#allocation52_spill] sm:$0xff]  ;;  %v12886_v14 = vpack.c.bf16 %v10506_v23, %v10504_v43  ;;  %v12888_v1 = vld [vmem:[#allocation19_spill] sm:$0xff] }
 0x3d3   : > { %6304 = vmatmul.mubr.bf16.gmra.mxu1 %v10351_v47  ;;  %3882 = vrot.lane.b32.xlu1 %v10561_v50, %s7417_s26  ;;  %v4101_v35 = vadd.f32 %v4069_v27, %v3973_v44  ;;  %v4084_v52 = vadd.f32 %v4052_v45, %v3956_v2  ;;  %v12881_v44 = vld [vmem:[#allocation56_spill] sm:$0xff]  ;;  %v3970_v9 = vmul.f32 %v12865_v38, %v12884_v7  ;;  %v12887_v2 = vld [vmem:[#allocation15_spill] sm:$0xff] }
 0x3d4   : > { %6305 = vmatprep.mubr.bf16.mxu1 %v10397_v62  ;;  %v3999_v48 = vpop.permute.xlu1 %3998  ;;  %v2386_v22 = vmul.f32 %v12873_v4, %v12881_v44  ;;  %v3954_v38 = vmul.f32 %v9861_v42, %v12887_v2  ;;  %v12896_v2 = vld [vmem:[#allocation122_spill] sm:$0xff] }
 0x3d5   : > { %v4053_v58 = vmul.f32 %v3999_v48, %v9797_v53  ;;  %v4025_v11 = vpop.permute.xlu0 %4024  ;;  %v4136_v47 = vpack.c.bf16 %v4101_v35, %v4100_v5  ;;  %v12885_v5 = vld [vmem:[#allocation55_spill] sm:$0xff] }
 0x3d6   : > { %v2514_v3 = vadd.f32 %v2482_v24, %v2386_v22  ;;  %v4066_v51 = vmul.f32 %v4025_v11, %v12861_v39  ;;  %v10621_v11 = vld [vmem:[%s12141_s8 + $0xd0] sm:$0xff] }
 0x3d7   : > { %v4085_v20 = vadd.f32 %v4053_v58, %v3957_v40 }
 0x3d8   : > { %v2445_v54 = vpop.permute.xlu1 %2444  ;;  %6434 = vmatpush3.bf16.xpose.msra.mxu1 %v12880_v8  ;;  %v4098_v29 = vadd.f32 %v4066_v51, %v3970_v9 }
 0x3d9   : > { %v4128_v33 = vpack.c.bf16 %v4085_v20, %v4084_v52  ;;  %v2483_v53 = vmul.f32 %v2445_v54, %v12876_v12  ;;  %v3993_v27 = vpop.permute.xlu0 %3992  ;;  %6435 = vmatprep.subr.bf16.mxu1 %v12883_v26  ;;  %v3971_v12 = vmul.f32 %v12867_v49, %v12885_v5  ;;  %v3955_v49 = vmul.f32 %v9876_v61, %v12888_v1  ;;  %v10628_v61 = vld [vmem:[%s12140_s7 + $0xd0] sm:$0xff]  ;;  %v12890_v52 = vld [vmem:[#allocation14_spill] sm:$0xff] }
 0x3da   : > { %v10642_v54 = vld [vmem:[%s12141_s8 + $0xd8] sm:$0xff] }
 0x3db   : > { %6306 = vmatmul.mubr.bf16.gmra.mxu1 %v10397_v62  ;;  %v2515_v36 = vadd.f32 %v2483_v53, %v2387_v56  ;;  %v4050_v62 = vmul.f32 %v3993_v27, %v9856_v10  ;;  %v12891_v27 = vld [vmem:[#allocation46_spill] sm:$0xff] }
 0x3dc   : > { %6307 = vmatprep.mubr.bf16.mxu1 %v10467_v6  ;;  %v4027_v4 = vpop.permute.xlu1 %4026  ;;  %v3968_v26 = vmul.f32 %v9913_v57, %v12891_v27  ;;  %v12901_v27 = vld [vmem:[#allocation85_spill] sm:$0xff] }
 0x3dd   : > { %v4067_v45 = vmul.f32 %v4027_v4, %v12868_v41  ;;  %v2447_v35 = vpop.permute.xlu0 %2446  ;;  %v10606_v31 = vpack.c.bf16 %v2515_v36, %v2514_v3  ;;  %v4082_v10 = vadd.f32 %v4050_v62, %v3954_v38  ;;  %v12892_v3 = vld [vmem:[#allocation65_spill] sm:$0xff] }
 0x3de   : > { %v2484_v43 = vmul.f32 %v10621_v11, %v2447_v35  ;;  %v3969_v51 = vmul.f32 %v9918_v19, %v12892_v3 }
 0x3df   : > { %v4099_v48 = vadd.f32 %v4067_v45, %v3971_v12  ;;  %v12893_v12 = vld [vmem:[#allocation89_spill] sm:$0xff] }
 0x3e0   : > { %v3995_v39 = vpop.permute.xlu1 %3994  ;;  %6436 = vmatpush3.bf16.xpose.msra.mxu1 %v12886_v14  ;;  %v3952_v57 = vmul.f32 %v9958_v15, %v12893_v12  ;;  %v12894_v45 = vld [vmem:[#allocation97_spill] sm:$0xff]  ;;  %v10668_v15 = vld [vmem:[%s12140_s7 + $0xe0] sm:$0xff]  ;;  %v10675_v14 = vld [vmem:[%s12140_s7 + $0xe8] sm:$0xff] }
 0x3e1   : > { %v4051_v41 = vmul.f32 %v3995_v39, %v9884_v25  ;;  %v4021_v40 = vpop.permute.xlu0 %4020  ;;  %6437 = vmatprep.subr.bf16.mxu1 %v4136_v47  ;;  %v4135_v58 = vpack.c.bf16 %v4099_v48, %v4098_v29  ;;  %v12889_v25 = vld [vmem:[#allocation62_spill] sm:$0xff]  ;;  %v3953_v19 = vmul.f32 %v9971_v63, %v12894_v45  ;;  %v12895_v63 = vld [vmem:[#allocation93_spill] sm:$0xff]  ;;  %v2391_v38 = vmul.f32 %v10675_v14, %v12896_v2  ;;  %v12910_v2 = vld [vmem:[#allocation68_spill] sm:$0xff] }
 0x3e2   : > { %v10635_v47 = vld [vmem:[%s12140_s7 + $0xd8] sm:$0xff]  ;;  %v4064_v60 = vmul.f32 %v4021_v40, %v9898_v34 }
 0x3e3   : > { %6308 = vmatmul.mubr.bf16.gmra.mxu1 %v10467_v6  ;;  %v4083_v23 = vadd.f32 %v4051_v41, %v3955_v49  ;;  %v2388_v6 = vmul.f32 %v10628_v61, %v12889_v25  ;;  %v2389_v24 = vmul.f32 %v10635_v47, %v12890_v52  ;;  %v10682_v49 = vld [vmem:[%s12141_s8 + $0xe8] sm:$0xff]  ;;  %v12905_v45 = vld [vmem:[#allocation30_spill] sm:$0xff] }
 0x3e4   : > { %6309 = vmatprep.mubr.bf16.mxu1 %v10574_v46  ;;  %v2449_v42 = vpop.permute.xlu1 %2448  ;;  %v4096_v9 = vadd.f32 %v4064_v60, %v3968_v26 }
 0x3e5   : > { %v4127_v20 = vpack.c.bf16 %v4083_v23, %v4082_v10  ;;  %v2485_v8 = vmul.f32 %v10642_v54, %v2449_v42  ;;  %v3989_v44 = vpop.permute.xlu0 %3988  ;;  %v2516_v22 = vadd.f32 %v2484_v43, %v2388_v6  ;;  %v12897_v42 = vld [vmem:[#allocation86_spill] sm:$0xff]  ;;  %v12898_v6 = vld [vmem:[#allocation81_spill] sm:$0xff] }
 0x3e6   : > { %v4048_v5 = vmul.f32 %v3989_v44, %v9953_v55  ;;  %v3966_v25 = vmul.f32 %v10004_v30, %v12897_v42  ;;  %v3967_v52 = vmul.f32 %v10017_v0, %v12898_v6  ;;  %v12902_v30 = vld [vmem:[#allocation123_spill] sm:$0xff]  ;;  %v12913_v6 = vld [vmem:[#allocation104_spill] sm:$0xff] }
 0x3e7   : > { %v2517_v56 = vadd.f32 %v2485_v8, %v2389_v24 }
 0x3e8   : > { %v4023_v53 = vpop.permute.xlu1 %4022  ;;  %6438 = vmatpush3.bf16.xpose.msra.mxu1 %v4128_v33  ;;  %v4080_v62 = vadd.f32 %v4048_v5, %v3952_v57  ;;  %v12903_v5 = vld [vmem:[#allocation41_spill] sm:$0xff] }
 0x3e9   : > { %v4065_v36 = vmul.f32 %v4023_v53, %v9936_v18  ;;  %v2451_v4 = vpop.permute.xlu0 %2450  ;;  %6439 = vmatprep.subr.bf16.mxu1 %v4135_v58  ;;  %v2695_v7 = vpack.c.bf16 %v2517_v56, %v2516_v22  ;;  %v12900_v53 = vld [vmem:[#allocation70_spill] sm:$0xff] }
 0x3ea   : > { %v3951_v26 = vmul.f32 %v12901_v27, %v12900_v53 }
 0x3eb   : > { %6310 = vmatmul.mubr.bf16.gmra.mxu1 %v10574_v46  ;;  %v4097_v34 = vadd.f32 %v4065_v36, %v3969_v51  ;;  %v10662_v46 = vld [vmem:[%s12141_s8 + $0xe0] sm:$0xff] }
 0x3ec   : > { %6311 = vmatprep.mubr.bf16.mxu1 %v10606_v31  ;;  %v2486_v55 = vmul.f32 %v10662_v46, %v2451_v4 }
 0x3ed   : > { %v3991_v33 = vpop.permute.xlu1 %3990  ;;  %v4134_v29 = vpack.c.bf16 %v4097_v34, %v4096_v9  ;;  %v2392_v34 = vmul.f32 %v10521_v28, %v12903_v5 }
 0x3ee   : > { %v4049_v18 = vmul.f32 %v3991_v33, %v9983_v13  ;;  %v4017_v35 = vpop.permute.xlu0 %4016  ;;  %v2390_v13 = vmul.f32 %v10668_v15, %v12895_v63  ;;  %v12904_v33 = vld [vmem:[#allocation106_spill] sm:$0xff] }
 0x3ef   : > { %v4062_v10 = vmul.f32 %v4017_v35, %v9997_v59  ;;  %v12899_v59 = vld [vmem:[#allocation49_spill] sm:$0xff]  ;;  %v2393_v12 = vmul.f32 %v10528_v16, %v12904_v33 }
 0x3f0   : > { %v4081_v48 = vadd.f32 %v4049_v18, %v3953_v19  ;;  %6440 = vmatpush3.bf16.xpose.msra.mxu1 %v4127_v20  ;;  %v2518_v58 = vadd.f32 %v2486_v55, %v2390_v13  ;;  %v3950_v56 = vmul.f32 %v10043_v21, %v12899_v59  ;;  %v12909_v13 = vld [vmem:[#allocation109_spill] sm:$0xff] }
 0x3f1   : > { %v2453_v39 = vpop.permute.xlu1 %2452  ;;  %6441 = vmatprep.subr.bf16.mxu1 %v4134_v29  ;;  %v4094_v44 = vadd.f32 %v4062_v10, %v3966_v25  ;;  %v12906_v29 = vld [vmem:[#allocation95_spill] sm:$0xff] }
 0x3f2   : > { %v4126_v1 = vpack.c.bf16 %v4081_v48, %v4080_v62  ;;  %v2487_v41 = vmul.f32 %v10682_v49, %v2453_v39  ;;  %v3985_v40 = vpop.permute.xlu0 %3984  ;;  %v12907_v48 = vld [vmem:[#allocation7_spill] sm:$0xff]  ;;  %v12908_v39 = vld [vmem:[#allocation100_spill] sm:$0xff] }
 0x3f3   : > { %6312 = vmatmul.mubr.bf16.gmra.mxu1 %v10606_v31  ;;  %v4046_v22 = vmul.f32 %v3985_v40, %v10038_v17  ;;  %v3964_v63 = vmul.f32 %v12908_v39, %v12907_v48  ;;  %v7301_v39 = vld [vmem:[%s12141_s8 + $0x20] sm:$0xff] }
 0x3f4   : > { %v2519_v43 = vadd.f32 %v2487_v41, %v2391_v38  ;;  %6313 = vmatprep.mubr.bf16.mxu1 %v2695_v7  ;;  %v3965_v38 = vmul.f32 %v12910_v2, %v12909_v13  ;;  %v12922_v2 = vld [vmem:[#allocation112_spill] sm:$0xff] }
 0x3f5   : > { %v4019_v23 = vpop.permute.xlu1 %4018 }
 0x3f6   : > { %v4063_v24 = vmul.f32 %v4019_v23, %v10024_v37  ;;  %v2455_v20 = vpop.permute.xlu0 %2454  ;;  %v2696_v8 = vpack.c.bf16 %v2519_v43, %v2518_v58  ;;  %v4078_v37 = vadd.f32 %v4046_v22, %v3950_v56  ;;  %v12912_v43 = vld [vmem:[#allocation13_spill] sm:$0xff] }
 0x3f7   : > { %v2488_v36 = vmul.f32 %v10500_v32, %v2455_v20  ;;  %v12915_v20 = vld [vmem:[#allocation73_spill] sm:$0xff] }
 0x3f8   : > { %v4095_v31 = vadd.f32 %v4063_v24, %v3967_v52  ;;  %6442 = vmatpush3.bf16.xpose.msra.mxu1 %v4126_v1  ;;  %v12911_v1 = vld [vmem:[#allocation82_spill] sm:$0xff] }
 0x3f9   : > { %v3987_v60 = vpop.permute.xlu1 %3986  ;;  %v2520_v35 = vadd.f32 %v2488_v36, %v2392_v34  ;;  %v12914_v52 = vld [vmem:[#allocation98_spill] sm:$0xff] }
 0x3fa   : > { %v4047_v3 = vmul.f32 %v3987_v60, %v12902_v30  ;;  %v4013_v51 = vpop.permute.xlu0 %4012  ;;  %v4133_v0 = vpack.c.bf16 %v4095_v31, %v4094_v44  ;;  %v3948_v24 = vmul.f32 %v12914_v52, %v12913_v6  ;;  %v12916_v44 = vld [vmem:[#allocation103_spill] sm:$0xff]  ;;  %v12917_v31 = vld [vmem:[#allocation101_spill] sm:$0xff] }
 0x3fb   : > { %6314 = vmatmul.mubr.bf16.gmra.mxu1 %v2695_v7  ;;  %v4060_v7 = vmul.f32 %v4013_v51, %v12906_v29  ;;  %v3949_v22 = vmul.f32 %v12916_v44, %v12915_v20  ;;  %v12918_v51 = vld [vmem:[#allocation43_spill] sm:$0xff] }
 0x3fc   : > { %v4079_v4 = vadd.f32 %v4047_v3, %v3951_v26  ;;  %6315 = vmatprep.mubr.bf16.mxu1 %v2696_v8  ;;  %6443 = vmatprep.subr.bf16.mxu1 %v4133_v0  ;;  %v3788_v0 = vmul.f32 %v12914_v52, %v12918_v51  ;;  %v7306_v52 = vld [vmem:[%s12140_s7 + $0x30] sm:$0xff] }
 0x3fd   : > { %v2457_v9 = vpop.permute.xlu1 %2456  ;;  %v4092_v10 = vadd.f32 %v4060_v7, %v3964_v63 }
 0x3fe   : > { %v4125_v57 = vpack.c.bf16 %v4079_v4, %v4078_v37  ;;  %v2489_v19 = vmul.f32 %v12905_v45, %v2457_v9  ;;  %v3981_v18 = vpop.permute.xlu0 %3980  ;;  %v12919_v37 = vld [vmem:[#allocation12_spill] sm:$0xff] }
 0x3ff   : > { %v4044_v23 = vmul.f32 %v3981_v18, %v12912_v43  ;;  %v3789_v36 = vmul.f32 %v12916_v44, %v12919_v37  ;;  %v7307_v44 = vld [vmem:[%s12140_s7 + $0x38] sm:$0xff]  ;;  %v7310_v37 = vld [vmem:[%s12140_s7 + $0x40] sm:$0xff] }
 0x400   : > { %v2521_v62 = vadd.f32 %v2489_v19, %v2393_v12  ;;  %6444 = vmatpush3.bf16.xpose.msra.mxu1 %v4125_v57  ;;  %v12920_v19 = vld [vmem:[#allocation107_spill] sm:$0xff] }
 0x401   : > { %v4015_v55 = vpop.permute.xlu1 %4014  ;;  %v4076_v53 = vadd.f32 %v4044_v23, %v3948_v24  ;;  %v3790_v18 = vmul.f32 %v10043_v21, %v12920_v19  ;;  %v7302_v21 = vld [vmem:[%s12140_s7 + $0x20] sm:$0xff]  ;;  %v7305_v23 = vld [vmem:[%s12141_s8 + $0x30] sm:$0xff]  ;;  %v12924_v24 = vld [vmem:[#allocation110_spill] sm:$0xff] }
 0x402   : > { %v4061_v41 = vmul.f32 %v4015_v55, %v12911_v1  ;;  %v3821_v40 = vpop.permute.xlu0 %3820  ;;  %v2697_v58 = vpack.c.bf16 %v2521_v62, %v2520_v35  ;;  %v12921_v35 = vld [vmem:[#allocation37_spill] sm:$0xff]  ;;  %v3794_v20 = vmul.f32 %v7306_v52, %v12924_v24  ;;  %v7320_v52 = vld [vmem:[%s12141_s8 + $0x68] sm:$0xff] }
 0x403   : > { %6316 = vmatmul.mubr.bf16.gmra.mxu1 %v2696_v8  ;;  %v3884_v26 = vmul.f32 %v3821_v40, %v12912_v43  ;;  %v3791_v29 = vmul.f32 %v12901_v27, %v12921_v35  ;;  %v7303_v27 = vld [vmem:[%s12140_s7 + $0x28] sm:$0xff]  ;;  %v7313_v35 = vld [vmem:[%s12141_s8 + $0x50] sm:$0xff] }
 0x404   : > { %v4093_v42 = vadd.f32 %v4061_v41, %v3965_v38  ;;  %6317 = vmatprep.mubr.bf16.mxu1 %v2697_v58  ;;  %v3792_v38 = vmul.f32 %v7302_v21, %v12922_v2  ;;  %v7304_v41 = vld [vmem:[%s12141_s8 + $0x28] sm:$0xff]  ;;  %v7316_v21 = vld [vmem:[%s12141_s8 + $0x58] sm:$0xff] }
 0x405   : > { %v3983_v25 = vpop.permute.xlu1 %3982  ;;  %v3916_v34 = vadd.f32 %v3884_v26, %v3788_v0 }
 0x406   : > { %v4045_v60 = vmul.f32 %v3983_v25, %v12917_v31  ;;  %v3825_v59 = vpop.permute.xlu0 %3824  ;;  %v4132_v56 = vpack.c.bf16 %v4093_v42, %v4092_v10 }
 0x407   : > { %v3886_v33 = vmul.f32 %v3825_v59, %v10038_v17 }
 0x408   : > { %v4077_v8 = vadd.f32 %v4045_v60, %v3949_v22  ;;  %6445 = vmatprep.subr.bf16.mxu1 %v4132_v56  ;;  %v12925_v22 = vld [vmem:[#allocation115_spill] sm:$0xff]  ;;  %v7308_v60 = vld [vmem:[%s12141_s8 + $0x38] sm:$0xff] }
 0x409   : > { %v3823_v3 = vpop.permute.xlu1 %3822  ;;  %v3918_v48 = vadd.f32 %v3886_v33, %v3790_v18  ;;  %v7312_v33 = vld [vmem:[%s12141_s8 + $0x48] sm:$0xff] }
 0x40a   : > { %v4124_v4 = vpack.c.bf16 %v4077_v8, %v4076_v53  ;;  %v3885_v9 = vmul.f32 %v3823_v3, %v12917_v31  ;;  %v3829_v5 = vpop.permute.xlu0 %3828  ;;  %v3795_v31 = vmul.f32 %v7307_v44, %v12925_v22  ;;  %v7309_v8 = vld [vmem:[%s12141_s8 + $0x40] sm:$0xff] }
 0x40b   : > { %6318 = vmatmul.mubr.bf16.gmra.mxu1 %v2697_v58  ;;  %v3888_v63 = vmul.f32 %v7301_v39, %v3829_v5  ;;  %v12927_v5 = vld [vmem:[#allocation39_spill] sm:$0xff] }
 0x40c   : > { %v3917_v12 = vadd.f32 %v3885_v9, %v3789_v36  ;;  %6446 = vmatpush3.bf16.xpose.msra.mxu1 %v4124_v4  ;;  %v12926_v36 = vld [vmem:[#allocation5_spill] sm:$0xff]  ;;  %v7311_v9 = vld [vmem:[%s12140_s7 + $0x48] sm:$0xff] }
 0x40d   : > { %v3827_v57 = vpop.permute.xlu1 %3826  ;;  %v3920_v43 = vadd.f32 %v3888_v63, %v3792_v38  ;;  %v3796_v4 = vmul.f32 %v7310_v37, %v12926_v36  ;;  %v7315_v63 = vld [vmem:[%s12140_s7 + $0x58] sm:$0xff] }
 0x40e   : > { %v3887_v7 = vmul.f32 %v3827_v57, %v12902_v30  ;;  %v3833_v62 = vpop.permute.xlu0 %3832  ;;  %v4108_v55 = vpack.c.bf16 %v3917_v12, %v3916_v34  ;;  %v12923_v30 = vld [vmem:[#allocation76_spill] sm:$0xff]  ;;  %v3797_v34 = vmul.f32 %v7311_v9, %v12927_v5  ;;  %v7324_v37 = vld [vmem:[%s12141_s8 + $0x78] sm:$0xff] }
 0x40f   : > { %v3793_v1 = vmul.f32 %v7303_v27, %v12923_v30  ;;  %v3890_v42 = vmul.f32 %v7305_v23, %v3833_v62 }
 0x410   : > { %v3919_v17 = vadd.f32 %v3887_v7, %v3791_v29  ;;  %6447 = vmatprep.mubr.bf16.mxu1 %v4108_v55 }
 0x411   : > { %v3831_v13 = vpop.permute.xlu1 %3830  ;;  %v3922_v26 = vadd.f32 %v3890_v42, %v3794_v20  ;;  %v7319_v42 = vld [vmem:[%s12140_s7 + $0x68] sm:$0xff] }
 0x412   : > { %v3889_v40 = vmul.f32 %v7304_v41, %v3831_v13  ;;  %v3837_v58 = vpop.permute.xlu0 %3836  ;;  %v4109_v10 = vpack.c.bf16 %v3919_v17, %v3918_v48  ;;  %v12928_v48 = vld [vmem:[#allocation3_spill] sm:$0xff]  ;;  %v12929_v17 = vld [vmem:[#allocation118_spill] sm:$0xff] }
 0x413   : > { %6448 = vmatmul.mubr.bf16.vlgmr.msra.gmra.mxu1 %v4108_v55  ;;  %v3892_v3 = vmul.f32 %v7309_v8, %v3837_v58  ;;  %v7314_v55 = vld [vmem:[%s12140_s7 + $0x50] sm:$0xff]  ;;  %v3799_v13 = vmul.f32 %v7315_v63, %v12929_v17  ;;  %v12932_v8 = vld [vmem:[#allocation10_spill] sm:$0xff] }
 0x414   : > { %v3921_v25 = vadd.f32 %v3889_v40, %v3793_v1  ;;  %6449 = vmatprep.mubr.bf16.mxu1 %v4109_v10  ;;  %v3798_v39 = vmul.f32 %v7314_v55, %v12928_v48  ;;  %v7317_v1 = vld [vmem:[%s12141_s8 + $0x60] sm:$0xff]  ;;  %v7328_v48 = vld [vmem:[%s12141_s8 + $0x88] sm:$0xff] }
 0x415   : > { %v3835_v6 = vpop.permute.xlu1 %3834  ;;  %v3924_v18 = vadd.f32 %v3892_v3, %v3796_v4 }
 0x416   : > { %v3891_v59 = vmul.f32 %v7308_v60, %v3835_v6  ;;  %v3841_v56 = vpop.permute.xlu0 %3840  ;;  %v4110_v53 = vpack.c.bf16 %v3921_v25, %v3920_v43  ;;  %v12930_v43 = vld [vmem:[#allocation113_spill] sm:$0xff] }
 0x417   : > { %v3894_v29 = vmul.f32 %v7313_v35, %v3841_v56  ;;  %v12931_v25 = vld [vmem:[#allocation9_spill] sm:$0xff] }
 0x418   : > { %v3923_v51 = vadd.f32 %v3891_v59, %v3795_v31  ;;  %v3801_v6 = vmul.f32 %v7319_v42, %v12931_v25  ;;  %v7321_v31 = vld [vmem:[%s12141_s8 + $0x70] sm:$0xff] }
 0x419   : > { %v3839_v0 = vpop.permute.xlu1 %3838  ;;  %v3926_v30 = vadd.f32 %v3894_v29, %v3798_v39  ;;  %v12934_v35 = vld [vmem:[#allocation121_spill] sm:$0xff] }
 0x41a   : > { %v3893_v12 = vmul.f32 %v7312_v33, %v3839_v0  ;;  %v3845_v57 = vpop.permute.xlu0 %3844  ;;  %v4111_v19 = vpack.c.bf16 %v3923_v51, %v3922_v26  ;;  %v7322_v26 = vld [vmem:[%s12140_s7 + $0x70] sm:$0xff]  ;;  %v7323_v51 = vld [vmem:[%s12140_s7 + $0x78] sm:$0xff] }
 0x41b   : > { %6450 = vmatmul.mubr.bf16.gmra.mxu1 %v4109_v10  ;;  %v3896_v41 = vmul.f32 %v7317_v1, %v3845_v57  ;;  %v7318_v10 = vld [vmem:[%s12140_s7 + $0x60] sm:$0xff]  ;;  %v3802_v3 = vmul.f32 %v7322_v26, %v12932_v8  ;;  %v7330_v1 = vld [vmem:[%s12140_s7 + $0x90] sm:$0xff] }
 0x41c   : > { %v3925_v7 = vadd.f32 %v3893_v12, %v3797_v34  ;;  %6451 = vmatprep.mubr.bf16.mxu1 %v4110_v53  ;;  %v3800_v23 = vmul.f32 %v7318_v10, %v12930_v43  ;;  %v7325_v34 = vld [vmem:[%s12141_s8 + $0x80] sm:$0xff]  ;;  %v7332_v43 = vld [vmem:[%s12141_s8 + $0x98] sm:$0xff]  ;;  %v12939_v26 = vld [vmem:[#allocation129_spill] sm:$0xff] }
 0x41d   : > { %v3843_v62 = vpop.permute.xlu1 %3842 }
 0x41e   : > { %v3895_v2 = vmul.f32 %v7316_v21, %v3843_v62  ;;  %v3849_v38 = vpop.permute.xlu0 %3848  ;;  %v10784_v27 = vpack.c.bf16 %v3925_v7, %v3924_v18  ;;  %v3928_v22 = vadd.f32 %v3896_v41, %v3800_v23  ;;  %v7326_v18 = vld [vmem:[%s12140_s7 + $0x80] sm:$0xff]  ;;  %v7327_v7 = vld [vmem:[%s12140_s7 + $0x88] sm:$0xff]  ;;  %v7329_v21 = vld [vmem:[%s12141_s8 + $0x90] sm:$0xff] }
 0x41f   : > { %v3898_v60 = vmul.f32 %v7321_v31, %v3849_v38  ;;  %v3804_v29 = vmul.f32 %v7326_v18, %v12934_v35  ;;  %v12935_v62 = vld [vmem:[#allocation16_spill] sm:$0xff]  ;;  %v7334_v31 = vld [vmem:[%s12140_s7 + $0xa0] sm:$0xff]  ;;  %v12941_v18 = vld [vmem:[#allocation18_spill] sm:$0xff] }
 0x420   : > { %v3927_v40 = vadd.f32 %v3895_v2, %v3799_v13  ;;  %v3805_v55 = vmul.f32 %v7327_v7, %v12935_v62  ;;  %v12936_v41 = vld [vmem:[#allocation116_spill] sm:$0xff] }
 0x421   : > { %v3847_v58 = vpop.permute.xlu1 %3846  ;;  %v3930_v5 = vadd.f32 %v3898_v60, %v3802_v3  ;;  %v12938_v60 = vld [vmem:[#allocation11_spill] sm:$0xff]  ;;  %v7336_v3 = vld [vmem:[%s12141_s8 + $0xa8] sm:$0xff] }
 0x422   : > { %v3897_v24 = vmul.f32 %v7320_v52, %v3847_v58  ;;  %v3853_v20 = vpop.permute.xlu0 %3852  ;;  %v10800_v44 = vpack.c.bf16 %v3927_v40, %v3926_v30  ;;  %v3806_v40 = vmul.f32 %v7330_v1, %v12936_v41  ;;  %v12937_v58 = vld [vmem:[#allocation23_spill] sm:$0xff]  ;;  %v7343_v1 = vld [vmem:[%s12140_s7 + $0xc8] sm:$0xff]  ;;  %v12943_v41 = vld [vmem:[#allocation6_spill] sm:$0xff] }
 0x423   : > { %6452 = vmatmul.mubr.bf16.gmra.mxu1 %v4110_v53  ;;  %v12933_v53 = vld [vmem:[#allocation8_spill] sm:$0xff]  ;;  %v3900_v33 = vmul.f32 %v7325_v34, %v3853_v20  ;;  %v7333_v52 = vld [vmem:[%s12141_s8 + $0xa0] sm:$0xff] }
 0x424   : > { %v3929_v59 = vadd.f32 %v3897_v24, %v3801_v6  ;;  %6453 = vmatprep.mubr.bf16.mxu1 %v4111_v19  ;;  %v3803_v0 = vmul.f32 %v7323_v51, %v12933_v53 }
 0x425   : > { %v3851_v56 = vpop.permute.xlu1 %3850  ;;  %v3932_v13 = vadd.f32 %v3900_v33, %v3804_v29  ;;  %v7338_v33 = vld [vmem:[%s12140_s7 + $0xb0] sm:$0xff]  ;;  %v7340_v29 = vld [vmem:[%s12141_s8 + $0xb8] sm:$0xff] }
 0x426   : > { %v3899_v36 = vmul.f32 %v7324_v37, %v3851_v56  ;;  %v3857_v4 = vpop.permute.xlu0 %3856  ;;  %v10816_v9 = vpack.c.bf16 %v3929_v59, %v3928_v22  ;;  %v3808_v59 = vmul.f32 %v7334_v31, %v12938_v60  ;;  %v7335_v56 = vld [vmem:[%s12140_s7 + $0xa8] sm:$0xff] }
 0x427   : > { %v3902_v2 = vmul.f32 %v7329_v21, %v3857_v4  ;;  %v3809_v8 = vmul.f32 %v7335_v56, %v12939_v26 }
 0x428   : > { %v3931_v12 = vadd.f32 %v3899_v36, %v3803_v0  ;;  %v7337_v36 = vld [vmem:[%s12141_s8 + $0xb0] sm:$0xff] }
 0x429   : > { %v3855_v57 = vpop.permute.xlu1 %3854  ;;  %v3934_v6 = vadd.f32 %v3902_v2, %v3806_v40  ;;  %v7342_v2 = vld [vmem:[%s12140_s7 + $0xc0] sm:$0xff]  ;;  %v3813_v40 = vmul.f32 %v7343_v1, %v12943_v41 }
 0x42a   : > { %v3901_v39 = vmul.f32 %v7328_v48, %v3855_v57  ;;  %v3861_v63 = vpop.permute.xlu0 %3860  ;;  %v10832_v17 = vpack.c.bf16 %v3931_v12, %v3930_v5  ;;  %v12940_v12 = vld [vmem:[#allocation124_spill] sm:$0xff] }
 0x42b   : > { %6454 = vmatmul.mubr.bf16.gmra.mxu1 %v4111_v19  ;;  %v7331_v19 = vld [vmem:[%s12140_s7 + $0x98] sm:$0xff]  ;;  %v3904_v24 = vmul.f32 %v7333_v52, %v3861_v63  ;;  %v3810_v57 = vmul.f32 %v7338_v33, %v12940_v12 }
 0x42c   : > { %v3933_v38 = vadd.f32 %v3901_v39, %v3805_v55  ;;  %6455 = vmatprep.mubr.bf16.mxu1 %v10784_v27  ;;  %v3807_v10 = vmul.f32 %v7331_v19, %v12937_v58  ;;  %v7341_v39 = vld [vmem:[%s12141_s8 + $0xc0] sm:$0xff]  ;;  %v7344_v19 = vld [vmem:[%s12141_s8 + $0xc8] sm:$0xff] }
 0x42d   : > { %v3859_v30 = vpop.permute.xlu1 %3858  ;;  %v3936_v37 = vadd.f32 %v3904_v24, %v3808_v59  ;;  %v12944_v24 = vld [vmem:[#allocation119_spill] sm:$0xff] }
 0x42e   : > { %v3903_v23 = vmul.f32 %v7332_v43, %v3859_v30  ;;  %v3865_v42 = vpop.permute.xlu0 %3864  ;;  %v10849_v25 = vpack.c.bf16 %v3933_v38, %v3932_v13  ;;  %v12942_v38 = vld [vmem:[#allocation126_spill] sm:$0xff] }
 0x42f   : > { %v3906_v4 = vmul.f32 %v7337_v36, %v3865_v42  ;;  %v3812_v30 = vmul.f32 %v7342_v2, %v12942_v38 }
 0x430   : > { %v3935_v20 = vadd.f32 %v3903_v23, %v3807_v10 }
 0x431   : > { %v3863_v22 = vpop.permute.xlu1 %3862  ;;  %v3938_v48 = vadd.f32 %v3906_v4, %v3810_v57 }
 0x432   : > { %v3905_v51 = vmul.f32 %v7336_v3, %v3863_v22  ;;  %v3869_v53 = vpop.permute.xlu0 %3868  ;;  %v10865_v0 = vpack.c.bf16 %v3935_v20, %v3934_v6  ;;  %v3814_v20 = vmul.f32 %v10628_v61, %v12944_v24  ;;  %v12945_v22 = vld [vmem:[#allocation132_spill] sm:$0xff]  ;;  %v12946_v3 = vld [vmem:[#allocation127_spill] sm:$0xff] }
 0x433   : > { %6456 = vmatmul.mubr.bf16.gmra.mxu1 %v10784_v27  ;;  %v7339_v27 = vld [vmem:[%s12140_s7 + $0xb8] sm:$0xff]  ;;  %v3908_v63 = vmul.f32 %v7341_v39, %v3869_v53  ;;  %v3815_v31 = vmul.f32 %v10635_v47, %v12945_v22 }
 0x434   : > { %v3937_v5 = vadd.f32 %v3905_v51, %v3809_v8  ;;  %6457 = vmatprep.mubr.bf16.mxu1 %v10800_v44  ;;  %v3811_v35 = vmul.f32 %v7339_v27, %v12941_v18  ;;  %v3816_v51 = vmul.f32 %v10668_v15, %v12946_v3  ;;  %v12947_v53 = vld [vmem:[#allocation130_spill] sm:$0xff]  ;;  %v3819_v15 = vmul.f32 %v10528_v16, %v10561_v50 }
 0x435   : > { %v3867_v34 = vpop.permute.xlu1 %3866  ;;  %v3940_v23 = vadd.f32 %v3908_v63, %v3812_v30 }
 0x436   : > { %v3907_v7 = vmul.f32 %v7340_v29, %v3867_v34  ;;  %v3873_v62 = vpop.permute.xlu0 %3872  ;;  %v10883_v55 = vpack.c.bf16 %v3937_v5, %v3936_v37  ;;  %v3817_v37 = vmul.f32 %v10675_v14, %v12947_v53  ;;  %v12948_v5 = vld [vmem:[#allocation28_spill] sm:$0xff] }
 0x437   : > { %v3910_v42 = vmul.f32 %v10621_v11, %v3873_v62  ;;  %v3818_v34 = vmul.f32 %v10521_v28, %v12948_v5 }
 0x438   : > { %v3939_v13 = vadd.f32 %v3907_v7, %v3811_v35 }
 0x439   : > { %v3871_v21 = vpop.permute.xlu1 %3870  ;;  %v3942_v56 = vadd.f32 %v3910_v42, %v3814_v20 }
 0x43a   : > { %v3909_v58 = vmul.f32 %v7344_v19, %v3871_v21  ;;  %v10899_v10 = vpack.c.bf16 %v3939_v13, %v3938_v48  ;;  %v3877_v43 = vpop.permute.xlu0 %3876 }
 0x43b   : > { %6458 = vmatmul.mubr.bf16.gmra.mxu1 %v10800_v44  ;;  %v3912_v44 = vmul.f32 %v10662_v46, %v3877_v43 }
 0x43c   : > { %v3941_v6 = vadd.f32 %v3909_v58, %v3813_v40  ;;  %6459 = vmatprep.mubr.bf16.mxu1 %v10816_v9 }
 0x43d   : > { %v3875_v52 = vpop.permute.xlu1 %3874  ;;  %v3944_v47 = vadd.f32 %v3912_v44, %v3816_v51 }
 0x43e   : > { %v3911_v60 = vmul.f32 %v10642_v54, %v3875_v52  ;;  %v10909_v59 = vpack.c.bf16 %v3941_v6, %v3940_v23  ;;  %v3881_v8 = vpop.permute.xlu0 %3880 }
 0x43f   : > { %v3914_v54 = vmul.f32 %v10500_v32, %v3881_v8 }
 0x440   : > { %v3943_v26 = vadd.f32 %v3911_v60, %v3815_v31 }
 0x441   : > { %v3879_v11 = vpop.permute.xlu1 %3878  ;;  %v3946_v33 = vadd.f32 %v3914_v54, %v3818_v34 }
 0x442   : > { %v3913_v61 = vmul.f32 %v10682_v49, %v3879_v11  ;;  %v10917_v36 = vpack.c.bf16 %v3943_v26, %v3942_v56 }
 0x443   : > { %6460 = vmatmul.mubr.bf16.gmra.mxu1 %v10816_v9 }
 0x444   : > { %v3945_v4 = vadd.f32 %v3913_v61, %v3817_v37  ;;  %6461 = vmatprep.mubr.bf16.mxu1 %v10832_v17 }
 0x445   : > { %v3883_v46 = vpop.permute.xlu1 %3882 }
 0x446   : > { %v3915_v14 = vmul.f32 %v12905_v45, %v3883_v46  ;;  %v10927_v49 = vpack.c.bf16 %v3945_v4, %v3944_v47 }
 0x448   : > { %v3947_v12 = vadd.f32 %v3915_v14, %v3819_v15 }
 0x44a   : > { %v10929_v9 = vpack.c.bf16 %v3947_v12, %v3946_v33 }
 0x44b   : > { %6462 = vmatmul.mubr.bf16.gmra.mxu1 %v10832_v17 }
 0x44c   : > { %6463 = vmatprep.mubr.bf16.mxu1 %v10849_v25 }
 0x453   : > { %v2748_v32 = vpop.f32.mrf.mxu1  ;;  %6464 = vmatmul.mubr.bf16.gmra.mxu1 %v10849_v25 }
 0x454   : > { %6465 = vmatprep.mubr.bf16.mxu1 %v10865_v0  ;;  %v10935_v57 = vmul.f32 0.088388346, %v2748_v32 }
 0x455   : > { %v2750_v28 = vpop.f32.mrf.mxu1 }
 0x456   : > { %v10937_v50 = vmul.f32 0.088388346, %v2750_v28 }
 0x457   : > { %v2752_v16 = vpop.f32.mrf.mxu1 }
 0x458   : > { %v2971_v45 = vmax.f32 %v10935_v57, %v10937_v50  ;;  %v10941_v18 = vmul.f32 0.088388346, %v2752_v16 }
 0x459   : > { %v2754_v27 = vpop.f32.mrf.mxu1 }
 0x45a   : > { %v10943_v17 = vmul.f32 0.088388346, %v2754_v27  ;;  %2972 = vmax.xlane.f32.xlu0 %v2971_v45 }
 0x45b   : > { %v2758_v35 = vpop.f32.mrf.mxu1  ;;  %6466 = vmatmul.mubr.bf16.gmra.mxu1 %v10865_v0 }
 0x45c   : > { %v2974_v25 = vmax.f32 %v10941_v18, %v10943_v17  ;;  %6467 = vmatprep.mubr.bf16.mxu1 %v10883_v55  ;;  %v10949_v7 = vmul.f32 0.088388346, %v2758_v35 }
 0x45d   : > { %v2760_v29 = vpop.f32.mrf.mxu1 }
 0x45e   : > { %v10951_v62 = vmul.f32 0.088388346, %v2760_v29  ;;  %2975 = vmax.xlane.f32.xlu1 %v2974_v25 }
 0x45f   : > { %v2762_v48 = vpop.f32.mrf.mxu1 }
 0x460   : > { %v2977_v39 = vmax.f32 %v10949_v7, %v10951_v62  ;;  %v10955_v13 = vmul.f32 0.088388346, %v2762_v48 }
 0x461   : > { %v2764_v63 = vpop.f32.mrf.mxu1 }
 0x462   : > { %v10957_v21 = vmul.f32 0.088388346, %v2764_v63  ;;  %2978 = vmax.xlane.f32.xlu0 %v2977_v39 }
 0x463   : > { %v2768_v0 = vpop.f32.mrf.mxu1  ;;  %6468 = vmatmul.mubr.bf16.gmra.mxu1 %v10883_v55 }
 0x464   : > { %v2980_v2 = vmax.f32 %v10955_v13, %v10957_v21  ;;  %6469 = vmatprep.mubr.bf16.mxu1 %v10899_v10  ;;  %v10963_v30 = vmul.f32 0.088388346, %v2768_v0 }
 0x465   : > { %v2770_v38 = vpop.f32.mrf.mxu1 }
 0x466   : > { %v10965_v1 = vmul.f32 0.088388346, %v2770_v38  ;;  %2981 = vmax.xlane.f32.xlu0 %v2980_v2 }
 0x467   : > { %v2772_v41 = vpop.f32.mrf.mxu1 }
 0x468   : > { %v2983_v40 = vmax.f32 %v10963_v30, %v10965_v1  ;;  %v10969_v58 = vmul.f32 0.088388346, %v2772_v41 }
 0x469   : > { %v2774_v19 = vpop.f32.mrf.mxu1 }
 0x46a   : > { %v10971_v43 = vmul.f32 0.088388346, %v2774_v19  ;;  %2984 = vmax.xlane.f32.xlu0 %v2983_v40 }
 0x46b   : > { %v2778_v55 = vpop.f32.mrf.mxu1  ;;  %6470 = vmatmul.mubr.bf16.gmra.mxu1 %v10899_v10 }
 0x46c   : > { %v2986_v23 = vmax.f32 %v10969_v58, %v10971_v43  ;;  %6471 = vmatprep.mubr.bf16.mxu1 %v10909_v59  ;;  %v10977_v6 = vmul.f32 0.088388346, %v2778_v55 }
 0x46d   : > { %v2780_v42 = vpop.f32.mrf.mxu1 }
 0x46e   : > { %v10979_v52 = vmul.f32 0.088388346, %v2780_v42  ;;  %2987 = vmax.xlane.f32.xlu1 %v2986_v23 }
 0x46f   : > { %v2782_v24 = vpop.f32.mrf.mxu1 }
 0x470   : > { %v2989_v20 = vmax.f32 %v10977_v6, %v10979_v52  ;;  %v10983_v31 = vmul.f32 0.088388346, %v2782_v24 }
 0x471   : > { %v2784_v22 = vpop.f32.mrf.mxu1 }
 0x472   : > { %v10985_v60 = vmul.f32 0.088388346, %v2784_v22  ;;  %2990 = vmax.xlane.f32.xlu0 %v2989_v20 }
 0x473   : > { %v2788_v10 = vpop.f32.mrf.mxu1  ;;  %6472 = vmatmul.mubr.bf16.gmra.mxu1 %v10909_v59 }
 0x474   : > { %v2992_v56 = vmax.f32 %v10983_v31, %v10985_v60  ;;  %6473 = vmatprep.mubr.bf16.mxu1 %v10917_v36  ;;  %v10991_v26 = vmul.f32 0.088388346, %v2788_v10 }
 0x475   : > { %v2790_v44 = vpop.f32.mrf.mxu1 }
 0x476   : > { %v10993_v8 = vmul.f32 0.088388346, %v2790_v44  ;;  %2993 = vmax.xlane.f32.xlu1 %v2992_v56 }
 0x477   : > { %v2792_v11 = vpop.f32.mrf.mxu1 }
 0x478   : > { %v2995_v3 = vmax.f32 %v10991_v26, %v10993_v8  ;;  %v10997_v53 = vmul.f32 0.088388346, %v2792_v11 }
 0x479   : > { %v2794_v51 = vpop.f32.mrf.mxu1 }
 0x47a   : > { %v10999_v37 = vmul.f32 0.088388346, %v2794_v51  ;;  %2996 = vmax.xlane.f32.xlu0 %v2995_v3 }
 0x47b   : > { %v2798_v59 = vpop.f32.mrf.mxu1  ;;  %6474 = vmatmul.mubr.bf16.gmra.mxu1 %v10917_v36 }
 0x47c   : > { %v2998_v61 = vmax.f32 %v10997_v53, %v10999_v37  ;;  %6475 = vmatprep.mubr.bf16.mxu1 %v10927_v49  ;;  %v11005_v54 = vmul.f32 0.088388346, %v2798_v59 }
 0x47d   : > { %v2800_v47 = vpop.f32.mrf.mxu1 }
 0x47e   : > { %v11007_v4 = vmul.f32 0.088388346, %v2800_v47  ;;  %2999 = vmax.xlane.f32.xlu1 %v2998_v61 }
 0x47f   : > { %v2802_v46 = vpop.f32.mrf.mxu1 }
 0x480   : > { %v3001_v5 = vmax.f32 %v11005_v54, %v11007_v4  ;;  %v11011_v15 = vmul.f32 0.088388346, %v2802_v46 }
 0x481   : > { %v2804_v34 = vpop.f32.mrf.mxu1 }
 0x482   : > { %v11013_v14 = vmul.f32 0.088388346, %v2804_v34  ;;  %3002 = vmax.xlane.f32.xlu0 %v3001_v5 }
 0x483   : > { %v2808_v36 = vpop.f32.mrf.mxu1  ;;  %6476 = vmatmul.mubr.bf16.gmra.mxu1 %v10927_v49 }
 0x484   : > { %v3004_v33 = vmax.f32 %v11011_v15, %v11013_v14  ;;  %6477 = vmatprep.mubr.bf16.mxu1 %v10929_v9  ;;  %v11019_v32 = vmul.f32 0.088388346, %v2808_v36 }
 0x485   : > { %v2810_v12 = vpop.f32.mrf.mxu1 }
 0x486   : > { %v11021_v28 = vmul.f32 0.088388346, %v2810_v12  ;;  %3005 = vmax.xlane.f32.xlu1 %v3004_v33 }
 0x487   : > { %v2812_v16 = vpop.f32.mrf.mxu1 }
 0x488   : > { %v3007_v45 = vmax.f32 %v11019_v32, %v11021_v28  ;;  %v11025_v35 = vmul.f32 0.088388346, %v2812_v16 }
 0x489   : > { %v2814_v27 = vpop.f32.mrf.mxu1 }
 0x48a   : > { %v11027_v25 = vmul.f32 0.088388346, %v2814_v27  ;;  %3008 = vmax.xlane.f32.xlu0 %v3007_v45 }
 0x48b   : > { %v2818_v49 = vpop.f32.mrf.mxu1  ;;  %6478 = vmatmul.mubr.bf16.gmra.mxu1 %v10929_v9 }
 0x48c   : > { %v3010_v29 = vmax.f32 %v11025_v35, %v11027_v25  ;;  %v11032_v39 = vmul.f32 0.088388346, %v2818_v49 }
 0x48d   : > { %v2820_v48 = vpop.f32.mrf.mxu1 }
 0x48e   : > { %v11034_v63 = vmul.f32 0.088388346, %v2820_v48  ;;  %3011 = vmax.xlane.f32.xlu1 %v3010_v29 }
 0x48f   : > { %v2822_v0 = vpop.f32.mrf.mxu1 }
 0x490   : > { %v3013_v2 = vmax.f32 %v11032_v39, %v11034_v63  ;;  %v11038_v41 = vmul.f32 0.088388346, %v2822_v0 }
 0x491   : > { %v2824_v38 = vpop.f32.mrf.mxu1 }
 0x492   : > { %v11040_v40 = vmul.f32 0.088388346, %v2824_v38  ;;  %3014 = vmax.xlane.f32.xlu0 %v3013_v2 }
 0x493   : > { %v2828_v9 = vpop.f32.mrf.mxu1 }
 0x494   : > { %v3016_v19 = vmax.f32 %v11038_v41, %v11040_v40  ;;  %v11044_v23 = vmul.f32 0.088388346, %v2828_v9 }
 0x495   : > { %v2830_v55 = vpop.f32.mrf.mxu1 }
 0x496   : > { %v11046_v42 = vmul.f32 0.088388346, %v2830_v55  ;;  %3017 = vmax.xlane.f32.xlu1 %v3016_v19 }
 0x497   : > { %v2832_v24 = vpop.f32.mrf.mxu1 }
 0x498   : > { %v3019_v20 = vmax.f32 %v11044_v23, %v11046_v42  ;;  %v11050_v10 = vmul.f32 0.088388346, %v2832_v24 }
 0x499   : > { %v2834_v22 = vpop.f32.mrf.mxu1 }
 0x49a   : > { %v11052_v56 = vmul.f32 0.088388346, %v2834_v22  ;;  %3020 = vmax.xlane.f32.xlu0 %v3019_v20 }
 0x49b   : > { %v2838_v44 = vpop.f32.mrf.mxu1 }
 0x49c   : > { %v3022_v11 = vmax.f32 %v11050_v10, %v11052_v56  ;;  %v11056_v51 = vmul.f32 0.088388346, %v2838_v44 }
 0x49d   : > { %v2840_v3 = vpop.f32.mrf.mxu1 }
 0x49e   : > { %v11058_v59 = vmul.f32 0.088388346, %v2840_v3  ;;  %3023 = vmax.xlane.f32.xlu1 %v3022_v11 }
 0x49f   : > { %v2842_v61 = vpop.f32.mrf.mxu1 }
 0x4a0   : > { %v3025_v47 = vmax.f32 %v11056_v51, %v11058_v59  ;;  %v11062_v5 = vmul.f32 0.088388346, %v2842_v61 }
 0x4a1   : > { %v2844_v46 = vpop.f32.mrf.mxu1 }
 0x4a2   : > { %v11064_v34 = vmul.f32 0.088388346, %v2844_v46  ;;  %3026 = vmax.xlane.f32.xlu0 %v3025_v47 }
 0x4a3   : > { %v2848_v36 = vpop.f32.mrf.mxu1 }
 0x4a4   : > { %v3028_v33 = vmax.f32 %v11062_v5, %v11064_v34  ;;  %v11068_v16 = vmul.f32 0.088388346, %v2848_v36 }
 0x4a5   : > { %v2850_v12 = vpop.f32.mrf.mxu1 }
 0x4a6   : > { %v11070_v45 = vmul.f32 0.088388346, %v2850_v12  ;;  %3029 = vmax.xlane.f32.xlu1 %v3028_v33 }
 0x4a7   : > { %v2852_v27 = vpop.f32.mrf.mxu1 }
 0x4a8   : > { %v3031_v49 = vmax.f32 %v11068_v16, %v11070_v45  ;;  %v11074_v48 = vmul.f32 0.088388346, %v2852_v27 }
 0x4a9   : > { %v2854_v29 = vpop.f32.mrf.mxu1 }
 0x4aa   : > { %v11076_v0 = vmul.f32 0.088388346, %v2854_v29  ;;  %3032 = vmax.xlane.f32.xlu0 %v3031_v49 }
 0x4ab   : > { %v2858_v2 = vpop.f32.mrf.mxu1 }
 0x4ac   : > { %v3034_v38 = vmax.f32 %v11074_v48, %v11076_v0  ;;  %v11080_v19 = vmul.f32 0.088388346, %v2858_v2 }
 0x4ad   : > { %v2860_v9 = vpop.f32.mrf.mxu1 }
 0x4ae   : > { %v11082_v55 = vmul.f32 0.088388346, %v2860_v9  ;;  %3035 = vmax.xlane.f32.xlu1 %v3034_v38 }
 0x4af   : > { %v2862_v24 = vpop.f32.mrf.mxu1 }
 0x4b0   : > { %12949 = vst [vmem:[#allocation135_spill] sm:$0xff] %v11082_v55  ;;  %v3037_v20 = vmax.f32 %v11080_v19, %v11082_v55  ;;  %v11086_v44 = vmul.f32 0.088388346, %v2862_v24 }
 0x4b1   : > { %v2864_v22 = vpop.f32.mrf.mxu1 }
 0x4b2   : > { %12950 = vst [vmem:[#allocation77_spill] sm:$0xff] %v11086_v44  ;;  %v11088_v11 = vmul.f32 0.088388346, %v2864_v22  ;;  %3038 = vmax.xlane.f32.xlu0 %v3037_v20 }
 0x4b3   : > { %v2868_v3 = vpop.f32.mrf.mxu1 }
 0x4b4   : > { %12951 = vst [vmem:[#allocation152_spill] sm:$0xff] %v11088_v11  ;;  %v3040_v61 = vmax.f32 %v11086_v44, %v11088_v11  ;;  %v11092_v46 = vmul.f32 0.088388346, %v2868_v3 }
 0x4b5   : > { %v2870_v47 = vpop.f32.mrf.mxu1 }
 0x4b6   : > { %12952 = vst [vmem:[#allocation22_spill] sm:$0xff] %v11092_v46  ;;  %v11094_v36 = vmul.f32 0.088388346, %v2870_v47  ;;  %3041 = vmax.xlane.f32.xlu1 %v3040_v61 }
 0x4b7   : > { %v2872_v33 = vpop.f32.mrf.mxu1 }
 0x4b8   : > { %12953 = vst [vmem:[#allocation32_spill] sm:$0xff] %v11094_v36  ;;  %v3043_v12 = vmax.f32 %v11092_v46, %v11094_v36  ;;  %v11098_v49 = vmul.f32 0.088388346, %v2872_v33 }
 0x4b9   : > { %v2874_v27 = vpop.f32.mrf.mxu1 }
 0x4ba   : > { %12954 = vst [vmem:[#allocation133_spill] sm:$0xff] %v11098_v49  ;;  %v11100_v29 = vmul.f32 0.088388346, %v2874_v27  ;;  %3044 = vmax.xlane.f32.xlu0 %v3043_v12 }
 0x4bb   : > { %v2878_v2 = vpop.f32.mrf.mxu1 }
 0x4bc   : > { %12955 = vst [vmem:[#allocation153_spill] sm:$0xff] %v11100_v29  ;;  %v3046_v38 = vmax.f32 %v11098_v49, %v11100_v29  ;;  %v11104_v24 = vmul.f32 0.088388346, %v2878_v2 }
 0x4bd   : > { %v2880_v9 = vpop.f32.mrf.mxu1 }
 0x4be   : > { %12956 = vst [vmem:[#allocation138_spill] sm:$0xff] %v11104_v24  ;;  %v11106_v20 = vmul.f32 0.088388346, %v2880_v9  ;;  %3047 = vmax.xlane.f32.xlu1 %v3046_v38 }
 0x4bf   : > { %v2882_v22 = vpop.f32.mrf.mxu1 }
 0x4c0   : > { %12957 = vst [vmem:[#allocation154_spill] sm:$0xff] %v11106_v20  ;;  %v3049_v3 = vmax.f32 %v11104_v24, %v11106_v20  ;;  %v11110_v47 = vmul.f32 0.088388346, %v2882_v22 }
 0x4c1   : > { %v2884_v61 = vpop.f32.mrf.mxu1 }
 0x4c2   : > { %12958 = vst [vmem:[#allocation155_spill] sm:$0xff] %v11110_v47  ;;  %v11112_v33 = vmul.f32 0.088388346, %v2884_v61  ;;  %3050 = vmax.xlane.f32.xlu0 %v3049_v3 }
 0x4c3   : > { %v2888_v12 = vpop.f32.mrf.mxu1 }
 0x4c4   : > { %12959 = vst [vmem:[#allocation31_spill] sm:$0xff] %v11112_v33  ;;  %v3052_v27 = vmax.f32 %v11110_v47, %v11112_v33  ;;  %v11116_v2 = vmul.f32 0.088388346, %v2888_v12 }
 0x4c5   : > { %v2890_v29 = vpop.f32.mrf.mxu1 }
 0x4c6   : > { %12960 = vst [vmem:[#allocation34_spill] sm:$0xff] %v11116_v2  ;;  %v11118_v9 = vmul.f32 0.088388346, %v2890_v29  ;;  %3053 = vmax.xlane.f32.xlu1 %v3052_v27 }
 0x4c7   : > { %v2892_v38 = vpop.f32.mrf.mxu1 }
 0x4c8   : > { %12961 = vst [vmem:[#allocation136_spill] sm:$0xff] %v11118_v9  ;;  %v3055_v20 = vmax.f32 %v11116_v2, %v11118_v9  ;;  %v11122_v22 = vmul.f32 0.088388346, %v2892_v38 }
 0x4c9   : > { %v2894_v24 = vpop.f32.mrf.mxu1 }
 0x4ca   : > { %12962 = vst [vmem:[#allocation141_spill] sm:$0xff] %v11122_v22  ;;  %v11124_v61 = vmul.f32 0.088388346, %v2894_v24  ;;  %3056 = vmax.xlane.f32.xlu0 %v3055_v20 }
 0x4cb   : > { %v2898_v3 = vpop.f32.mrf.mxu1 }
 0x4cc   : > { %12963 = vst [vmem:[#allocation33_spill] sm:$0xff] %v11124_v61  ;;  %v3058_v33 = vmax.f32 %v11122_v22, %v11124_v61  ;;  %v11128_v12 = vmul.f32 0.088388346, %v2898_v3 }
 0x4cd   : > { %v2900_v47 = vpop.f32.mrf.mxu1 }
 0x4ce   : > { %12964 = vst [vmem:[#allocation142_spill] sm:$0xff] %v11128_v12  ;;  %v11130_v29 = vmul.f32 0.088388346, %v2900_v47  ;;  %3059 = vmax.xlane.f32.xlu1 %v3058_v33 }
 0x4cf   : > { %v2902_v27 = vpop.f32.mrf.mxu1 }
 0x4d0   : > { %12965 = vst [vmem:[#allocation144_spill] sm:$0xff] %v11130_v29  ;;  %v3061_v9 = vmax.f32 %v11128_v12, %v11130_v29  ;;  %v11134_v38 = vmul.f32 0.088388346, %v2902_v27 }
 0x4d1   : > { %v2904_v2 = vpop.f32.mrf.mxu1 }
 0x4d2   : > { %12966 = vst [vmem:[#allocation36_spill] sm:$0xff] %v11134_v38  ;;  %v11136_v24 = vmul.f32 0.088388346, %v2904_v2  ;;  %3062 = vmax.xlane.f32.xlu0 %v3061_v9 }
 0x4d3   : > { %v4174_v20 = vpop.f32.mrf.mxu1 }
 0x4d4   : > { %12967 = vst [vmem:[#allocation35_spill] sm:$0xff] %v11136_v24  ;;  %v3064_v61 = vmax.f32 %v11134_v38, %v11136_v24  ;;  %v11140_v3 = vmul.f32 0.088388346, %v4174_v20 }
 0x4d5   : > { %v4176_v22 = vpop.f32.mrf.mxu1 }
 0x4d6   : > { %12968 = vst [vmem:[#allocation145_spill] sm:$0xff] %v11140_v3  ;;  %v11142_v47 = vmul.f32 0.088388346, %v4176_v22  ;;  %3065 = vmax.xlane.f32.xlu1 %v3064_v61 }
 0x4d7   : > { %v4178_v33 = vpop.f32.mrf.mxu1 }
 0x4d8   : > { %12969 = vst [vmem:[#allocation40_spill] sm:$0xff] %v11142_v47  ;;  %v4397_v29 = vmax.f32 %v11140_v3, %v11142_v47  ;;  %v11146_v27 = vmul.f32 0.088388346, %v4178_v33 }
 0x4d9   : > { %v4180_v12 = vpop.f32.mrf.mxu1 }
 0x4da   : > { %12970 = vst [vmem:[#allocation147_spill] sm:$0xff] %v11146_v27  ;;  %v11148_v2 = vmul.f32 0.088388346, %v4180_v12  ;;  %4398 = vmax.xlane.f32.xlu0 %v4397_v29 }
 0x4db   : > { %v4184_v9 = vpop.f32.mrf.mxu1 }
 0x4dc   : > { %12971 = vst [vmem:[#allocation156_spill] sm:$0xff] %v11148_v2  ;;  %v4400_v24 = vmax.f32 %v11146_v27, %v11148_v2  ;;  %v11152_v20 = vmul.f32 0.088388346, %v4184_v9 }
 0x4dd   : > { %v4186_v38 = vpop.f32.mrf.mxu1 }
 0x4de   : > { %12972 = vst [vmem:[#allocation38_spill] sm:$0xff] %v11152_v20  ;;  %v11154_v22 = vmul.f32 0.088388346, %v4186_v38  ;;  %4401 = vmax.xlane.f32.xlu1 %v4400_v24 }
 0x4df   : > { %v4188_v61 = vpop.f32.mrf.mxu1 }
 0x4e0   : > { %12973 = vst [vmem:[#allocation45_spill] sm:$0xff] %v11154_v22  ;;  %v4403_v47 = vmax.f32 %v11152_v20, %v11154_v22  ;;  %v11158_v33 = vmul.f32 0.088388346, %v4188_v61 }
 0x4e1   : > { %v4190_v3 = vpop.f32.mrf.mxu1 }
 0x4e2   : > { %12974 = vst [vmem:[#allocation148_spill] sm:$0xff] %v11158_v33  ;;  %v11160_v12 = vmul.f32 0.088388346, %v4190_v3  ;;  %4404 = vmax.xlane.f32.xlu0 %v4403_v47 }
 0x4e3   : > { %v2973_v29 = vpop.xlane.xlu0 %2972  ;;  %v4194_v49 = vpop.f32.mrf.mxu1 }
 0x4e4   : > { %12975 = vst [vmem:[#allocation79_spill] sm:$0xff] %v11160_v12  ;;  %v4406_v2 = vmax.f32 %v11158_v33, %v11160_v12  ;;  %v3067_v9 = vsub.f32 %v10935_v57, %v2973_v29  ;;  %v3068_v38 = vsub.f32 %v10937_v50, %v2973_v29  ;;  %v11166_v24 = vmul.f32 0.088388346, %v4194_v49 }
 0x4e5   : > { %v4196_v27 = vpop.f32.mrf.mxu1 }
 0x4e6   : > { %12976 = vst [vmem:[#allocation72_spill] sm:$0xff] %v11166_v24  ;;  %v3131_v36 = vmul.f32 1.442695, %v3067_v9  ;;  %v3133_v22 = vmul.f32 1.442695, %v3068_v38  ;;  %4407 = vmax.xlane.f32.xlu1 %v4406_v2 }
 0x4e7   : > { %v11168_v20 = vmul.f32 0.088388346, %v4196_v27  ;;  %v2976_v3 = vpop.xlane.xlu1 %2975  ;;  %v4198_v61 = vpop.f32.mrf.mxu1 }
 0x4e8   : > { %6904 = vpow2.f32 %v3131_v36  ;;  %v3069_v12 = vsub.f32 %v10941_v18, %v2976_v3  ;;  %v3070_v57 = vsub.f32 %v10943_v17, %v2976_v3  ;;  %v11174_v50 = vmul.f32 0.088388346, %v4198_v61 }
 0x4e9   : > { %12977 = vst [vmem:[#allocation157_spill] sm:$0xff] %v11168_v20  ;;  %v4409_v47 = vmax.f32 %v11166_v24, %v11168_v20  ;;  %6906 = vpow2.f32 %v3133_v22  ;;  %v4200_v49 = vpop.f32.mrf.mxu1  ;;  %v12995_v24 = vld [vmem:[#allocation17_spill] sm:$0xff] }
 0x4ea   : > { %12978 = vst [vmem:[#allocation158_spill] sm:$0xff] %v11174_v50  ;;  %v3135_v29 = vmul.f32 1.442695, %v3069_v12  ;;  %v3137_v9 = vmul.f32 1.442695, %v3070_v57 }
 0x4eb   : > { %v11176_v38 = vmul.f32 0.088388346, %v4200_v49  ;;  %4410 = vmax.xlane.f32.xlu0 %v4409_v47  ;;  %v2979_v27 = vpop.xlane.xlu0 %2978  ;;  %v4204_v2 = vpop.f32.mrf.mxu1 }
 0x4ec   : > { %6908 = vpow2.f32 %v3135_v29  ;;  %v3071_v20 = vsub.f32 %v10949_v7, %v2979_v27  ;;  %v3072_v18 = vsub.f32 %v10951_v62, %v2979_v27  ;;  %v11182_v17 = vmul.f32 0.088388346, %v4204_v2 }
 0x4ed   : > { %12979 = vst [vmem:[#allocation4_spill] sm:$0xff] %v11176_v38  ;;  %v4412_v36 = vmax.f32 %v11174_v50, %v11176_v38  ;;  %6910 = vpow2.f32 %v3137_v9  ;;  %v4206_v22 = vpop.f32.mrf.mxu1 }
 0x4ee   : > { %12980 = vst [vmem:[#allocation42_spill] sm:$0xff] %v11182_v17  ;;  %v3139_v3 = vmul.f32 1.442695, %v3071_v20  ;;  %v3141_v12 = vmul.f32 1.442695, %v3072_v18 }
 0x4ef   : > { %v11184_v61 = vmul.f32 0.088388346, %v4206_v22  ;;  %4413 = vmax.xlane.f32.xlu1 %v4412_v36  ;;  %v2982_v47 = vpop.xlane.xlu0 %2981  ;;  %v4208_v57 = vpop.f32.mrf.mxu1 }
 0x4f0   : > { %6912 = vpow2.f32 %v3139_v3  ;;  %v3073_v29 = vsub.f32 %v10955_v13, %v2982_v47  ;;  %v3074_v7 = vsub.f32 %v10957_v21, %v2982_v47  ;;  %v11190_v62 = vmul.f32 0.088388346, %v4208_v57  ;;  %v12985_v47 = vld [vmem:[#allocation88_spill] sm:$0xff] }
 0x4f1   : > { %12981 = vst [vmem:[#allocation29_spill] sm:$0xff] %v11184_v61  ;;  %v4415_v49 = vmax.f32 %v11182_v17, %v11184_v61  ;;  %6914 = vpow2.f32 %v3141_v12  ;;  %v4210_v9 = vpop.f32.mrf.mxu1  ;;  %v12984_v12 = vld [vmem:[#allocation90_spill] sm:$0xff] }
 0x4f2   : > { %12982 = vst [vmem:[#allocation51_spill] sm:$0xff] %v11190_v62  ;;  %v3143_v27 = vmul.f32 1.442695, %v3073_v29  ;;  %v3145_v20 = vmul.f32 1.442695, %v3074_v7  ;;  %v11200_v57 = vadd.f32 %v12985_v47, %v12984_v12  ;;  %v12986_v29 = vld [vmem:[#allocation91_spill] sm:$0xff] }
 0x4f3   : > { %v11192_v2 = vmul.f32 0.088388346, %v4210_v9  ;;  %4416 = vmax.xlane.f32.xlu0 %v4415_v49  ;;  %v2985_v36 = vpop.xlane.xlu0 %2984  ;;  %v4214_v18 = vpop.f32.mrf.mxu1  ;;  %v11204_v7 = vadd.f32 %v12986_v29, %v12984_v12  ;;  %v12990_v47 = vld [vmem:[#allocation99_spill] sm:$0xff]  ;;  %v12991_v29 = vld [vmem:[#allocation108_spill] sm:$0xff] }
 0x4f4   : > { %6916 = vpow2.f32 %v3143_v27  ;;  %v3075_v3 = vsub.f32 %v10963_v30, %v2985_v36  ;;  %v3076_v13 = vsub.f32 %v10965_v1, %v2985_v36  ;;  %v11206_v49 = vmul.f32 0.088388346, %v4214_v18  ;;  %v12992_v18 = vld [vmem:[#allocation111_spill] sm:$0xff] }
 0x4f5   : > { %12983 = vst [vmem:[#allocation44_spill] sm:$0xff] %v11192_v2  ;;  %v4418_v22 = vmax.f32 %v11190_v62, %v11192_v2  ;;  %v6905_v21 = vpop.eup %6904  ;;  %6918 = vpow2.f32 %v3145_v20  ;;  %v4216_v9 = vpop.f32.mrf.mxu1  ;;  %v12988_v2 = vld [vmem:[#allocation96_spill] sm:$0xff]  ;;  %v11216_v61 = vadd.f32 %v12990_v47, %v12984_v12  ;;  %v11220_v20 = vadd.f32 %v12991_v29, %v12984_v12  ;;  %v12994_v47 = vld [vmem:[#allocation117_spill] sm:$0xff] }
 0x4f6   : > { %12987 = vst [vmem:[#allocation48_spill] sm:$0xff] %v11206_v49  ;;  %v6907_v27 = vpop.eup %6906  ;;  %v11210_v62 = vadd.f32 %v12988_v2, %v12984_v12  ;;  %v3147_v30 = vmul.f32 1.442695, %v3075_v3  ;;  %v3149_v1 = vmul.f32 1.442695, %v3076_v13  ;;  %v11224_v17 = vadd.f32 %v12992_v18, %v12984_v12 }
 0x4f7   : > { %v11212_v36 = vmul.f32 0.088388346, %v4216_v9  ;;  %4419 = vmax.xlane.f32.xlu1 %v4418_v22  ;;  %v2988_v38 = vpop.xlane.xlu1 %2987  ;;  %v4218_v2 = vpop.f32.mrf.mxu1  ;;  %v11226_v50 = vadd.f32 %v6907_v27, %v6905_v21  ;;  %v2200_v29 = vadd.f32 %v12994_v47, %v12984_v12  ;;  %v2270_v18 = vadd.f32 %v12995_v24, %v12984_v12 }
 0x4f8   : > { %6920 = vpow2.f32 %v3147_v30  ;;  %v3077_v3 = vsub.f32 %v10969_v58, %v2988_v38  ;;  %v3078_v13 = vsub.f32 %v10971_v43, %v2988_v38  ;;  %v11236_v33 = vmul.f32 0.088388346, %v4218_v2  ;;  %v12997_v43 = vld [vmem:[#allocation114_spill] sm:$0xff] }
 0x4f9   : > { %12989 = vst [vmem:[#allocation47_spill] sm:$0xff] %v11212_v36  ;;  %12993 = vst [vmem:[#allocation57_spill] sm:$0xff] %v11226_v50  ;;  %v4421_v22 = vmax.f32 %v11206_v49, %v11212_v36  ;;  %v6909_v9 = vpop.eup %6908  ;;  %6922 = vpow2.f32 %v3149_v1  ;;  %v4220_v46 = vpop.f32.mrf.mxu1  ;;  %v2196_v38 = vadd.f32 %v12997_v43, %v12984_v12  ;;  %v12998_v36 = vld [vmem:[#allocation74_spill] sm:$0xff] }
 0x4fa   : > { %v6911_v50 = vpop.eup %6910  ;;  %v3151_v30 = vmul.f32 1.442695, %v3077_v3  ;;  %v3153_v11 = vmul.f32 1.442695, %v3078_v13  ;;  %v11238_v44 = vmul.f32 0.088388346, %v4220_v46  ;;  %v3355_v58 = vpack.c.bf16 %v6909_v9, %v6905_v21 }
 0x4fb   : > { %4422 = vmax.xlane.f32.xlu0 %v4421_v22  ;;  %v2266_v47 = vadd.f32 %v12998_v36, %v12984_v12  ;;  %v2991_v49 = vpop.xlane.xlu0 %2990  ;;  %v4224_v55 = vpop.f32.mrf.mxu1  ;;  %v3356_v24 = vpack.c.bf16 %v6911_v50, %v6907_v27  ;;  %v11244_v1 = vadd.f32 %v6911_v50, %v6909_v9  ;;  %v3779_v3 = vpack.c.bf16 %v2200_v29, %v2196_v38  ;;  %v13000_v13 = vld [vmem:[#allocation151_spill] sm:$0xff] }
 0x4fc   : > { %12996 = vst [vmem:[#allocation54_spill] sm:$0xff] %v11238_v44  ;;  %6924 = vpow2.f32 %v3151_v30  ;;  %v4424_v2 = vmax.f32 %v11236_v33, %v11238_v44  ;;  %v3079_v46 = vsub.f32 %v10977_v6, %v2991_v49  ;;  %v3080_v22 = vsub.f32 %v10979_v52, %v2991_v49  ;;  %v13001_v6 = vld [vmem:[#allocation105_spill] sm:$0xff] }
 0x4fd   : > { %12999 = vst [vmem:[#allocation63_spill] sm:$0xff] %v11244_v1  ;;  %v6913_v21 = vpop.eup %6912  ;;  %v2260_v43 = vadd.f32 %v13000_v13, %v12984_v12  ;;  %6926 = vpow2.f32 %v3153_v11  ;;  %v11252_v36 = vmul.f32 0.088388346, %v4224_v55  ;;  %3419 = vmatprep.mubr.bf16.mxu0 %v3356_v24  ;;  %v4226_v27 = vpop.f32.mrf.mxu1  ;;  %v3786_v9 = vpack.c.bf16 %v2270_v18, %v2266_v47  ;;  %v13002_v11 = vld [vmem:[#allocation150_spill] sm:$0xff] }
 0x4fe   : > { %v6915_v50 = vpop.eup %6914  ;;  %v3155_v30 = vmul.f32 1.442695, %v3079_v46  ;;  %v3157_v1 = vmul.f32 1.442695, %v3080_v22  ;;  %3420 = vmatmul.mubr.bf16.vlgmr.msra.gmra.mxu0 %v3355_v58  ;;  %v11254_v44 = vmul.f32 0.088388346, %v4226_v27  ;;  %4425 = vmax.xlane.f32.xlu1 %v4424_v2  ;;  %v2180_v52 = vadd.f32 %v13001_v6, %v12984_v12 }
 0x4ff   : > { %v3778_v49 = vpack.c.bf16 %v11224_v17, %v11220_v20  ;;  %v2256_v55 = vadd.f32 %v13002_v11, %v12984_v12  ;;  %6480 = vmatpush3.bf16.msra.mxu0 %v3779_v3  ;;  %v2994_v29 = vpop.xlane.xlu1 %2993  ;;  %v4228_v38 = vpop.f32.mrf.mxu1  ;;  %v11262_v24 = vadd.f32 %v6915_v50, %v6913_v21  ;;  %v13003_v17 = vld [vmem:[#allocation149_spill] sm:$0xff] }
 0x500   : > { %6928 = vpow2.f32 %v3155_v30  ;;  %v4427_v18 = vmax.f32 %v11252_v36, %v11254_v44  ;;  %6481 = vmatprep.subr.bf16.mxu0 %v3786_v9  ;;  %v3081_v58 = vsub.f32 %v10983_v31, %v2994_v29  ;;  %v3082_v47 = vsub.f32 %v10985_v60, %v2994_v29  ;;  %v13004_v31 = vld [vmem:[#allocation102_spill] sm:$0xff] }
 0x501   : > { %v6917_v2 = vpop.eup %6916  ;;  %v2250_v20 = vadd.f32 %v13003_v17, %v12984_v12  ;;  %v3785_v46 = vpack.c.bf16 %v2260_v43, %v2256_v55  ;;  %6930 = vpow2.f32 %v3157_v1  ;;  %v11270_v22 = vmul.f32 0.088388346, %v4228_v38  ;;  %v4230_v3 = vpop.f32.mrf.mxu1  ;;  %v13005_v60 = vld [vmem:[#allocation146_spill] sm:$0xff] }
 0x502   : > { %v6919_v13 = vpop.eup %6918  ;;  %v3159_v27 = vmul.f32 1.442695, %v3081_v58  ;;  %v3161_v30 = vmul.f32 1.442695, %v3082_v47  ;;  %v11272_v6 = vmul.f32 0.088388346, %v4230_v3  ;;  %4428 = vmax.xlane.f32.xlu0 %v4427_v18  ;;  %v3357_v9 = vpack.c.bf16 %v6917_v2, %v6913_v21 }
 0x503   : > { %v2176_v11 = vadd.f32 %v13004_v31, %v12984_v12  ;;  %v2246_v29 = vadd.f32 %v13005_v60, %v12984_v12  ;;  %6482 = vmatpush3.bf16.msra.mxu0 %v3778_v49  ;;  %v2997_v17 = vpop.xlane.xlu0 %2996  ;;  %v4234_v43 = vpop.f32.mrf.mxu1  ;;  %v3358_v1 = vpack.c.bf16 %v6919_v13, %v6915_v50  ;;  %v11278_v55 = vadd.f32 %v6919_v13, %v6917_v2  ;;  %v13006_v3 = vld [vmem:[#allocation143_spill] sm:$0xff] }
 0x504   : > { %6932 = vpow2.f32 %v3159_v27  ;;  %v4430_v38 = vmax.f32 %v11270_v22, %v11272_v6  ;;  %6483 = vmatprep.subr.bf16.mxu0 %v3785_v46  ;;  %v3083_v18 = vsub.f32 %v10991_v26, %v2997_v17  ;;  %v3084_v21 = vsub.f32 %v10993_v8, %v2997_v17  ;;  %v13007_v26 = vld [vmem:[#allocation94_spill] sm:$0xff] }
 0x505   : > { %v6921_v58 = vpop.eup %6920  ;;  %v3777_v47 = vpack.c.bf16 %v2180_v52, %v2176_v11  ;;  %v2240_v31 = vadd.f32 %v13006_v3, %v12984_v12  ;;  %6934 = vpow2.f32 %v3161_v30  ;;  %v11286_v49 = vmul.f32 0.088388346, %v4234_v43  ;;  %3427 = vmatprep.mubr.bf16.mxu0 %v3358_v1  ;;  %v4236_v50 = vpop.f32.mrf.mxu1  ;;  %v13008_v30 = vld [vmem:[#allocation140_spill] sm:$0xff] }
 0x506   : > { %v6923_v2 = vpop.eup %6922  ;;  %v3784_v13 = vpack.c.bf16 %v2250_v20, %v2246_v29  ;;  %v3163_v27 = vmul.f32 1.442695, %v3083_v18  ;;  %v3165_v60 = vmul.f32 1.442695, %v3084_v21  ;;  %3428 = vmatmul.mubr.bf16.gmra.mxu0 %v3357_v9  ;;  %v11288_v46 = vmul.f32 0.088388346, %v4236_v50  ;;  %4431 = vmax.xlane.f32.xlu1 %v4430_v38 }
 0x507   : > { %v2160_v8 = vadd.f32 %v13007_v26, %v12984_v12  ;;  %v3776_v52 = vpack.c.bf16 %v11216_v61, %v11210_v62  ;;  %v2236_v11 = vadd.f32 %v13008_v30, %v12984_v12  ;;  %6484 = vmatpush3.bf16.msra.mxu0 %v3777_v47  ;;  %v3000_v17 = vpop.xlane.xlu1 %2999  ;;  %v4238_v43 = vpop.f32.mrf.mxu1  ;;  %v11296_v1 = vadd.f32 %v6923_v2, %v6921_v58  ;;  %v13009_v61 = vld [vmem:[#allocation137_spill] sm:$0xff] }
 0x508   : > { %6936 = vpow2.f32 %v3163_v27  ;;  %v4433_v20 = vmax.f32 %v11286_v49, %v11288_v46  ;;  %6485 = vmatprep.subr.bf16.mxu0 %v3784_v13  ;;  %v3085_v9 = vsub.f32 %v10997_v53, %v3000_v17  ;;  %v3086_v29 = vsub.f32 %v10999_v37, %v3000_v17  ;;  %v13010_v53 = vld [vmem:[#allocation92_spill] sm:$0xff]  ;;  %v13011_v37 = vld [vmem:[#allocation134_spill] sm:$0xff] }
 0x509   : > { %v6925_v38 = vpop.eup %6924  ;;  %v2230_v62 = vadd.f32 %v13009_v61, %v12984_v12  ;;  %v3783_v18 = vpack.c.bf16 %v2240_v31, %v2236_v11  ;;  %6938 = vpow2.f32 %v3165_v60  ;;  %v11304_v21 = vmul.f32 0.088388346, %v4238_v43  ;;  %v4240_v47 = vpop.f32.mrf.mxu1 }
 0x50a   : > { %v6927_v3 = vpop.eup %6926  ;;  %v3167_v50 = vmul.f32 1.442695, %v3085_v9  ;;  %v3169_v27 = vmul.f32 1.442695, %v3086_v29  ;;  %v11306_v26 = vmul.f32 0.088388346, %v4240_v47  ;;  %4434 = vmax.xlane.f32.xlu0 %v4433_v20  ;;  %v3359_v13 = vpack.c.bf16 %v6925_v38, %v6921_v58 }
 0x50b   : > { %v2156_v30 = vadd.f32 %v13010_v53, %v12984_v12  ;;  %v2226_v17 = vadd.f32 %v13011_v37, %v12984_v12  ;;  %6486 = vmatpush3.bf16.msra.mxu0 %v3776_v52  ;;  %v3003_v61 = vpop.xlane.xlu0 %3002  ;;  %v4244_v31 = vpop.f32.mrf.mxu1  ;;  %v3360_v60 = vpack.c.bf16 %v6927_v3, %v6923_v2  ;;  %v11312_v11 = vadd.f32 %v6927_v3, %v6925_v38  ;;  %v13012_v47 = vld [vmem:[#allocation131_spill] sm:$0xff] }
 0x50c   : > { %6940 = vpow2.f32 %v3167_v50  ;;  %v4436_v43 = vmax.f32 %v11304_v21, %v11306_v26  ;;  %6487 = vmatprep.subr.bf16.mxu0 %v3783_v18  ;;  %v3087_v20 = vsub.f32 %v11005_v54, %v3003_v61  ;;  %v3088_v58 = vsub.f32 %v11007_v4, %v3003_v61  ;;  %v13013_v54 = vld [vmem:[#allocation87_spill] sm:$0xff] }
 0x50d   : > { %v6929_v9 = vpop.eup %6928  ;;  %v3775_v29 = vpack.c.bf16 %v2160_v8, %v2156_v30  ;;  %v2220_v53 = vadd.f32 %v13012_v47, %v12984_v12  ;;  %6942 = vpow2.f32 %v3169_v27  ;;  %v11320_v52 = vmul.f32 0.088388346, %v4244_v31  ;;  %3435 = vmatprep.mubr.bf16.mxu0 %v3360_v60  ;;  %v4246_v2 = vpop.f32.mrf.mxu1  ;;  %v13014_v27 = vld [vmem:[#allocation128_spill] sm:$0xff] }
 0x50e   : > { %v6931_v38 = vpop.eup %6930  ;;  %v3782_v3 = vpack.c.bf16 %v2230_v62, %v2226_v17  ;;  %v3171_v50 = vmul.f32 1.442695, %v3087_v20  ;;  %v3173_v37 = vmul.f32 1.442695, %v3088_v58  ;;  %3436 = vmatmul.mubr.bf16.gmra.mxu0 %v3359_v13  ;;  %v11322_v18 = vmul.f32 0.088388346, %v4246_v2  ;;  %4437 = vmax.xlane.f32.xlu1 %v4436_v43 }
 0x50f   : > { %v2140_v4 = vadd.f32 %v13013_v54, %v12984_v12  ;;  %v3774_v8 = vpack.c.bf16 %v11204_v7, %v11200_v57  ;;  %v2216_v30 = vadd.f32 %v13014_v27, %v12984_v12  ;;  %6488 = vmatpush3.bf16.msra.mxu0 %v3775_v29  ;;  %v3006_v61 = vpop.xlane.xlu1 %3005  ;;  %v4248_v31 = vpop.f32.mrf.mxu1  ;;  %v11330_v60 = vadd.f32 %v6931_v38, %v6929_v9  ;;  %v13015_v57 = vld [vmem:[#allocation125_spill] sm:$0xff] }
 0x510   : > { %6944 = vpow2.f32 %v3171_v50  ;;  %v4439_v62 = vmax.f32 %v11320_v52, %v11322_v18  ;;  %6489 = vmatprep.subr.bf16.mxu0 %v3782_v3  ;;  %v3089_v13 = vsub.f32 %v11011_v15, %v3006_v61  ;;  %v3090_v17 = vsub.f32 %v11013_v14, %v3006_v61  ;;  %v13016_v15 = vld [vmem:[#allocation84_spill] sm:$0xff] }
 0x511   : > { %v6933_v43 = vpop.eup %6932  ;;  %v2210_v7 = vadd.f32 %v13015_v57, %v12984_v12  ;;  %v3781_v20 = vpack.c.bf16 %v2220_v53, %v2216_v30  ;;  %6946 = vpow2.f32 %v3173_v37  ;;  %v11338_v58 = vmul.f32 0.088388346, %v4248_v31  ;;  %v4250_v29 = vpop.f32.mrf.mxu1  ;;  %v13017_v14 = vld [vmem:[#allocation120_spill] sm:$0xff] }
 0x512   : > { %v6935_v47 = vpop.eup %6934  ;;  %v3175_v2 = vmul.f32 1.442695, %v3089_v13  ;;  %v3177_v50 = vmul.f32 1.442695, %v3090_v17  ;;  %v11340_v54 = vmul.f32 0.088388346, %v4250_v29  ;;  %4440 = vmax.xlane.f32.xlu0 %v4439_v62  ;;  %v3361_v3 = vpack.c.bf16 %v6933_v43, %v6929_v9 }
 0x513   : > { %v2136_v27 = vadd.f32 %v13016_v15, %v12984_v12  ;;  %v2206_v61 = vadd.f32 %v13017_v14, %v12984_v12  ;;  %6490 = vmatpush3.bf16.msra.mxu0 %v3774_v8  ;;  %v3009_v57 = vpop.xlane.xlu0 %3008  ;;  %v4254_v53 = vpop.f32.mrf.mxu1  ;;  %v3362_v37 = vpack.c.bf16 %v6935_v47, %v6931_v38  ;;  %v11346_v30 = vadd.f32 %v6935_v47, %v6933_v43  ;;  %v13018_v17 = vld [vmem:[#allocation83_spill] sm:$0xff] }
 0x514   : > { %6948 = vpow2.f32 %v3175_v2  ;;  %v4442_v31 = vmax.f32 %v11338_v58, %v11340_v54  ;;  %6491 = vmatprep.subr.bf16.mxu0 %v3781_v20  ;;  %v3091_v62 = vsub.f32 %v11019_v32, %v3009_v57  ;;  %v3092_v9 = vsub.f32 %v11021_v28, %v3009_v57  ;;  %v13019_v32 = vld [vmem:[#allocation80_spill] sm:$0xff] }
 0x515   : > { %v6937_v13 = vpop.eup %6936  ;;  %v2130_v29 = vadd.f32 %v13018_v17, %v12984_v12  ;;  %v3773_v15 = vpack.c.bf16 %v2140_v4, %v2136_v27  ;;  %6950 = vpow2.f32 %v3177_v50  ;;  %v11354_v8 = vmul.f32 0.088388346, %v4254_v53  ;;  %3443 = vmatprep.mubr.bf16.mxu0 %v3362_v37  ;;  %v4256_v38 = vpop.f32.mrf.mxu1 }
 0x516   : > { %v6939_v43 = vpop.eup %6938  ;;  %v3780_v47 = vpack.c.bf16 %v2210_v7, %v2206_v61  ;;  %v3179_v2 = vmul.f32 1.442695, %v3091_v62  ;;  %v3181_v14 = vmul.f32 1.442695, %v3092_v9  ;;  %3444 = vmatmul.mubr.bf16.gmra.mxu0 %v3361_v3  ;;  %v11356_v20 = vmul.f32 0.088388346, %v4256_v38  ;;  %4443 = vmax.xlane.f32.xlu1 %v4442_v31 }
 0x517   : > { %v2126_v28 = vadd.f32 %v13019_v32, %v12984_v12  ;;  %6492 = vmatpush3.bf16.msra.mxu0 %v3773_v15  ;;  %v3012_v57 = vpop.xlane.xlu1 %3011  ;;  %v4258_v17 = vpop.f32.mrf.mxu1  ;;  %v11360_v4 = vadd.f32 %v6939_v43, %v6937_v13 }
 0x518   : > { %6952 = vpow2.f32 %v3179_v2  ;;  %v4445_v50 = vmax.f32 %v11354_v8, %v11356_v20  ;;  %6493 = vmatprep.subr.bf16.mxu0 %v3780_v47  ;;  %v3093_v7 = vsub.f32 %v11025_v35, %v3012_v57  ;;  %v3094_v3 = vsub.f32 %v11027_v25, %v3012_v57 }
 0x519   : > { %v6941_v27 = vpop.eup %6940  ;;  %v3772_v61 = vpack.c.bf16 %v2130_v29, %v2126_v28  ;;  %6954 = vpow2.f32 %v3181_v14  ;;  %v11366_v53 = vmul.f32 0.088388346, %v4258_v17  ;;  %v4260_v12 = vpop.f32.mrf.mxu1 }
 0x51a   : > { %v6943_v37 = vpop.eup %6942  ;;  %v3183_v31 = vmul.f32 1.442695, %v3093_v7  ;;  %v3185_v62 = vmul.f32 1.442695, %v3094_v3  ;;  %v11368_v9 = vmul.f32 0.088388346, %v4260_v12  ;;  %4446 = vmax.xlane.f32.xlu0 %v4445_v50  ;;  %v3363_v15 = vpack.c.bf16 %v6941_v27, %v6937_v13 }
 0x51b   : > { %6494 = vmatpush3.bf16.msra.mxu0 %v3772_v61  ;;  %v3015_v38 = vpop.xlane.xlu0 %3014  ;;  %v4264_v47 = vpop.f32.mrf.mxu1  ;;  %v3364_v2 = vpack.c.bf16 %v6943_v37, %v6939_v43  ;;  %v11370_v35 = vadd.f32 %v6943_v37, %v6941_v27 }
 0x51c   : > { %6956 = vpow2.f32 %v3183_v31  ;;  %v4448_v25 = vmax.f32 %v11366_v53, %v11368_v9  ;;  %v3095_v29 = vsub.f32 %v11032_v39, %v3015_v38  ;;  %v3096_v14 = vsub.f32 %v11034_v63, %v3015_v38 }
 0x51d   : > { %v6945_v32 = vpop.eup %6944  ;;  %6958 = vpow2.f32 %v3185_v62  ;;  %v11376_v28 = vmul.f32 0.088388346, %v4264_v47  ;;  %3451 = vmatprep.mubr.bf16.mxu0 %v3364_v2  ;;  %v4266_v13 = vpop.f32.mrf.mxu1 }
 0x51e   : > { %v6947_v57 = vpop.eup %6946  ;;  %v3187_v17 = vmul.f32 1.442695, %v3095_v29  ;;  %v3189_v50 = vmul.f32 1.442695, %v3096_v14  ;;  %3452 = vmatmul.mubr.bf16.gmra.mxu0 %v3363_v15  ;;  %v11378_v43 = vmul.f32 0.088388346, %v4266_v13  ;;  %4449 = vmax.xlane.f32.xlu1 %v4448_v25 }
 0x51f   : > { %v3018_v7 = vpop.xlane.xlu1 %3017  ;;  %v4268_v3 = vpop.f32.mrf.mxu1  ;;  %v11380_v27 = vadd.f32 %v6947_v57, %v6945_v32 }
 0x520   : > { %6960 = vpow2.f32 %v3187_v17  ;;  %v4451_v39 = vmax.f32 %v11376_v28, %v11378_v43  ;;  %v3097_v63 = vsub.f32 %v11038_v41, %v3018_v7  ;;  %v3098_v61 = vsub.f32 %v11040_v40, %v3018_v7 }
 0x521   : > { %v6949_v12 = vpop.eup %6948  ;;  %6962 = vpow2.f32 %v3189_v50  ;;  %v11386_v37 = vmul.f32 0.088388346, %v4268_v3  ;;  %v4270_v31 = vpop.f32.mrf.mxu1 }
 0x522   : > { %v6951_v62 = vpop.eup %6950  ;;  %v3191_v15 = vmul.f32 1.442695, %v3097_v63  ;;  %v3193_v38 = vmul.f32 1.442695, %v3098_v61  ;;  %v11388_v47 = vmul.f32 0.088388346, %v4270_v31  ;;  %4452 = vmax.xlane.f32.xlu0 %v4451_v39  ;;  %v3365_v2 = vpack.c.bf16 %v6949_v12, %v6945_v32 }
 0x523   : > { %v3021_v25 = vpop.xlane.xlu0 %3020  ;;  %v4274_v29 = vpop.f32.mrf.mxu1  ;;  %v3366_v14 = vpack.c.bf16 %v6951_v62, %v6947_v57  ;;  %v11390_v13 = vadd.f32 %v6951_v62, %v6949_v12 }
 0x524   : > { %6964 = vpow2.f32 %v3191_v15  ;;  %v4454_v41 = vmax.f32 %v11386_v37, %v11388_v47  ;;  %v3099_v40 = vsub.f32 %v11044_v23, %v3021_v25  ;;  %v3100_v17 = vsub.f32 %v11046_v42, %v3021_v25 }
 0x525   : > { %v6953_v50 = vpop.eup %6952  ;;  %6966 = vpow2.f32 %v3193_v38  ;;  %v11396_v7 = vmul.f32 0.088388346, %v4274_v29  ;;  %3459 = vmatprep.mubr.bf16.mxu0 %v3366_v14  ;;  %v4276_v3 = vpop.f32.mrf.mxu1 }
 0x526   : > { %v6955_v32 = vpop.eup %6954  ;;  %v3195_v39 = vmul.f32 1.442695, %v3099_v40  ;;  %v3197_v63 = vmul.f32 1.442695, %v3100_v17  ;;  %3460 = vmatmul.mubr.bf16.gmra.mxu0 %v3365_v2  ;;  %v11398_v57 = vmul.f32 0.088388346, %v4276_v3  ;;  %4455 = vmax.xlane.f32.xlu1 %v4454_v41 }
 0x527   : > { %v3024_v61 = vpop.xlane.xlu1 %3023  ;;  %v4278_v12 = vpop.f32.mrf.mxu1  ;;  %v11400_v31 = vadd.f32 %v6955_v32, %v6953_v50 }
 0x528   : > { %13020 = vst [vmem:[#allocation64_spill] sm:$0xff] %v11398_v57  ;;  %6968 = vpow2.f32 %v3195_v39  ;;  %v4457_v23 = vmax.f32 %v11396_v7, %v11398_v57  ;;  %v3101_v42 = vsub.f32 %v11050_v10, %v3024_v61  ;;  %v3102_v62 = vsub.f32 %v11052_v56, %v3024_v61 }
 0x529   : > { %v6957_v15 = vpop.eup %6956  ;;  %6970 = vpow2.f32 %v3197_v63  ;;  %v11406_v38 = vmul.f32 0.088388346, %v4278_v12  ;;  %v4280_v2 = vpop.f32.mrf.mxu1 }
 0x52a   : > { %v6959_v25 = vpop.eup %6958  ;;  %v3199_v29 = vmul.f32 1.442695, %v3101_v42  ;;  %v3201_v14 = vmul.f32 1.442695, %v3102_v62  ;;  %v11408_v41 = vmul.f32 0.088388346, %v4280_v2  ;;  %4458 = vmax.xlane.f32.xlu0 %v4457_v23  ;;  %v3367_v40 = vpack.c.bf16 %v6957_v15, %v6953_v50 }
 0x52b   : > { %v3027_v17 = vpop.xlane.xlu0 %3026  ;;  %v4284_v3 = vpop.f32.mrf.mxu1  ;;  %v3368_v39 = vpack.c.bf16 %v6959_v25, %v6955_v32  ;;  %v11410_v57 = vadd.f32 %v6959_v25, %v6957_v15 }
 0x52c   : > { %13021 = vst [vmem:[#allocation67_spill] sm:$0xff] %v11408_v41  ;;  %6972 = vpow2.f32 %v3199_v29  ;;  %v4460_v10 = vmax.f32 %v11406_v38, %v11408_v41  ;;  %v3103_v56 = vsub.f32 %v11056_v51, %v3027_v17  ;;  %v3104_v63 = vsub.f32 %v11058_v59, %v3027_v17 }
 0x52d   : > { %v6961_v61 = vpop.eup %6960  ;;  %6974 = vpow2.f32 %v3201_v14  ;;  %v11416_v12 = vmul.f32 0.088388346, %v4284_v3  ;;  %3467 = vmatprep.mubr.bf16.mxu0 %v3368_v39  ;;  %v4286_v23 = vpop.f32.mrf.mxu1 }
 0x52e   : > { %v6963_v50 = vpop.eup %6962  ;;  %v3203_v42 = vmul.f32 1.442695, %v3103_v56  ;;  %v3205_v62 = vmul.f32 1.442695, %v3104_v63  ;;  %3468 = vmatmul.mubr.bf16.gmra.mxu0 %v3367_v40  ;;  %v11418_v32 = vmul.f32 0.088388346, %v4286_v23  ;;  %4461 = vmax.xlane.f32.xlu1 %v4460_v10 }
 0x52f   : > { %v3030_v15 = vpop.xlane.xlu1 %3029  ;;  %v4288_v2 = vpop.f32.mrf.mxu1  ;;  %v11420_v25 = vadd.f32 %v6963_v50, %v6961_v61 }
 0x530   : > { %13022 = vst [vmem:[#allocation160_spill] sm:$0xff] %v11418_v32  ;;  %6976 = vpow2.f32 %v3203_v42  ;;  %v4463_v51 = vmax.f32 %v11416_v12, %v11418_v32  ;;  %v3105_v59 = vsub.f32 %v11062_v5, %v3030_v15  ;;  %v3106_v29 = vsub.f32 %v11064_v34, %v3030_v15 }
 0x531   : > { %v6965_v14 = vpop.eup %6964  ;;  %6978 = vpow2.f32 %v3205_v62  ;;  %v11426_v17 = vmul.f32 0.088388346, %v4288_v2  ;;  %v4290_v40 = vpop.f32.mrf.mxu1 }
 0x532   : > { %v6967_v3 = vpop.eup %6966  ;;  %v3207_v39 = vmul.f32 1.442695, %v3105_v59  ;;  %v3209_v10 = vmul.f32 1.442695, %v3106_v29  ;;  %v11428_v56 = vmul.f32 0.088388346, %v4290_v40  ;;  %4464 = vmax.xlane.f32.xlu0 %v4463_v51  ;;  %v3369_v63 = vpack.c.bf16 %v6965_v14, %v6961_v61 }
 0x533   : > { %13023 = vst [vmem:[#allocation27_spill] sm:$0xff] %v11426_v17  ;;  %v3033_v23 = vpop.xlane.xlu0 %3032  ;;  %v4294_v42 = vpop.f32.mrf.mxu1  ;;  %v3370_v41 = vpack.c.bf16 %v6967_v3, %v6963_v50  ;;  %v11430_v32 = vadd.f32 %v6967_v3, %v6965_v14 }
 0x534   : > { %13024 = vst [vmem:[#allocation60_spill] sm:$0xff] %v11428_v56  ;;  %6980 = vpow2.f32 %v3207_v39  ;;  %v4466_v5 = vmax.f32 %v11426_v17, %v11428_v56  ;;  %v3107_v34 = vsub.f32 %v11068_v16, %v3033_v23  ;;  %v3108_v62 = vsub.f32 %v11070_v45, %v3033_v23 }
 0x535   : > { %v6969_v15 = vpop.eup %6968  ;;  %6982 = vpow2.f32 %v3209_v10  ;;  %v11436_v2 = vmul.f32 0.088388346, %v4294_v42  ;;  %3475 = vmatprep.mubr.bf16.mxu0 %v3370_v41  ;;  %v4296_v51 = vpop.f32.mrf.mxu1 }
 0x536   : > { %v6971_v61 = vpop.eup %6970  ;;  %v3211_v59 = vmul.f32 1.442695, %v3107_v34  ;;  %v3213_v29 = vmul.f32 1.442695, %v3108_v62  ;;  %3476 = vmatmul.mubr.bf16.gmra.mxu0 %v3369_v63  ;;  %v11438_v50 = vmul.f32 0.088388346, %v4296_v51  ;;  %4467 = vmax.xlane.f32.xlu1 %v4466_v5 }
 0x537   : > { %13025 = vst [vmem:[#allocation26_spill] sm:$0xff] %v11436_v2  ;;  %v3036_v14 = vpop.xlane.xlu1 %3035  ;;  %v4298_v40 = vpop.f32.mrf.mxu1  ;;  %v11440_v3 = vadd.f32 %v6971_v61, %v6969_v15 }
 0x538   : > { %13026 = vst [vmem:[#allocation69_spill] sm:$0xff] %v11438_v50  ;;  %6984 = vpow2.f32 %v3211_v59  ;;  %v4469_v16 = vmax.f32 %v11436_v2, %v11438_v50  ;;  %v3109_v45 = vsub.f32 %v11074_v48, %v3036_v14  ;;  %v3110_v41 = vsub.f32 %v11076_v0, %v3036_v14 }
 0x539   : > { %v6973_v39 = vpop.eup %6972  ;;  %6986 = vpow2.f32 %v3213_v29  ;;  %v11446_v10 = vmul.f32 0.088388346, %v4298_v40  ;;  %v4300_v63 = vpop.f32.mrf.mxu1  ;;  %v13029_v29 = vld [vmem:[#allocation135_spill] sm:$0xff] }
 0x53a   : > { %v6975_v23 = vpop.eup %6974  ;;  %v3215_v42 = vmul.f32 1.442695, %v3109_v45  ;;  %v3217_v5 = vmul.f32 1.442695, %v3110_v41  ;;  %v11448_v34 = vmul.f32 0.088388346, %v4300_v63  ;;  %4470 = vmax.xlane.f32.xlu0 %v4469_v16  ;;  %v3371_v62 = vpack.c.bf16 %v6973_v39, %v6969_v15 }
 0x53b   : > { %13027 = vst [vmem:[#allocation66_spill] sm:$0xff] %v11446_v10  ;;  %v3039_v51 = vpop.xlane.xlu0 %3038  ;;  %v4304_v59 = vpop.f32.mrf.mxu1  ;;  %v3372_v56 = vpack.c.bf16 %v6975_v23, %v6971_v61  ;;  %v11450_v50 = vadd.f32 %v6975_v23, %v6973_v39 }
 0x53c   : > { %13028 = vst [vmem:[#allocation75_spill] sm:$0xff] %v11448_v34  ;;  %6988 = vpow2.f32 %v3215_v42  ;;  %v4472_v48 = vmax.f32 %v11446_v10, %v11448_v34  ;;  %v3111_v0 = vsub.f32 %v11080_v19, %v3039_v51  ;;  %v3112_v14 = vsub.f32 %v13029_v29, %v3039_v51 }
 0x53d   : > { %v6977_v40 = vpop.eup %6976  ;;  %6990 = vpow2.f32 %v3217_v5  ;;  %v11456_v45 = vmul.f32 0.088388346, %v4304_v59  ;;  %3483 = vmatprep.mubr.bf16.mxu0 %v3372_v56  ;;  %v4306_v16 = vpop.f32.mrf.mxu1  ;;  %v13032_v5 = vld [vmem:[#allocation77_spill] sm:$0xff]  ;;  %v13033_v59 = vld [vmem:[#allocation152_spill] sm:$0xff] }
 0x53e   : > { %v6979_v15 = vpop.eup %6978  ;;  %v3219_v41 = vmul.f32 1.442695, %v3111_v0  ;;  %v3221_v63 = vmul.f32 1.442695, %v3112_v14  ;;  %3484 = vmatmul.mubr.bf16.gmra.mxu0 %v3371_v62  ;;  %v11458_v61 = vmul.f32 0.088388346, %v4306_v16  ;;  %4473 = vmax.xlane.f32.xlu1 %v4472_v48 }
 0x53f   : > { %13030 = vst [vmem:[#allocation139_spill] sm:$0xff] %v11456_v45  ;;  %v3042_v39 = vpop.xlane.xlu1 %3041  ;;  %v4308_v23 = vpop.f32.mrf.mxu1  ;;  %v11460_v42 = vadd.f32 %v6979_v15, %v6977_v40 }
 0x540   : > { %13031 = vst [vmem:[#allocation159_spill] sm:$0xff] %v11458_v61  ;;  %6992 = vpow2.f32 %v3219_v41  ;;  %v4475_v19 = vmax.f32 %v11456_v45, %v11458_v61  ;;  %v3113_v51 = vsub.f32 %v13032_v5, %v3042_v39  ;;  %v3114_v56 = vsub.f32 %v13033_v59, %v3042_v39  ;;  %v13038_v5 = vld [vmem:[#allocation32_spill] sm:$0xff] }
 0x541   : > { %v6981_v29 = vpop.eup %6980  ;;  %6994 = vpow2.f32 %v3221_v63  ;;  %v11466_v0 = vmul.f32 0.088388346, %v4308_v23  ;;  %v4310_v62 = vpop.f32.mrf.mxu1  ;;  %v13037_v63 = vld [vmem:[#allocation22_spill] sm:$0xff] }
 0x542   : > { %v6983_v14 = vpop.eup %6982  ;;  %v3223_v16 = vmul.f32 1.442695, %v3113_v51  ;;  %v3225_v48 = vmul.f32 1.442695, %v3114_v56  ;;  %v11468_v34 = vmul.f32 0.088388346, %v4310_v62  ;;  %4476 = vmax.xlane.f32.xlu0 %v4475_v19  ;;  %v3373_v10 = vpack.c.bf16 %v6981_v29, %v6977_v40 }
 0x543   : > { %13034 = vst [vmem:[#allocation165_spill] sm:$0xff] %v11466_v0  ;;  %v3045_v41 = vpop.xlane.xlu0 %3044  ;;  %v4314_v2 = vpop.f32.mrf.mxu1  ;;  %v3374_v17 = vpack.c.bf16 %v6983_v14, %v6979_v15  ;;  %v11470_v61 = vadd.f32 %v6983_v14, %v6981_v29 }
 0x544   : > { %13035 = vst [vmem:[#allocation71_spill] sm:$0xff] %v11468_v34  ;;  %6996 = vpow2.f32 %v3223_v16  ;;  %v4478_v39 = vmax.f32 %v11466_v0, %v11468_v34  ;;  %v3115_v23 = vsub.f32 %v13037_v63, %v3045_v41  ;;  %v3116_v59 = vsub.f32 %v13038_v5, %v3045_v41  ;;  %v13043_v63 = vld [vmem:[#allocation153_spill] sm:$0xff] }
 0x545   : > { %13036 = vst [vmem:[#allocation50_spill] sm:$0xff] %v11470_v61  ;;  %v6985_v45 = vpop.eup %6984  ;;  %6998 = vpow2.f32 %v3225_v48  ;;  %v11476_v51 = vmul.f32 0.088388346, %v4314_v2  ;;  %3491 = vmatprep.mubr.bf16.mxu0 %v3374_v17  ;;  %v4316_v19 = vpop.f32.mrf.mxu1  ;;  %v13042_v48 = vld [vmem:[#allocation133_spill] sm:$0xff] }
 0x546   : > { %v6987_v40 = vpop.eup %6986  ;;  %v3227_v56 = vmul.f32 1.442695, %v3115_v23  ;;  %v3229_v62 = vmul.f32 1.442695, %v3116_v59  ;;  %3492 = vmatmul.mubr.bf16.gmra.mxu0 %v3373_v10  ;;  %v11478_v15 = vmul.f32 0.088388346, %v4316_v19  ;;  %4479 = vmax.xlane.f32.xlu1 %v4478_v39 }
 0x547   : > { %13039 = vst [vmem:[#allocation166_spill] sm:$0xff] %v11476_v51  ;;  %v3048_v29 = vpop.xlane.xlu1 %3047  ;;  %v4318_v14 = vpop.f32.mrf.mxu1  ;;  %v11480_v16 = vadd.f32 %v6987_v40, %v6985_v45 }
 0x548   : > { %13040 = vst [vmem:[#allocation53_spill] sm:$0xff] %v11478_v15  ;;  %7000 = vpow2.f32 %v3227_v56  ;;  %v4481_v41 = vmax.f32 %v11476_v51, %v11478_v15  ;;  %v3117_v2 = vsub.f32 %v13042_v48, %v3048_v29  ;;  %v3118_v17 = vsub.f32 %v13043_v63, %v3048_v29  ;;  %v13048_v48 = vld [vmem:[#allocation154_spill] sm:$0xff] }
 0x549   : > { %13041 = vst [vmem:[#allocation167_spill] sm:$0xff] %v11480_v16  ;;  %v6989_v5 = vpop.eup %6988  ;;  %7002 = vpow2.f32 %v3229_v62  ;;  %v11486_v23 = vmul.f32 0.088388346, %v4318_v14  ;;  %v4320_v10 = vpop.f32.mrf.mxu1  ;;  %v13047_v62 = vld [vmem:[#allocation138_spill] sm:$0xff] }
 0x54a   : > { %v6991_v59 = vpop.eup %6990  ;;  %v3231_v19 = vmul.f32 1.442695, %v3117_v2  ;;  %v3233_v39 = vmul.f32 1.442695, %v3118_v17  ;;  %v11488_v34 = vmul.f32 0.088388346, %v4320_v10  ;;  %4482 = vmax.xlane.f32.xlu0 %v4481_v41  ;;  %v3375_v0 = vpack.c.bf16 %v6989_v5, %v6985_v45 }
 0x54b   : > { %13044 = vst [vmem:[#allocation168_spill] sm:$0xff] %v11486_v23  ;;  %v3051_v56 = vpop.xlane.xlu0 %3050  ;;  %v4324_v16 = vpop.f32.mrf.mxu1  ;;  %v3376_v61 = vpack.c.bf16 %v6991_v59, %v6987_v40  ;;  %v11490_v15 = vadd.f32 %v6991_v59, %v6989_v5 }
 0x54c   : > { %13045 = vst [vmem:[#allocation161_spill] sm:$0xff] %v11488_v34  ;;  %7004 = vpow2.f32 %v3231_v19  ;;  %v4484_v29 = vmax.f32 %v11486_v23, %v11488_v34  ;;  %v3119_v14 = vsub.f32 %v13047_v62, %v3051_v56  ;;  %v3120_v63 = vsub.f32 %v13048_v48, %v3051_v56  ;;  %v13053_v62 = vld [vmem:[#allocation31_spill] sm:$0xff] }
 0x54d   : > { %13046 = vst [vmem:[#allocation78_spill] sm:$0xff] %v11490_v15  ;;  %v6993_v51 = vpop.eup %6992  ;;  %7006 = vpow2.f32 %v3233_v39  ;;  %v11496_v2 = vmul.f32 0.088388346, %v4324_v16  ;;  %3499 = vmatprep.mubr.bf16.mxu0 %v3376_v61  ;;  %v4326_v41 = vpop.f32.mrf.mxu1  ;;  %v13052_v39 = vld [vmem:[#allocation155_spill] sm:$0xff] }
 0x54e   : > { %v6995_v45 = vpop.eup %6994  ;;  %v3235_v17 = vmul.f32 1.442695, %v3119_v14  ;;  %v3237_v10 = vmul.f32 1.442695, %v3120_v63  ;;  %3500 = vmatmul.mubr.bf16.gmra.mxu0 %v3375_v0  ;;  %v11498_v40 = vmul.f32 0.088388346, %v4326_v41  ;;  %4485 = vmax.xlane.f32.xlu1 %v4484_v29 }
 0x54f   : > { %13049 = vst [vmem:[#allocation58_spill] sm:$0xff] %v11496_v2  ;;  %v3054_v5 = vpop.xlane.xlu1 %3053  ;;  %v4328_v59 = vpop.f32.mrf.mxu1  ;;  %v11500_v19 = vadd.f32 %v6995_v45, %v6993_v51 }
 0x550   : > { %13050 = vst [vmem:[#allocation162_spill] sm:$0xff] %v11498_v40  ;;  %7008 = vpow2.f32 %v3235_v17  ;;  %v4487_v56 = vmax.f32 %v11496_v2, %v11498_v40  ;;  %v3121_v16 = vsub.f32 %v13052_v39, %v3054_v5  ;;  %v3122_v61 = vsub.f32 %v13053_v62, %v3054_v5  ;;  %v13056_v39 = vld [vmem:[#allocation34_spill] sm:$0xff] }
 0x551   : > { %13051 = vst [vmem:[#allocation61_spill] sm:$0xff] %v11500_v19  ;;  %v6997_v48 = vpop.eup %6996  ;;  %7010 = vpow2.f32 %v3237_v10  ;;  %v11506_v14 = vmul.f32 0.088388346, %v4328_v59  ;;  %v4330_v0 = vpop.f32.mrf.mxu1  ;;  %v13057_v59 = vld [vmem:[#allocation136_spill] sm:$0xff] }
 0x552   : > { %v6999_v63 = vpop.eup %6998  ;;  %v3239_v41 = vmul.f32 1.442695, %v3121_v16  ;;  %v3241_v29 = vmul.f32 1.442695, %v3122_v61  ;;  %v11508_v34 = vmul.f32 0.088388346, %v4330_v0  ;;  %4488 = vmax.xlane.f32.xlu0 %v4487_v56  ;;  %v3377_v23 = vpack.c.bf16 %v6997_v48, %v6993_v51 }
 0x553   : > { %13054 = vst [vmem:[#allocation163_spill] sm:$0xff] %v11506_v14  ;;  %v3057_v17 = vpop.xlane.xlu0 %3056  ;;  %v3378_v19 = vpack.c.bf16 %v6999_v63, %v6995_v45  ;;  %v11510_v15 = vadd.f32 %v6999_v63, %v6997_v48  ;;  %v13058_v51 = vld [vmem:[#allocation57_spill] sm:$0xff] }
 0x554   : > { %13055 = vst [vmem:[#allocation164_spill] sm:$0xff] %v11508_v34  ;;  %7012 = vpow2.f32 %v3239_v41  ;;  %v4490_v5 = vmax.f32 %v11506_v14, %v11508_v34  ;;  %v3123_v10 = vsub.f32 %v13056_v39, %v3057_v17  ;;  %v3124_v62 = vsub.f32 %v13057_v59, %v3057_v17  ;;  %v13060_v48 = vld [vmem:[#allocation141_spill] sm:$0xff] }
 0x555   : > { %v7001_v40 = vpop.eup %7000  ;;  %7014 = vpow2.f32 %v3241_v29  ;;  %3507 = vmatprep.mubr.bf16.mxu0 %v3378_v19  ;;  %v13061_v41 = vld [vmem:[#allocation33_spill] sm:$0xff] }
 0x556   : > { %v7003_v16 = vpop.eup %7002  ;;  %v3243_v61 = vmul.f32 1.442695, %v3123_v10  ;;  %v3245_v0 = vmul.f32 1.442695, %v3124_v62  ;;  %3508 = vmatmul.mubr.bf16.gmra.mxu0 %v3377_v23  ;;  %3260 = vadd.xlane.f32.xlu0 %v13058_v51  ;;  %v13062_v10 = vld [vmem:[#allocation63_spill] sm:$0xff] }
 0x557   : > { %4491 = vmax.xlane.f32.xlu1 %v4490_v5  ;;  %v3060_v45 = vpop.xlane.xlu1 %3059  ;;  %v11517_v56 = vadd.f32 %v7003_v16, %v7001_v40  ;;  %v13064_v5 = vld [vmem:[#allocation142_spill] sm:$0xff] }
 0x558   : > { %7016 = vpow2.f32 %v3243_v61  ;;  %v3125_v63 = vsub.f32 %v13060_v48, %v3060_v45  ;;  %v3126_v39 = vsub.f32 %v13061_v41, %v3060_v45  ;;  %v13065_v61 = vld [vmem:[#allocation144_spill] sm:$0xff] }
 0x559   : > { %13059 = vst [vmem:[#allocation20_spill] sm:$0xff] %v11517_v56  ;;  %v7005_v34 = vpop.eup %7004  ;;  %7018 = vpow2.f32 %v3245_v0 }
 0x55a   : > { %v7007_v17 = vpop.eup %7006  ;;  %v3247_v29 = vmul.f32 1.442695, %v3125_v63  ;;  %v3249_v19 = vmul.f32 1.442695, %v3126_v39  ;;  %v3379_v59 = vpack.c.bf16 %v7005_v34, %v7001_v40  ;;  %v13067_v39 = vld [vmem:[#allocation36_spill] sm:$0xff] }
 0x55b   : > { %3263 = vadd.xlane.f32.xlu1 %v13062_v10  ;;  %v3063_v23 = vpop.xlane.xlu0 %3062  ;;  %v3380_v62 = vpack.c.bf16 %v7007_v17, %v7003_v16  ;;  %v11522_v51 = vadd.f32 %v7007_v17, %v7005_v34  ;;  %v13068_v34 = vld [vmem:[#allocation35_spill] sm:$0xff] }
 0x55c   : > { %7020 = vpow2.f32 %v3247_v29  ;;  %v3127_v14 = vsub.f32 %v13064_v5, %v3063_v23  ;;  %v3128_v2 = vsub.f32 %v13065_v61, %v3063_v23 }
 0x55d   : > { %13063 = vst [vmem:[#allocation21_spill] sm:$0xff] %v11522_v51  ;;  %v7009_v48 = vpop.eup %7008  ;;  %7022 = vpow2.f32 %v3249_v19  ;;  %3515 = vmatprep.mubr.bf16.mxu0 %v3380_v62 }
 0x55e   : > { %v7011_v45 = vpop.eup %7010  ;;  %v3251_v0 = vmul.f32 1.442695, %v3127_v14  ;;  %v3253_v41 = vmul.f32 1.442695, %v3128_v2  ;;  %3516 = vmatmul.mubr.bf16.gmra.mxu0 %v3379_v59  ;;  %v13070_v2 = vld [vmem:[#allocation145_spill] sm:$0xff]  ;;  %v13071_v59 = vld [vmem:[#allocation40_spill] sm:$0xff] }
 0x55f   : > { %v3066_v63 = vpop.xlane.xlu1 %3065  ;;  %v11526_v40 = vadd.f32 %v7011_v45, %v7009_v48 }
 0x560   : > { %7024 = vpow2.f32 %v3251_v0  ;;  %v3129_v16 = vsub.f32 %v13067_v39, %v3066_v63  ;;  %v3130_v17 = vsub.f32 %v13068_v34, %v3066_v63 }
 0x561   : > { %13066 = vst [vmem:[#allocation56_spill] sm:$0xff] %v11526_v40  ;;  %v7013_v29 = vpop.eup %7012  ;;  %7026 = vpow2.f32 %v3253_v41 }
 0x562   : > { %v7015_v10 = vpop.eup %7014  ;;  %v3255_v5 = vmul.f32 1.442695, %v3129_v16  ;;  %v3257_v23 = vmul.f32 1.442695, %v3130_v17  ;;  %v3381_v61 = vpack.c.bf16 %v7013_v29, %v7009_v48  ;;  %v13073_v48 = vld [vmem:[#allocation147_spill] sm:$0xff]  ;;  %v13074_v17 = vld [vmem:[#allocation156_spill] sm:$0xff] }
 0x563   : > { %v4399_v19 = vpop.xlane.xlu0 %4398  ;;  %v3382_v62 = vpack.c.bf16 %v7015_v10, %v7011_v45  ;;  %v11530_v51 = vadd.f32 %v7015_v10, %v7013_v29 }
 0x564   : > { %7028 = vpow2.f32 %v3255_v5  ;;  %v4493_v14 = vsub.f32 %v13070_v2, %v4399_v19  ;;  %v4494_v40 = vsub.f32 %v13071_v59, %v4399_v19 }
 0x565   : > { %13069 = vst [vmem:[#allocation59_spill] sm:$0xff] %v11530_v51  ;;  %v7017_v0 = vpop.eup %7016  ;;  %7030 = vpow2.f32 %v3257_v23  ;;  %3523 = vmatprep.mubr.bf16.mxu0 %v3382_v62 }
 0x566   : > { %v7019_v39 = vpop.eup %7018  ;;  %v4557_v63 = vmul.f32 1.442695, %v4493_v14  ;;  %v4559_v34 = vmul.f32 1.442695, %v4494_v40  ;;  %3524 = vmatmul.mubr.bf16.gmra.mxu0 %v3381_v61  ;;  %v13076_v40 = vld [vmem:[#allocation38_spill] sm:$0xff]  ;;  %v13077_v14 = vld [vmem:[#allocation45_spill] sm:$0xff] }
 0x567   : > { %v4402_v41 = vpop.xlane.xlu1 %4401  ;;  %v11534_v16 = vadd.f32 %v7019_v39, %v7017_v0 }
 0x568   : > { %7032 = vpow2.f32 %v4557_v63  ;;  %v4495_v45 = vsub.f32 %v13073_v48, %v4402_v41  ;;  %v4496_v29 = vsub.f32 %v13074_v17, %v4402_v41 }
 0x569   : > { %13072 = vst [vmem:[#allocation52_spill] sm:$0xff] %v11534_v16  ;;  %v7021_v10 = vpop.eup %7020  ;;  %7034 = vpow2.f32 %v4559_v34 }
 0x56a   : > { %v7023_v5 = vpop.eup %7022  ;;  %v4561_v2 = vmul.f32 1.442695, %v4495_v45  ;;  %v4563_v19 = vmul.f32 1.442695, %v4496_v29  ;;  %v3383_v59 = vpack.c.bf16 %v7021_v10, %v7017_v0  ;;  %v13079_v0 = vld [vmem:[#allocation148_spill] sm:$0xff]  ;;  %v13080_v29 = vld [vmem:[#allocation79_spill] sm:$0xff] }
 0x56b   : > { %v4405_v23 = vpop.xlane.xlu0 %4404  ;;  %v3384_v62 = vpack.c.bf16 %v7023_v5, %v7019_v39  ;;  %v11538_v51 = vadd.f32 %v7023_v5, %v7021_v10 }
 0x56c   : > { %7036 = vpow2.f32 %v4561_v2  ;;  %v4497_v61 = vsub.f32 %v13076_v40, %v4405_v23  ;;  %v4498_v16 = vsub.f32 %v13077_v14, %v4405_v23 }
 0x56d   : > { %13075 = vst [vmem:[#allocation55_spill] sm:$0xff] %v11538_v51  ;;  %v7025_v63 = vpop.eup %7024  ;;  %7038 = vpow2.f32 %v4563_v19  ;;  %3531 = vmatprep.mubr.bf16.mxu0 %v3384_v62 }
 0x56e   : > { %v7027_v48 = vpop.eup %7026  ;;  %v4565_v41 = vmul.f32 1.442695, %v4497_v61  ;;  %v4567_v17 = vmul.f32 1.442695, %v4498_v16  ;;  %3532 = vmatmul.mubr.bf16.gmra.mxu0 %v3383_v59  ;;  %v13082_v16 = vld [vmem:[#allocation72_spill] sm:$0xff]  ;;  %v13083_v61 = vld [vmem:[#allocation157_spill] sm:$0xff] }
 0x56f   : > { %v4408_v34 = vpop.xlane.xlu1 %4407  ;;  %v11542_v45 = vadd.f32 %v7027_v48, %v7025_v63 }
 0x570   : > { %7040 = vpow2.f32 %v4565_v41  ;;  %v4499_v39 = vsub.f32 %v13079_v0, %v4408_v34  ;;  %v4500_v10 = vsub.f32 %v13080_v29, %v4408_v34 }
 0x571   : > { %13078 = vst [vmem:[#allocation15_spill] sm:$0xff] %v11542_v45  ;;  %v7029_v5 = vpop.eup %7028  ;;  %7042 = vpow2.f32 %v4567_v17 }
 0x572   : > { %v7031_v2 = vpop.eup %7030  ;;  %v4569_v40 = vmul.f32 1.442695, %v4499_v39  ;;  %v4571_v23 = vmul.f32 1.442695, %v4500_v10  ;;  %v3385_v14 = vpack.c.bf16 %v7029_v5, %v7025_v63  ;;  %v13084_v63 = vld [vmem:[#allocation158_spill] sm:$0xff] }
 0x573   : > { %v3386_v62 = vpack.c.bf16 %v7031_v2, %v7027_v48  ;;  %v11546_v51 = vadd.f32 %v7031_v2, %v7029_v5  ;;  %v13085_v48 = vld [vmem:[#allocation4_spill] sm:$0xff] }
 0x574   : > { %v4411_v19 = vpop.xlane.xlu0 %4410  ;;  %7044 = vpow2.f32 %v4569_v40 }
 0x575   : > { %13081 = vst [vmem:[#allocation19_spill] sm:$0xff] %v11546_v51  ;;  %v4501_v59 = vsub.f32 %v13082_v16, %v4411_v19  ;;  %v4502_v45 = vsub.f32 %v13083_v61, %v4411_v19  ;;  %v7033_v41 = vpop.eup %7032  ;;  %7046 = vpow2.f32 %v4571_v23  ;;  %3539 = vmatprep.mubr.bf16.mxu0 %v3386_v62 }
 0x576   : > { %v7035_v0 = vpop.eup %7034  ;;  %3540 = vmatmul.mubr.bf16.gmra.mxu0 %v3385_v14 }
 0x577   : > { %v4573_v34 = vmul.f32 1.442695, %v4501_v59  ;;  %v4575_v29 = vmul.f32 1.442695, %v4502_v45  ;;  %v4685_v39 = vadd.f32 %v7035_v0, %v7033_v41  ;;  %v13086_v45 = vld [vmem:[#allocation42_spill] sm:$0xff]  ;;  %v13087_v59 = vld [vmem:[#allocation29_spill] sm:$0xff] }
 0x578   : > { %v4414_v17 = vpop.xlane.xlu1 %4413 }
 0x579   : > { %7048 = vpow2.f32 %v4573_v34  ;;  %v4503_v10 = vsub.f32 %v13084_v63, %v4414_v17  ;;  %v4504_v5 = vsub.f32 %v13085_v48, %v4414_v17  ;;  %v7037_v2 = vpop.eup %7036  ;;  %4686 = vadd.xlane.f32.xlu0 %v4685_v39  ;;  %v13089_v48 = vld [vmem:[#allocation44_spill] sm:$0xff] }
 0x57a   : > { %7050 = vpow2.f32 %v4575_v29  ;;  %v7039_v40 = vpop.eup %7038  ;;  %v4781_v16 = vpack.c.bf16 %v7037_v2, %v7033_v41 }
 0x57b   : > { %v4577_v19 = vmul.f32 1.442695, %v4503_v10  ;;  %v4579_v61 = vmul.f32 1.442695, %v4504_v5  ;;  %v4782_v62 = vpack.c.bf16 %v7039_v40, %v7035_v0  ;;  %v4688_v51 = vadd.f32 %v7039_v40, %v7037_v2  ;;  %v13088_v0 = vld [vmem:[#allocation51_spill] sm:$0xff] }
 0x57c   : > { %v4417_v23 = vpop.xlane.xlu0 %4416 }
 0x57d   : > { %7052 = vpow2.f32 %v4577_v19  ;;  %v4505_v14 = vsub.f32 %v13086_v45, %v4417_v23  ;;  %v4506_v56 = vsub.f32 %v13087_v59, %v4417_v23  ;;  %v7041_v34 = vpop.eup %7040  ;;  %3266 = vadd.xlane.f32.xlu0 %v11262_v24  ;;  %4845 = vmatprep.mubr.bf16.mxu0 %v4782_v62  ;;  %v13091_v45 = vld [vmem:[#allocation47_spill] sm:$0xff] }
 0x57e   : > { %7054 = vpow2.f32 %v4579_v61  ;;  %v7043_v17 = vpop.eup %7042  ;;  %4689 = vadd.xlane.f32.xlu1 %v4688_v51  ;;  %4846 = vmatmul.mubr.bf16.vlgmr.msra.gmra.mxu0 %v4781_v16  ;;  %v13090_v16 = vld [vmem:[#allocation48_spill] sm:$0xff] }
 0x57f   : > { %v4581_v29 = vmul.f32 1.442695, %v4505_v14  ;;  %v4583_v39 = vmul.f32 1.442695, %v4506_v56  ;;  %v4691_v63 = vadd.f32 %v7043_v17, %v7041_v34 }
 0x580   : > { %v4420_v41 = vpop.xlane.xlu1 %4419 }
 0x581   : > { %7056 = vpow2.f32 %v4581_v29  ;;  %v4507_v10 = vsub.f32 %v13088_v0, %v4420_v41  ;;  %v4508_v5 = vsub.f32 %v13089_v48, %v4420_v41  ;;  %v7045_v2 = vpop.eup %7044  ;;  %4692 = vadd.xlane.f32.xlu0 %v4691_v63  ;;  %v13092_v63 = vld [vmem:[#allocation54_spill] sm:$0xff] }
 0x582   : > { %7058 = vpow2.f32 %v4583_v39  ;;  %v7047_v40 = vpop.eup %7046  ;;  %3269 = vadd.xlane.f32.xlu1 %v11278_v55  ;;  %v4783_v24 = vpack.c.bf16 %v7045_v2, %v7041_v34 }
 0x583   : > { %v4585_v19 = vmul.f32 1.442695, %v4507_v10  ;;  %v4587_v61 = vmul.f32 1.442695, %v4508_v5  ;;  %v4784_v56 = vpack.c.bf16 %v7047_v40, %v7043_v17  ;;  %v4694_v51 = vadd.f32 %v7047_v40, %v7045_v2 }
 0x584   : > { %v4423_v23 = vpop.xlane.xlu0 %4422 }
 0x585   : > { %7060 = vpow2.f32 %v4585_v19  ;;  %v4509_v62 = vsub.f32 %v13090_v16, %v4423_v23  ;;  %v4510_v14 = vsub.f32 %v13091_v45, %v4423_v23  ;;  %3272 = vadd.xlane.f32.xlu0 %v11296_v1  ;;  %4853 = vmatprep.mubr.bf16.mxu0 %v4784_v56 }
 0x586   : > { %v7049_v59 = vpop.eup %7048  ;;  %7062 = vpow2.f32 %v4587_v61  ;;  %4695 = vadd.xlane.f32.xlu1 %v4694_v51  ;;  %4854 = vmatmul.mubr.bf16.gmra.mxu0 %v4783_v24 }
 0x587   : > { %v7051_v29 = vpop.eup %7050  ;;  %v4589_v39 = vmul.f32 1.442695, %v4509_v62  ;;  %v4591_v41 = vmul.f32 1.442695, %v4510_v14  ;;  %v4426_v55 = vpop.xlane.xlu1 %4425 }
 0x588   : > { %v4697_v34 = vadd.f32 %v7051_v29, %v7049_v59  ;;  %v4511_v17 = vsub.f32 %v11236_v33, %v4426_v55  ;;  %v4512_v0 = vsub.f32 %v13092_v63, %v4426_v55 }
 0x589   : > { %7064 = vpow2.f32 %v4589_v39 }
 0x58a   : > { %v7053_v10 = vpop.eup %7052  ;;  %7066 = vpow2.f32 %v4591_v41  ;;  %4698 = vadd.xlane.f32.xlu0 %v4697_v34  ;;  %v4593_v5 = vmul.f32 1.442695, %v4511_v17  ;;  %v4595_v2 = vmul.f32 1.442695, %v4512_v0  ;;  %3275 = vadd.xlane.f32.xlu1 %v11312_v11 }
 0x58b   : > { %v7055_v48 = vpop.eup %7054  ;;  %v4785_v1 = vpack.c.bf16 %v7053_v10, %v7049_v59  ;;  %v4429_v40 = vpop.xlane.xlu0 %4428 }
 0x58c   : > { %v4786_v19 = vpack.c.bf16 %v7055_v48, %v7051_v29  ;;  %v4700_v61 = vadd.f32 %v7055_v48, %v7053_v10  ;;  %7068 = vpow2.f32 %v4593_v5  ;;  %v4513_v24 = vsub.f32 %v11252_v36, %v4429_v40  ;;  %v6746_v48 = vld [vmem:[%s12138_s5 + $0x74] ss:$8 sps:$4 sm:$0xff]  }
 0x58d   : > { %v4514_v23 = vsub.f32 %v11254_v44, %v4429_v40  ;;  %7070 = vpow2.f32 %v4595_v2  ;;  %5594 = vmatprep.subr.bf16.mxu1 %v6746_v48 }
 0x58e   : > { %v7057_v33 = vpop.eup %7056  ;;  %3278 = vadd.xlane.f32.xlu0 %v11330_v60  ;;  %4861 = vmatprep.mubr.bf16.mxu0 %v4786_v19  ;;  %v4597_v51 = vmul.f32 1.442695, %v4513_v24 }
 0x58f   : > { %v7059_v56 = vpop.eup %7058  ;;  %v4599_v16 = vmul.f32 1.442695, %v4514_v23  ;;  %4701 = vadd.xlane.f32.xlu1 %v4700_v61  ;;  %4862 = vmatmul.mubr.bf16.gmra.mxu0 %v4785_v1  ;;  %v4432_v11 = vpop.xlane.xlu1 %4431 }
 0x590   : > { %v4703_v62 = vadd.f32 %v7059_v56, %v7057_v33  ;;  %7072 = vpow2.f32 %v4597_v51  ;;  %v4515_v45 = vsub.f32 %v11270_v22, %v4432_v11  ;;  %v4516_v14 = vsub.f32 %v11272_v6, %v4432_v11 }
 0x591   : > { %7074 = vpow2.f32 %v4599_v16 }
 0x592   : > { %v7061_v36 = vpop.eup %7060  ;;  %4704 = vadd.xlane.f32.xlu0 %v4703_v62  ;;  %v4601_v59 = vmul.f32 1.442695, %v4515_v45  ;;  %v4603_v29 = vmul.f32 1.442695, %v4516_v14 }
 0x593   : > { %v7063_v44 = vpop.eup %7062  ;;  %3281 = vadd.xlane.f32.xlu1 %v11346_v30  ;;  %v4787_v60 = vpack.c.bf16 %v7061_v36, %v7057_v33  ;;  %v4435_v39 = vpop.xlane.xlu0 %4434 }
 0x594   : > { %v4788_v41 = vpack.c.bf16 %v7063_v44, %v7059_v56  ;;  %v4706_v55 = vadd.f32 %v7063_v44, %v7061_v36  ;;  %7076 = vpow2.f32 %v4601_v59  ;;  %v4517_v34 = vsub.f32 %v11286_v49, %v4435_v39  ;;  %v6747_v56 = vld [vmem:[%s12138_s5 + $0x60] ss:$8 sps:$4 sm:$0xff]  }
 0x595   : > { %v4518_v17 = vsub.f32 %v11288_v46, %v4435_v39  ;;  %7078 = vpow2.f32 %v4603_v29 }
 0x596   : > { %v7065_v22 = vpop.eup %7064  ;;  %3284 = vadd.xlane.f32.xlu0 %v11360_v4  ;;  %4869 = vmatprep.mubr.bf16.mxu0 %v4788_v41  ;;  %v4605_v63 = vmul.f32 1.442695, %v4517_v34  ;;  %v6744_v4 = vld [vmem:[%s12138_s5 + $0x70] ss:$8 sps:$4 sm:$0xff]  }
 0x597   : > { %v7067_v6 = vpop.eup %7066  ;;  %v4607_v0 = vmul.f32 1.442695, %v4518_v17  ;;  %4707 = vadd.xlane.f32.xlu1 %v4706_v55  ;;  %4870 = vmatmul.mubr.bf16.gmra.mxu0 %v4787_v60  ;;  %v4438_v30 = vpop.xlane.xlu1 %4437  ;;  %v6753_v17 = vld [vmem:[%s12138_s5 + $0x40] ss:$8 sps:$4 sm:$0xff]  }
 0x598   : > { %v4709_v10 = vadd.f32 %v7067_v6, %v7065_v22  ;;  %7080 = vpow2.f32 %v4605_v63  ;;  %v4519_v49 = vsub.f32 %v11304_v21, %v4438_v30  ;;  %v4520_v46 = vsub.f32 %v11306_v26, %v4438_v30  ;;  %5595 = vmatpush1.bf16.msra.mxu1 %v6744_v4  ;;  %v6749_v26 = vld [vmem:[%s12138_s5 + $0x64] ss:$8 sps:$4 sm:$0xff]  }
 0x599   : > { %v7069_v5 = vpop.eup %7068  ;;  %7082 = vpow2.f32 %v4607_v0  ;;  %5596 = vmatprep.subr.bf16.mxu1 %v6749_v26 }
 0x59a   : > { %4710 = vadd.xlane.f32.xlu0 %v4709_v10  ;;  %v7071_v2 = vpop.eup %7070  ;;  %v4609_v1 = vmul.f32 1.442695, %v4519_v49  ;;  %v4611_v40 = vmul.f32 1.442695, %v4520_v46  ;;  %v4789_v19 = vpack.c.bf16 %v7069_v5, %v7065_v22 }
 0x59b   : > { %3287 = vadd.xlane.f32.xlu1 %v11370_v35  ;;  %v4441_v61 = vpop.xlane.xlu0 %4440  ;;  %v4790_v24 = vpack.c.bf16 %v7071_v2, %v7067_v6  ;;  %v4712_v21 = vadd.f32 %v7071_v2, %v7069_v5 }
 0x59c   : > { %7084 = vpow2.f32 %v4609_v1  ;;  %v4521_v23 = vsub.f32 %v11320_v52, %v4441_v61  ;;  %v4522_v33 = vsub.f32 %v11322_v18, %v4441_v61  ;;  %v6752_v52 = vld [vmem:[%s12138_s5 + $0x54] ss:$8 sps:$4 sm:$0xff]   ;;  %5597 = vmatpush1.bf16.msra.mxu1 %v6747_v56  ;;  %v6759_v61 = vld [vmem:[%s12138_s5 + $0x20] ss:$8 sps:$4 sm:$0xff]  }
 0x59d   : > { %v7073_v51 = vpop.eup %7072  ;;  %7086 = vpow2.f32 %v4611_v40  ;;  %4877 = vmatprep.mubr.bf16.mxu0 %v4790_v24  ;;  %5598 = vmatprep.subr.bf16.mxu1 %v6752_v52 }
 0x59e   : > { %3290 = vadd.xlane.f32.xlu0 %v11380_v27  ;;  %v7075_v35 = vpop.eup %7074  ;;  %v4613_v16 = vmul.f32 1.442695, %v4521_v23  ;;  %v4615_v11 = vmul.f32 1.442695, %v4522_v33  ;;  %v6750_v27 = vld [vmem:[%s12138_s5 + $0x50] ss:$8 sps:$4 sm:$0xff]  }
 0x59f   : > { %4713 = vadd.xlane.f32.xlu1 %v4712_v21  ;;  %4878 = vmatmul.mubr.bf16.gmra.mxu0 %v4789_v19  ;;  %v4444_v62 = vpop.xlane.xlu1 %4443  ;;  %v4715_v45 = vadd.f32 %v7075_v35, %v7073_v51 }
 0x5a0   : > { %7088 = vpow2.f32 %v4613_v16  ;;  %v4523_v18 = vsub.f32 %v11338_v58, %v4444_v62  ;;  %v4524_v14 = vsub.f32 %v11340_v54, %v4444_v62  ;;  %v6755_v54 = vld [vmem:[%s12138_s5 + $0x44] ss:$8 sps:$4 sm:$0xff]   ;;  %5599 = vmatpush1.bf16.msra.mxu1 %v6750_v27 }
 0x5a1   : > { %v7077_v36 = vpop.eup %7076  ;;  %7090 = vpow2.f32 %v4615_v11  ;;  %5600 = vmatprep.subr.bf16.mxu1 %v6755_v54 }
 0x5a2   : > { %4716 = vadd.xlane.f32.xlu0 %v4715_v45  ;;  %v7079_v44 = vpop.eup %7078  ;;  %v4617_v59 = vmul.f32 1.442695, %v4523_v18  ;;  %v4619_v29 = vmul.f32 1.442695, %v4524_v14  ;;  %v4791_v60 = vpack.c.bf16 %v7077_v36, %v7073_v51  ;;  %v13093_v14 = vld [vmem:[#allocation64_spill] sm:$0xff] }
 0x5a3   : > { %3293 = vadd.xlane.f32.xlu1 %v11390_v13  ;;  %v4447_v39 = vpop.xlane.xlu0 %4446  ;;  %v4792_v41 = vpack.c.bf16 %v7079_v44, %v7075_v35  ;;  %v4718_v58 = vadd.f32 %v7079_v44, %v7077_v36  ;;  %v6765_v36 = vld [vmem:[%s12138_s5] ss:$8 sps:$4 sm:$0xff]  }
 0x5a4   : > { %7092 = vpow2.f32 %v4617_v59  ;;  %v4525_v55 = vsub.f32 %v11354_v8, %v4447_v39  ;;  %v4526_v34 = vsub.f32 %v11356_v20, %v4447_v39  ;;  %v6758_v8 = vld [vmem:[%s12138_s5 + $0x34] ss:$8 sps:$4 sm:$0xff]   ;;  %5601 = vmatpush1.bf16.msra.mxu1 %v6753_v17 }
 0x5a5   : > { %v7081_v22 = vpop.eup %7080  ;;  %7094 = vpow2.f32 %v4619_v29  ;;  %4885 = vmatprep.mubr.bf16.mxu0 %v4792_v41  ;;  %5602 = vmatprep.subr.bf16.mxu1 %v6758_v8  ;;  %v13095_v8 = vld [vmem:[#allocation160_spill] sm:$0xff] }
 0x5a6   : > { %3296 = vadd.xlane.f32.xlu0 %v11400_v31  ;;  %v7083_v13 = vpop.eup %7082  ;;  %v4621_v6 = vmul.f32 1.442695, %v4525_v55  ;;  %v4623_v63 = vmul.f32 1.442695, %v4526_v34  ;;  %v6756_v31 = vld [vmem:[%s12138_s5 + $0x30] ss:$8 sps:$4 sm:$0xff]  }
 0x5a7   : > { %4719 = vadd.xlane.f32.xlu1 %v4718_v58  ;;  %4886 = vmatmul.mubr.bf16.gmra.mxu0 %v4791_v60  ;;  %v4450_v0 = vpop.xlane.xlu1 %4449  ;;  %v4721_v30 = vadd.f32 %v7083_v13, %v7081_v22  ;;  %v13094_v58 = vld [vmem:[#allocation67_spill] sm:$0xff] }
 0x5a8   : > { %7096 = vpow2.f32 %v4621_v6  ;;  %v4527_v20 = vsub.f32 %v11366_v53, %v4450_v0  ;;  %v4528_v10 = vsub.f32 %v11368_v9, %v4450_v0  ;;  %v6761_v9 = vld [vmem:[%s12138_s5 + $0x24] ss:$8 sps:$4 sm:$0xff]   ;;  %5603 = vmatpush1.bf16.msra.mxu1 %v6756_v31 }
 0x5a9   : > { %v7085_v48 = vpop.eup %7084  ;;  %7098 = vpow2.f32 %v4623_v63  ;;  %5604 = vmatprep.subr.bf16.mxu1 %v6761_v9  ;;  %v6773_v0 = vld [vmem:[%s12138_s5 + $0xe4] ss:$8 sps:$4 sm:$0xff]  }
 0x5aa   : > { %4722 = vadd.xlane.f32.xlu0 %v4721_v30  ;;  %v7087_v49 = vpop.eup %7086  ;;  %v4625_v46 = vmul.f32 1.442695, %v4527_v20  ;;  %v4627_v4 = vmul.f32 1.442695, %v4528_v10  ;;  %v4793_v5 = vpack.c.bf16 %v7085_v48, %v7081_v22  ;;  %v6771_v10 = vld [vmem:[%s12138_s5 + $0xe0] ss:$8 sps:$4 sm:$0xff]  }
 0x5ab   : > { %3299 = vadd.xlane.f32.xlu1 %v11410_v57  ;;  %v4453_v2 = vpop.xlane.xlu0 %4452  ;;  %v4794_v1 = vpack.c.bf16 %v7087_v49, %v7083_v13  ;;  %v4724_v53 = vadd.f32 %v7087_v49, %v7085_v48 }
 0x5ac   : > { %7100 = vpow2.f32 %v4625_v46  ;;  %v4529_v40 = vsub.f32 %v11376_v28, %v4453_v2  ;;  %v4530_v19 = vsub.f32 %v11378_v43, %v4453_v2  ;;  %v6764_v28 = vld [vmem:[%s12138_s5 + $0x14] ss:$8 sps:$4 sm:$0xff]   ;;  %5605 = vmatpush1.bf16.msra.mxu1 %v6759_v61 }
 0x5ad   : > { %v7089_v24 = vpop.eup %7088  ;;  %7102 = vpow2.f32 %v4627_v4  ;;  %4893 = vmatprep.mubr.bf16.mxu0 %v4794_v1  ;;  %5606 = vmatprep.subr.bf16.mxu1 %v6764_v28  ;;  %v13096_v1 = vld [vmem:[#allocation27_spill] sm:$0xff] }
 0x5ae   : > { %3302 = vadd.xlane.f32.xlu0 %v11420_v25  ;;  %v7091_v57 = vpop.eup %7090  ;;  %v4629_v21 = vmul.f32 1.442695, %v4529_v40  ;;  %v4631_v26 = vmul.f32 1.442695, %v4530_v19  ;;  %v6762_v25 = vld [vmem:[%s12138_s5 + $0x10] ss:$8 sps:$4 sm:$0xff]  }
 0x5af   : > { %4725 = vadd.xlane.f32.xlu1 %v4724_v53  ;;  %4894 = vmatmul.mubr.bf16.gmra.mxu0 %v4793_v5  ;;  %v4456_v23 = vpop.xlane.xlu1 %4455  ;;  %v4727_v33 = vadd.f32 %v7091_v57, %v7089_v24  ;;  %v6776_v5 = vld [vmem:[%s12138_s5 + $0xd4] ss:$8 sps:$4 sm:$0xff]   ;;  %v13097_v53 = vld [vmem:[#allocation60_spill] sm:$0xff]  ;;  %v6774_v40 = vld [vmem:[%s12138_s5 + $0xd0] ss:$8 sps:$4 sm:$0xff]  }
 0x5b0   : > { %7104 = vpow2.f32 %v4629_v21  ;;  %v4531_v43 = vsub.f32 %v11386_v37, %v4456_v23  ;;  %v4532_v56 = vsub.f32 %v11388_v47, %v4456_v23  ;;  %v6767_v47 = vld [vmem:[%s12138_s5 + $0x4] ss:$8 sps:$4 sm:$0xff]   ;;  %5607 = vmatpush1.bf16.msra.mxu1 %v6762_v25  ;;  %v13098_v21 = vld [vmem:[#allocation50_spill] sm:$0xff] }
 0x5b1   : > { %v7093_v51 = vpop.eup %7092  ;;  %7106 = vpow2.f32 %v4631_v26  ;;  %5608 = vmatprep.subr.bf16.mxu1 %v6767_v47 }
 0x5b2   : > { %4728 = vadd.xlane.f32.xlu0 %v4727_v33  ;;  %v7095_v35 = vpop.eup %7094  ;;  %v4633_v16 = vmul.f32 1.442695, %v4531_v43  ;;  %v4635_v11 = vmul.f32 1.442695, %v4532_v56  ;;  %v4795_v62 = vpack.c.bf16 %v7093_v51, %v7089_v24  ;;  %v6779_v56 = vld [vmem:[%s12138_s5 + $0xc4] ss:$8 sps:$4 sm:$0xff]  }
 0x5b3   : > { %3305 = vadd.xlane.f32.xlu1 %v11430_v32  ;;  %v4459_v45 = vpop.xlane.xlu0 %4458  ;;  %v4796_v52 = vpack.c.bf16 %v7095_v35, %v7091_v57  ;;  %v4730_v37 = vadd.f32 %v7095_v35, %v7093_v51  ;;  %v13099_v51 = vld [vmem:[#allocation26_spill] sm:$0xff] }
 0x5b4   : > { %7108 = vpow2.f32 %v4633_v16  ;;  %v4533_v18 = vsub.f32 %v11396_v7, %v4459_v45  ;;  %v4534_v27 = vsub.f32 %v13093_v14, %v4459_v45  ;;  %v6770_v7 = vld [vmem:[%s12138_s5 + $0xf4] ss:$8 sps:$4 sm:$0xff]   ;;  %5609 = vmatpush1.bf16.msra.mxu1 %v6765_v36 }
 0x5b5   : > { %v7097_v44 = vpop.eup %7096  ;;  %7110 = vpow2.f32 %v4635_v11  ;;  %4901 = vmatprep.mubr.bf16.mxu0 %v4796_v52  ;;  %5610 = vmatprep.subr.bf16.mxu1 %v6770_v7  ;;  %v13100_v16 = vld [vmem:[#allocation69_spill] sm:$0xff]  ;;  %v13101_v52 = vld [vmem:[#allocation167_spill] sm:$0xff] }
 0x5b6   : > { %3308 = vadd.xlane.f32.xlu0 %v11440_v3  ;;  %v7099_v32 = vpop.eup %7098  ;;  %v4637_v59 = vmul.f32 1.442695, %v4533_v18  ;;  %v4639_v29 = vmul.f32 1.442695, %v4534_v27  ;;  %v6768_v3 = vld [vmem:[%s12138_s5 + $0xf0] ss:$8 sps:$4 sm:$0xff]  }
 0x5b7   : > { %4731 = vadd.xlane.f32.xlu1 %v4730_v37  ;;  %4902 = vmatmul.mubr.bf16.gmra.mxu0 %v4795_v62  ;;  %v4462_v60 = vpop.xlane.xlu1 %4461  ;;  %v4733_v39 = vadd.f32 %v7099_v32, %v7097_v44  ;;  %v6777_v62 = vld [vmem:[%s12138_s5 + $0xc0] ss:$8 sps:$4 sm:$0xff]   ;;  %v6780_v7 = vld [vmem:[%s12138_s5 + $0xb0] ss:$8 sps:$4 sm:$0xff]  }
 0x5b8   : > { %7112 = vpow2.f32 %v4637_v59  ;;  %v4535_v41 = vsub.f32 %v11406_v38, %v4462_v60  ;;  %v4536_v54 = vsub.f32 %v13094_v58, %v4462_v60  ;;  %5611 = vmatpush2.bf16.msra.mxu1 %v6768_v3  ;;  %v13102_v59 = vld [vmem:[#allocation66_spill] sm:$0xff]  ;;  %v13103_v60 = vld [vmem:[#allocation75_spill] sm:$0xff] }
 0x5b9   : > { %v7101_v55 = vpop.eup %7100  ;;  %7114 = vpow2.f32 %v4639_v29  ;;  %5612 = vmatprep.subr.bf16.mxu1 %v6773_v0 }
 0x5ba   : > { %4734 = vadd.xlane.f32.xlu0 %v4733_v39  ;;  %v7103_v34 = vpop.eup %7102  ;;  %v4641_v17 = vmul.f32 1.442695, %v4535_v41  ;;  %v4643_v22 = vmul.f32 1.442695, %v4536_v54  ;;  %v4797_v13 = vpack.c.bf16 %v7101_v55, %v7097_v44  ;;  %v6782_v44 = vld [vmem:[%s12138_s5 + $0xb4] ss:$8 sps:$4 sm:$0xff]  }
 0x5bb   : > { %3311 = vadd.xlane.f32.xlu1 %v11450_v50  ;;  %v4465_v6 = vpop.xlane.xlu0 %4464  ;;  %v4798_v63 = vpack.c.bf16 %v7103_v34, %v7099_v32  ;;  %v4736_v38 = vadd.f32 %v7103_v34, %v7101_v55  ;;  %v13104_v34 = vld [vmem:[#allocation78_spill] sm:$0xff] }
 0x5bc   : > { %7116 = vpow2.f32 %v4641_v17  ;;  %v4537_v30 = vsub.f32 %v11416_v12, %v4465_v6  ;;  %v4538_v20 = vsub.f32 %v13095_v8, %v4465_v6  ;;  %5613 = vmatpush2.bf16.msra.mxu1 %v6771_v10 }
 0x5bd   : > { %v7105_v31 = vpop.eup %7104  ;;  %7118 = vpow2.f32 %v4643_v22  ;;  %4909 = vmatprep.mubr.bf16.mxu0 %v4798_v63  ;;  %5614 = vmatprep.subr.bf16.mxu1 %v6776_v5 }
 0x5be   : > { %3314 = vadd.xlane.f32.xlu0 %v11460_v42  ;;  %v7107_v50 = vpop.eup %7106  ;;  %v4645_v48 = vmul.f32 1.442695, %v4537_v30  ;;  %v4647_v49 = vmul.f32 1.442695, %v4538_v20  ;;  %v11663_v46 = vpop.f32.mrf.mxu0  ;;  %v13105_v30 = vld [vmem:[#allocation139_spill] sm:$0xff] }
 0x5bf   : > { %4737 = vadd.xlane.f32.xlu1 %v4736_v38  ;;  %4910 = vmatmul.mubr.bf16.gmra.mxu0 %v4797_v13  ;;  %v4468_v12 = vpop.xlane.xlu1 %4467  ;;  %v4739_v4 = vadd.f32 %v7107_v50, %v7105_v31  ;;  %v6785_v38 = vld [vmem:[%s12138_s5 + $0xa4] ss:$8 sps:$4 sm:$0xff]  }
 0x5c0   : > { %7120 = vpow2.f32 %v4645_v48  ;;  %v11668_v2 = vpop.f32.mrf.mxu0  ;;  %v4539_v42 = vsub.f32 %v13096_v1, %v4468_v12  ;;  %v4540_v9 = vsub.f32 %v13097_v53, %v4468_v12  ;;  %5615 = vmatpush2.bf16.msra.mxu1 %v6774_v40  ;;  %v13106_v20 = vld [vmem:[#allocation159_spill] sm:$0xff] }
 0x5c1   : > { %v7109_v19 = vpop.eup %7108  ;;  %7122 = vpow2.f32 %v4647_v49  ;;  %5616 = vmatprep.subr.bf16.mxu1 %v6779_v56  ;;  %v13107_v49 = vld [vmem:[#allocation61_spill] sm:$0xff] }
 0x5c2   : > { %4740 = vadd.xlane.f32.xlu0 %v4739_v4  ;;  %v7111_v61 = vpop.eup %7110  ;;  %v4649_v24 = vmul.f32 1.442695, %v4539_v42  ;;  %v4651_v57 = vmul.f32 1.442695, %v4540_v9  ;;  %v11676_v26 = vpop.f32.mrf.mxu0  ;;  %v4799_v23 = vpack.c.bf16 %v7109_v19, %v7105_v31  ;;  %v6783_v31 = vld [vmem:[%s12138_s5 + $0xa0] ss:$8 sps:$4 sm:$0xff]  }
 0x5c3   : > { %3317 = vadd.xlane.f32.xlu1 %v13098_v21  ;;  %v4471_v33 = vpop.xlane.xlu0 %4470  ;;  %v4800_v28 = vpack.c.bf16 %v7111_v61, %v7107_v50  ;;  %v4742_v43 = vadd.f32 %v7111_v61, %v7109_v19  ;;  %v6788_v9 = vld [vmem:[%s12138_s5 + $0x94] ss:$8 sps:$4 sm:$0xff]   ;;  %v6786_v21 = vld [vmem:[%s12138_s5 + $0x90] ss:$8 sps:$4 sm:$0xff]  }
 0x5c4   : > { %7124 = vpow2.f32 %v4649_v24  ;;  %v11681_v25 = vpop.f32.mrf.mxu0  ;;  %v4541_v35 = vsub.f32 %v13099_v51, %v4471_v33  ;;  %v4542_v11 = vsub.f32 %v13100_v16, %v4471_v33  ;;  %5617 = vmatpush2.bf16.msra.mxu1 %v6777_v62  ;;  %v13108_v19 = vld [vmem:[#allocation165_spill] sm:$0xff]  ;;  %v13109_v24 = vld [vmem:[#allocation71_spill] sm:$0xff] }
 0x5c5   : > { %v7113_v45 = vpop.eup %7112  ;;  %7126 = vpow2.f32 %v4651_v57  ;;  %4917 = vmatprep.mubr.bf16.mxu0 %v4800_v28  ;;  %5618 = vmatprep.subr.bf16.mxu1 %v6782_v44  ;;  %v13112_v44 = vld [vmem:[#allocation20_spill] sm:$0xff] }
 0x5c6   : > { %3320 = vadd.xlane.f32.xlu0 %v13101_v52  ;;  %v7115_v37 = vpop.eup %7114  ;;  %v4653_v47 = vmul.f32 1.442695, %v4541_v35  ;;  %v4655_v18 = vmul.f32 1.442695, %v4542_v11  ;;  %v6341_v14 = vpop.f32.mrf.mxu0 }
 0x5c7   : > { %4743 = vadd.xlane.f32.xlu1 %v4742_v43  ;;  %4918 = vmatmul.mubr.bf16.gmra.mxu0 %v4799_v23  ;;  %v4474_v27 = vpop.xlane.xlu1 %4473  ;;  %v4745_v36 = vadd.f32 %v7115_v37, %v7113_v45 }
 0x5c8   : > { %7128 = vpow2.f32 %v4653_v47  ;;  %v6342_v32 = vpop.f32.mrf.mxu0  ;;  %v4543_v29 = vsub.f32 %v13102_v59, %v4474_v27  ;;  %v4544_v39 = vsub.f32 %v13103_v60, %v4474_v27  ;;  %5619 = vmatpush2.bf16.msra.mxu1 %v6780_v7 }
 0x5c9   : > { %v7117_v41 = vpop.eup %7116  ;;  %7130 = vpow2.f32 %v4655_v18  ;;  %v11697_v58 = vadd.f32 %v6342_v32, %v6341_v14  ;;  %5620 = vmatprep.subr.bf16.mxu1 %v6785_v38  ;;  %v13111_v18 = vld [vmem:[#allocation53_spill] sm:$0xff] }
 0x5ca   : > { %4746 = vadd.xlane.f32.xlu0 %v4745_v36  ;;  %v7119_v54 = vpop.eup %7118  ;;  %v4657_v3 = vmul.f32 1.442695, %v4543_v29  ;;  %v4659_v55 = vmul.f32 1.442695, %v4544_v39  ;;  %v6344_v17 = vpop.f32.mrf.mxu0  ;;  %v4801_v22 = vpack.c.bf16 %v7117_v41, %v7113_v45  ;;  %v6791_v45 = vld [vmem:[%s12138_s5 + $0x84] ss:$8 sps:$4 sm:$0xff]  }
 0x5cb   : > { %3323 = vadd.xlane.f32.xlu1 %v13104_v34  ;;  %v4477_v13 = vpop.xlane.xlu0 %4476  ;;  %v4802_v6 = vpack.c.bf16 %v7119_v54, %v7115_v37  ;;  %v4748_v63 = vadd.f32 %v7119_v54, %v7117_v41  ;;  %v13110_v37 = vld [vmem:[#allocation166_spill] sm:$0xff]  ;;  %v13113_v54 = vld [vmem:[#allocation168_spill] sm:$0xff]  ;;  %v13115_v38 = vld [vmem:[#allocation21_spill] sm:$0xff] }
 0x5cc   : > { %7132 = vpow2.f32 %v4657_v3  ;;  %v6345_v0 = vpop.f32.mrf.mxu0  ;;  %v4545_v8 = vsub.f32 %v13105_v30, %v4477_v13  ;;  %v4546_v10 = vsub.f32 %v13106_v20, %v4477_v13  ;;  %5621 = vmatpush2.bf16.msra.mxu1 %v6783_v31 }
 0x5cd   : > { %v7121_v50 = vpop.eup %7120  ;;  %7134 = vpow2.f32 %v4659_v55  ;;  %v11708_v48 = vadd.f32 %v6345_v0, %v6344_v17  ;;  %4925 = vmatprep.mubr.bf16.mxu0 %v4802_v6  ;;  %5622 = vmatprep.subr.bf16.mxu1 %v6788_v9  ;;  %v13114_v55 = vld [vmem:[#allocation161_spill] sm:$0xff] }
 0x5ce   : > { %3326 = vadd.xlane.f32.xlu0 %v13107_v49  ;;  %v7123_v12 = vpop.eup %7122  ;;  %v4661_v4 = vmul.f32 1.442695, %v4545_v8  ;;  %v4663_v5 = vmul.f32 1.442695, %v4546_v10  ;;  %v6347_v1 = vpop.f32.mrf.mxu0 }
 0x5cf   : > { %4749 = vadd.xlane.f32.xlu1 %v4748_v63  ;;  %4926 = vmatmul.mubr.bf16.gmra.mxu0 %v4801_v22  ;;  %v4480_v42 = vpop.xlane.xlu1 %4479  ;;  %v4751_v53 = vadd.f32 %v7123_v12, %v7121_v50 }
 0x5d0   : > { %7136 = vpow2.f32 %v4661_v4  ;;  %v6348_v40 = vpop.f32.mrf.mxu0  ;;  %v4547_v61 = vsub.f32 %v13108_v19, %v4480_v42  ;;  %v4548_v57 = vsub.f32 %v13109_v24, %v4480_v42  ;;  %5623 = vmatpush2.bf16.msra.mxu1 %v6786_v21  ;;  %v13118_v42 = vld [vmem:[#allocation56_spill] sm:$0xff] }
 0x5d1   : > { %v7125_v23 = vpop.eup %7124  ;;  %7138 = vpow2.f32 %v4663_v5  ;;  %v11719_v33 = vadd.f32 %v6348_v40, %v6347_v1  ;;  %5624 = vmatprep.subr.bf16.mxu1 %v6791_v45 }
 0x5d2   : > { %4752 = vadd.xlane.f32.xlu0 %v4751_v53  ;;  %v7127_v28 = vpop.eup %7126  ;;  %v4665_v43 = vmul.f32 1.442695, %v4547_v61  ;;  %v4667_v56 = vmul.f32 1.442695, %v4548_v57  ;;  %v6350_v51 = vpop.f32.mrf.mxu0  ;;  %v4803_v35 = vpack.c.bf16 %v7125_v23, %v7121_v50  ;;  %v13116_v50 = vld [vmem:[#allocation58_spill] sm:$0xff] }
 0x5d3   : > { %3329 = vadd.xlane.f32.xlu1 %v11510_v15  ;;  %v4483_v16 = vpop.xlane.xlu0 %4482  ;;  %v4804_v11 = vpack.c.bf16 %v7127_v28, %v7123_v12  ;;  %v4754_v62 = vadd.f32 %v7127_v28, %v7125_v23  ;;  %v6789_v15 = vld [vmem:[%s12138_s5 + $0x80] ss:$8 sps:$4 sm:$0xff]   ;;  %v13117_v12 = vld [vmem:[#allocation162_spill] sm:$0xff] }
 0x5d4   : > { %7140 = vpow2.f32 %v4665_v43  ;;  %v6351_v52 = vpop.f32.mrf.mxu0  ;;  %v4549_v47 = vsub.f32 %v13110_v37, %v4483_v16  ;;  %v4550_v14 = vsub.f32 %v13111_v18, %v4483_v16  ;;  %5625 = vmatpush2.bf16.msra.mxu1 %v6789_v15  ;;  %v13119_v43 = vld [vmem:[#allocation163_spill] sm:$0xff] }
 0x5d5   : > { %v7129_v27 = vpop.eup %7128  ;;  %7142 = vpow2.f32 %v4667_v56  ;;  %v11730_v36 = vadd.f32 %v6351_v52, %v6350_v51  ;;  %4933 = vmatprep.mubr.bf16.mxu0 %v4804_v11  ;;  %v13120_v51 = vld [vmem:[#allocation164_spill] sm:$0xff]  ;;  %v13121_v11 = vld [vmem:[#allocation59_spill] sm:$0xff] }
 0x5d6   : > { %3332 = vadd.xlane.f32.xlu0 %v13112_v44  ;;  %v7131_v32 = vpop.eup %7130  ;;  %v4669_v59 = vmul.f32 1.442695, %v4549_v47  ;;  %v4671_v29 = vmul.f32 1.442695, %v4550_v14  ;;  %v6353_v60 = vpop.f32.mrf.mxu0 }
 0x5d7   : > { %4755 = vadd.xlane.f32.xlu1 %v4754_v62  ;;  %4934 = vmatmul.mubr.bf16.gmra.mxu0 %v4803_v35  ;;  %v4486_v39 = vpop.xlane.xlu1 %4485  ;;  %v4757_v7 = vadd.f32 %v7131_v32, %v7129_v27 }
 0x5d8   : > { %7144 = vpow2.f32 %v4669_v59  ;;  %v6354_v41 = vpop.f32.mrf.mxu0  ;;  %v4551_v3 = vsub.f32 %v13113_v54, %v4486_v39  ;;  %v4552_v34 = vsub.f32 %v13114_v55, %v4486_v39 }
 0x5d9   : > { %v7133_v17 = vpop.eup %7132  ;;  %7146 = vpow2.f32 %v4671_v29  ;;  %v11735_v22 = vadd.f32 %v6354_v41, %v6353_v60 }
 0x5da   : > { %4758 = vadd.xlane.f32.xlu0 %v4757_v7  ;;  %v7135_v13 = vpop.eup %7134  ;;  %v4673_v6 = vmul.f32 1.442695, %v4551_v3  ;;  %v4675_v63 = vmul.f32 1.442695, %v4552_v34  ;;  %v6356_v0 = vpop.f32.mrf.mxu0  ;;  %v4805_v30 = vpack.c.bf16 %v7133_v17, %v7129_v27  ;;  %v13123_v3 = vld [vmem:[#allocation55_spill] sm:$0xff] }
 0x5db   : > { %3335 = vadd.xlane.f32.xlu1 %v13115_v38  ;;  %v4489_v8 = vpop.xlane.xlu0 %4488  ;;  %v4806_v20 = vpack.c.bf16 %v7135_v13, %v7131_v32  ;;  %v4760_v10 = vadd.f32 %v7135_v13, %v7133_v17  ;;  %v13122_v32 = vld [vmem:[#allocation52_spill] sm:$0xff] }
 0x5dc   : > { %7148 = vpow2.f32 %v4673_v6  ;;  %v6357_v31 = vpop.f32.mrf.mxu0  ;;  %v4553_v49 = vsub.f32 %v13116_v50, %v4489_v8  ;;  %v4554_v4 = vsub.f32 %v13117_v12, %v4489_v8  ;;  %v6337_v8 = vadd.f32 %v11668_v2, %v11663_v46 }
 0x5dd   : > { %v7137_v5 = vpop.eup %7136  ;;  %7150 = vpow2.f32 %v4675_v63  ;;  %v11740_v1 = vadd.f32 %v6357_v31, %v6356_v0  ;;  %4941 = vmatprep.mubr.bf16.mxu0 %v4806_v20  ;;  %v13124_v0 = vld [vmem:[#allocation15_spill] sm:$0xff] }
 0x5de   : > { %3338 = vadd.xlane.f32.xlu0 %v13118_v42  ;;  %v7139_v53 = vpop.eup %7138  ;;  %v4677_v9 = vmul.f32 1.442695, %v4553_v49  ;;  %v4679_v40 = vmul.f32 1.442695, %v4554_v4  ;;  %v6359_v19 = vpop.f32.mrf.mxu0  ;;  %v13125_v42 = vld [vmem:[#allocation19_spill] sm:$0xff] }
 0x5df   : > { %4761 = vadd.xlane.f32.xlu1 %v4760_v10  ;;  %4942 = vmatmul.mubr.bf16.gmra.mxu0 %v4805_v30  ;;  %v3261_v61 = vpop.xlane.xlu0 %3260  ;;  %v4763_v24 = vadd.f32 %v7139_v53, %v7137_v5 }
 0x5e0   : > { %7152 = vpow2.f32 %v4677_v9  ;;  %v6360_v57 = vpop.f32.mrf.mxu0  ;;  %v4492_v21 = vpop.xlane.xlu1 %4491 }
 0x5e1   : > { %v7141_v23 = vpop.eup %7140  ;;  %7154 = vpow2.f32 %v4679_v40  ;;  %v11743_v28 = vadd.f32 %v6360_v57, %v6359_v19  ;;  %v4555_v56 = vsub.f32 %v13119_v43, %v4492_v21  ;;  %v4556_v35 = vsub.f32 %v13120_v51, %v4492_v21 }
 0x5e2   : > { %4764 = vadd.xlane.f32.xlu0 %v4763_v24  ;;  %v7143_v16 = vpop.eup %7142  ;;  %7156 = vrcp.f32 %v3261_v61  ;;  %v6362_v62 = vpop.f32.mrf.mxu0  ;;  %v4807_v45 = vpack.c.bf16 %v7141_v23, %v7137_v5  ;;  %v6340_v40 = vadd.f32 %v11681_v25, %v11676_v26 }
 0x5e3   : > { %3341 = vadd.xlane.f32.xlu1 %v13121_v11  ;;  %v4681_v52 = vmul.f32 1.442695, %v4555_v56  ;;  %v4683_v37 = vmul.f32 1.442695, %v4556_v35  ;;  %v4808_v47 = vpack.c.bf16 %v7143_v16, %v7139_v53  ;;  %v4766_v18 = vadd.f32 %v7143_v16, %v7141_v23 }
 0x5e4   : > { %v6363_v14 = vpop.f32.mrf.mxu0  ;;  %v3264_v15 = vpop.xlane.xlu1 %3263 }
 0x5e5   : > { %v7145_v27 = vpop.eup %7144  ;;  %7158 = vpow2.f32 %v4681_v52  ;;  %v11748_v44 = vadd.f32 %v6363_v14, %v6362_v62  ;;  %4949 = vmatprep.mubr.bf16.mxu0 %v4808_v47 }
 0x5e6   : > { %3344 = vadd.xlane.f32.xlu0 %v13122_v32  ;;  %v7147_v59 = vpop.eup %7146  ;;  %7160 = vpow2.f32 %v4683_v37  ;;  %v6365_v29 = vpop.f32.mrf.mxu0 }
 0x5e7   : > { %4767 = vadd.xlane.f32.xlu1 %v4766_v18  ;;  %4950 = vmatmul.mubr.bf16.gmra.mxu0 %v4807_v45  ;;  %7162 = vrcp.f32 %v3264_v15  ;;  %v4769_v60 = vadd.f32 %v7147_v59, %v7145_v27 }
 0x5e8   : > { %v6366_v39 = vpop.f32.mrf.mxu0 }
 0x5e9   : > { %v7149_v7 = vpop.eup %7148  ;;  %v11751_v41 = vadd.f32 %v6366_v39, %v6365_v29 }
 0x5ea   : > { %4770 = vadd.xlane.f32.xlu0 %v4769_v60  ;;  %v7151_v54 = vpop.eup %7150  ;;  %v6368_v55 = vpop.f32.mrf.mxu0  ;;  %v4809_v34 = vpack.c.bf16 %v7149_v7, %v7145_v27 }
 0x5eb   : > { %3347 = vadd.xlane.f32.xlu1 %v13123_v3  ;;  %v4810_v17 = vpack.c.bf16 %v7151_v54, %v7147_v59  ;;  %v4772_v13 = vadd.f32 %v7151_v54, %v7149_v7 }
 0x5ec   : > { %v6369_v6 = vpop.f32.mrf.mxu0 }
 0x5ed   : > { %v7153_v63 = vpop.eup %7152  ;;  %v11754_v38 = vadd.f32 %v6369_v6, %v6368_v55  ;;  %4957 = vmatprep.mubr.bf16.mxu0 %v4810_v17 }
 0x5ee   : > { %3350 = vadd.xlane.f32.xlu0 %v13124_v0  ;;  %v7155_v30 = vpop.eup %7154  ;;  %v6371_v20 = vpop.f32.mrf.mxu0 }
 0x5ef   : > { %4773 = vadd.xlane.f32.xlu1 %v4772_v13  ;;  %4958 = vmatmul.mubr.bf16.gmra.mxu0 %v4809_v34  ;;  %v7157_v10 = vpop.eup %7156  ;;  %v4775_v31 = vadd.f32 %v7155_v30, %v7153_v63 }
 0x5f0   : > { %v3580_v50 = vmul.f32 %v7157_v10, %v6337_v8  ;;  %v6372_v49 = vpop.f32.mrf.mxu0 }
 0x5f1   : > { %v11759_v12 = vadd.f32 %v6372_v49, %v6371_v20 }
 0x5f2   : > { %4776 = vadd.xlane.f32.xlu0 %v4775_v31  ;;  %v7159_v4 = vpop.eup %7158  ;;  %v6207_v5 = vpack.c.bf16 %v3580_v50, %v3580_v50  ;;  %v6374_v53 = vpop.f32.mrf.mxu0 }
 0x5f3   : > { %3353 = vadd.xlane.f32.xlu1 %v13125_v42  ;;  %v7161_v9 = vpop.eup %7160  ;;  %v4811_v46 = vpack.c.bf16 %v7159_v4, %v7153_v63 }
 0x5f4   : > { %v7163_v2 = vpop.eup %7162  ;;  %3740 = vst [vmem:[#allocation2] sm:$0xf] %v6207_v5  ;;  %v6375_v19 = vpop.f32.mrf.mxu0  ;;  %v4812_v61 = vpack.c.bf16 %v7161_v9, %v7155_v30  ;;  %v4778_v24 = vadd.f32 %v7161_v9, %v7159_v4 }
 0x5f5   : > { %v3581_v57 = vmul.f32 %v7163_v2, %v6340_v40  ;;  %v11764_v21 = vadd.f32 %v6375_v19, %v6374_v53 }
 0x5f6   : > { %4965 = vmatprep.mubr.bf16.mxu0 %v4812_v61  ;;  %v6377_v23 = vpop.f32.mrf.mxu0 }
 0x5f7   : > { %4779 = vadd.xlane.f32.xlu1 %v4778_v24  ;;  %v6208_v43 = vpack.c.bf16 %v3581_v57, %v3581_v57  ;;  %4966 = vmatmul.mubr.bf16.gmra.mxu0 %v4811_v46 }
 0x5f8   : > { %v6378_v56 = vpop.f32.mrf.mxu0 }
 0x5f9   : > { %3741 = vst [vmem:[#allocation2 + $0x8] sm:$0xf] %v6208_v43  ;;  %v11766_v51 = vadd.f32 %v6378_v56, %v6377_v23 }
 0x5fa   : > { %v6380_v35 = vpop.f32.mrf.mxu0 }
 0x5fc   : > { %v6381_v26 = vpop.f32.mrf.mxu0 }
 0x5fd   : > { %v11768_v25 = vadd.f32 %v6381_v26, %v6380_v35 }
 0x5fe   : > { %v6383_v16 = vpop.f32.mrf.mxu0 }
 0x600   : > { %v6384_v11 = vpop.f32.mrf.mxu0 }
 0x601   : > { %v11770_v62 = vadd.f32 %v6384_v11, %v6383_v16 }
 0x602   : > { %v6386_v45 = vpop.f32.mrf.mxu0  ;;  %v11772_v52 = vpop.xlane.xlu0 %4686 }
 0x604   : > { %v6387_v37 = vpop.f32.mrf.mxu0 }
 0x605   : > { %v11774_v47 = vadd.f32 %v6387_v37, %v6386_v45 }
 0x606   : > { %v6389_v18 = vpop.f32.mrf.mxu0  ;;  %v3267_v14 = vpop.xlane.xlu0 %3266 }
 0x607   : > { %7164 = vrcp.f32 %v3267_v14  ;;  %v11776_v15 = vpop.xlane.xlu1 %4689 }
 0x608   : > { %v6390_v27 = vpop.f32.mrf.mxu0 }
 0x609   : > { %v11778_v32 = vadd.f32 %v6390_v27, %v6389_v18 }
 0x60a   : > { %v6392_v59 = vpop.f32.mrf.mxu0  ;;  %v11780_v29 = vpop.xlane.xlu0 %4692 }
 0x60b   : > { %v3270_v60 = vpop.xlane.xlu1 %3269 }
 0x60c   : > { %7166 = vrcp.f32 %v3270_v60  ;;  %v6393_v39 = vpop.f32.mrf.mxu0 }
 0x60d   : > { %v11782_v7 = vadd.f32 %v6393_v39, %v6392_v59 }
 0x60e   : > { %v6395_v54 = vpop.f32.mrf.mxu0  ;;  %v3273_v3 = vpop.xlane.xlu0 %3272 }
 0x60f   : > { %7168 = vrcp.f32 %v3273_v3  ;;  %v11784_v55 = vpop.xlane.xlu1 %4695 }
 0x610   : > { %v6396_v34 = vpop.f32.mrf.mxu0 }
 0x611   : > { %v11786_v17 = vadd.f32 %v6396_v34, %v6395_v54 }
 0x612   : > { %v6398_v13 = vpop.f32.mrf.mxu0 }
 0x613   : > { %v11788_v6 = vpop.xlane.xlu0 %4698  ;;  %v3276_v63 = vpop.xlane.xlu1 %3275 }
 0x614   : > { %v7165_v0 = vpop.eup %7164  ;;  %7170 = vrcp.f32 %v3276_v63  ;;  %v6399_v30 = vpop.f32.mrf.mxu0 }
 0x615   : > { %v3582_v8 = vmul.f32 %v7165_v0, %v11697_v58  ;;  %v11791_v20 = vadd.f32 %v6399_v30, %v6398_v13 }
 0x616   : > { %v6401_v10 = vpop.f32.mrf.mxu0 }
 0x617   : > { %v3279_v31 = vpop.xlane.xlu0 %3278  ;;  %v6209_v50 = vpack.c.bf16 %v3582_v8, %v3582_v8 }
 0x618   : > { %7172 = vrcp.f32 %v3279_v31  ;;  %v11793_v49 = vpop.xlane.xlu1 %4701  ;;  %v6402_v4 = vpop.f32.mrf.mxu0 }
 0x619   : > { %v7167_v5 = vpop.eup %7166  ;;  %3742 = vst [vmem:[#allocation2 + $0x10] sm:$0xf] %v6209_v50  ;;  %v11795_v42 = vadd.f32 %v6402_v4, %v6401_v10 }
 0x61a   : > { %v3583_v53 = vmul.f32 %v7167_v5, %v11708_v48  ;;  %v6404_v9 = vpop.f32.mrf.mxu0 }
 0x61b   : > { %v11798_v40 = vpop.xlane.xlu0 %4704 }
 0x61c   : > { %v3282_v46 = vpop.xlane.xlu1 %3281  ;;  %v7169_v58 = vpop.eup %7168  ;;  %v6210_v2 = vpack.c.bf16 %v3583_v53, %v3583_v53 }
 0x61d   : > { %7174 = vrcp.f32 %v3282_v46  ;;  %v6405_v19 = vpop.f32.mrf.mxu0  ;;  %v3584_v61 = vmul.f32 %v7169_v58, %v11719_v33 }
 0x61e   : > { %v11801_v24 = vadd.f32 %v6405_v19, %v6404_v9  ;;  %3743 = vst [vmem:[#allocation2 + $0x18] sm:$0xf] %v6210_v2 }
 0x61f   : > { %v6407_v57 = vpop.f32.mrf.mxu0  ;;  %v3285_v23 = vpop.xlane.xlu0 %3284  ;;  %v6211_v43 = vpack.c.bf16 %v3584_v61, %v3584_v61 }
 0x620   : > { %7176 = vrcp.f32 %v3285_v23  ;;  %v11803_v56 = vpop.xlane.xlu1 %4707 }
 0x621   : > { %v6408_v48 = vpop.f32.mrf.mxu0  ;;  %v7171_v35 = vpop.eup %7170  ;;  %3744 = vst [vmem:[#allocation2 + $0x20] sm:$0xf] %v6211_v43 }
 0x622   : > { %v11805_v26 = vadd.f32 %v6408_v48, %v6407_v57  ;;  %v3585_v16 = vmul.f32 %v7171_v35, %v11730_v36 }
 0x623   : > { %v6410_v11 = vpop.f32.mrf.mxu0  ;;  %v11808_v45 = vpop.xlane.xlu0 %4710 }
 0x624   : > { %v3288_v33 = vpop.xlane.xlu1 %3287  ;;  %v6212_v18 = vpack.c.bf16 %v3585_v16, %v3585_v16 }
 0x625   : > { %v7173_v37 = vpop.eup %7172  ;;  %7178 = vrcp.f32 %v3288_v33  ;;  %v6411_v14 = vpop.f32.mrf.mxu0 }
 0x626   : > { %v3586_v27 = vmul.f32 %v7173_v37, %v11735_v22  ;;  %v11811_v59 = vadd.f32 %v6411_v14, %v6410_v11  ;;  %3745 = vst [vmem:[#allocation2 + $0x28] sm:$0xf] %v6212_v18 }
 0x627   : > { %v6413_v60 = vpop.f32.mrf.mxu0  ;;  %v3291_v39 = vpop.xlane.xlu0 %3290 }
 0x628   : > { %v6213_v54 = vpack.c.bf16 %v3586_v27, %v3586_v27  ;;  %7180 = vrcp.f32 %v3291_v39  ;;  %v11813_v3 = vpop.xlane.xlu1 %4713 }
 0x629   : > { %v6414_v36 = vpop.f32.mrf.mxu0 }
 0x62a   : > { %v7175_v34 = vpop.eup %7174  ;;  %3746 = vst [vmem:[#allocation2 + $0x30] sm:$0xf] %v6213_v54  ;;  %v11815_v13 = vadd.f32 %v6414_v36, %v6413_v60 }
 0x62b   : > { %v3587_v63 = vmul.f32 %v7175_v34, %v11740_v1  ;;  %v6416_v0 = vpop.f32.mrf.mxu0  ;;  %v11818_v30 = vpop.xlane.xlu0 %4716 }
 0x62c   : > { %v3294_v22 = vpop.xlane.xlu1 %3293 }
 0x62d   : > { %v7177_v8 = vpop.eup %7176  ;;  %v6214_v10 = vpack.c.bf16 %v3587_v63, %v3587_v63  ;;  %7182 = vrcp.f32 %v3294_v22  ;;  %v6417_v31 = vpop.f32.mrf.mxu0 }
 0x62e   : > { %v3588_v50 = vmul.f32 %v7177_v8, %v11743_v28  ;;  %v11821_v4 = vadd.f32 %v6417_v31, %v6416_v0 }
 0x62f   : > { %3747 = vst [vmem:[#allocation2 + $0x38] sm:$0xf] %v6214_v10  ;;  %v6419_v5 = vpop.f32.mrf.mxu0  ;;  %v3297_v53 = vpop.xlane.xlu0 %3296 }
 0x630   : > { %v6215_v9 = vpack.c.bf16 %v3588_v50, %v3588_v50  ;;  %7184 = vrcp.f32 %v3297_v53  ;;  %v11823_v46 = vpop.xlane.xlu1 %4719 }
 0x631   : > { %v6420_v1 = vpop.f32.mrf.mxu0 }
 0x632   : > { %v7179_v58 = vpop.eup %7178  ;;  %3748 = vst [vmem:[#allocation2 + $0x40] sm:$0xf] %v6215_v9  ;;  %v11825_v2 = vadd.f32 %v6420_v1, %v6419_v5 }
 0x633   : > { %v3589_v19 = vmul.f32 %v7179_v58, %v11748_v44  ;;  %v6422_v61 = vpop.f32.mrf.mxu0  ;;  %v11828_v57 = vpop.xlane.xlu0 %4722 }
 0x634   : > { %v3300_v28 = vpop.xlane.xlu1 %3299 }
 0x635   : > { %v7181_v23 = vpop.eup %7180  ;;  %v6216_v43 = vpack.c.bf16 %v3589_v19, %v3589_v19  ;;  %7186 = vrcp.f32 %v3300_v28  ;;  %v6423_v48 = vpop.f32.mrf.mxu0 }
 0x636   : > { %7188 = vrcp.f32 %v11772_v52  ;;  %v3590_v35 = vmul.f32 %v7181_v23, %v11751_v41  ;;  %v11832_v16 = vadd.f32 %v6423_v48, %v6422_v61 }
 0x637   : > { %3749 = vst [vmem:[#allocation2 + $0x48] sm:$0xf] %v6216_v43  ;;  %v3303_v11 = vpop.xlane.xlu0 %3302  ;;  %v6425_v33 = vpop.f32.mrf.mxu0 }
 0x638   : > { %v6217_v37 = vpack.c.bf16 %v3590_v35, %v3590_v35  ;;  %7190 = vrcp.f32 %v3303_v11  ;;  %v11834_v44 = vpop.xlane.xlu1 %4725 }
 0x639   : > { %v6426_v18 = vpop.f32.mrf.mxu0  ;;  %7192 = vrcp.f32 %v11776_v15 }
 0x63a   : > { %v7183_v14 = vpop.eup %7182  ;;  %3750 = vst [vmem:[#allocation2 + $0x50] sm:$0xf] %v6217_v37  ;;  %v11837_v27 = vadd.f32 %v6426_v18, %v6425_v33 }
 0x63b   : > { %v3591_v52 = vmul.f32 %v7183_v14, %v11754_v38  ;;  %v11840_v60 = vpop.xlane.xlu0 %4728  ;;  %v6428_v41 = vpop.f32.mrf.mxu0 }
 0x63c   : > { %v3306_v39 = vpop.xlane.xlu1 %3305 }
 0x63d   : > { %v7185_v54 = vpop.eup %7184  ;;  %v6218_v36 = vpack.c.bf16 %v3591_v52, %v3591_v52  ;;  %7194 = vrcp.f32 %v3306_v39  ;;  %v6429_v34 = vpop.f32.mrf.mxu0 }
 0x63e   : > { %7196 = vrcp.f32 %v11780_v29  ;;  %v3592_v63 = vmul.f32 %v7185_v54, %v11759_v12  ;;  %v11844_v0 = vadd.f32 %v6429_v34, %v6428_v41 }
 0x63f   : > { %3751 = vst [vmem:[#allocation2 + $0x58] sm:$0xf] %v6218_v36  ;;  %v3309_v15 = vpop.xlane.xlu0 %3308  ;;  %v6495_v22 = vpop.f32.mrf.mxu0 }
 0x640   : > { %v6219_v8 = vpack.c.bf16 %v3592_v63, %v3592_v63  ;;  %7198 = vrcp.f32 %v3309_v15  ;;  %v11846_v38 = vpop.xlane.xlu1 %4731 }
 0x641   : > { %v6496_v10 = vpop.f32.mrf.mxu0  ;;  %7200 = vrcp.f32 %v11784_v55 }
 0x642   : > { %v7187_v31 = vpop.eup %7186  ;;  %3752 = vst [vmem:[#allocation2 + $0x60] sm:$0xf] %v6219_v8  ;;  %v6497_v50 = vadd.f32 %v6496_v10, %v6495_v22 }
 0x643   : > { %v7189_v5 = vpop.eup %7188  ;;  %v3593_v29 = vmul.f32 %v7187_v31, %v11764_v21  ;;  %v11850_v53 = vpop.xlane.xlu0 %4734 }
 0x644   : > { %v6498_v12 = vpop.f32.mrf.mxu0  ;;  %v5006_v9 = vmul.f32 %v7189_v5, %v6497_v50  ;;  %v3312_v1 = vpop.xlane.xlu1 %3311 }
 0x645   : > { %v7191_v58 = vpop.eup %7190  ;;  %v6220_v19 = vpack.c.bf16 %v3593_v29, %v3593_v29  ;;  %7202 = vrcp.f32 %v3312_v1 }
 0x646   : > { %v6499_v61 = vpop.f32.mrf.mxu0  ;;  %7204 = vrcp.f32 %v11788_v6  ;;  %v3594_v28 = vmul.f32 %v7191_v58, %v11766_v51  ;;  %v6239_v23 = vpack.c.bf16 %v5006_v9, %v5006_v9  ;;  %v7193_v43 = vpop.eup %7192 }
 0x647   : > { %v6500_v55 = vadd.f32 %v6499_v61, %v6498_v12  ;;  %3753 = vst [vmem:[#allocation2 + $0x68] sm:$0xf] %v6220_v19  ;;  %v3315_v48 = vpop.xlane.xlu0 %3314 }
 0x648   : > { %v6501_v35 = vpop.f32.mrf.mxu0  ;;  %v6221_v21 = vpack.c.bf16 %v3594_v28, %v3594_v28  ;;  %5166 = vst [vmem:[#allocation2 + $0x4] sm:$0xf] %v6239_v23  ;;  %7206 = vrcp.f32 %v3315_v48  ;;  %v11854_v33 = vpop.xlane.xlu1 %4737  ;;  %v6792_v28 = vld [vmem:[#allocation2] ss:$8 sps:$4 sm:$0xff]  }
 0x649   : > { %v5007_v11 = vmul.f32 %v7193_v43, %v6500_v55  ;;  %7208 = vrcp.f32 %v11793_v49 }
 0x64a   : > { %v6502_v37 = vpop.f32.mrf.mxu0  ;;  %v7195_v18 = vpop.eup %7194  ;;  %3754 = vst [vmem:[#allocation2 + $0x70] sm:$0xf] %v6221_v21 }
 0x64b   : > { %v6240_v6 = vpack.c.bf16 %v5007_v11, %v5007_v11  ;;  %v6503_v14 = vadd.f32 %v6502_v37, %v6501_v35  ;;  %v7197_v51 = vpop.eup %7196  ;;  %v3595_v52 = vmul.f32 %v7195_v18, %v11768_v25  ;;  %v11858_v41 = vpop.xlane.xlu0 %4740 }
 0x64c   : > { %v6504_v39 = vpop.f32.mrf.mxu0  ;;  %v3318_v36 = vpop.xlane.xlu1 %3317 }
 0x64d   : > { %5167 = vst [vmem:[#allocation2 + $0xc] sm:$0xf] %v6240_v6  ;;  %v5008_v54 = vmul.f32 %v7197_v51, %v6503_v14  ;;  %v7199_v34 = vpop.eup %7198  ;;  %v6222_v63 = vpack.c.bf16 %v3595_v52, %v3595_v52  ;;  %7210 = vrcp.f32 %v3318_v36 }
 0x64e   : > { %v6505_v15 = vpop.f32.mrf.mxu0  ;;  %7212 = vrcp.f32 %v11798_v40  ;;  %v3596_v49 = vmul.f32 %v7199_v34, %v11770_v62  ;;  %v7201_v10 = vpop.eup %7200 }
 0x64f   : > { %v6241_v22 = vpack.c.bf16 %v5008_v54, %v5008_v54  ;;  %v6506_v8 = vadd.f32 %v6505_v15, %v6504_v39  ;;  %3755 = vst [vmem:[#allocation2 + $0x78] sm:$0xf] %v6222_v63  ;;  %v3321_v31 = vpop.xlane.xlu0 %3320 }
 0x650   : > { %v6507_v25 = vpop.f32.mrf.mxu0  ;;  %v6223_v50 = vpack.c.bf16 %v3596_v49, %v3596_v49  ;;  %7214 = vrcp.f32 %v3321_v31  ;;  %v11862_v29 = vpop.xlane.xlu1 %4743  ;;  %v6795_v49 = vld [vmem:[#allocation2 + $0x10] ss:$8 sps:$4 sm:$0xff]  }
 0x651   : > { %5168 = vst [vmem:[#allocation2 + $0x14] sm:$0xf] %v6241_v22  ;;  %v5009_v5 = vmul.f32 %v7201_v10, %v6506_v8  ;;  %7216 = vrcp.f32 %v11803_v56 }
 0x652   : > { %v6508_v12 = vpop.f32.mrf.mxu0  ;;  %v7203_v9 = vpop.eup %7202  ;;  %3756 = vst [vmem:[#allocation2 + $0x80] sm:$0xf] %v6223_v50 }
 0x653   : > { %v6242_v40 = vpack.c.bf16 %v5009_v5, %v5009_v5  ;;  %v6509_v1 = vadd.f32 %v6508_v12, %v6507_v25  ;;  %v7205_v62 = vpop.eup %7204  ;;  %v3597_v58 = vmul.f32 %v7203_v9, %v11774_v47  ;;  %v11866_v19 = vpop.xlane.xlu0 %4746 }
 0x654   : > { %v6510_v61 = vpop.f32.mrf.mxu0  ;;  %v6794_v23 = vld [vmem:[#allocation2 + $0x4] ss:$8 sps:$4 sm:$0xff]   ;;  %v3324_v43 = vpop.xlane.xlu1 %3323 }
 0x655   : > { %5169 = vst [vmem:[#allocation2 + $0x1c] sm:$0xf] %v6242_v40  ;;  %v5010_v55 = vmul.f32 %v7205_v62, %v6509_v1  ;;  %v7207_v48 = vpop.eup %7206  ;;  %v6224_v35 = vpack.c.bf16 %v3597_v58, %v3597_v58  ;;  %7218 = vrcp.f32 %v3324_v43  ;;  %5626 = vmatprep.mubr.bf16.mxu1 %v6794_v23 }
 0x656   : > { %v6511_v21 = vpop.f32.mrf.mxu0  ;;  %7220 = vrcp.f32 %v11808_v45  ;;  %v3598_v56 = vmul.f32 %v7207_v48, %v11778_v32  ;;  %5627 = vmatmul.mubr.bf16.vlgmr.msra.gmra.mxu1 %v6792_v28  ;;  %v7209_v47 = vpop.eup %7208 }
 0x657   : > { %v6243_v11 = vpack.c.bf16 %v5010_v55, %v5010_v55  ;;  %v6512_v37 = vadd.f32 %v6511_v21, %v6510_v61  ;;  %3757 = vst [vmem:[#allocation2 + $0x88] sm:$0xf] %v6224_v35  ;;  %v3327_v18 = vpop.xlane.xlu0 %3326  ;;  %v6798_v35 = vld [vmem:[#allocation2 + $0x20] ss:$8 sps:$4 sm:$0xff]  }
 0x658   : > { %v6513_v6 = vpop.f32.mrf.mxu0  ;;  %v6225_v14 = vpack.c.bf16 %v3598_v56, %v3598_v56  ;;  %7222 = vrcp.f32 %v3327_v18  ;;  %v11870_v52 = vpop.xlane.xlu1 %4749 }
 0x659   : > { %5170 = vst [vmem:[#allocation2 + $0x24] sm:$0xf] %v6243_v11  ;;  %v5011_v51 = vmul.f32 %v7209_v47, %v6512_v37  ;;  %7224 = vrcp.f32 %v11813_v3 }
 0x65a   : > { %v6514_v39 = vpop.f32.mrf.mxu0  ;;  %v7211_v54 = vpop.eup %7210  ;;  %3758 = vst [vmem:[#allocation2 + $0x90] sm:$0xf] %v6225_v14 }
 0x65b   : > { %v6244_v45 = vpack.c.bf16 %v5011_v51, %v5011_v51  ;;  %v6515_v32 = vadd.f32 %v6514_v39, %v6513_v6  ;;  %v7213_v36 = vpop.eup %7212  ;;  %v3599_v34 = vmul.f32 %v7211_v54, %v11782_v7  ;;  %v11874_v63 = vpop.xlane.xlu0 %4752 }
 0x65c   : > { %v6516_v15 = vpop.f32.mrf.mxu0  ;;  %v6797_v22 = vld [vmem:[#allocation2 + $0x14] ss:$8 sps:$4 sm:$0xff]   ;;  %v3330_v10 = vpop.xlane.xlu1 %3329 }
 0x65d   : > { %5171 = vst [vmem:[#allocation2 + $0x2c] sm:$0xf] %v6244_v45  ;;  %v5012_v8 = vmul.f32 %v7213_v36, %v6515_v32  ;;  %v7215_v31 = vpop.eup %7214  ;;  %v6226_v25 = vpack.c.bf16 %v3599_v34, %v3599_v34  ;;  %7226 = vrcp.f32 %v3330_v10  ;;  %5636 = vmatprep.mubr.bf16.mxu1 %v6797_v22  ;;  %v6801_v10 = vld [vmem:[#allocation2 + $0x30] ss:$8 sps:$4 sm:$0xff]  }
 0x65e   : > { %v6517_v50 = vpop.f32.mrf.mxu0  ;;  %7228 = vrcp.f32 %v11818_v30  ;;  %v3600_v3 = vmul.f32 %v7215_v31, %v11786_v17  ;;  %5637 = vmatmul.mubr.bf16.gmra.mxu1 %v6795_v49  ;;  %v7217_v7 = vpop.eup %7216 }
 0x65f   : > { %v6245_v5 = vpack.c.bf16 %v5012_v8, %v5012_v8  ;;  %v6518_v12 = vadd.f32 %v6517_v50, %v6516_v15  ;;  %3759 = vst [vmem:[#allocation2 + $0x98] sm:$0xf] %v6226_v25  ;;  %v3333_v9 = vpop.xlane.xlu0 %3332 }
 0x660   : > { %v6519_v40 = vpop.f32.mrf.mxu0  ;;  %v6227_v1 = vpack.c.bf16 %v3600_v3, %v3600_v3  ;;  %7230 = vrcp.f32 %v3333_v9  ;;  %v11878_v58 = vpop.xlane.xlu1 %4755 }
 0x661   : > { %5172 = vst [vmem:[#allocation2 + $0x34] sm:$0xf] %v6245_v5  ;;  %v5013_v62 = vmul.f32 %v7217_v7, %v6518_v12  ;;  %7232 = vrcp.f32 %v11823_v46 }
 0x662   : > { %v6520_v61 = vpop.f32.mrf.mxu0  ;;  %v7219_v28 = vpop.eup %7218  ;;  %3760 = vst [vmem:[#allocation2 + $0xa0] sm:$0xf] %v6227_v1 }
 0x663   : > { %v6246_v30 = vpack.c.bf16 %v5013_v62, %v5013_v62  ;;  %v6521_v17 = vadd.f32 %v6520_v61, %v6519_v40  ;;  %v7221_v23 = vpop.eup %7220  ;;  %v3601_v55 = vmul.f32 %v7219_v28, %v11791_v20  ;;  %v11882_v43 = vpop.xlane.xlu0 %4758 }
 0x664   : > { %v6522_v48 = vpop.f32.mrf.mxu0  ;;  %v6800_v21 = vld [vmem:[#allocation2 + $0x24] ss:$8 sps:$4 sm:$0xff]   ;;  %v3336_v11 = vpop.xlane.xlu1 %3335 }
 0x665   : > { %5173 = vst [vmem:[#allocation2 + $0x3c] sm:$0xf] %v6246_v30  ;;  %v5014_v56 = vmul.f32 %v7221_v23, %v6521_v17  ;;  %v7223_v37 = vpop.eup %7222  ;;  %v6228_v47 = vpack.c.bf16 %v3601_v55, %v3601_v55  ;;  %7234 = vrcp.f32 %v3336_v11  ;;  %5646 = vmatprep.mubr.bf16.mxu1 %v6800_v21  ;;  %v6804_v21 = vld [vmem:[#allocation2 + $0x40] ss:$8 sps:$4 sm:$0xff]  }
 0x666   : > { %v6523_v18 = vpop.f32.mrf.mxu0  ;;  %7236 = vrcp.f32 %v11828_v57  ;;  %v3602_v46 = vmul.f32 %v7223_v37, %v11795_v42  ;;  %5647 = vmatmul.mubr.bf16.gmra.mxu1 %v6798_v35  ;;  %v7225_v20 = vpop.eup %7224 }
 0x667   : > { %v6247_v6 = vpack.c.bf16 %v5014_v56, %v5014_v56  ;;  %v6524_v14 = vadd.f32 %v6523_v18, %v6522_v48  ;;  %3761 = vst [vmem:[#allocation2 + $0xa8] sm:$0xf] %v6228_v47  ;;  %v3339_v51 = vpop.xlane.xlu0 %3338 }
 0x668   : > { %v6525_v39 = vpop.f32.mrf.mxu0  ;;  %v6229_v54 = vpack.c.bf16 %v3602_v46, %v3602_v46  ;;  %7238 = vrcp.f32 %v3339_v51  ;;  %v11886_v32 = vpop.xlane.xlu1 %4761 }
 0x669   : > { %5174 = vst [vmem:[#allocation2 + $0x44] sm:$0xf] %v6247_v6  ;;  %v5015_v45 = vmul.f32 %v7225_v20, %v6524_v14  ;;  %7240 = vrcp.f32 %v11834_v44 }
 0x66a   : > { %v6526_v36 = vpop.f32.mrf.mxu0  ;;  %v7227_v34 = vpop.eup %7226  ;;  %3762 = vst [vmem:[#allocation2 + $0xb0] sm:$0xf] %v6229_v54 }
 0x66b   : > { %v6248_v57 = vpack.c.bf16 %v5015_v45, %v5015_v45  ;;  %v6527_v42 = vadd.f32 %v6526_v36, %v6525_v39  ;;  %v7229_v15 = vpop.eup %7228  ;;  %v3603_v49 = vmul.f32 %v7227_v34, %v11801_v24  ;;  %v11890_v22 = vpop.xlane.xlu0 %4764 }
 0x66c   : > { %v6528_v8 = vpop.f32.mrf.mxu0  ;;  %v6803_v31 = vld [vmem:[#allocation2 + $0x34] ss:$8 sps:$4 sm:$0xff]   ;;  %v3342_v50 = vpop.xlane.xlu1 %3341 }
 0x66d   : > { %5175 = vst [vmem:[#allocation2 + $0x4c] sm:$0xf] %v6248_v57  ;;  %v5016_v25 = vmul.f32 %v7229_v15, %v6527_v42  ;;  %v7231_v3 = vpop.eup %7230  ;;  %v6230_v5 = vpack.c.bf16 %v3603_v49, %v3603_v49  ;;  %7242 = vrcp.f32 %v3342_v50  ;;  %5656 = vmatprep.mubr.bf16.mxu1 %v6803_v31  ;;  %v6807_v49 = vld [vmem:[#allocation2 + $0x50] ss:$8 sps:$4 sm:$0xff]  }
 0x66e   : > { %v6529_v12 = vpop.f32.mrf.mxu0  ;;  %7244 = vrcp.f32 %v11840_v60  ;;  %v3604_v44 = vmul.f32 %v7231_v3, %v11805_v26  ;;  %5657 = vmatmul.mubr.bf16.gmra.mxu1 %v6801_v10  ;;  %v7233_v24 = vpop.eup %7232 }
 0x66f   : > { %v6249_v7 = vpack.c.bf16 %v5016_v25, %v5016_v25  ;;  %v6530_v9 = vadd.f32 %v6529_v12, %v6528_v8  ;;  %3763 = vst [vmem:[#allocation2 + $0xb8] sm:$0xf] %v6230_v5  ;;  %v3345_v40 = vpop.xlane.xlu0 %3344 }
 0x670   : > { %v6531_v1 = vpop.f32.mrf.mxu0  ;;  %v6231_v62 = vpack.c.bf16 %v3604_v44, %v3604_v44  ;;  %7246 = vrcp.f32 %v3345_v40  ;;  %v11894_v28 = vpop.xlane.xlu1 %4767 }
 0x671   : > { %5176 = vst [vmem:[#allocation2 + $0x54] sm:$0xf] %v6249_v7  ;;  %v5017_v61 = vmul.f32 %v7233_v24, %v6530_v9  ;;  %7248 = vrcp.f32 %v11846_v38 }
 0x672   : > { %v6532_v30 = vpop.f32.mrf.mxu0  ;;  %v7235_v17 = vpop.eup %7234  ;;  %3764 = vst [vmem:[#allocation2 + $0xc0] sm:$0xf] %v6231_v62 }
 0x673   : > { %v6250_v60 = vpack.c.bf16 %v5017_v61, %v5017_v61  ;;  %v6533_v26 = vadd.f32 %v6532_v30, %v6531_v1  ;;  %v7237_v23 = vpop.eup %7236  ;;  %v3605_v55 = vmul.f32 %v7235_v17, %v11811_v59  ;;  %v11898_v48 = vpop.xlane.xlu0 %4770  ;;  %v6810_v30 = vld [vmem:[#allocation2 + $0x60] ss:$8 sps:$4 sm:$0xff]  }
 0x674   : > { %v6534_v35 = vpop.f32.mrf.mxu0  ;;  %v6806_v56 = vld [vmem:[#allocation2 + $0x44] ss:$8 sps:$4 sm:$0xff]   ;;  %v3348_v37 = vpop.xlane.xlu1 %3347 }
 0x675   : > { %5177 = vst [vmem:[#allocation2 + $0x5c] sm:$0xf] %v6250_v60  ;;  %v5018_v11 = vmul.f32 %v7237_v23, %v6533_v26  ;;  %v7239_v47 = vpop.eup %7238  ;;  %v6232_v18 = vpack.c.bf16 %v3605_v55, %v3605_v55  ;;  %7250 = vrcp.f32 %v3348_v37  ;;  %5666 = vmatprep.mubr.bf16.mxu1 %v6806_v56 }
 0x676   : > { %v6535_v46 = vpop.f32.mrf.mxu0  ;;  %7252 = vrcp.f32 %v11850_v53  ;;  %v3606_v38 = vmul.f32 %v7239_v47, %v11815_v13  ;;  %5667 = vmatmul.mubr.bf16.gmra.mxu1 %v6804_v21  ;;  %v7241_v59 = vpop.eup %7240 }
 0x677   : > { %v6251_v6 = vpack.c.bf16 %v5018_v11, %v5018_v11  ;;  %v6536_v14 = vadd.f32 %v6535_v46, %v6534_v35  ;;  %3765 = vst [vmem:[#allocation2 + $0xc8] sm:$0xf] %v6232_v18  ;;  %v3351_v20 = vpop.xlane.xlu0 %3350 }
 0x678   : > { %v6537_v51 = vpop.f32.mrf.mxu0  ;;  %v6233_v39 = vpack.c.bf16 %v3606_v38, %v3606_v38  ;;  %7254 = vrcp.f32 %v3351_v20  ;;  %v11902_v45 = vpop.xlane.xlu1 %4773 }
 0x679   : > { %5178 = vst [vmem:[#allocation2 + $0x64] sm:$0xf] %v6251_v6  ;;  %v5019_v54 = vmul.f32 %v7241_v59, %v6536_v14  ;;  %7256 = vrcp.f32 %v11854_v33  ;;  %v6813_v14 = vld [vmem:[#allocation2 + $0x70] ss:$8 sps:$4 sm:$0xff]  }
 0x67a   : > { %v6538_v36 = vpop.f32.mrf.mxu0  ;;  %v7243_v34 = vpop.eup %7242  ;;  %3766 = vst [vmem:[#allocation2 + $0xd0] sm:$0xf] %v6233_v39 }
 0x67b   : > { %v6252_v53 = vpack.c.bf16 %v5019_v54, %v5019_v54  ;;  %v6539_v13 = vadd.f32 %v6538_v36, %v6537_v51  ;;  %v7245_v57 = vpop.eup %7244  ;;  %v3607_v42 = vmul.f32 %v7243_v34, %v11821_v4 }
 0x67c   : > { %v6540_v15 = vpop.f32.mrf.mxu0  ;;  %v6809_v8 = vld [vmem:[#allocation2 + $0x54] ss:$8 sps:$4 sm:$0xff]   ;;  %v3354_v31 = vpop.xlane.xlu1 %3353 }
 0x67d   : > { %5179 = vst [vmem:[#allocation2 + $0x6c] sm:$0xf] %v6252_v53  ;;  %v5020_v10 = vmul.f32 %v7245_v57, %v6539_v13  ;;  %v7247_v25 = vpop.eup %7246  ;;  %v6234_v50 = vpack.c.bf16 %v3607_v42, %v3607_v42  ;;  %7258 = vrcp.f32 %v3354_v31  ;;  %5676 = vmatprep.mubr.bf16.mxu1 %v6809_v8 }
 0x67e   : > { %v6541_v3 = vpop.f32.mrf.mxu0  ;;  %7260 = vrcp.f32 %v11858_v41  ;;  %v3608_v33 = vmul.f32 %v7247_v25, %v11825_v2  ;;  %5677 = vmatmul.mubr.bf16.gmra.mxu1 %v6807_v49  ;;  %v7249_v44 = vpop.eup %7248  ;;  %v6816_v49 = vld [vmem:[#allocation2 + $0x80] ss:$8 sps:$4 sm:$0xff]  }
 0x67f   : > { %v6253_v5 = vpack.c.bf16 %v5020_v10, %v5020_v10  ;;  %v6542_v12 = vadd.f32 %v6541_v3, %v6540_v15  ;;  %3767 = vst [vmem:[#allocation2 + $0xd8] sm:$0xf] %v6234_v50  ;;  %7262 = vrcp.f32 %v11862_v29 }
 0x680   : > { %v6543_v4 = vpop.f32.mrf.mxu0  ;;  %v6235_v7 = vpack.c.bf16 %v3608_v33, %v3608_v33  ;;  %7264 = vrcp.f32 %v11866_v19 }
 0x681   : > { %5180 = vst [vmem:[#allocation2 + $0x74] sm:$0xf] %v6253_v5  ;;  %v5021_v9 = vmul.f32 %v7249_v44, %v6542_v12  ;;  %7266 = vrcp.f32 %v11870_v52 }
 0x682   : > { %v6544_v24 = vpop.f32.mrf.mxu0  ;;  %v7251_v40 = vpop.eup %7250  ;;  %3768 = vst [vmem:[#allocation2 + $0xe0] sm:$0xf] %v6235_v7  ;;  %7268 = vrcp.f32 %v11874_v63  ;;  %v6819_v7 = vld [vmem:[#allocation2 + $0x90] ss:$8 sps:$4 sm:$0xff]  }
 0x683   : > { %v6254_v1 = vpack.c.bf16 %v5021_v9, %v5021_v9  ;;  %v6545_v62 = vadd.f32 %v6544_v24, %v6543_v4  ;;  %v7253_v61 = vpop.eup %7252  ;;  %v3609_v41 = vmul.f32 %v7251_v40, %v11832_v16  ;;  %7270 = vrcp.f32 %v11878_v58 }
 0x684   : > { %v6546_v2 = vpop.f32.mrf.mxu0  ;;  %v6812_v17 = vld [vmem:[#allocation2 + $0x64] ss:$8 sps:$4 sm:$0xff]   ;;  %7272 = vrcp.f32 %v11882_v43 }
 0x685   : > { %5181 = vst [vmem:[#allocation2 + $0x7c] sm:$0xf] %v6254_v1  ;;  %v5022_v60 = vmul.f32 %v7253_v61, %v6545_v62  ;;  %v7255_v26 = vpop.eup %7254  ;;  %v6236_v23 = vpack.c.bf16 %v3609_v41, %v3609_v41  ;;  %5686 = vmatprep.mubr.bf16.mxu1 %v6812_v17  ;;  %7274 = vrcp.f32 %v11886_v32 }
 0x686   : > { %v6547_v55 = vpop.f32.mrf.mxu0  ;;  %v3610_v35 = vmul.f32 %v7255_v26, %v11837_v27  ;;  %5687 = vmatmul.mubr.bf16.gmra.mxu1 %v6810_v30  ;;  %v7257_v56 = vpop.eup %7256  ;;  %7276 = vrcp.f32 %v11890_v22  ;;  %v6822_v26 = vld [vmem:[#allocation2 + $0xa0] ss:$8 sps:$4 sm:$0xff]  }
 0x687   : > { %v6255_v29 = vpack.c.bf16 %v5022_v60, %v5022_v60  ;;  %v6548_v21 = vadd.f32 %v6547_v55, %v6546_v2  ;;  %3769 = vst [vmem:[#allocation2 + $0xe8] sm:$0xf] %v6236_v23  ;;  %7278 = vrcp.f32 %v11894_v28 }
 0x688   : > { %v6549_v11 = vpop.f32.mrf.mxu0  ;;  %v6237_v16 = vpack.c.bf16 %v3610_v35, %v3610_v35  ;;  %7280 = vrcp.f32 %v11898_v48 }
 0x689   : > { %5182 = vst [vmem:[#allocation2 + $0x84] sm:$0xf] %v6255_v29  ;;  %v5023_v37 = vmul.f32 %v7257_v56, %v6548_v21  ;;  %7282 = vrcp.f32 %v11902_v45 }
 0x68a   : > { %v6550_v47 = vpop.f32.mrf.mxu0  ;;  %v7259_v18 = vpop.eup %7258  ;;  %3770 = vst [vmem:[#allocation2 + $0xf0] sm:$0xf] %v6237_v16 }
 0x68b   : > { %v6256_v46 = vpack.c.bf16 %v5023_v37, %v5023_v37  ;;  %v6551_v38 = vadd.f32 %v6550_v47, %v6549_v11  ;;  %v7261_v6 = vpop.eup %7260  ;;  %v3611_v19 = vmul.f32 %v7259_v18, %v11844_v0 }
 0x68c   : > { %v6552_v27 = vpop.f32.mrf.mxu0  ;;  %v6815_v59 = vld [vmem:[#allocation2 + $0x74] ss:$8 sps:$4 sm:$0xff]   ;;  %v7263_v52 = vpop.eup %7262 }
 0x68d   : > { %5183 = vst [vmem:[#allocation2 + $0x8c] sm:$0xf] %v6256_v46  ;;  %v5024_v20 = vmul.f32 %v7261_v6, %v6551_v38  ;;  %v6238_v51 = vpack.c.bf16 %v3611_v19, %v3611_v19  ;;  %5696 = vmatprep.mubr.bf16.mxu1 %v6815_v59  ;;  %v7265_v42 = vpop.eup %7264  ;;  %v6825_v46 = vld [vmem:[#allocation2 + $0xb0] ss:$8 sps:$4 sm:$0xff]   ;;  %v4777_v6 = vpop.xlane.xlu0 %4776 }
 0x68e   : > { %v6553_v39 = vpop.f32.mrf.mxu0  ;;  %5697 = vmatmul.mubr.bf16.gmra.mxu1 %v6813_v14  ;;  %v7267_v50 = vpop.eup %7266  ;;  %7284 = vrcp.f32 %v4777_v6 }
 0x68f   : > { %v6257_v54 = vpack.c.bf16 %v5024_v20, %v5024_v20  ;;  %v6554_v36 = vadd.f32 %v6553_v39, %v6552_v27  ;;  %3771 = vst [vmem:[#allocation2 + $0xf8] sm:$0xf] %v6238_v51  ;;  %v7269_v44 = vpop.eup %7268  ;;  %v4780_v51 = vpop.xlane.xlu1 %4779 }
 0x690   : > { %v6555_v34 = vpop.f32.mrf.mxu0  ;;  %v7271_v62 = vpop.eup %7270  ;;  %7286 = vrcp.f32 %v4780_v51 }
 0x691   : > { %5184 = vst [vmem:[#allocation2 + $0x94] sm:$0xf] %v6257_v54  ;;  %v5025_v53 = vmul.f32 %v7263_v52, %v6554_v36  ;;  %v7273_v17 = vpop.eup %7272 }
 0x692   : > { %v6556_v13 = vpop.f32.mrf.mxu0  ;;  %v7275_v21 = vpop.eup %7274 }
 0x693   : > { %v6258_v0 = vpack.c.bf16 %v5025_v53, %v5025_v53  ;;  %v6557_v57 = vadd.f32 %v6556_v13, %v6555_v34  ;;  %v7277_v47 = vpop.eup %7276  ;;  %v6828_v53 = vld [vmem:[#allocation2 + $0xc0] ss:$8 sps:$4 sm:$0xff]  }
 0x694   : > { %v6558_v15 = vpop.f32.mrf.mxu0  ;;  %v6818_v8 = vld [vmem:[#allocation2 + $0x84] ss:$8 sps:$4 sm:$0xff]   ;;  %v7279_v59 = vpop.eup %7278 }
 0x695   : > { %5185 = vst [vmem:[#allocation2 + $0x9c] sm:$0xf] %v6258_v0  ;;  %v5026_v10 = vmul.f32 %v7265_v42, %v6557_v57  ;;  %5706 = vmatprep.mubr.bf16.mxu1 %v6818_v8  ;;  %v7281_v52 = vpop.eup %7280 }
 0x696   : > { %v6559_v63 = vpop.f32.mrf.mxu0  ;;  %5707 = vmatmul.mubr.bf16.gmra.mxu1 %v6816_v49  ;;  %v7283_v49 = vpop.eup %7282 }
 0x697   : > { %v6259_v31 = vpack.c.bf16 %v5026_v10, %v5026_v10  ;;  %v6560_v25 = vadd.f32 %v6559_v63, %v6558_v15 }
 0x698   : > { %v6561_v3 = vpop.f32.mrf.mxu0 }
 0x699   : > { %5186 = vst [vmem:[#allocation2 + $0xa4] sm:$0xf] %v6259_v31  ;;  %v5027_v33 = vmul.f32 %v7267_v50, %v6560_v25  ;;  %v6831_v50 = vld [vmem:[#allocation2 + $0xd0] ss:$8 sps:$4 sm:$0xff]  }
 0x69a   : > { %v6562_v58 = vpop.f32.mrf.mxu0 }
 0x69b   : > { %v6260_v5 = vpack.c.bf16 %v5027_v33, %v5027_v33  ;;  %v6563_v12 = vadd.f32 %v6562_v58, %v6561_v3  ;;  %v7285_v33 = vpop.eup %7284 }
 0x69c   : > { %v6564_v4 = vpop.f32.mrf.mxu0  ;;  %v6821_v9 = vld [vmem:[#allocation2 + $0x94] ss:$8 sps:$4 sm:$0xff]  }
 0x69d   : > { %5187 = vst [vmem:[#allocation2 + $0xac] sm:$0xf] %v6260_v5  ;;  %v5028_v24 = vmul.f32 %v7269_v44, %v6563_v12  ;;  %5716 = vmatprep.mubr.bf16.mxu1 %v6821_v9 }
 0x69e   : > { %v6565_v40 = vpop.f32.mrf.mxu0  ;;  %5717 = vmatmul.mubr.bf16.gmra.mxu1 %v6819_v7  ;;  %v7287_v7 = vpop.eup %7286 }
 0x69f   : > { %v6261_v43 = vpack.c.bf16 %v5028_v24, %v5028_v24  ;;  %v6566_v1 = vadd.f32 %v6565_v40, %v6564_v4  ;;  %v6834_v40 = vld [vmem:[#allocation2 + $0xe0] ss:$8 sps:$4 sm:$0xff]  }
 0x6a0   : > { %v6567_v61 = vpop.f32.mrf.mxu0 }
 0x6a1   : > { %5188 = vst [vmem:[#allocation2 + $0xb4] sm:$0xf] %v6261_v43  ;;  %v5029_v41 = vmul.f32 %v7271_v62, %v6566_v1  ;;  %v6837_v1 = vld [vmem:[#allocation2 + $0xf0] ss:$8 sps:$4 sm:$0xff]  }
 0x6a2   : > { %v6568_v32 = vpop.f32.mrf.mxu0 }
 0x6a3   : > { %v6262_v2 = vpack.c.bf16 %v5029_v41, %v5029_v41  ;;  %v6569_v30 = vadd.f32 %v6568_v32, %v6567_v61  ;;  %v5262_v61 = vld [vmem:[%s12139_s6] sm:$0x3]  ;;  %v13126_v41 = vld [vmem:[#allocation25_spill] sm:$0xff] }
 0x6a4   : > { %v6570_v60 = vpop.f32.mrf.mxu0  ;;  %v6824_v23 = vld [vmem:[#allocation2 + $0xa4] ss:$8 sps:$4 sm:$0xff]   ;;  %v11926_v32 = vrot.slane %v5262_v61, %v13126_v41 }
 0x6a5   : > { %5189 = vst [vmem:[#allocation2 + $0xbc] sm:$0xf] %v6262_v2  ;;  %v5030_v55 = vmul.f32 %v7273_v17, %v6569_v30  ;;  %5726 = vmatprep.mubr.bf16.mxu1 %v6824_v23  ;;  %v13127_v2 = vld [vmem:[#allocation24_spill] sm:$0xff]  ;;  %v7345_v23 = vld [vmem:[%s7484_s14] sm:$0xff] }
 0x6a6   : > { %v6571_v35 = vpop.f32.mrf.mxu0  ;;  %5727 = vmatmul.mubr.bf16.gmra.mxu1 %v6822_v26  ;;  %v11929_v30 = vrot.slane %v5262_v61, %v13127_v2  ;;  %v7359_v61 = vld [vmem:[%s7484_s14 + $0x70] sm:$0xff] }
 0x6a7   : > { %v6263_v22 = vpack.c.bf16 %v5030_v55, %v5030_v55  ;;  %v6572_v29 = vadd.f32 %v6571_v35, %v6570_v60 }
 0x6a8   : > { %v6573_v56 = vpop.f32.mrf.mxu0 }
 0x6a9   : > { %5190 = vst [vmem:[#allocation2 + $0xc4] sm:$0xf] %v6263_v22  ;;  %v5031_v11 = vmul.f32 %v7275_v21, %v6572_v29  ;;  %v7346_v29 = vld [vmem:[%s7484_s14 + $0x8] sm:$0xff] }
 0x6aa   : > { %v6574_v28 = vpop.f32.mrf.mxu0 }
 0x6ab   : > { %v6264_v16 = vpack.c.bf16 %v5031_v11, %v5031_v11  ;;  %v6575_v37 = vadd.f32 %v6574_v28, %v6573_v56  ;;  %v7347_v28 = vld [vmem:[%s7484_s14 + $0x10] sm:$0xff] }
 0x6ac   : > { %v6576_v18 = vpop.f32.mrf.mxu0  ;;  %v6827_v38 = vld [vmem:[#allocation2 + $0xb4] ss:$8 sps:$4 sm:$0xff]  }
 0x6ad   : > { %5191 = vst [vmem:[#allocation2 + $0xcc] sm:$0xf] %v6264_v16  ;;  %v5032_v19 = vmul.f32 %v7277_v47, %v6575_v37  ;;  %5736 = vmatprep.mubr.bf16.mxu1 %v6827_v38 }
 0x6ae   : > { %v6577_v48 = vpop.f32.mrf.mxu0  ;;  %5737 = vmatmul.mubr.bf16.gmra.mxu1 %v6825_v46 }
 0x6af   : > { %v6265_v27 = vpack.c.bf16 %v5032_v19, %v5032_v19  ;;  %v6578_v14 = vadd.f32 %v6577_v48, %v6576_v18  ;;  %v7348_v18 = vld [vmem:[%s7484_s14 + $0x18] sm:$0xff]  ;;  %v7349_v19 = vld [vmem:[%s7484_s14 + $0x20] sm:$0xff] }
 0x6b0   : > { %v6579_v20 = vpop.f32.mrf.mxu0 }
 0x6b1   : > { %5192 = vst [vmem:[#allocation2 + $0xd4] sm:$0xf] %v6265_v27  ;;  %v5033_v45 = vmul.f32 %v7279_v59, %v6578_v14  ;;  %v7350_v59 = vld [vmem:[%s7484_s14 + $0x28] sm:$0xff] }
 0x6b2   : > { %v6580_v39 = vpop.f32.mrf.mxu0 }
 0x6b3   : > { %v6266_v54 = vpack.c.bf16 %v5033_v45, %v5033_v45  ;;  %v6581_v36 = vadd.f32 %v6580_v39, %v6579_v20  ;;  %v7351_v39 = vld [vmem:[%s7484_s14 + $0x30] sm:$0xff] }
 0x6b4   : > { %v6582_v34 = vpop.f32.mrf.mxu0  ;;  %v6830_v13 = vld [vmem:[#allocation2 + $0xc4] ss:$8 sps:$4 sm:$0xff]  }
 0x6b5   : > { %5193 = vst [vmem:[#allocation2 + $0xdc] sm:$0xf] %v6266_v54  ;;  %v5034_v0 = vmul.f32 %v7281_v52, %v6581_v36  ;;  %5746 = vmatprep.mubr.bf16.mxu1 %v6830_v13 }
 0x6b6   : > { %v6583_v57 = vpop.f32.mrf.mxu0  ;;  %5747 = vmatmul.mubr.bf16.gmra.mxu1 %v6828_v53 }
 0x6b7   : > { %v6267_v42 = vpack.c.bf16 %v5034_v0, %v5034_v0  ;;  %v6584_v15 = vadd.f32 %v6583_v57, %v6582_v34  ;;  %v7352_v34 = vld [vmem:[%s7484_s14 + $0x38] sm:$0xff]  ;;  %v7353_v57 = vld [vmem:[%s7484_s14 + $0x40] sm:$0xff] }
 0x6b8   : > { %v6585_v10 = vpop.f32.mrf.mxu0 }
 0x6b9   : > { %5194 = vst [vmem:[#allocation2 + $0xe4] sm:$0xf] %v6267_v42  ;;  %v5035_v8 = vmul.f32 %v7283_v49, %v6584_v15 }
 0x6ba   : > { %v6586_v31 = vpop.f32.mrf.mxu0 }
 0x6bb   : > { %v6268_v63 = vpack.c.bf16 %v5035_v8, %v5035_v8  ;;  %v6587_v25 = vadd.f32 %v6586_v31, %v6585_v10  ;;  %v7354_v8 = vld [vmem:[%s7484_s14 + $0x48] sm:$0xff] }
 0x6bc   : > { %v6833_v3 = vld [vmem:[#allocation2 + $0xd4] ss:$8 sps:$4 sm:$0xff]   ;;  %v6588_v58 = vpop.f32.mrf.mxu0 }
 0x6bd   : > { %5195 = vst [vmem:[#allocation2 + $0xec] sm:$0xf] %v6268_v63  ;;  %v5036_v5 = vmul.f32 %v7285_v33, %v6587_v25  ;;  %5756 = vmatprep.mubr.bf16.mxu1 %v6833_v3  ;;  %v7355_v25 = vld [vmem:[%s7484_s14 + $0x50] sm:$0xff] }
 0x6be   : > { %v6589_v12 = vpop.f32.mrf.mxu0  ;;  %5757 = vmatmul.mubr.bf16.gmra.mxu1 %v6831_v50 }
 0x6bf   : > { %v6269_v44 = vpack.c.bf16 %v5036_v5, %v5036_v5  ;;  %v6590_v4 = vadd.f32 %v6589_v12, %v6588_v58  ;;  %v7356_v58 = vld [vmem:[%s7484_s14 + $0x58] sm:$0xff] }
 0x6c1   : > { %5196 = vst [vmem:[#allocation2 + $0xf4] sm:$0xf] %v6269_v44  ;;  %v5037_v9 = vmul.f32 %v7287_v7, %v6590_v4  ;;  %v7357_v4 = vld [vmem:[%s7484_s14 + $0x60] sm:$0xff] }
 0x6c3   : > { %v6270_v24 = vpack.c.bf16 %v5037_v9, %v5037_v9 }
 0x6c4   : > { %v6836_v43 = vld [vmem:[#allocation2 + $0xe4] ss:$8 sps:$4 sm:$0xff]  }
 0x6c5   : > { %5197 = vst [vmem:[#allocation2 + $0xfc] sm:$0xf] %v6270_v24  ;;  %5766 = vmatprep.mubr.bf16.mxu1 %v6836_v43 }
 0x6c6   : > { %5767 = vmatmul.mubr.bf16.gmra.mxu1 %v6834_v40  ;;  %v7358_v40 = vld [vmem:[%s7484_s14 + $0x68] sm:$0xff] }
 0x6cc   : > { %v6839_v62 = vld [vmem:[#allocation2 + $0xf4] ss:$8 sps:$4 sm:$0xff]  }
 0x6cd   : > { %5776 = vmatprep.mubr.bf16.mxu1 %v6839_v62 }
 0x6ce   : > { %5777 = vmatmul.mubr.bf16.gmra.mxu1 %v6837_v1 }
 0x716   : > { %v5628_v17 = vpop.f32.mrf.mxu1 }
 0x717   : > { %v5629_v60 = vadd.f32 %v5628_v17, %v11926_v32 }
 0x718   : > { %v5630_v26 = vpop.f32.mrf.mxu1 }
 0x719   : > { %v5787_v55 = vadd.f32 %v7345_v23, %v5629_v60  ;;  %v5631_v35 = vadd.f32 %v5630_v26, %v11929_v30  ;;  %v7360_v60 = vld [vmem:[%s7484_s14 + $0x78] sm:$0xff] }
 0x71a   : > { %v5632_v22 = vpop.f32.mrf.mxu1 }
 0x71b   : > { %5851 = vst [vmem:[%s11937_s21] sm:$0xff] %v5787_v55  ;;  %v5788_v21 = vadd.f32 %v7346_v29, %v5631_v35  ;;  %v5633_v56 = vadd.f32 %v5632_v22, %v11926_v32  ;;  %v7361_v35 = vld [vmem:[%s7484_s14 + $0x80] sm:$0xff] }
 0x71c   : > { %v5634_v11 = vpop.f32.mrf.mxu1 }
 0x71d   : > { %5852 = vst [vmem:[%s11937_s21 + $0x8] sm:$0xff] %v5788_v21  ;;  %v5789_v16 = vadd.f32 %v7347_v28, %v5633_v56  ;;  %v5635_v37 = vadd.f32 %v5634_v11, %v11929_v30  ;;  %v7362_v56 = vld [vmem:[%s7484_s14 + $0x88] sm:$0xff] }
 0x71e   : > { %v5638_v47 = vpop.f32.mrf.mxu1 }
 0x71f   : > { %5853 = vst [vmem:[%s11937_s21 + $0x10] sm:$0xff] %v5789_v16  ;;  %v5790_v46 = vadd.f32 %v7348_v18, %v5635_v37  ;;  %v5639_v38 = vadd.f32 %v5638_v47, %v11926_v32  ;;  %v7363_v37 = vld [vmem:[%s7484_s14 + $0x90] sm:$0xff] }
 0x720   : > { %v5640_v6 = vpop.f32.mrf.mxu1 }
 0x721   : > { %5854 = vst [vmem:[%s11937_s21 + $0x18] sm:$0xff] %v5790_v46  ;;  %v5791_v48 = vadd.f32 %v7349_v19, %v5639_v38  ;;  %v5641_v27 = vadd.f32 %v5640_v6, %v11929_v30  ;;  %v7364_v38 = vld [vmem:[%s7484_s14 + $0x98] sm:$0xff] }
 0x722   : > { %v5642_v14 = vpop.f32.mrf.mxu1 }
 0x723   : > { %5855 = vst [vmem:[%s11937_s21 + $0x20] sm:$0xff] %v5791_v48  ;;  %v5792_v20 = vadd.f32 %v7350_v59, %v5641_v27  ;;  %v5643_v51 = vadd.f32 %v5642_v14, %v11926_v32  ;;  %v7365_v27 = vld [vmem:[%s7484_s14 + $0xa0] sm:$0xff] }
 0x724   : > { %v5644_v45 = vpop.f32.mrf.mxu1 }
 0x725   : > { %5856 = vst [vmem:[%s11937_s21 + $0x28] sm:$0xff] %v5792_v20  ;;  %v5793_v54 = vadd.f32 %v7351_v39, %v5643_v51  ;;  %v5645_v36 = vadd.f32 %v5644_v45, %v11929_v30  ;;  %v7366_v51 = vld [vmem:[%s7484_s14 + $0xa8] sm:$0xff] }
 0x726   : > { %v5648_v52 = vpop.f32.mrf.mxu1 }
 0x727   : > { %5857 = vst [vmem:[%s11937_s21 + $0x30] sm:$0xff] %v5793_v54  ;;  %v5794_v53 = vadd.f32 %v7352_v34, %v5645_v36  ;;  %v5649_v13 = vadd.f32 %v5648_v52, %v11926_v32  ;;  %v7367_v36 = vld [vmem:[%s7484_s14 + $0xb0] sm:$0xff] }
 0x728   : > { %v5650_v0 = vpop.f32.mrf.mxu1 }
 0x729   : > { %5858 = vst [vmem:[%s11937_s21 + $0x38] sm:$0xff] %v5794_v53  ;;  %v5795_v42 = vadd.f32 %v7353_v57, %v5649_v13  ;;  %v5651_v15 = vadd.f32 %v5650_v0, %v11929_v30  ;;  %v7368_v13 = vld [vmem:[%s7484_s14 + $0xb8] sm:$0xff] }
 0x72a   : > { %v5652_v49 = vpop.f32.mrf.mxu1 }
 0x72b   : > { %5859 = vst [vmem:[%s11937_s21 + $0x40] sm:$0xff] %v5795_v42  ;;  %v5796_v10 = vadd.f32 %v7354_v8, %v5651_v15  ;;  %v5653_v63 = vadd.f32 %v5652_v49, %v11926_v32  ;;  %v7369_v15 = vld [vmem:[%s7484_s14 + $0xc0] sm:$0xff] }
 0x72c   : > { %v5654_v31 = vpop.f32.mrf.mxu1 }
 0x72d   : > { %5860 = vst [vmem:[%s11937_s21 + $0x48] sm:$0xff] %v5796_v10  ;;  %v5797_v50 = vadd.f32 %v7355_v25, %v5653_v63  ;;  %v5655_v3 = vadd.f32 %v5654_v31, %v11929_v30  ;;  %v7370_v63 = vld [vmem:[%s7484_s14 + $0xc8] sm:$0xff] }
 0x72e   : > { %v5658_v33 = vpop.f32.mrf.mxu1 }
 0x72f   : > { %5861 = vst [vmem:[%s11937_s21 + $0x50] sm:$0xff] %v5797_v50  ;;  %v5798_v5 = vadd.f32 %v7356_v58, %v5655_v3  ;;  %v5659_v12 = vadd.f32 %v5658_v33, %v11926_v32  ;;  %v7371_v3 = vld [vmem:[%s7484_s14 + $0xd0] sm:$0xff] }
 0x730   : > { %v5660_v44 = vpop.f32.mrf.mxu1 }
 0x731   : > { %5862 = vst [vmem:[%s11937_s21 + $0x58] sm:$0xff] %v5798_v5  ;;  %v5799_v7 = vadd.f32 %v7357_v4, %v5659_v12  ;;  %v5661_v9 = vadd.f32 %v5660_v44, %v11929_v30  ;;  %v7372_v12 = vld [vmem:[%s7484_s14 + $0xd8] sm:$0xff] }
 0x732   : > { %v5662_v24 = vpop.f32.mrf.mxu1 }
 0x733   : > { %5863 = vst [vmem:[%s11937_s21 + $0x60] sm:$0xff] %v5799_v7  ;;  %v5800_v43 = vadd.f32 %v7358_v40, %v5661_v9  ;;  %v5663_v1 = vadd.f32 %v5662_v24, %v11926_v32  ;;  %v7373_v9 = vld [vmem:[%s7484_s14 + $0xe0] sm:$0xff] }
 0x734   : > { %v5664_v62 = vpop.f32.mrf.mxu1 }
 0x735   : > { %5864 = vst [vmem:[%s11937_s21 + $0x68] sm:$0xff] %v5800_v43  ;;  %v5801_v41 = vadd.f32 %v7359_v61, %v5663_v1  ;;  %v5665_v2 = vadd.f32 %v5664_v62, %v11929_v30  ;;  %v7374_v1 = vld [vmem:[%s7484_s14 + $0xe8] sm:$0xff] }
 0x736   : > { %v5668_v17 = vpop.f32.mrf.mxu1 }
 0x737   : > { %5865 = vst [vmem:[%s11937_s21 + $0x70] sm:$0xff] %v5801_v41  ;;  %v5802_v26 = vadd.f32 %v7360_v60, %v5665_v2  ;;  %v5669_v23 = vadd.f32 %v5668_v17, %v11926_v32  ;;  %v7375_v2 = vld [vmem:[%s7484_s14 + $0xf0] sm:$0xff] }
 0x738   : > { %v5670_v55 = vpop.f32.mrf.mxu1 }
 0x739   : > { %5866 = vst [vmem:[%s11937_s21 + $0x78] sm:$0xff] %v5802_v26  ;;  %v5803_v22 = vadd.f32 %v7361_v35, %v5669_v23  ;;  %v5671_v29 = vadd.f32 %v5670_v55, %v11929_v30  ;;  %v7376_v23 = vld [vmem:[%s7484_s14 + $0xf8] sm:$0xff] }
 0x73a   : > { %v5672_v21 = vpop.f32.mrf.mxu1 }
 0x73b   : > { %5867 = vst [vmem:[%s11937_s21 + $0x80] sm:$0xff] %v5803_v22  ;;  %v5804_v11 = vadd.f32 %v7362_v56, %v5671_v29  ;;  %v5673_v28 = vadd.f32 %v5672_v21, %v11926_v32  ;;  %v7377_v29 = vld [vmem:[%s7484_s14 + $0x100] sm:$0xff] }
 0x73c   : > { %v5674_v16 = vpop.f32.mrf.mxu1 }
 0x73d   : > { %5868 = vst [vmem:[%s11937_s21 + $0x88] sm:$0xff] %v5804_v11  ;;  %v5805_v47 = vadd.f32 %v7363_v37, %v5673_v28  ;;  %v5675_v18 = vadd.f32 %v5674_v16, %v11929_v30  ;;  %v7378_v28 = vld [vmem:[%s7484_s14 + $0x108] sm:$0xff] }
 0x73e   : > { %v5678_v46 = vpop.f32.mrf.mxu1 }
 0x73f   : > { %5869 = vst [vmem:[%s11937_s21 + $0x90] sm:$0xff] %v5805_v47  ;;  %v5806_v6 = vadd.f32 %v7364_v38, %v5675_v18  ;;  %v5679_v19 = vadd.f32 %v5678_v46, %v11926_v32  ;;  %v7379_v18 = vld [vmem:[%s7484_s14 + $0x110] sm:$0xff] }
 0x740   : > { %v5680_v48 = vpop.f32.mrf.mxu1 }
 0x741   : > { %5870 = vst [vmem:[%s11937_s21 + $0x98] sm:$0xff] %v5806_v6  ;;  %v5807_v14 = vadd.f32 %v7365_v27, %v5679_v19  ;;  %v5681_v59 = vadd.f32 %v5680_v48, %v11929_v30  ;;  %v7380_v19 = vld [vmem:[%s7484_s14 + $0x118] sm:$0xff] }
 0x742   : > { %v5682_v20 = vpop.f32.mrf.mxu1 }
 0x743   : > { %5871 = vst [vmem:[%s11937_s21 + $0xa0] sm:$0xff] %v5807_v14  ;;  %v5808_v45 = vadd.f32 %v7366_v51, %v5681_v59  ;;  %v5683_v39 = vadd.f32 %v5682_v20, %v11926_v32  ;;  %v7381_v59 = vld [vmem:[%s7484_s14 + $0x120] sm:$0xff] }
 0x744   : > { %v5684_v54 = vpop.f32.mrf.mxu1 }
 0x745   : > { %5872 = vst [vmem:[%s11937_s21 + $0xa8] sm:$0xff] %v5808_v45  ;;  %v5809_v52 = vadd.f32 %v7367_v36, %v5683_v39  ;;  %v5685_v34 = vadd.f32 %v5684_v54, %v11929_v30  ;;  %v7382_v39 = vld [vmem:[%s7484_s14 + $0x128] sm:$0xff] }
 0x746   : > { %v5688_v53 = vpop.f32.mrf.mxu1 }
 0x747   : > { %5873 = vst [vmem:[%s11937_s21 + $0xb0] sm:$0xff] %v5809_v52  ;;  %v5810_v0 = vadd.f32 %v7368_v13, %v5685_v34  ;;  %v5689_v57 = vadd.f32 %v5688_v53, %v11926_v32  ;;  %v7383_v34 = vld [vmem:[%s7484_s14 + $0x130] sm:$0xff] }
 0x748   : > { %v5690_v42 = vpop.f32.mrf.mxu1 }
 0x749   : > { %5874 = vst [vmem:[%s11937_s21 + $0xb8] sm:$0xff] %v5810_v0  ;;  %v5811_v49 = vadd.f32 %v7369_v15, %v5689_v57  ;;  %v5691_v8 = vadd.f32 %v5690_v42, %v11929_v30  ;;  %v7384_v57 = vld [vmem:[%s7484_s14 + $0x138] sm:$0xff] }
 0x74a   : > { %v5692_v10 = vpop.f32.mrf.mxu1 }
 0x74b   : > { %5875 = vst [vmem:[%s11937_s21 + $0xc0] sm:$0xff] %v5811_v49  ;;  %v5812_v31 = vadd.f32 %v7370_v63, %v5691_v8  ;;  %v5693_v25 = vadd.f32 %v5692_v10, %v11926_v32  ;;  %v7385_v8 = vld [vmem:[%s7484_s14 + $0x140] sm:$0xff] }
 0x74c   : > { %v5694_v50 = vpop.f32.mrf.mxu1 }
 0x74d   : > { %5876 = vst [vmem:[%s11937_s21 + $0xc8] sm:$0xff] %v5812_v31  ;;  %v5813_v33 = vadd.f32 %v7371_v3, %v5693_v25  ;;  %v5695_v58 = vadd.f32 %v5694_v50, %v11929_v30  ;;  %v7386_v25 = vld [vmem:[%s7484_s14 + $0x148] sm:$0xff] }
 0x74e   : > { %v5698_v5 = vpop.f32.mrf.mxu1 }
 0x74f   : > { %5877 = vst [vmem:[%s11937_s21 + $0xd0] sm:$0xff] %v5813_v33  ;;  %v5814_v44 = vadd.f32 %v7372_v12, %v5695_v58  ;;  %v5699_v4 = vadd.f32 %v5698_v5, %v11926_v32  ;;  %v7387_v58 = vld [vmem:[%s7484_s14 + $0x150] sm:$0xff] }
 0x750   : > { %v5700_v7 = vpop.f32.mrf.mxu1 }
 0x751   : > { %5878 = vst [vmem:[%s11937_s21 + $0xd8] sm:$0xff] %v5814_v44  ;;  %v5815_v24 = vadd.f32 %v7373_v9, %v5699_v4  ;;  %v5701_v40 = vadd.f32 %v5700_v7, %v11929_v30  ;;  %v7388_v4 = vld [vmem:[%s7484_s14 + $0x158] sm:$0xff] }
 0x752   : > { %v5702_v43 = vpop.f32.mrf.mxu1 }
 0x753   : > { %5879 = vst [vmem:[%s11937_s21 + $0xe0] sm:$0xff] %v5815_v24  ;;  %v5816_v62 = vadd.f32 %v7374_v1, %v5701_v40  ;;  %v5703_v61 = vadd.f32 %v5702_v43, %v11926_v32  ;;  %v7389_v40 = vld [vmem:[%s7484_s14 + $0x160] sm:$0xff] }
 0x754   : > { %v5704_v41 = vpop.f32.mrf.mxu1 }
 0x755   : > { %5880 = vst [vmem:[%s11937_s21 + $0xe8] sm:$0xff] %v5816_v62  ;;  %v5817_v17 = vadd.f32 %v7375_v2, %v5703_v61  ;;  %v5705_v60 = vadd.f32 %v5704_v41, %v11929_v30  ;;  %v7390_v61 = vld [vmem:[%s7484_s14 + $0x168] sm:$0xff] }
 0x756   : > { %v5708_v26 = vpop.f32.mrf.mxu1 }
 0x757   : > { %5881 = vst [vmem:[%s11937_s21 + $0xf0] sm:$0xff] %v5817_v17  ;;  %v5818_v55 = vadd.f32 %v7376_v23, %v5705_v60  ;;  %v5709_v35 = vadd.f32 %v5708_v26, %v11926_v32  ;;  %v7391_v60 = vld [vmem:[%s7484_s14 + $0x170] sm:$0xff] }
 0x758   : > { %v5710_v22 = vpop.f32.mrf.mxu1 }
 0x759   : > { %5882 = vst [vmem:[%s11937_s21 + $0xf8] sm:$0xff] %v5818_v55  ;;  %v5819_v21 = vadd.f32 %v7377_v29, %v5709_v35  ;;  %v5711_v56 = vadd.f32 %v5710_v22, %v11929_v30  ;;  %v7392_v35 = vld [vmem:[%s7484_s14 + $0x178] sm:$0xff] }
 0x75a   : > { %v5712_v11 = vpop.f32.mrf.mxu1 }
 0x75b   : > { %5883 = vst [vmem:[%s11937_s21 + $0x100] sm:$0xff] %v5819_v21  ;;  %v5820_v16 = vadd.f32 %v7378_v28, %v5711_v56  ;;  %v5713_v37 = vadd.f32 %v5712_v11, %v11926_v32  ;;  %v7393_v56 = vld [vmem:[%s7484_s14 + $0x180] sm:$0xff] }
 0x75c   : > { %v5714_v47 = vpop.f32.mrf.mxu1 }
 0x75d   : > { %5884 = vst [vmem:[%s11937_s21 + $0x108] sm:$0xff] %v5820_v16  ;;  %v5821_v46 = vadd.f32 %v7379_v18, %v5713_v37  ;;  %v5715_v38 = vadd.f32 %v5714_v47, %v11929_v30  ;;  %v7394_v37 = vld [vmem:[%s7484_s14 + $0x188] sm:$0xff] }
 0x75e   : > { %v5718_v6 = vpop.f32.mrf.mxu1 }
 0x75f   : > { %5885 = vst [vmem:[%s11937_s21 + $0x110] sm:$0xff] %v5821_v46  ;;  %v5822_v48 = vadd.f32 %v7380_v19, %v5715_v38  ;;  %v5719_v27 = vadd.f32 %v5718_v6, %v11926_v32  ;;  %v7395_v38 = vld [vmem:[%s7484_s14 + $0x190] sm:$0xff] }
 0x760   : > { %v5720_v14 = vpop.f32.mrf.mxu1 }
 0x761   : > { %5886 = vst [vmem:[%s11937_s21 + $0x118] sm:$0xff] %v5822_v48  ;;  %v5823_v20 = vadd.f32 %v7381_v59, %v5719_v27  ;;  %v5721_v51 = vadd.f32 %v5720_v14, %v11929_v30  ;;  %v7396_v27 = vld [vmem:[%s7484_s14 + $0x198] sm:$0xff] }
 0x762   : > { %v5722_v45 = vpop.f32.mrf.mxu1 }
 0x763   : > { %5887 = vst [vmem:[%s11937_s21 + $0x120] sm:$0xff] %v5823_v20  ;;  %v5824_v54 = vadd.f32 %v7382_v39, %v5721_v51  ;;  %v5723_v36 = vadd.f32 %v5722_v45, %v11926_v32  ;;  %v7397_v51 = vld [vmem:[%s7484_s14 + $0x1a0] sm:$0xff] }
 0x764   : > { %v5724_v52 = vpop.f32.mrf.mxu1 }
 0x765   : > { %5888 = vst [vmem:[%s11937_s21 + $0x128] sm:$0xff] %v5824_v54  ;;  %v5825_v53 = vadd.f32 %v7383_v34, %v5723_v36  ;;  %v5725_v13 = vadd.f32 %v5724_v52, %v11929_v30  ;;  %v7398_v36 = vld [vmem:[%s7484_s14 + $0x1a8] sm:$0xff] }
 0x766   : > { %v5728_v0 = vpop.f32.mrf.mxu1 }
 0x767   : > { %5889 = vst [vmem:[%s11937_s21 + $0x130] sm:$0xff] %v5825_v53  ;;  %v5826_v42 = vadd.f32 %v7384_v57, %v5725_v13  ;;  %v5729_v15 = vadd.f32 %v5728_v0, %v11926_v32  ;;  %v7399_v13 = vld [vmem:[%s7484_s14 + $0x1b0] sm:$0xff] }
 0x768   : > { %v5730_v49 = vpop.f32.mrf.mxu1 }
 0x769   : > { %5890 = vst [vmem:[%s11937_s21 + $0x138] sm:$0xff] %v5826_v42  ;;  %v5827_v10 = vadd.f32 %v7385_v8, %v5729_v15  ;;  %v5731_v63 = vadd.f32 %v5730_v49, %v11929_v30  ;;  %v7400_v15 = vld [vmem:[%s7484_s14 + $0x1b8] sm:$0xff] }
 0x76a   : > { %v5732_v31 = vpop.f32.mrf.mxu1 }
 0x76b   : > { %5891 = vst [vmem:[%s11937_s21 + $0x140] sm:$0xff] %v5827_v10  ;;  %v5828_v50 = vadd.f32 %v7386_v25, %v5731_v63  ;;  %v5733_v3 = vadd.f32 %v5732_v31, %v11926_v32  ;;  %v7401_v63 = vld [vmem:[%s7484_s14 + $0x1c0] sm:$0xff] }
 0x76c   : > { %v5734_v33 = vpop.f32.mrf.mxu1 }
 0x76d   : > { %5892 = vst [vmem:[%s11937_s21 + $0x148] sm:$0xff] %v5828_v50  ;;  %v5829_v5 = vadd.f32 %v7387_v58, %v5733_v3  ;;  %v5735_v12 = vadd.f32 %v5734_v33, %v11929_v30  ;;  %v7402_v3 = vld [vmem:[%s7484_s14 + $0x1c8] sm:$0xff] }
 0x76e   : > { %v5738_v44 = vpop.f32.mrf.mxu1 }
 0x76f   : > { %5893 = vst [vmem:[%s11937_s21 + $0x150] sm:$0xff] %v5829_v5  ;;  %v5830_v7 = vadd.f32 %v7388_v4, %v5735_v12  ;;  %v5739_v9 = vadd.f32 %v5738_v44, %v11926_v32  ;;  %v7403_v12 = vld [vmem:[%s7484_s14 + $0x1d0] sm:$0xff] }
 0x770   : > { %v5740_v24 = vpop.f32.mrf.mxu1 }
 0x771   : > { %5894 = vst [vmem:[%s11937_s21 + $0x158] sm:$0xff] %v5830_v7  ;;  %v5831_v43 = vadd.f32 %v7389_v40, %v5739_v9  ;;  %v5741_v1 = vadd.f32 %v5740_v24, %v11929_v30  ;;  %v7404_v7 = vld [vmem:[%s7484_s14 + $0x1d8] sm:$0xff] }
 0x772   : > { %v5742_v62 = vpop.f32.mrf.mxu1 }
 0x773   : > { %5895 = vst [vmem:[%s11937_s21 + $0x160] sm:$0xff] %v5831_v43  ;;  %v5832_v41 = vadd.f32 %v7390_v61, %v5741_v1  ;;  %v5743_v2 = vadd.f32 %v5742_v62, %v11926_v32  ;;  %v7405_v1 = vld [vmem:[%s7484_s14 + $0x1e0] sm:$0xff] }
 0x774   : > { %v5744_v17 = vpop.f32.mrf.mxu1 }
 0x775   : > { %5896 = vst [vmem:[%s11937_s21 + $0x168] sm:$0xff] %v5832_v41  ;;  %v5833_v26 = vadd.f32 %v7391_v60, %v5743_v2  ;;  %v5745_v23 = vadd.f32 %v5744_v17, %v11929_v30  ;;  %v7406_v2 = vld [vmem:[%s7484_s14 + $0x1e8] sm:$0xff] }
 0x776   : > { %v5748_v55 = vpop.f32.mrf.mxu1 }
 0x777   : > { %5897 = vst [vmem:[%s11937_s21 + $0x170] sm:$0xff] %v5833_v26  ;;  %v5834_v22 = vadd.f32 %v7392_v35, %v5745_v23  ;;  %v5749_v29 = vadd.f32 %v5748_v55, %v11926_v32  ;;  %v7407_v23 = vld [vmem:[%s7484_s14 + $0x1f0] sm:$0xff] }
 0x778   : > { %v5750_v21 = vpop.f32.mrf.mxu1 }
 0x779   : > { %5898 = vst [vmem:[%s11937_s21 + $0x178] sm:$0xff] %v5834_v22  ;;  %v5835_v11 = vadd.f32 %v7393_v56, %v5749_v29  ;;  %v5751_v28 = vadd.f32 %v5750_v21, %v11929_v30  ;;  %v7408_v22 = vld [vmem:[%s7484_s14 + $0x1f8] sm:$0xff] }
 0x77a   : > { %v5752_v16 = vpop.f32.mrf.mxu1 }
 0x77b   : > { %5899 = vst [vmem:[%s11937_s21 + $0x180] sm:$0xff] %v5835_v11  ;;  %v5836_v47 = vadd.f32 %v7394_v37, %v5751_v28  ;;  %v5753_v18 = vadd.f32 %v5752_v16, %v11926_v32 }
 0x77c   : > { %v5754_v46 = vpop.f32.mrf.mxu1 }
 0x77d   : > { %5900 = vst [vmem:[%s11937_s21 + $0x188] sm:$0xff] %v5836_v47  ;;  %v5837_v6 = vadd.f32 %v7395_v38, %v5753_v18  ;;  %v5755_v19 = vadd.f32 %v5754_v46, %v11929_v30 }
 0x77e   : > { %v5758_v48 = vpop.f32.mrf.mxu1 }
 0x77f   : > { %5901 = vst [vmem:[%s11937_s21 + $0x190] sm:$0xff] %v5837_v6  ;;  %v5838_v14 = vadd.f32 %v7396_v27, %v5755_v19  ;;  %v5759_v59 = vadd.f32 %v5758_v48, %v11926_v32 }
 0x780   : > { %v5760_v20 = vpop.f32.mrf.mxu1 }
 0x781   : > { %5902 = vst [vmem:[%s11937_s21 + $0x198] sm:$0xff] %v5838_v14  ;;  %v5839_v45 = vadd.f32 %v7397_v51, %v5759_v59  ;;  %v5761_v39 = vadd.f32 %v5760_v20, %v11929_v30 }
 0x782   : > { %v5762_v54 = vpop.f32.mrf.mxu1 }
 0x783   : > { %5903 = vst [vmem:[%s11937_s21 + $0x1a0] sm:$0xff] %v5839_v45  ;;  %v5840_v52 = vadd.f32 %v7398_v36, %v5761_v39  ;;  %v5763_v34 = vadd.f32 %v5762_v54, %v11926_v32 }
 0x784   : > { %v5764_v53 = vpop.f32.mrf.mxu1 }
 0x785   : > { %5904 = vst [vmem:[%s11937_s21 + $0x1a8] sm:$0xff] %v5840_v52  ;;  %v5841_v0 = vadd.f32 %v7399_v13, %v5763_v34  ;;  %v5765_v57 = vadd.f32 %v5764_v53, %v11929_v30 }
 0x786   : > { %v5768_v42 = vpop.f32.mrf.mxu1 }
 0x787   : > { %5905 = vst [vmem:[%s11937_s21 + $0x1b0] sm:$0xff] %v5841_v0  ;;  %v5842_v49 = vadd.f32 %v7400_v15, %v5765_v57  ;;  %v5769_v8 = vadd.f32 %v5768_v42, %v11926_v32 }
 0x788   : > { %v5770_v10 = vpop.f32.mrf.mxu1 }
 0x789   : > { %5906 = vst [vmem:[%s11937_s21 + $0x1b8] sm:$0xff] %v5842_v49  ;;  %v5843_v31 = vadd.f32 %v7401_v63, %v5769_v8  ;;  %v5771_v25 = vadd.f32 %v5770_v10, %v11929_v30 }
 0x78a   : > { %v5772_v50 = vpop.f32.mrf.mxu1 }
 0x78b   : > { %5907 = vst [vmem:[%s11937_s21 + $0x1c0] sm:$0xff] %v5843_v31  ;;  %v5844_v33 = vadd.f32 %v7402_v3, %v5771_v25  ;;  %v5773_v58 = vadd.f32 %v5772_v50, %v11926_v32 }
 0x78c   : > { %v5774_v5 = vpop.f32.mrf.mxu1 }
 0x78d   : > { %5908 = vst [vmem:[%s11937_s21 + $0x1c8] sm:$0xff] %v5844_v33  ;;  %v5845_v44 = vadd.f32 %v7403_v12, %v5773_v58  ;;  %v5775_v4 = vadd.f32 %v5774_v5, %v11929_v30 }
 0x78e   : > { %v5778_v24 = vpop.f32.mrf.mxu1 }
 0x78f   : > { %5909 = vst [vmem:[%s11937_s21 + $0x1d0] sm:$0xff] %v5845_v44  ;;  %v5846_v9 = vadd.f32 %v7404_v7, %v5775_v4  ;;  %v5779_v40 = vadd.f32 %v5778_v24, %v11926_v32 }
 0x790   : > { %v5780_v43 = vpop.f32.mrf.mxu1 }
 0x791   : > { %5910 = vst [vmem:[%s11937_s21 + $0x1d8] sm:$0xff] %v5846_v9  ;;  %v5847_v62 = vadd.f32 %v7405_v1, %v5779_v40  ;;  %v5781_v61 = vadd.f32 %v5780_v43, %v11929_v30 }
 0x792   : > { %v5782_v41 = vpop.f32.mrf.mxu1 }
 0x793   : > { %5911 = vst [vmem:[%s11937_s21 + $0x1e0] sm:$0xff] %v5847_v62  ;;  %v5848_v17 = vadd.f32 %v7406_v2, %v5781_v61  ;;  %v5783_v60 = vadd.f32 %v5782_v41, %v11926_v32 }
 0x794   : > { %v5784_v26 = vpop.f32.mrf.mxu1 }
 0x795   : > { %5912 = vst [vmem:[%s11937_s21 + $0x1e8] sm:$0xff] %v5848_v17  ;;  %v5849_v55 = vadd.f32 %v7407_v23, %v5783_v60  ;;  %v5785_v35 = vadd.f32 %v5784_v26, %v11929_v30 }
 0x797   : > { %5913 = vst [vmem:[%s11937_s21 + $0x1f0] sm:$0xff] %v5849_v55  ;;  %v5850_v29 = vadd.f32 %v7408_v22, %v5785_v35 }
 0x799   : > { %5914 = vst [vmem:[%s11937_s21 + $0x1f8] sm:$0xff] %v5850_v29 }
 0x79a PF: > { %s19_s30 = sadd.s32 1, %s7415_s30  }
 0x79b   : > { %p16_p4 = scmp.ge.s32.totalorder %s19_s30, 4  }
 0x79d   :  { %18 = sbr.rel (!%p16_p4) target bundleno = 1 (0x1), region = 86 }

</bundles_post_ra>
